<compile_context>
chip_gen: v5e
topology: v5e:2x2
jax: 0.10.0
libtpu: 0.0.40
codegen_flags: <defaults>
</compile_context>

<pallas_src>
import math
from functools import partial

import jax
import jax.numpy as jnp
from jax import lax
from jax.experimental import pallas as pl
from jax.experimental.pallas import tpu as pltpu

# ----------------------------- model config ---------------------------------
D_MODEL = 32
N_HEADS = 4
D_HEAD = D_MODEL // N_HEADS
D_FF = 64
N_LAYERS = 2
VOCAB = 16
EPS = 1e-6        # LayerNorm eps (Annotated Transformer default)
NEG_INF = -1e9    # masked_fill value in the reference attention

# ------------------------ packed parameter layout ----------------------------
N_ATTN = 3 * N_LAYERS          # [enc self]*L + [dec self, dec cross]*L
N_LN = 5 * N_LAYERS + 2        # 2 per enc layer + enc final + 3 per dec layer + dec final
N_FF = 2 * N_LAYERS            # enc FFNs then dec FFNs


def _enc_attn(l): return l
def _dec_self(l): return N_LAYERS + 2 * l
def _dec_cross(l): return N_LAYERS + 2 * l + 1


def _enc_ln(l, j): return 2 * l + j                      # j in {0,1}
_ENC_FINAL_LN = 2 * N_LAYERS
def _dec_ln(l, j): return 2 * N_LAYERS + 1 + 3 * l + j    # j in {0,1,2}
_DEC_FINAL_LN = 2 * N_LAYERS + 1 + 3 * N_LAYERS


def _enc_ff(l): return l
def _dec_ff(l): return N_LAYERS + l


# ----------------------------- fused kernel ----------------------------------
def _fused_kernel(src_tok_ref, tgt_tok_ref, enc_bias_ref, self_bias_ref, cross_bias_ref,
                  pe_src_ref, pe_tgt_ref, src_emb_ref, tgt_emb_ref,
                  ln_a_ref, ln_b_ref,
                  wq_ref, bq_ref, wk_ref, bk_ref, wv_ref, bv_ref, wo_ref, bo_ref,
                  w1_ref, b1_ref, w2_ref, b2_ref,
                  out_ref, *, batch, s_src, s_tgt):
    f32 = jnp.float32
    scale = 1.0 / math.sqrt(D_HEAD)

    def layer_norm(x, idx):
        # Annotated-Transformer LayerNorm: unbiased std, a * (x - mean) / (std + eps) + b
        mean = jnp.mean(x, axis=-1, keepdims=True)
        var = jnp.sum((x - mean) ** 2, axis=-1, keepdims=True) * (1.0 / (D_MODEL - 1))
        inv = pl.reciprocal(jnp.sqrt(var) + EPS, approx=True)   # EUP slot (free-ish)
        return ln_a_ref[idx] * (x - mean) * inv + ln_b_ref[idx]

    def attention(i, xq, xkv, bias):
        # xq: (Rq, D), xkv: (Rk, D), bias: (Rq, Rk) additive mask (0 / -1e9).
        # Full-width projections (matches nn.Linear(d_model, d_model) layout exactly).
        q = jnp.dot(xq, wq_ref[i], preferred_element_type=f32) + bq_ref[i]
        k = jnp.dot(xkv, wk_ref[i], preferred_element_type=f32) + bk_ref[i]
        v = jnp.dot(xkv, wv_ref[i], preferred_element_type=f32) + bv_ref[i]
        ctx = []
        for h in range(N_HEADS):
            lo, hi = h * D_HEAD, (h + 1) * D_HEAD
            qh, kh, vh = q[:, lo:hi], k[:, lo:hi], v[:, lo:hi]
            # scores = q_h @ k_h.T (contract the head dim of both) -> (Rq, Rk)
            s = lax.dot_general(qh, kh, (((1,), (1,)), ((), ())),
                                preferred_element_type=f32) * scale + bias
            s = s - jnp.max(s, axis=-1, keepdims=True)
            p = jnp.exp(s)
            p = p * pl.reciprocal(jnp.sum(p, axis=-1, keepdims=True), approx=True)
            ctx.append(jnp.dot(p, vh, preferred_element_type=f32))    # (Rq, dk)
        ctx = jnp.concatenate(ctx, axis=-1)                           # (Rq, D)
        return jnp.dot(ctx, wo_ref[i], preferred_element_type=f32) + bo_ref[i]

    def feed_forward(i, x):
        h1 = jnp.dot(x, w1_ref[i], preferred_element_type=f32) + b1_ref[i]
        h1 = jnp.maximum(h1, 0.0)
        return jnp.dot(h1, w2_ref[i], preferred_element_type=f32) + b2_ref[i]

    def embed(tok_ref, emb_ref, pe_ref, rows):
        # Embedding lookup as a one-hot matmul (keeps gather out of the kernel),
        # * sqrt(d_model) + positional encoding (dropout = eval mode).
        tok = tok_ref[...]                                           # (rows, 1) int32
        vocab_iota = lax.broadcasted_iota(jnp.int32, (rows, VOCAB), 1)
        onehot = (vocab_iota == tok).astype(f32)
        x = jnp.dot(onehot, emb_ref[...], preferred_element_type=f32)
        return x * math.sqrt(D_MODEL) + pe_ref[...]

    enc_bias = enc_bias_ref[...]      # (B*S_src, B*S_src)
    self_bias = self_bias_ref[...]    # (B*S_tgt, B*S_tgt)
    cross_bias = cross_bias_ref[...]  # (B*S_tgt, B*S_src)

    # ------------------------------- encoder --------------------------------
    x = embed(src_tok_ref, src_emb_ref, pe_src_ref, batch * s_src)   # (B*S_src, D)
    for l in range(N_LAYERS):
        nx = layer_norm(x, _enc_ln(l, 0))
        x = x + attention(_enc_attn(l), nx, nx, enc_bias)
        nx = layer_norm(x, _enc_ln(l, 1))
        x = x + feed_forward(_enc_ff(l), nx)
    memory = layer_norm(x, _ENC_FINAL_LN)                            # (B*S_src, D)

    # ------------------------------- decoder --------------------------------
    y = embed(tgt_tok_ref, tgt_emb_ref, pe_tgt_ref, batch * s_tgt)   # (B*S_tgt, D)
    for l in range(N_LAYERS):
        ny = layer_norm(y, _dec_ln(l, 0))
        y = y + attention(_dec_self(l), ny, ny, self_bias)
        ny = layer_norm(y, _dec_ln(l, 1))
        y = y + attention(_dec_cross(l), ny, memory, cross_bias)
        ny = layer_norm(y, _dec_ln(l, 2))
        y = y + feed_forward(_dec_ff(l), ny)
    out_ref[...] = layer_norm(y, _DEC_FINAL_LN)


# ----------------------------- wrapper ----------------------------------------
def _block_diag_bias(mask, batch, sq, sk):
    """mask: (batch, {1|sq}, sk) {0,1} -> (batch*sq, batch*sk) additive bias (0 / -1e9)."""
    m = jnp.broadcast_to(mask.astype(jnp.float32), (batch, sq, sk))
    eye = jnp.eye(batch, dtype=jnp.float32)
    full = jnp.einsum("bc,bqk->bqck", eye, m)            # cross-batch blocks -> 0
    full = full.reshape(batch * sq, batch * sk)
    return jnp.where(full == 0.0, NEG_INF, 0.0).astype(jnp.float32)


def encoder_decoder_forward(params, src, tgt, src_mask, tgt_mask):
    # == EncoderDecoder.forward: decode(encode(src, src_mask), src_mask, tgt, tgt_mask)
    # TODO(synk): the `generator` (final log_softmax projection) is not applied in the
    # reference forward(), so it is intentionally not applied here.
    batch, s_src = src.shape
    s_tgt = tgt.shape[1]

    src_tok = src.reshape(batch * s_src, 1).astype(jnp.int32)
    tgt_tok = tgt.reshape(batch * s_tgt, 1).astype(jnp.int32)
    pe = params["pe"]
    pe_src = jnp.tile(pe[:s_src], (batch, 1))
    pe_tgt = jnp.tile(pe[:s_tgt], (batch, 1))

    src_mask3 = src_mask.astype(jnp.float32).reshape(batch, -1, s_src)
    tgt_mask3 = tgt_mask.astype(jnp.float32).reshape(batch, -1, s_tgt)
    enc_bias = _block_diag_bias(src_mask3, batch, s_src, s_src)
    self_bias = _block_diag_bias(tgt_mask3, batch, s_tgt, s_tgt)
    cross_bias = _block_diag_bias(src_mask3, batch, s_tgt, s_src)

    args = (src_tok, tgt_tok, enc_bias, self_bias, cross_bias, pe_src, pe_tgt,
            params["src_emb"], params["tgt_emb"], params["ln_a"], params["ln_b"],
            params["attn_wq"], params["attn_bq"], params["attn_wk"], params["attn_bk"],
            params["attn_wv"], params["attn_bv"], params["attn_wo"], params["attn_bo"],
            params["ff_w1"], params["ff_b1"], params["ff_w2"], params["ff_b2"])

    out2d = pl.pallas_call(
        partial(_fused_kernel, batch=batch, s_src=s_src, s_tgt=s_tgt),
        out_shape=jax.ShapeDtypeStruct((batch * s_tgt, D_MODEL), jnp.float32),
        in_specs=[pl.BlockSpec(memory_space=pltpu.MemorySpace.VMEM) for _ in args],
        out_specs=pl.BlockSpec(memory_space=pltpu.MemorySpace.VMEM),
    )(*args)
    return out2d.reshape(batch, s_tgt, D_MODEL)


# ----------------------------- parameters ------------------------------------
def positional_encoding(max_len, d_model):
    pos = jnp.arange(max_len, dtype=jnp.float32)[:, None]
    div = jnp.exp(jnp.arange(0, d_model, 2, dtype=jnp.float32)
                  * (-math.log(10000.0) / d_model))
    pe = jnp.zeros((max_len, d_model), jnp.float32)
    pe = pe.at[:, 0::2].set(jnp.sin(pos * div))
    pe = pe.at[:, 1::2].set(jnp.cos(pos * div))
    return pe


def init_params(key, max_len=64):
    keys = iter(jax.random.split(key, 64))

    def rnd(shape, scl):
        return scl * jax.random.normal(next(keys), shape, jnp.float32)

    w_scl = 1.0 / math.sqrt(D_MODEL)
    return {
        "src_emb": rnd((VOCAB, D_MODEL), 1.0),
        "tgt_emb": rnd((VOCAB, D_MODEL), 1.0),
        "pe": positional_encoding(max_len, D_MODEL),
        # 12 LayerNorms packed along the leading dim (see index helpers above).
        "ln_a": jnp.ones((N_LN, 1, D_MODEL), jnp.float32),
        "ln_b": jnp.zeros((N_LN, 1, D_MODEL), jnp.float32),
        # 6 attentions, full-width nn.Linear(d_model, d_model) weights packed per-attn.
        "attn_wq": rnd((N_ATTN, D_MODEL, D_MODEL), w_scl),
        "attn_bq": rnd((N_ATTN, 1, D_MODEL), 0.01),
        "attn_wk": rnd((N_ATTN, D_MODEL, D_MODEL), w_scl),
        "attn_bk": rnd((N_ATTN, 1, D_MODEL), 0.01),
        "attn_wv": rnd((N_ATTN, D_MODEL, D_MODEL), w_scl),
        "attn_bv": rnd((N_ATTN, 1, D_MODEL), 0.01),
        "attn_wo": rnd((N_ATTN, D_MODEL, D_MODEL), w_scl),
        "attn_bo": rnd((N_ATTN, 1, D_MODEL), 0.01),
        # 4 position-wise FFNs.
        "ff_w1": rnd((N_FF, D_MODEL, D_FF), w_scl),
        "ff_b1": rnd((N_FF, 1, D_FF), 0.01),
        "ff_w2": rnd((N_FF, D_FF, D_MODEL), 1.0 / math.sqrt(D_FF)),
        "ff_b2": rnd((N_FF, 1, D_MODEL), 0.01),
    }


# ----------------------------- main -------------------------------------------
if __name__ == "__main__":
    B, S_SRC, S_TGT = 2, 8, 8
    key = jax.random.PRNGKey(0)
    k_param, k_src, k_tgt = jax.random.split(key, 3)

    params = init_params(k_param)

    src = jax.random.randint(k_src, (B, S_SRC), 1, VOCAB)   # token ids, no padding
    tgt = jax.random.randint(k_tgt, (B, S_TGT), 1, VOCAB)

    # src_mask: (B, 1, S_src) padding mask (all valid); tgt_mask: (B, S_tgt, S_tgt)
    # causal (subsequent) mask, as in the Annotated Transformer.
    src_mask = jnp.ones((B, 1, S_SRC), jnp.float32)
    tgt_mask = jnp.broadcast_to(
        jnp.tril(jnp.ones((S_TGT, S_TGT), jnp.float32)), (B, S_TGT, S_TGT))

    fwd = jax.jit(encoder_decoder_forward)
    out = jax.block_until_ready(fwd(params, src, tgt, src_mask, tgt_mask))

    assert out.shape == (B, S_TGT, D_MODEL), out.shape
    assert bool(jnp.all(jnp.isfinite(out)))
    print("KERNEL_OK")
</pallas_src>

<mosaic_0001>
module attributes {stable_mosaic.version = 11 : i64} {
  func.func @_fused_kernel(%arg0: memref<16x1xi32, #tpu.memory_space<vmem>>, %arg1: memref<16x1xi32, #tpu.memory_space<vmem>>, %arg2: memref<16x16xf32, #tpu.memory_space<vmem>>, %arg3: memref<16x16xf32, #tpu.memory_space<vmem>>, %arg4: memref<16x16xf32, #tpu.memory_space<vmem>>, %arg5: memref<16x32xf32, #tpu.memory_space<vmem>>, %arg6: memref<16x32xf32, #tpu.memory_space<vmem>>, %arg7: memref<16x32xf32, #tpu.memory_space<vmem>>, %arg8: memref<16x32xf32, #tpu.memory_space<vmem>>, %arg9: memref<12x1x32xf32, #tpu.memory_space<vmem>>, %arg10: memref<12x1x32xf32, #tpu.memory_space<vmem>>, %arg11: memref<6x32x32xf32, #tpu.memory_space<vmem>>, %arg12: memref<6x1x32xf32, #tpu.memory_space<vmem>>, %arg13: memref<6x32x32xf32, #tpu.memory_space<vmem>>, %arg14: memref<6x1x32xf32, #tpu.memory_space<vmem>>, %arg15: memref<6x32x32xf32, #tpu.memory_space<vmem>>, %arg16: memref<6x1x32xf32, #tpu.memory_space<vmem>>, %arg17: memref<6x32x32xf32, #tpu.memory_space<vmem>>, %arg18: memref<6x1x32xf32, #tpu.memory_space<vmem>>, %arg19: memref<4x32x64xf32, #tpu.memory_space<vmem>>, %arg20: memref<4x1x64xf32, #tpu.memory_space<vmem>>, %arg21: memref<4x64x32xf32, #tpu.memory_space<vmem>>, %arg22: memref<4x1x32xf32, #tpu.memory_space<vmem>>, %arg23: memref<16x32xf32, #tpu.memory_space<vmem>>) attributes {dimension_semantics = [], scalar_prefetch = 0 : i64, scratch_operands = 0 : i64, tpu.core_type = #tpu.core_type<tc>} {
    %c0 = arith.constant 0 : index
    %c0_0 = arith.constant 0 : index
    %0 = vector.load %arg2[%c0, %c0_0] : memref<16x16xf32, #tpu.memory_space<vmem>>, vector<16x16xf32>
    %c0_1 = arith.constant 0 : index
    %c0_2 = arith.constant 0 : index
    %1 = vector.load %arg3[%c0_1, %c0_2] : memref<16x16xf32, #tpu.memory_space<vmem>>, vector<16x16xf32>
    %c0_3 = arith.constant 0 : index
    %c0_4 = arith.constant 0 : index
    %2 = vector.load %arg4[%c0_3, %c0_4] : memref<16x16xf32, #tpu.memory_space<vmem>>, vector<16x16xf32>
    %c0_5 = arith.constant 0 : index
    %c0_6 = arith.constant 0 : index
    %3 = vector.load %arg0[%c0_5, %c0_6] : memref<16x1xi32, #tpu.memory_space<vmem>>, vector<16x1xi32>
    %4 = tpu.iota {dimensions = array<i32: 1>} : vector<16x16xi32>
    %5 = vector.broadcast %3 : vector<16x1xi32> to vector<16x16xi32>
    %6 = arith.cmpi eq, %4, %5 : vector<16x16xi32>
    %7 = arith.extui %6 : vector<16x16xi1> to vector<16x16xi32>
    %8 = arith.sitofp %7 : vector<16x16xi32> to vector<16x16xf32>
    %c0_7 = arith.constant 0 : index
    %c0_8 = arith.constant 0 : index
    %9 = vector.load %arg7[%c0_7, %c0_8] : memref<16x32xf32, #tpu.memory_space<vmem>>, vector<16x32xf32>
    %cst = arith.constant dense<0.000000e+00> : vector<16x32xf32>
    %10 = tpu.matmul %8, %9, %cst {dimension_numbers = #tpu.dot_dimension_numbers<[1], [0], [0], [1], [0, 0, 1, 1], [], []>} : vector<16x16xf32>, vector<16x32xf32>, vector<16x32xf32> -> vector<16x32xf32>
    %cst_9 = arith.constant 5.65685415 : f32
    %11 = vector.broadcast %cst_9 : f32 to vector<16x32xf32>
    %12 = arith.mulf %10, %11 : vector<16x32xf32>
    %c0_10 = arith.constant 0 : index
    %c0_11 = arith.constant 0 : index
    %13 = vector.load %arg5[%c0_10, %c0_11] : memref<16x32xf32, #tpu.memory_space<vmem>>, vector<16x32xf32>
    %14 = arith.addf %12, %13 : vector<16x32xf32>
    %cst_12 = arith.constant dense<0.000000e+00> : vector<16xf32>
    %15 = vector.multi_reduction <add>, %14, %cst_12 [1] : vector<16x32xf32> to vector<16xf32>
    %16 = vector.shape_cast %15 : vector<16xf32> to vector<16x1xf32>
    %cst_13 = arith.constant 3.200000e+01 : f32
    %17 = vector.broadcast %cst_13 : f32 to vector<16x1xf32>
    %18 = arith.divf %16, %17 : vector<16x1xf32>
    %19 = vector.broadcast %18 : vector<16x1xf32> to vector<16x32xf32>
    %20 = arith.subf %14, %19 : vector<16x32xf32>
    %21 = arith.mulf %20, %20 : vector<16x32xf32>
    %cst_14 = arith.constant dense<0.000000e+00> : vector<16xf32>
    %22 = vector.multi_reduction <add>, %21, %cst_14 [1] : vector<16x32xf32> to vector<16xf32>
    %23 = vector.shape_cast %22 : vector<16xf32> to vector<16x1xf32>
    %cst_15 = arith.constant 0.0322580636 : f32
    %24 = vector.broadcast %cst_15 : f32 to vector<16x1xf32>
    %25 = arith.mulf %23, %24 : vector<16x1xf32>
    %26 = math.sqrt %25 : vector<16x1xf32>
    %cst_16 = arith.constant 9.99999997E-7 : f32
    %27 = vector.broadcast %cst_16 : f32 to vector<16x1xf32>
    %28 = arith.addf %26, %27 : vector<16x1xf32>
    %29 = tpu.reciprocal %28 {approx = true} : vector<16x1xf32> -> vector<16x1xf32>
    %c0_17 = arith.constant 0 : index
    %c0_18 = arith.constant 0 : index
    %c0_19 = arith.constant 0 : index
    %30 = vector.load %arg9[%c0_17, %c0_18, %c0_19] : memref<12x1x32xf32, #tpu.memory_space<vmem>>, vector<1x1x32xf32>
    %31 = vector.shape_cast %30 : vector<1x1x32xf32> to vector<1x32xf32>
    %32 = vector.broadcast %18 : vector<16x1xf32> to vector<16x32xf32>
    %33 = arith.subf %14, %32 : vector<16x32xf32>
    %34 = vector.broadcast %31 : vector<1x32xf32> to vector<16x32xf32>
    %35 = arith.mulf %34, %33 : vector<16x32xf32>
    %36 = vector.broadcast %29 : vector<16x1xf32> to vector<16x32xf32>
    %37 = arith.mulf %35, %36 : vector<16x32xf32>
    %c0_20 = arith.constant 0 : index
    %c0_21 = arith.constant 0 : index
    %c0_22 = arith.constant 0 : index
    %38 = vector.load %arg10[%c0_20, %c0_21, %c0_22] : memref<12x1x32xf32, #tpu.memory_space<vmem>>, vector<1x1x32xf32>
    %39 = vector.shape_cast %38 : vector<1x1x32xf32> to vector<1x32xf32>
    %40 = vector.broadcast %39 : vector<1x32xf32> to vector<16x32xf32>
    %41 = arith.addf %37, %40 : vector<16x32xf32>
    %c0_23 = arith.constant 0 : index
    %c0_24 = arith.constant 0 : index
    %c0_25 = arith.constant 0 : index
    %42 = vector.load %arg11[%c0_23, %c0_24, %c0_25] : memref<6x32x32xf32, #tpu.memory_space<vmem>>, vector<1x32x32xf32>
    %43 = vector.shape_cast %42 : vector<1x32x32xf32> to vector<32x32xf32>
    %cst_26 = arith.constant dense<0.000000e+00> : vector<16x32xf32>
    %44 = tpu.matmul %41, %43, %cst_26 {dimension_numbers = #tpu.dot_dimension_numbers<[1], [0], [0], [1], [0, 0, 1, 1], [], []>} : vector<16x32xf32>, vector<32x32xf32>, vector<16x32xf32> -> vector<16x32xf32>
    %c0_27 = arith.constant 0 : index
    %c0_28 = arith.constant 0 : index
    %c0_29 = arith.constant 0 : index
    %45 = vector.load %arg12[%c0_27, %c0_28, %c0_29] : memref<6x1x32xf32, #tpu.memory_space<vmem>>, vector<1x1x32xf32>
    %46 = vector.shape_cast %45 : vector<1x1x32xf32> to vector<1x32xf32>
    %47 = vector.broadcast %46 : vector<1x32xf32> to vector<16x32xf32>
    %48 = arith.addf %44, %47 : vector<16x32xf32>
    %c0_30 = arith.constant 0 : index
    %c0_31 = arith.constant 0 : index
    %c0_32 = arith.constant 0 : index
    %49 = vector.load %arg13[%c0_30, %c0_31, %c0_32] : memref<6x32x32xf32, #tpu.memory_space<vmem>>, vector<1x32x32xf32>
    %50 = vector.shape_cast %49 : vector<1x32x32xf32> to vector<32x32xf32>
    %cst_33 = arith.constant dense<0.000000e+00> : vector<16x32xf32>
    %51 = tpu.matmul %41, %50, %cst_33 {dimension_numbers = #tpu.dot_dimension_numbers<[1], [0], [0], [1], [0, 0, 1, 1], [], []>} : vector<16x32xf32>, vector<32x32xf32>, vector<16x32xf32> -> vector<16x32xf32>
    %c0_34 = arith.constant 0 : index
    %c0_35 = arith.constant 0 : index
    %c0_36 = arith.constant 0 : index
    %52 = vector.load %arg14[%c0_34, %c0_35, %c0_36] : memref<6x1x32xf32, #tpu.memory_space<vmem>>, vector<1x1x32xf32>
    %53 = vector.shape_cast %52 : vector<1x1x32xf32> to vector<1x32xf32>
    %54 = vector.broadcast %53 : vector<1x32xf32> to vector<16x32xf32>
    %55 = arith.addf %51, %54 : vector<16x32xf32>
    %c0_37 = arith.constant 0 : index
    %c0_38 = arith.constant 0 : index
    %c0_39 = arith.constant 0 : index
    %56 = vector.load %arg15[%c0_37, %c0_38, %c0_39] : memref<6x32x32xf32, #tpu.memory_space<vmem>>, vector<1x32x32xf32>
    %57 = vector.shape_cast %56 : vector<1x32x32xf32> to vector<32x32xf32>
    %cst_40 = arith.constant dense<0.000000e+00> : vector<16x32xf32>
    %58 = tpu.matmul %41, %57, %cst_40 {dimension_numbers = #tpu.dot_dimension_numbers<[1], [0], [0], [1], [0, 0, 1, 1], [], []>} : vector<16x32xf32>, vector<32x32xf32>, vector<16x32xf32> -> vector<16x32xf32>
    %c0_41 = arith.constant 0 : index
    %c0_42 = arith.constant 0 : index
    %c0_43 = arith.constant 0 : index
    %59 = vector.load %arg16[%c0_41, %c0_42, %c0_43] : memref<6x1x32xf32, #tpu.memory_space<vmem>>, vector<1x1x32xf32>
    %60 = vector.shape_cast %59 : vector<1x1x32xf32> to vector<1x32xf32>
    %61 = vector.broadcast %60 : vector<1x32xf32> to vector<16x32xf32>
    %62 = arith.addf %58, %61 : vector<16x32xf32>
    %63 = vector.extract_strided_slice %48 {offsets = [0, 0], sizes = [16, 8], strides = [1, 1]} : vector<16x32xf32> to vector<16x8xf32>
    %64 = vector.extract_strided_slice %55 {offsets = [0, 0], sizes = [16, 8], strides = [1, 1]} : vector<16x32xf32> to vector<16x8xf32>
    %65 = vector.extract_strided_slice %62 {offsets = [0, 0], sizes = [16, 8], strides = [1, 1]} : vector<16x32xf32> to vector<16x8xf32>
    %cst_44 = arith.constant dense<0.000000e+00> : vector<16x16xf32>
    %66 = tpu.matmul %63, %64, %cst_44 {dimension_numbers = #tpu.dot_dimension_numbers<[1], [1], [0], [0], [0, 0, 1, 0], [], []>} : vector<16x8xf32>, vector<16x8xf32>, vector<16x16xf32> -> vector<16x16xf32>
    %cst_45 = arith.constant 0.353553385 : f32
    %67 = vector.broadcast %cst_45 : f32 to vector<16x16xf32>
    %68 = arith.mulf %66, %67 : vector<16x16xf32>
    %69 = arith.addf %68, %0 : vector<16x16xf32>
    %cst_46 = arith.constant dense<0xFF800000> : vector<16xf32>
    %70 = vector.multi_reduction <maximumf>, %69, %cst_46 [1] : vector<16x16xf32> to vector<16xf32>
    %71 = vector.shape_cast %70 : vector<16xf32> to vector<16x1xf32>
    %72 = vector.broadcast %71 : vector<16x1xf32> to vector<16x16xf32>
    %73 = arith.subf %69, %72 : vector<16x16xf32>
    %74 = math.exp %73 : vector<16x16xf32>
    %cst_47 = arith.constant dense<0.000000e+00> : vector<16xf32>
    %75 = vector.multi_reduction <add>, %74, %cst_47 [1] : vector<16x16xf32> to vector<16xf32>
    %76 = vector.shape_cast %75 : vector<16xf32> to vector<16x1xf32>
    %77 = tpu.reciprocal %76 {approx = true} : vector<16x1xf32> -> vector<16x1xf32>
    %78 = vector.broadcast %77 : vector<16x1xf32> to vector<16x16xf32>
    %79 = arith.mulf %74, %78 : vector<16x16xf32>
    %cst_48 = arith.constant dense<0.000000e+00> : vector<16x8xf32>
    %80 = tpu.matmul %79, %65, %cst_48 {dimension_numbers = #tpu.dot_dimension_numbers<[1], [0], [0], [1], [0, 0, 1, 1], [], []>} : vector<16x16xf32>, vector<16x8xf32>, vector<16x8xf32> -> vector<16x8xf32>
    %81 = vector.extract_strided_slice %48 {offsets = [0, 8], sizes = [16, 8], strides = [1, 1]} : vector<16x32xf32> to vector<16x8xf32>
    %82 = vector.extract_strided_slice %55 {offsets = [0, 8], sizes = [16, 8], strides = [1, 1]} : vector<16x32xf32> to vector<16x8xf32>
    %83 = vector.extract_strided_slice %62 {offsets = [0, 8], sizes = [16, 8], strides = [1, 1]} : vector<16x32xf32> to vector<16x8xf32>
    %cst_49 = arith.constant dense<0.000000e+00> : vector<16x16xf32>
    %84 = tpu.matmul %81, %82, %cst_49 {dimension_numbers = #tpu.dot_dimension_numbers<[1], [1], [0], [0], [0, 0, 1, 0], [], []>} : vector<16x8xf32>, vector<16x8xf32>, vector<16x16xf32> -> vector<16x16xf32>
    %cst_50 = arith.constant 0.353553385 : f32
    %85 = vector.broadcast %cst_50 : f32 to vector<16x16xf32>
    %86 = arith.mulf %84, %85 : vector<16x16xf32>
    %87 = arith.addf %86, %0 : vector<16x16xf32>
    %cst_51 = arith.constant dense<0xFF800000> : vector<16xf32>
    %88 = vector.multi_reduction <maximumf>, %87, %cst_51 [1] : vector<16x16xf32> to vector<16xf32>
    %89 = vector.shape_cast %88 : vector<16xf32> to vector<16x1xf32>
    %90 = vector.broadcast %89 : vector<16x1xf32> to vector<16x16xf32>
    %91 = arith.subf %87, %90 : vector<16x16xf32>
    %92 = math.exp %91 : vector<16x16xf32>
    %cst_52 = arith.constant dense<0.000000e+00> : vector<16xf32>
    %93 = vector.multi_reduction <add>, %92, %cst_52 [1] : vector<16x16xf32> to vector<16xf32>
    %94 = vector.shape_cast %93 : vector<16xf32> to vector<16x1xf32>
    %95 = tpu.reciprocal %94 {approx = true} : vector<16x1xf32> -> vector<16x1xf32>
    %96 = vector.broadcast %95 : vector<16x1xf32> to vector<16x16xf32>
    %97 = arith.mulf %92, %96 : vector<16x16xf32>
    %cst_53 = arith.constant dense<0.000000e+00> : vector<16x8xf32>
    %98 = tpu.matmul %97, %83, %cst_53 {dimension_numbers = #tpu.dot_dimension_numbers<[1], [0], [0], [1], [0, 0, 1, 1], [], []>} : vector<16x16xf32>, vector<16x8xf32>, vector<16x8xf32> -> vector<16x8xf32>
    %99 = vector.extract_strided_slice %48 {offsets = [0, 16], sizes = [16, 8], strides = [1, 1]} : vector<16x32xf32> to vector<16x8xf32>
    %100 = vector.extract_strided_slice %55 {offsets = [0, 16], sizes = [16, 8], strides = [1, 1]} : vector<16x32xf32> to vector<16x8xf32>
    %101 = vector.extract_strided_slice %62 {offsets = [0, 16], sizes = [16, 8], strides = [1, 1]} : vector<16x32xf32> to vector<16x8xf32>
    %cst_54 = arith.constant dense<0.000000e+00> : vector<16x16xf32>
    %102 = tpu.matmul %99, %100, %cst_54 {dimension_numbers = #tpu.dot_dimension_numbers<[1], [1], [0], [0], [0, 0, 1, 0], [], []>} : vector<16x8xf32>, vector<16x8xf32>, vector<16x16xf32> -> vector<16x16xf32>
    %cst_55 = arith.constant 0.353553385 : f32
    %103 = vector.broadcast %cst_55 : f32 to vector<16x16xf32>
    %104 = arith.mulf %102, %103 : vector<16x16xf32>
    %105 = arith.addf %104, %0 : vector<16x16xf32>
    %cst_56 = arith.constant dense<0xFF800000> : vector<16xf32>
    %106 = vector.multi_reduction <maximumf>, %105, %cst_56 [1] : vector<16x16xf32> to vector<16xf32>
    %107 = vector.shape_cast %106 : vector<16xf32> to vector<16x1xf32>
    %108 = vector.broadcast %107 : vector<16x1xf32> to vector<16x16xf32>
    %109 = arith.subf %105, %108 : vector<16x16xf32>
    %110 = math.exp %109 : vector<16x16xf32>
    %cst_57 = arith.constant dense<0.000000e+00> : vector<16xf32>
    %111 = vector.multi_reduction <add>, %110, %cst_57 [1] : vector<16x16xf32> to vector<16xf32>
    %112 = vector.shape_cast %111 : vector<16xf32> to vector<16x1xf32>
    %113 = tpu.reciprocal %112 {approx = true} : vector<16x1xf32> -> vector<16x1xf32>
    %114 = vector.broadcast %113 : vector<16x1xf32> to vector<16x16xf32>
    %115 = arith.mulf %110, %114 : vector<16x16xf32>
    %cst_58 = arith.constant dense<0.000000e+00> : vector<16x8xf32>
    %116 = tpu.matmul %115, %101, %cst_58 {dimension_numbers = #tpu.dot_dimension_numbers<[1], [0], [0], [1], [0, 0, 1, 1], [], []>} : vector<16x16xf32>, vector<16x8xf32>, vector<16x8xf32> -> vector<16x8xf32>
    %117 = vector.extract_strided_slice %48 {offsets = [0, 24], sizes = [16, 8], strides = [1, 1]} : vector<16x32xf32> to vector<16x8xf32>
    %118 = vector.extract_strided_slice %55 {offsets = [0, 24], sizes = [16, 8], strides = [1, 1]} : vector<16x32xf32> to vector<16x8xf32>
    %119 = vector.extract_strided_slice %62 {offsets = [0, 24], sizes = [16, 8], strides = [1, 1]} : vector<16x32xf32> to vector<16x8xf32>
    %cst_59 = arith.constant dense<0.000000e+00> : vector<16x16xf32>
    %120 = tpu.matmul %117, %118, %cst_59 {dimension_numbers = #tpu.dot_dimension_numbers<[1], [1], [0], [0], [0, 0, 1, 0], [], []>} : vector<16x8xf32>, vector<16x8xf32>, vector<16x16xf32> -> vector<16x16xf32>
    %cst_60 = arith.constant 0.353553385 : f32
    %121 = vector.broadcast %cst_60 : f32 to vector<16x16xf32>
    %122 = arith.mulf %120, %121 : vector<16x16xf32>
    %123 = arith.addf %122, %0 : vector<16x16xf32>
    %cst_61 = arith.constant dense<0xFF800000> : vector<16xf32>
    %124 = vector.multi_reduction <maximumf>, %123, %cst_61 [1] : vector<16x16xf32> to vector<16xf32>
    %125 = vector.shape_cast %124 : vector<16xf32> to vector<16x1xf32>
    %126 = vector.broadcast %125 : vector<16x1xf32> to vector<16x16xf32>
    %127 = arith.subf %123, %126 : vector<16x16xf32>
    %128 = math.exp %127 : vector<16x16xf32>
    %cst_62 = arith.constant dense<0.000000e+00> : vector<16xf32>
    %129 = vector.multi_reduction <add>, %128, %cst_62 [1] : vector<16x16xf32> to vector<16xf32>
    %130 = vector.shape_cast %129 : vector<16xf32> to vector<16x1xf32>
    %131 = tpu.reciprocal %130 {approx = true} : vector<16x1xf32> -> vector<16x1xf32>
    %132 = vector.broadcast %131 : vector<16x1xf32> to vector<16x16xf32>
    %133 = arith.mulf %128, %132 : vector<16x16xf32>
    %cst_63 = arith.constant dense<0.000000e+00> : vector<16x8xf32>
    %134 = tpu.matmul %133, %119, %cst_63 {dimension_numbers = #tpu.dot_dimension_numbers<[1], [0], [0], [1], [0, 0, 1, 1], [], []>} : vector<16x16xf32>, vector<16x8xf32>, vector<16x8xf32> -> vector<16x8xf32>
    %135 = tpu.concatenate %80, %98, %116, %134 in 1 : vector<16x8xf32>, vector<16x8xf32>, vector<16x8xf32>, vector<16x8xf32> -> vector<16x32xf32>
    %c0_64 = arith.constant 0 : index
    %c0_65 = arith.constant 0 : index
    %c0_66 = arith.constant 0 : index
    %136 = vector.load %arg17[%c0_64, %c0_65, %c0_66] : memref<6x32x32xf32, #tpu.memory_space<vmem>>, vector<1x32x32xf32>
    %137 = vector.shape_cast %136 : vector<1x32x32xf32> to vector<32x32xf32>
    %cst_67 = arith.constant dense<0.000000e+00> : vector<16x32xf32>
    %138 = tpu.matmul %135, %137, %cst_67 {dimension_numbers = #tpu.dot_dimension_numbers<[1], [0], [0], [1], [0, 0, 1, 1], [], []>} : vector<16x32xf32>, vector<32x32xf32>, vector<16x32xf32> -> vector<16x32xf32>
    %c0_68 = arith.constant 0 : index
    %c0_69 = arith.constant 0 : index
    %c0_70 = arith.constant 0 : index
    %139 = vector.load %arg18[%c0_68, %c0_69, %c0_70] : memref<6x1x32xf32, #tpu.memory_space<vmem>>, vector<1x1x32xf32>
    %140 = vector.shape_cast %139 : vector<1x1x32xf32> to vector<1x32xf32>
    %141 = vector.broadcast %140 : vector<1x32xf32> to vector<16x32xf32>
    %142 = arith.addf %138, %141 : vector<16x32xf32>
    %143 = arith.addf %14, %142 : vector<16x32xf32>
    %cst_71 = arith.constant dense<0.000000e+00> : vector<16xf32>
    %144 = vector.multi_reduction <add>, %143, %cst_71 [1] : vector<16x32xf32> to vector<16xf32>
    %145 = vector.shape_cast %144 : vector<16xf32> to vector<16x1xf32>
    %cst_72 = arith.constant 3.200000e+01 : f32
    %146 = vector.broadcast %cst_72 : f32 to vector<16x1xf32>
    %147 = arith.divf %145, %146 : vector<16x1xf32>
    %148 = vector.broadcast %147 : vector<16x1xf32> to vector<16x32xf32>
    %149 = arith.subf %143, %148 : vector<16x32xf32>
    %150 = arith.mulf %149, %149 : vector<16x32xf32>
    %cst_73 = arith.constant dense<0.000000e+00> : vector<16xf32>
    %151 = vector.multi_reduction <add>, %150, %cst_73 [1] : vector<16x32xf32> to vector<16xf32>
    %152 = vector.shape_cast %151 : vector<16xf32> to vector<16x1xf32>
    %cst_74 = arith.constant 0.0322580636 : f32
    %153 = vector.broadcast %cst_74 : f32 to vector<16x1xf32>
    %154 = arith.mulf %152, %153 : vector<16x1xf32>
    %155 = math.sqrt %154 : vector<16x1xf32>
    %cst_75 = arith.constant 9.99999997E-7 : f32
    %156 = vector.broadcast %cst_75 : f32 to vector<16x1xf32>
    %157 = arith.addf %155, %156 : vector<16x1xf32>
    %158 = tpu.reciprocal %157 {approx = true} : vector<16x1xf32> -> vector<16x1xf32>
    %c1 = arith.constant 1 : index
    %c0_76 = arith.constant 0 : index
    %c0_77 = arith.constant 0 : index
    %159 = vector.load %arg9[%c1, %c0_76, %c0_77] : memref<12x1x32xf32, #tpu.memory_space<vmem>>, vector<1x1x32xf32>
    %160 = vector.shape_cast %159 : vector<1x1x32xf32> to vector<1x32xf32>
    %161 = vector.broadcast %147 : vector<16x1xf32> to vector<16x32xf32>
    %162 = arith.subf %143, %161 : vector<16x32xf32>
    %163 = vector.broadcast %160 : vector<1x32xf32> to vector<16x32xf32>
    %164 = arith.mulf %163, %162 : vector<16x32xf32>
    %165 = vector.broadcast %158 : vector<16x1xf32> to vector<16x32xf32>
    %166 = arith.mulf %164, %165 : vector<16x32xf32>
    %c1_78 = arith.constant 1 : index
    %c0_79 = arith.constant 0 : index
    %c0_80 = arith.constant 0 : index
    %167 = vector.load %arg10[%c1_78, %c0_79, %c0_80] : memref<12x1x32xf32, #tpu.memory_space<vmem>>, vector<1x1x32xf32>
    %168 = vector.shape_cast %167 : vector<1x1x32xf32> to vector<1x32xf32>
    %169 = vector.broadcast %168 : vector<1x32xf32> to vector<16x32xf32>
    %170 = arith.addf %166, %169 : vector<16x32xf32>
    %c0_81 = arith.constant 0 : index
    %c0_82 = arith.constant 0 : index
    %c0_83 = arith.constant 0 : index
    %171 = vector.load %arg19[%c0_81, %c0_82, %c0_83] : memref<4x32x64xf32, #tpu.memory_space<vmem>>, vector<1x32x64xf32>
    %172 = vector.shape_cast %171 : vector<1x32x64xf32> to vector<32x64xf32>
    %cst_84 = arith.constant dense<0.000000e+00> : vector<16x64xf32>
    %173 = tpu.matmul %170, %172, %cst_84 {dimension_numbers = #tpu.dot_dimension_numbers<[1], [0], [0], [1], [0, 0, 1, 1], [], []>} : vector<16x32xf32>, vector<32x64xf32>, vector<16x64xf32> -> vector<16x64xf32>
    %c0_85 = arith.constant 0 : index
    %c0_86 = arith.constant 0 : index
    %c0_87 = arith.constant 0 : index
    %174 = vector.load %arg20[%c0_85, %c0_86, %c0_87] : memref<4x1x64xf32, #tpu.memory_space<vmem>>, vector<1x1x64xf32>
    %175 = vector.shape_cast %174 : vector<1x1x64xf32> to vector<1x64xf32>
    %176 = vector.broadcast %175 : vector<1x64xf32> to vector<16x64xf32>
    %177 = arith.addf %173, %176 : vector<16x64xf32>
    %cst_88 = arith.constant 0.000000e+00 : f32
    %178 = vector.broadcast %cst_88 : f32 to vector<16x64xf32>
    %179 = arith.maximumf %177, %178 : vector<16x64xf32>
    %c0_89 = arith.constant 0 : index
    %c0_90 = arith.constant 0 : index
    %c0_91 = arith.constant 0 : index
    %180 = vector.load %arg21[%c0_89, %c0_90, %c0_91] : memref<4x64x32xf32, #tpu.memory_space<vmem>>, vector<1x64x32xf32>
    %181 = vector.shape_cast %180 : vector<1x64x32xf32> to vector<64x32xf32>
    %cst_92 = arith.constant dense<0.000000e+00> : vector<16x32xf32>
    %182 = tpu.matmul %179, %181, %cst_92 {dimension_numbers = #tpu.dot_dimension_numbers<[1], [0], [0], [1], [0, 0, 1, 1], [], []>} : vector<16x64xf32>, vector<64x32xf32>, vector<16x32xf32> -> vector<16x32xf32>
    %c0_93 = arith.constant 0 : index
    %c0_94 = arith.constant 0 : index
    %c0_95 = arith.constant 0 : index
    %183 = vector.load %arg22[%c0_93, %c0_94, %c0_95] : memref<4x1x32xf32, #tpu.memory_space<vmem>>, vector<1x1x32xf32>
    %184 = vector.shape_cast %183 : vector<1x1x32xf32> to vector<1x32xf32>
    %185 = vector.broadcast %184 : vector<1x32xf32> to vector<16x32xf32>
    %186 = arith.addf %182, %185 : vector<16x32xf32>
    %187 = arith.addf %143, %186 : vector<16x32xf32>
    %cst_96 = arith.constant dense<0.000000e+00> : vector<16xf32>
    %188 = vector.multi_reduction <add>, %187, %cst_96 [1] : vector<16x32xf32> to vector<16xf32>
    %189 = vector.shape_cast %188 : vector<16xf32> to vector<16x1xf32>
    %cst_97 = arith.constant 3.200000e+01 : f32
    %190 = vector.broadcast %cst_97 : f32 to vector<16x1xf32>
    %191 = arith.divf %189, %190 : vector<16x1xf32>
    %192 = vector.broadcast %191 : vector<16x1xf32> to vector<16x32xf32>
    %193 = arith.subf %187, %192 : vector<16x32xf32>
    %194 = arith.mulf %193, %193 : vector<16x32xf32>
    %cst_98 = arith.constant dense<0.000000e+00> : vector<16xf32>
    %195 = vector.multi_reduction <add>, %194, %cst_98 [1] : vector<16x32xf32> to vector<16xf32>
    %196 = vector.shape_cast %195 : vector<16xf32> to vector<16x1xf32>
    %cst_99 = arith.constant 0.0322580636 : f32
    %197 = vector.broadcast %cst_99 : f32 to vector<16x1xf32>
    %198 = arith.mulf %196, %197 : vector<16x1xf32>
    %199 = math.sqrt %198 : vector<16x1xf32>
    %cst_100 = arith.constant 9.99999997E-7 : f32
    %200 = vector.broadcast %cst_100 : f32 to vector<16x1xf32>
    %201 = arith.addf %199, %200 : vector<16x1xf32>
    %202 = tpu.reciprocal %201 {approx = true} : vector<16x1xf32> -> vector<16x1xf32>
    %c2 = arith.constant 2 : index
    %c0_101 = arith.constant 0 : index
    %c0_102 = arith.constant 0 : index
    %203 = vector.load %arg9[%c2, %c0_101, %c0_102] : memref<12x1x32xf32, #tpu.memory_space<vmem>>, vector<1x1x32xf32>
    %204 = vector.shape_cast %203 : vector<1x1x32xf32> to vector<1x32xf32>
    %205 = vector.broadcast %191 : vector<16x1xf32> to vector<16x32xf32>
    %206 = arith.subf %187, %205 : vector<16x32xf32>
    %207 = vector.broadcast %204 : vector<1x32xf32> to vector<16x32xf32>
    %208 = arith.mulf %207, %206 : vector<16x32xf32>
    %209 = vector.broadcast %202 : vector<16x1xf32> to vector<16x32xf32>
    %210 = arith.mulf %208, %209 : vector<16x32xf32>
    %c2_103 = arith.constant 2 : index
    %c0_104 = arith.constant 0 : index
    %c0_105 = arith.constant 0 : index
    %211 = vector.load %arg10[%c2_103, %c0_104, %c0_105] : memref<12x1x32xf32, #tpu.memory_space<vmem>>, vector<1x1x32xf32>
    %212 = vector.shape_cast %211 : vector<1x1x32xf32> to vector<1x32xf32>
    %213 = vector.broadcast %212 : vector<1x32xf32> to vector<16x32xf32>
    %214 = arith.addf %210, %213 : vector<16x32xf32>
    %c1_106 = arith.constant 1 : index
    %c0_107 = arith.constant 0 : index
    %c0_108 = arith.constant 0 : index
    %215 = vector.load %arg11[%c1_106, %c0_107, %c0_108] : memref<6x32x32xf32, #tpu.memory_space<vmem>>, vector<1x32x32xf32>
    %216 = vector.shape_cast %215 : vector<1x32x32xf32> to vector<32x32xf32>
    %cst_109 = arith.constant dense<0.000000e+00> : vector<16x32xf32>
    %217 = tpu.matmul %214, %216, %cst_109 {dimension_numbers = #tpu.dot_dimension_numbers<[1], [0], [0], [1], [0, 0, 1, 1], [], []>} : vector<16x32xf32>, vector<32x32xf32>, vector<16x32xf32> -> vector<16x32xf32>
    %c1_110 = arith.constant 1 : index
    %c0_111 = arith.constant 0 : index
    %c0_112 = arith.constant 0 : index
    %218 = vector.load %arg12[%c1_110, %c0_111, %c0_112] : memref<6x1x32xf32, #tpu.memory_space<vmem>>, vector<1x1x32xf32>
    %219 = vector.shape_cast %218 : vector<1x1x32xf32> to vector<1x32xf32>
    %220 = vector.broadcast %219 : vector<1x32xf32> to vector<16x32xf32>
    %221 = arith.addf %217, %220 : vector<16x32xf32>
    %c1_113 = arith.constant 1 : index
    %c0_114 = arith.constant 0 : index
    %c0_115 = arith.constant 0 : index
    %222 = vector.load %arg13[%c1_113, %c0_114, %c0_115] : memref<6x32x32xf32, #tpu.memory_space<vmem>>, vector<1x32x32xf32>
    %223 = vector.shape_cast %222 : vector<1x32x32xf32> to vector<32x32xf32>
    %cst_116 = arith.constant dense<0.000000e+00> : vector<16x32xf32>
    %224 = tpu.matmul %214, %223, %cst_116 {dimension_numbers = #tpu.dot_dimension_numbers<[1], [0], [0], [1], [0, 0, 1, 1], [], []>} : vector<16x32xf32>, vector<32x32xf32>, vector<16x32xf32> -> vector<16x32xf32>
    %c1_117 = arith.constant 1 : index
    %c0_118 = arith.constant 0 : index
    %c0_119 = arith.constant 0 : index
    %225 = vector.load %arg14[%c1_117, %c0_118, %c0_119] : memref<6x1x32xf32, #tpu.memory_space<vmem>>, vector<1x1x32xf32>
    %226 = vector.shape_cast %225 : vector<1x1x32xf32> to vector<1x32xf32>
    %227 = vector.broadcast %226 : vector<1x32xf32> to vector<16x32xf32>
    %228 = arith.addf %224, %227 : vector<16x32xf32>
    %c1_120 = arith.constant 1 : index
    %c0_121 = arith.constant 0 : index
    %c0_122 = arith.constant 0 : index
    %229 = vector.load %arg15[%c1_120, %c0_121, %c0_122] : memref<6x32x32xf32, #tpu.memory_space<vmem>>, vector<1x32x32xf32>
    %230 = vector.shape_cast %229 : vector<1x32x32xf32> to vector<32x32xf32>
    %cst_123 = arith.constant dense<0.000000e+00> : vector<16x32xf32>
    %231 = tpu.matmul %214, %230, %cst_123 {dimension_numbers = #tpu.dot_dimension_numbers<[1], [0], [0], [1], [0, 0, 1, 1], [], []>} : vector<16x32xf32>, vector<32x32xf32>, vector<16x32xf32> -> vector<16x32xf32>
    %c1_124 = arith.constant 1 : index
    %c0_125 = arith.constant 0 : index
    %c0_126 = arith.constant 0 : index
    %232 = vector.load %arg16[%c1_124, %c0_125, %c0_126] : memref<6x1x32xf32, #tpu.memory_space<vmem>>, vector<1x1x32xf32>
    %233 = vector.shape_cast %232 : vector<1x1x32xf32> to vector<1x32xf32>
    %234 = vector.broadcast %233 : vector<1x32xf32> to vector<16x32xf32>
    %235 = arith.addf %231, %234 : vector<16x32xf32>
    %236 = vector.extract_strided_slice %221 {offsets = [0, 0], sizes = [16, 8], strides = [1, 1]} : vector<16x32xf32> to vector<16x8xf32>
    %237 = vector.extract_strided_slice %228 {offsets = [0, 0], sizes = [16, 8], strides = [1, 1]} : vector<16x32xf32> to vector<16x8xf32>
    %238 = vector.extract_strided_slice %235 {offsets = [0, 0], sizes = [16, 8], strides = [1, 1]} : vector<16x32xf32> to vector<16x8xf32>
    %cst_127 = arith.constant dense<0.000000e+00> : vector<16x16xf32>
    %239 = tpu.matmul %236, %237, %cst_127 {dimension_numbers = #tpu.dot_dimension_numbers<[1], [1], [0], [0], [0, 0, 1, 0], [], []>} : vector<16x8xf32>, vector<16x8xf32>, vector<16x16xf32> -> vector<16x16xf32>
    %cst_128 = arith.constant 0.353553385 : f32
    %240 = vector.broadcast %cst_128 : f32 to vector<16x16xf32>
    %241 = arith.mulf %239, %240 : vector<16x16xf32>
    %242 = arith.addf %241, %0 : vector<16x16xf32>
    %cst_129 = arith.constant dense<0xFF800000> : vector<16xf32>
    %243 = vector.multi_reduction <maximumf>, %242, %cst_129 [1] : vector<16x16xf32> to vector<16xf32>
    %244 = vector.shape_cast %243 : vector<16xf32> to vector<16x1xf32>
    %245 = vector.broadcast %244 : vector<16x1xf32> to vector<16x16xf32>
    %246 = arith.subf %242, %245 : vector<16x16xf32>
    %247 = math.exp %246 : vector<16x16xf32>
    %cst_130 = arith.constant dense<0.000000e+00> : vector<16xf32>
    %248 = vector.multi_reduction <add>, %247, %cst_130 [1] : vector<16x16xf32> to vector<16xf32>
    %249 = vector.shape_cast %248 : vector<16xf32> to vector<16x1xf32>
    %250 = tpu.reciprocal %249 {approx = true} : vector<16x1xf32> -> vector<16x1xf32>
    %251 = vector.broadcast %250 : vector<16x1xf32> to vector<16x16xf32>
    %252 = arith.mulf %247, %251 : vector<16x16xf32>
    %cst_131 = arith.constant dense<0.000000e+00> : vector<16x8xf32>
    %253 = tpu.matmul %252, %238, %cst_131 {dimension_numbers = #tpu.dot_dimension_numbers<[1], [0], [0], [1], [0, 0, 1, 1], [], []>} : vector<16x16xf32>, vector<16x8xf32>, vector<16x8xf32> -> vector<16x8xf32>
    %254 = vector.extract_strided_slice %221 {offsets = [0, 8], sizes = [16, 8], strides = [1, 1]} : vector<16x32xf32> to vector<16x8xf32>
    %255 = vector.extract_strided_slice %228 {offsets = [0, 8], sizes = [16, 8], strides = [1, 1]} : vector<16x32xf32> to vector<16x8xf32>
    %256 = vector.extract_strided_slice %235 {offsets = [0, 8], sizes = [16, 8], strides = [1, 1]} : vector<16x32xf32> to vector<16x8xf32>
    %cst_132 = arith.constant dense<0.000000e+00> : vector<16x16xf32>
    %257 = tpu.matmul %254, %255, %cst_132 {dimension_numbers = #tpu.dot_dimension_numbers<[1], [1], [0], [0], [0, 0, 1, 0], [], []>} : vector<16x8xf32>, vector<16x8xf32>, vector<16x16xf32> -> vector<16x16xf32>
    %cst_133 = arith.constant 0.353553385 : f32
    %258 = vector.broadcast %cst_133 : f32 to vector<16x16xf32>
    %259 = arith.mulf %257, %258 : vector<16x16xf32>
    %260 = arith.addf %259, %0 : vector<16x16xf32>
    %cst_134 = arith.constant dense<0xFF800000> : vector<16xf32>
    %261 = vector.multi_reduction <maximumf>, %260, %cst_134 [1] : vector<16x16xf32> to vector<16xf32>
    %262 = vector.shape_cast %261 : vector<16xf32> to vector<16x1xf32>
    %263 = vector.broadcast %262 : vector<16x1xf32> to vector<16x16xf32>
    %264 = arith.subf %260, %263 : vector<16x16xf32>
    %265 = math.exp %264 : vector<16x16xf32>
    %cst_135 = arith.constant dense<0.000000e+00> : vector<16xf32>
    %266 = vector.multi_reduction <add>, %265, %cst_135 [1] : vector<16x16xf32> to vector<16xf32>
    %267 = vector.shape_cast %266 : vector<16xf32> to vector<16x1xf32>
    %268 = tpu.reciprocal %267 {approx = true} : vector<16x1xf32> -> vector<16x1xf32>
    %269 = vector.broadcast %268 : vector<16x1xf32> to vector<16x16xf32>
    %270 = arith.mulf %265, %269 : vector<16x16xf32>
    %cst_136 = arith.constant dense<0.000000e+00> : vector<16x8xf32>
    %271 = tpu.matmul %270, %256, %cst_136 {dimension_numbers = #tpu.dot_dimension_numbers<[1], [0], [0], [1], [0, 0, 1, 1], [], []>} : vector<16x16xf32>, vector<16x8xf32>, vector<16x8xf32> -> vector<16x8xf32>
    %272 = vector.extract_strided_slice %221 {offsets = [0, 16], sizes = [16, 8], strides = [1, 1]} : vector<16x32xf32> to vector<16x8xf32>
    %273 = vector.extract_strided_slice %228 {offsets = [0, 16], sizes = [16, 8], strides = [1, 1]} : vector<16x32xf32> to vector<16x8xf32>
    %274 = vector.extract_strided_slice %235 {offsets = [0, 16], sizes = [16, 8], strides = [1, 1]} : vector<16x32xf32> to vector<16x8xf32>
    %cst_137 = arith.constant dense<0.000000e+00> : vector<16x16xf32>
    %275 = tpu.matmul %272, %273, %cst_137 {dimension_numbers = #tpu.dot_dimension_numbers<[1], [1], [0], [0], [0, 0, 1, 0], [], []>} : vector<16x8xf32>, vector<16x8xf32>, vector<16x16xf32> -> vector<16x16xf32>
    %cst_138 = arith.constant 0.353553385 : f32
    %276 = vector.broadcast %cst_138 : f32 to vector<16x16xf32>
    %277 = arith.mulf %275, %276 : vector<16x16xf32>
    %278 = arith.addf %277, %0 : vector<16x16xf32>
    %cst_139 = arith.constant dense<0xFF800000> : vector<16xf32>
    %279 = vector.multi_reduction <maximumf>, %278, %cst_139 [1] : vector<16x16xf32> to vector<16xf32>
    %280 = vector.shape_cast %279 : vector<16xf32> to vector<16x1xf32>
    %281 = vector.broadcast %280 : vector<16x1xf32> to vector<16x16xf32>
    %282 = arith.subf %278, %281 : vector<16x16xf32>
    %283 = math.exp %282 : vector<16x16xf32>
    %cst_140 = arith.constant dense<0.000000e+00> : vector<16xf32>
    %284 = vector.multi_reduction <add>, %283, %cst_140 [1] : vector<16x16xf32> to vector<16xf32>
    %285 = vector.shape_cast %284 : vector<16xf32> to vector<16x1xf32>
    %286 = tpu.reciprocal %285 {approx = true} : vector<16x1xf32> -> vector<16x1xf32>
    %287 = vector.broadcast %286 : vector<16x1xf32> to vector<16x16xf32>
    %288 = arith.mulf %283, %287 : vector<16x16xf32>
    %cst_141 = arith.constant dense<0.000000e+00> : vector<16x8xf32>
    %289 = tpu.matmul %288, %274, %cst_141 {dimension_numbers = #tpu.dot_dimension_numbers<[1], [0], [0], [1], [0, 0, 1, 1], [], []>} : vector<16x16xf32>, vector<16x8xf32>, vector<16x8xf32> -> vector<16x8xf32>
    %290 = vector.extract_strided_slice %221 {offsets = [0, 24], sizes = [16, 8], strides = [1, 1]} : vector<16x32xf32> to vector<16x8xf32>
    %291 = vector.extract_strided_slice %228 {offsets = [0, 24], sizes = [16, 8], strides = [1, 1]} : vector<16x32xf32> to vector<16x8xf32>
    %292 = vector.extract_strided_slice %235 {offsets = [0, 24], sizes = [16, 8], strides = [1, 1]} : vector<16x32xf32> to vector<16x8xf32>
    %cst_142 = arith.constant dense<0.000000e+00> : vector<16x16xf32>
    %293 = tpu.matmul %290, %291, %cst_142 {dimension_numbers = #tpu.dot_dimension_numbers<[1], [1], [0], [0], [0, 0, 1, 0], [], []>} : vector<16x8xf32>, vector<16x8xf32>, vector<16x16xf32> -> vector<16x16xf32>
    %cst_143 = arith.constant 0.353553385 : f32
    %294 = vector.broadcast %cst_143 : f32 to vector<16x16xf32>
    %295 = arith.mulf %293, %294 : vector<16x16xf32>
    %296 = arith.addf %295, %0 : vector<16x16xf32>
    %cst_144 = arith.constant dense<0xFF800000> : vector<16xf32>
    %297 = vector.multi_reduction <maximumf>, %296, %cst_144 [1] : vector<16x16xf32> to vector<16xf32>
    %298 = vector.shape_cast %297 : vector<16xf32> to vector<16x1xf32>
    %299 = vector.broadcast %298 : vector<16x1xf32> to vector<16x16xf32>
    %300 = arith.subf %296, %299 : vector<16x16xf32>
    %301 = math.exp %300 : vector<16x16xf32>
    %cst_145 = arith.constant dense<0.000000e+00> : vector<16xf32>
    %302 = vector.multi_reduction <add>, %301, %cst_145 [1] : vector<16x16xf32> to vector<16xf32>
    %303 = vector.shape_cast %302 : vector<16xf32> to vector<16x1xf32>
    %304 = tpu.reciprocal %303 {approx = true} : vector<16x1xf32> -> vector<16x1xf32>
    %305 = vector.broadcast %304 : vector<16x1xf32> to vector<16x16xf32>
    %306 = arith.mulf %301, %305 : vector<16x16xf32>
    %cst_146 = arith.constant dense<0.000000e+00> : vector<16x8xf32>
    %307 = tpu.matmul %306, %292, %cst_146 {dimension_numbers = #tpu.dot_dimension_numbers<[1], [0], [0], [1], [0, 0, 1, 1], [], []>} : vector<16x16xf32>, vector<16x8xf32>, vector<16x8xf32> -> vector<16x8xf32>
    %308 = tpu.concatenate %253, %271, %289, %307 in 1 : vector<16x8xf32>, vector<16x8xf32>, vector<16x8xf32>, vector<16x8xf32> -> vector<16x32xf32>
    %c1_147 = arith.constant 1 : index
    %c0_148 = arith.constant 0 : index
    %c0_149 = arith.constant 0 : index
    %309 = vector.load %arg17[%c1_147, %c0_148, %c0_149] : memref<6x32x32xf32, #tpu.memory_space<vmem>>, vector<1x32x32xf32>
    %310 = vector.shape_cast %309 : vector<1x32x32xf32> to vector<32x32xf32>
    %cst_150 = arith.constant dense<0.000000e+00> : vector<16x32xf32>
    %311 = tpu.matmul %308, %310, %cst_150 {dimension_numbers = #tpu.dot_dimension_numbers<[1], [0], [0], [1], [0, 0, 1, 1], [], []>} : vector<16x32xf32>, vector<32x32xf32>, vector<16x32xf32> -> vector<16x32xf32>
    %c1_151 = arith.constant 1 : index
    %c0_152 = arith.constant 0 : index
    %c0_153 = arith.constant 0 : index
    %312 = vector.load %arg18[%c1_151, %c0_152, %c0_153] : memref<6x1x32xf32, #tpu.memory_space<vmem>>, vector<1x1x32xf32>
    %313 = vector.shape_cast %312 : vector<1x1x32xf32> to vector<1x32xf32>
    %314 = vector.broadcast %313 : vector<1x32xf32> to vector<16x32xf32>
    %315 = arith.addf %311, %314 : vector<16x32xf32>
    %316 = arith.addf %187, %315 : vector<16x32xf32>
    %cst_154 = arith.constant dense<0.000000e+00> : vector<16xf32>
    %317 = vector.multi_reduction <add>, %316, %cst_154 [1] : vector<16x32xf32> to vector<16xf32>
    %318 = vector.shape_cast %317 : vector<16xf32> to vector<16x1xf32>
    %cst_155 = arith.constant 3.200000e+01 : f32
    %319 = vector.broadcast %cst_155 : f32 to vector<16x1xf32>
    %320 = arith.divf %318, %319 : vector<16x1xf32>
    %321 = vector.broadcast %320 : vector<16x1xf32> to vector<16x32xf32>
    %322 = arith.subf %316, %321 : vector<16x32xf32>
    %323 = arith.mulf %322, %322 : vector<16x32xf32>
    %cst_156 = arith.constant dense<0.000000e+00> : vector<16xf32>
    %324 = vector.multi_reduction <add>, %323, %cst_156 [1] : vector<16x32xf32> to vector<16xf32>
    %325 = vector.shape_cast %324 : vector<16xf32> to vector<16x1xf32>
    %cst_157 = arith.constant 0.0322580636 : f32
    %326 = vector.broadcast %cst_157 : f32 to vector<16x1xf32>
    %327 = arith.mulf %325, %326 : vector<16x1xf32>
    %328 = math.sqrt %327 : vector<16x1xf32>
    %cst_158 = arith.constant 9.99999997E-7 : f32
    %329 = vector.broadcast %cst_158 : f32 to vector<16x1xf32>
    %330 = arith.addf %328, %329 : vector<16x1xf32>
    %331 = tpu.reciprocal %330 {approx = true} : vector<16x1xf32> -> vector<16x1xf32>
    %c3 = arith.constant 3 : index
    %c0_159 = arith.constant 0 : index
    %c0_160 = arith.constant 0 : index
    %332 = vector.load %arg9[%c3, %c0_159, %c0_160] : memref<12x1x32xf32, #tpu.memory_space<vmem>>, vector<1x1x32xf32>
    %333 = vector.shape_cast %332 : vector<1x1x32xf32> to vector<1x32xf32>
    %334 = vector.broadcast %320 : vector<16x1xf32> to vector<16x32xf32>
    %335 = arith.subf %316, %334 : vector<16x32xf32>
    %336 = vector.broadcast %333 : vector<1x32xf32> to vector<16x32xf32>
    %337 = arith.mulf %336, %335 : vector<16x32xf32>
    %338 = vector.broadcast %331 : vector<16x1xf32> to vector<16x32xf32>
    %339 = arith.mulf %337, %338 : vector<16x32xf32>
    %c3_161 = arith.constant 3 : index
    %c0_162 = arith.constant 0 : index
    %c0_163 = arith.constant 0 : index
    %340 = vector.load %arg10[%c3_161, %c0_162, %c0_163] : memref<12x1x32xf32, #tpu.memory_space<vmem>>, vector<1x1x32xf32>
    %341 = vector.shape_cast %340 : vector<1x1x32xf32> to vector<1x32xf32>
    %342 = vector.broadcast %341 : vector<1x32xf32> to vector<16x32xf32>
    %343 = arith.addf %339, %342 : vector<16x32xf32>
    %c1_164 = arith.constant 1 : index
    %c0_165 = arith.constant 0 : index
    %c0_166 = arith.constant 0 : index
    %344 = vector.load %arg19[%c1_164, %c0_165, %c0_166] : memref<4x32x64xf32, #tpu.memory_space<vmem>>, vector<1x32x64xf32>
    %345 = vector.shape_cast %344 : vector<1x32x64xf32> to vector<32x64xf32>
    %cst_167 = arith.constant dense<0.000000e+00> : vector<16x64xf32>
    %346 = tpu.matmul %343, %345, %cst_167 {dimension_numbers = #tpu.dot_dimension_numbers<[1], [0], [0], [1], [0, 0, 1, 1], [], []>} : vector<16x32xf32>, vector<32x64xf32>, vector<16x64xf32> -> vector<16x64xf32>
    %c1_168 = arith.constant 1 : index
    %c0_169 = arith.constant 0 : index
    %c0_170 = arith.constant 0 : index
    %347 = vector.load %arg20[%c1_168, %c0_169, %c0_170] : memref<4x1x64xf32, #tpu.memory_space<vmem>>, vector<1x1x64xf32>
    %348 = vector.shape_cast %347 : vector<1x1x64xf32> to vector<1x64xf32>
    %349 = vector.broadcast %348 : vector<1x64xf32> to vector<16x64xf32>
    %350 = arith.addf %346, %349 : vector<16x64xf32>
    %cst_171 = arith.constant 0.000000e+00 : f32
    %351 = vector.broadcast %cst_171 : f32 to vector<16x64xf32>
    %352 = arith.maximumf %350, %351 : vector<16x64xf32>
    %c1_172 = arith.constant 1 : index
    %c0_173 = arith.constant 0 : index
    %c0_174 = arith.constant 0 : index
    %353 = vector.load %arg21[%c1_172, %c0_173, %c0_174] : memref<4x64x32xf32, #tpu.memory_space<vmem>>, vector<1x64x32xf32>
    %354 = vector.shape_cast %353 : vector<1x64x32xf32> to vector<64x32xf32>
    %cst_175 = arith.constant dense<0.000000e+00> : vector<16x32xf32>
    %355 = tpu.matmul %352, %354, %cst_175 {dimension_numbers = #tpu.dot_dimension_numbers<[1], [0], [0], [1], [0, 0, 1, 1], [], []>} : vector<16x64xf32>, vector<64x32xf32>, vector<16x32xf32> -> vector<16x32xf32>
    %c1_176 = arith.constant 1 : index
    %c0_177 = arith.constant 0 : index
    %c0_178 = arith.constant 0 : index
    %356 = vector.load %arg22[%c1_176, %c0_177, %c0_178] : memref<4x1x32xf32, #tpu.memory_space<vmem>>, vector<1x1x32xf32>
    %357 = vector.shape_cast %356 : vector<1x1x32xf32> to vector<1x32xf32>
    %358 = vector.broadcast %357 : vector<1x32xf32> to vector<16x32xf32>
    %359 = arith.addf %355, %358 : vector<16x32xf32>
    %360 = arith.addf %316, %359 : vector<16x32xf32>
    %cst_179 = arith.constant dense<0.000000e+00> : vector<16xf32>
    %361 = vector.multi_reduction <add>, %360, %cst_179 [1] : vector<16x32xf32> to vector<16xf32>
    %362 = vector.shape_cast %361 : vector<16xf32> to vector<16x1xf32>
    %cst_180 = arith.constant 3.200000e+01 : f32
    %363 = vector.broadcast %cst_180 : f32 to vector<16x1xf32>
    %364 = arith.divf %362, %363 : vector<16x1xf32>
    %365 = vector.broadcast %364 : vector<16x1xf32> to vector<16x32xf32>
    %366 = arith.subf %360, %365 : vector<16x32xf32>
    %367 = arith.mulf %366, %366 : vector<16x32xf32>
    %cst_181 = arith.constant dense<0.000000e+00> : vector<16xf32>
    %368 = vector.multi_reduction <add>, %367, %cst_181 [1] : vector<16x32xf32> to vector<16xf32>
    %369 = vector.shape_cast %368 : vector<16xf32> to vector<16x1xf32>
    %cst_182 = arith.constant 0.0322580636 : f32
    %370 = vector.broadcast %cst_182 : f32 to vector<16x1xf32>
    %371 = arith.mulf %369, %370 : vector<16x1xf32>
    %372 = math.sqrt %371 : vector<16x1xf32>
    %cst_183 = arith.constant 9.99999997E-7 : f32
    %373 = vector.broadcast %cst_183 : f32 to vector<16x1xf32>
    %374 = arith.addf %372, %373 : vector<16x1xf32>
    %375 = tpu.reciprocal %374 {approx = true} : vector<16x1xf32> -> vector<16x1xf32>
    %c4 = arith.constant 4 : index
    %c0_184 = arith.constant 0 : index
    %c0_185 = arith.constant 0 : index
    %376 = vector.load %arg9[%c4, %c0_184, %c0_185] : memref<12x1x32xf32, #tpu.memory_space<vmem>>, vector<1x1x32xf32>
    %377 = vector.shape_cast %376 : vector<1x1x32xf32> to vector<1x32xf32>
    %378 = vector.broadcast %364 : vector<16x1xf32> to vector<16x32xf32>
    %379 = arith.subf %360, %378 : vector<16x32xf32>
    %380 = vector.broadcast %377 : vector<1x32xf32> to vector<16x32xf32>
    %381 = arith.mulf %380, %379 : vector<16x32xf32>
    %382 = vector.broadcast %375 : vector<16x1xf32> to vector<16x32xf32>
    %383 = arith.mulf %381, %382 : vector<16x32xf32>
    %c4_186 = arith.constant 4 : index
    %c0_187 = arith.constant 0 : index
    %c0_188 = arith.constant 0 : index
    %384 = vector.load %arg10[%c4_186, %c0_187, %c0_188] : memref<12x1x32xf32, #tpu.memory_space<vmem>>, vector<1x1x32xf32>
    %385 = vector.shape_cast %384 : vector<1x1x32xf32> to vector<1x32xf32>
    %386 = vector.broadcast %385 : vector<1x32xf32> to vector<16x32xf32>
    %387 = arith.addf %383, %386 : vector<16x32xf32>
    %c0_189 = arith.constant 0 : index
    %c0_190 = arith.constant 0 : index
    %388 = vector.load %arg1[%c0_189, %c0_190] : memref<16x1xi32, #tpu.memory_space<vmem>>, vector<16x1xi32>
    %389 = tpu.iota {dimensions = array<i32: 1>} : vector<16x16xi32>
    %390 = vector.broadcast %388 : vector<16x1xi32> to vector<16x16xi32>
    %391 = arith.cmpi eq, %389, %390 : vector<16x16xi32>
    %392 = arith.extui %391 : vector<16x16xi1> to vector<16x16xi32>
    %393 = arith.sitofp %392 : vector<16x16xi32> to vector<16x16xf32>
    %c0_191 = arith.constant 0 : index
    %c0_192 = arith.constant 0 : index
    %394 = vector.load %arg8[%c0_191, %c0_192] : memref<16x32xf32, #tpu.memory_space<vmem>>, vector<16x32xf32>
    %cst_193 = arith.constant dense<0.000000e+00> : vector<16x32xf32>
    %395 = tpu.matmul %393, %394, %cst_193 {dimension_numbers = #tpu.dot_dimension_numbers<[1], [0], [0], [1], [0, 0, 1, 1], [], []>} : vector<16x16xf32>, vector<16x32xf32>, vector<16x32xf32> -> vector<16x32xf32>
    %cst_194 = arith.constant 5.65685415 : f32
    %396 = vector.broadcast %cst_194 : f32 to vector<16x32xf32>
    %397 = arith.mulf %395, %396 : vector<16x32xf32>
    %c0_195 = arith.constant 0 : index
    %c0_196 = arith.constant 0 : index
    %398 = vector.load %arg6[%c0_195, %c0_196] : memref<16x32xf32, #tpu.memory_space<vmem>>, vector<16x32xf32>
    %399 = arith.addf %397, %398 : vector<16x32xf32>
    %cst_197 = arith.constant dense<0.000000e+00> : vector<16xf32>
    %400 = vector.multi_reduction <add>, %399, %cst_197 [1] : vector<16x32xf32> to vector<16xf32>
    %401 = vector.shape_cast %400 : vector<16xf32> to vector<16x1xf32>
    %cst_198 = arith.constant 3.200000e+01 : f32
    %402 = vector.broadcast %cst_198 : f32 to vector<16x1xf32>
    %403 = arith.divf %401, %402 : vector<16x1xf32>
    %404 = vector.broadcast %403 : vector<16x1xf32> to vector<16x32xf32>
    %405 = arith.subf %399, %404 : vector<16x32xf32>
    %406 = arith.mulf %405, %405 : vector<16x32xf32>
    %cst_199 = arith.constant dense<0.000000e+00> : vector<16xf32>
    %407 = vector.multi_reduction <add>, %406, %cst_199 [1] : vector<16x32xf32> to vector<16xf32>
    %408 = vector.shape_cast %407 : vector<16xf32> to vector<16x1xf32>
    %cst_200 = arith.constant 0.0322580636 : f32
    %409 = vector.broadcast %cst_200 : f32 to vector<16x1xf32>
    %410 = arith.mulf %408, %409 : vector<16x1xf32>
    %411 = math.sqrt %410 : vector<16x1xf32>
    %cst_201 = arith.constant 9.99999997E-7 : f32
    %412 = vector.broadcast %cst_201 : f32 to vector<16x1xf32>
    %413 = arith.addf %411, %412 : vector<16x1xf32>
    %414 = tpu.reciprocal %413 {approx = true} : vector<16x1xf32> -> vector<16x1xf32>
    %c5 = arith.constant 5 : index
    %c0_202 = arith.constant 0 : index
    %c0_203 = arith.constant 0 : index
    %415 = vector.load %arg9[%c5, %c0_202, %c0_203] : memref<12x1x32xf32, #tpu.memory_space<vmem>>, vector<1x1x32xf32>
    %416 = vector.shape_cast %415 : vector<1x1x32xf32> to vector<1x32xf32>
    %417 = vector.broadcast %403 : vector<16x1xf32> to vector<16x32xf32>
    %418 = arith.subf %399, %417 : vector<16x32xf32>
    %419 = vector.broadcast %416 : vector<1x32xf32> to vector<16x32xf32>
    %420 = arith.mulf %419, %418 : vector<16x32xf32>
    %421 = vector.broadcast %414 : vector<16x1xf32> to vector<16x32xf32>
    %422 = arith.mulf %420, %421 : vector<16x32xf32>
    %c5_204 = arith.constant 5 : index
    %c0_205 = arith.constant 0 : index
    %c0_206 = arith.constant 0 : index
    %423 = vector.load %arg10[%c5_204, %c0_205, %c0_206] : memref<12x1x32xf32, #tpu.memory_space<vmem>>, vector<1x1x32xf32>
    %424 = vector.shape_cast %423 : vector<1x1x32xf32> to vector<1x32xf32>
    %425 = vector.broadcast %424 : vector<1x32xf32> to vector<16x32xf32>
    %426 = arith.addf %422, %425 : vector<16x32xf32>
    %c2_207 = arith.constant 2 : index
    %c0_208 = arith.constant 0 : index
    %c0_209 = arith.constant 0 : index
    %427 = vector.load %arg11[%c2_207, %c0_208, %c0_209] : memref<6x32x32xf32, #tpu.memory_space<vmem>>, vector<1x32x32xf32>
    %428 = vector.shape_cast %427 : vector<1x32x32xf32> to vector<32x32xf32>
    %cst_210 = arith.constant dense<0.000000e+00> : vector<16x32xf32>
    %429 = tpu.matmul %426, %428, %cst_210 {dimension_numbers = #tpu.dot_dimension_numbers<[1], [0], [0], [1], [0, 0, 1, 1], [], []>} : vector<16x32xf32>, vector<32x32xf32>, vector<16x32xf32> -> vector<16x32xf32>
    %c2_211 = arith.constant 2 : index
    %c0_212 = arith.constant 0 : index
    %c0_213 = arith.constant 0 : index
    %430 = vector.load %arg12[%c2_211, %c0_212, %c0_213] : memref<6x1x32xf32, #tpu.memory_space<vmem>>, vector<1x1x32xf32>
    %431 = vector.shape_cast %430 : vector<1x1x32xf32> to vector<1x32xf32>
    %432 = vector.broadcast %431 : vector<1x32xf32> to vector<16x32xf32>
    %433 = arith.addf %429, %432 : vector<16x32xf32>
    %c2_214 = arith.constant 2 : index
    %c0_215 = arith.constant 0 : index
    %c0_216 = arith.constant 0 : index
    %434 = vector.load %arg13[%c2_214, %c0_215, %c0_216] : memref<6x32x32xf32, #tpu.memory_space<vmem>>, vector<1x32x32xf32>
    %435 = vector.shape_cast %434 : vector<1x32x32xf32> to vector<32x32xf32>
    %cst_217 = arith.constant dense<0.000000e+00> : vector<16x32xf32>
    %436 = tpu.matmul %426, %435, %cst_217 {dimension_numbers = #tpu.dot_dimension_numbers<[1], [0], [0], [1], [0, 0, 1, 1], [], []>} : vector<16x32xf32>, vector<32x32xf32>, vector<16x32xf32> -> vector<16x32xf32>
    %c2_218 = arith.constant 2 : index
    %c0_219 = arith.constant 0 : index
    %c0_220 = arith.constant 0 : index
    %437 = vector.load %arg14[%c2_218, %c0_219, %c0_220] : memref<6x1x32xf32, #tpu.memory_space<vmem>>, vector<1x1x32xf32>
    %438 = vector.shape_cast %437 : vector<1x1x32xf32> to vector<1x32xf32>
    %439 = vector.broadcast %438 : vector<1x32xf32> to vector<16x32xf32>
    %440 = arith.addf %436, %439 : vector<16x32xf32>
    %c2_221 = arith.constant 2 : index
    %c0_222 = arith.constant 0 : index
    %c0_223 = arith.constant 0 : index
    %441 = vector.load %arg15[%c2_221, %c0_222, %c0_223] : memref<6x32x32xf32, #tpu.memory_space<vmem>>, vector<1x32x32xf32>
    %442 = vector.shape_cast %441 : vector<1x32x32xf32> to vector<32x32xf32>
    %cst_224 = arith.constant dense<0.000000e+00> : vector<16x32xf32>
    %443 = tpu.matmul %426, %442, %cst_224 {dimension_numbers = #tpu.dot_dimension_numbers<[1], [0], [0], [1], [0, 0, 1, 1], [], []>} : vector<16x32xf32>, vector<32x32xf32>, vector<16x32xf32> -> vector<16x32xf32>
    %c2_225 = arith.constant 2 : index
    %c0_226 = arith.constant 0 : index
    %c0_227 = arith.constant 0 : index
    %444 = vector.load %arg16[%c2_225, %c0_226, %c0_227] : memref<6x1x32xf32, #tpu.memory_space<vmem>>, vector<1x1x32xf32>
    %445 = vector.shape_cast %444 : vector<1x1x32xf32> to vector<1x32xf32>
    %446 = vector.broadcast %445 : vector<1x32xf32> to vector<16x32xf32>
    %447 = arith.addf %443, %446 : vector<16x32xf32>
    %448 = vector.extract_strided_slice %433 {offsets = [0, 0], sizes = [16, 8], strides = [1, 1]} : vector<16x32xf32> to vector<16x8xf32>
    %449 = vector.extract_strided_slice %440 {offsets = [0, 0], sizes = [16, 8], strides = [1, 1]} : vector<16x32xf32> to vector<16x8xf32>
    %450 = vector.extract_strided_slice %447 {offsets = [0, 0], sizes = [16, 8], strides = [1, 1]} : vector<16x32xf32> to vector<16x8xf32>
    %cst_228 = arith.constant dense<0.000000e+00> : vector<16x16xf32>
    %451 = tpu.matmul %448, %449, %cst_228 {dimension_numbers = #tpu.dot_dimension_numbers<[1], [1], [0], [0], [0, 0, 1, 0], [], []>} : vector<16x8xf32>, vector<16x8xf32>, vector<16x16xf32> -> vector<16x16xf32>
    %cst_229 = arith.constant 0.353553385 : f32
    %452 = vector.broadcast %cst_229 : f32 to vector<16x16xf32>
    %453 = arith.mulf %451, %452 : vector<16x16xf32>
    %454 = arith.addf %453, %1 : vector<16x16xf32>
    %cst_230 = arith.constant dense<0xFF800000> : vector<16xf32>
    %455 = vector.multi_reduction <maximumf>, %454, %cst_230 [1] : vector<16x16xf32> to vector<16xf32>
    %456 = vector.shape_cast %455 : vector<16xf32> to vector<16x1xf32>
    %457 = vector.broadcast %456 : vector<16x1xf32> to vector<16x16xf32>
    %458 = arith.subf %454, %457 : vector<16x16xf32>
    %459 = math.exp %458 : vector<16x16xf32>
    %cst_231 = arith.constant dense<0.000000e+00> : vector<16xf32>
    %460 = vector.multi_reduction <add>, %459, %cst_231 [1] : vector<16x16xf32> to vector<16xf32>
    %461 = vector.shape_cast %460 : vector<16xf32> to vector<16x1xf32>
    %462 = tpu.reciprocal %461 {approx = true} : vector<16x1xf32> -> vector<16x1xf32>
    %463 = vector.broadcast %462 : vector<16x1xf32> to vector<16x16xf32>
    %464 = arith.mulf %459, %463 : vector<16x16xf32>
    %cst_232 = arith.constant dense<0.000000e+00> : vector<16x8xf32>
    %465 = tpu.matmul %464, %450, %cst_232 {dimension_numbers = #tpu.dot_dimension_numbers<[1], [0], [0], [1], [0, 0, 1, 1], [], []>} : vector<16x16xf32>, vector<16x8xf32>, vector<16x8xf32> -> vector<16x8xf32>
    %466 = vector.extract_strided_slice %433 {offsets = [0, 8], sizes = [16, 8], strides = [1, 1]} : vector<16x32xf32> to vector<16x8xf32>
    %467 = vector.extract_strided_slice %440 {offsets = [0, 8], sizes = [16, 8], strides = [1, 1]} : vector<16x32xf32> to vector<16x8xf32>
    %468 = vector.extract_strided_slice %447 {offsets = [0, 8], sizes = [16, 8], strides = [1, 1]} : vector<16x32xf32> to vector<16x8xf32>
    %cst_233 = arith.constant dense<0.000000e+00> : vector<16x16xf32>
    %469 = tpu.matmul %466, %467, %cst_233 {dimension_numbers = #tpu.dot_dimension_numbers<[1], [1], [0], [0], [0, 0, 1, 0], [], []>} : vector<16x8xf32>, vector<16x8xf32>, vector<16x16xf32> -> vector<16x16xf32>
    %cst_234 = arith.constant 0.353553385 : f32
    %470 = vector.broadcast %cst_234 : f32 to vector<16x16xf32>
    %471 = arith.mulf %469, %470 : vector<16x16xf32>
    %472 = arith.addf %471, %1 : vector<16x16xf32>
    %cst_235 = arith.constant dense<0xFF800000> : vector<16xf32>
    %473 = vector.multi_reduction <maximumf>, %472, %cst_235 [1] : vector<16x16xf32> to vector<16xf32>
    %474 = vector.shape_cast %473 : vector<16xf32> to vector<16x1xf32>
    %475 = vector.broadcast %474 : vector<16x1xf32> to vector<16x16xf32>
    %476 = arith.subf %472, %475 : vector<16x16xf32>
    %477 = math.exp %476 : vector<16x16xf32>
    %cst_236 = arith.constant dense<0.000000e+00> : vector<16xf32>
    %478 = vector.multi_reduction <add>, %477, %cst_236 [1] : vector<16x16xf32> to vector<16xf32>
    %479 = vector.shape_cast %478 : vector<16xf32> to vector<16x1xf32>
    %480 = tpu.reciprocal %479 {approx = true} : vector<16x1xf32> -> vector<16x1xf32>
    %481 = vector.broadcast %480 : vector<16x1xf32> to vector<16x16xf32>
    %482 = arith.mulf %477, %481 : vector<16x16xf32>
    %cst_237 = arith.constant dense<0.000000e+00> : vector<16x8xf32>
    %483 = tpu.matmul %482, %468, %cst_237 {dimension_numbers = #tpu.dot_dimension_numbers<[1], [0], [0], [1], [0, 0, 1, 1], [], []>} : vector<16x16xf32>, vector<16x8xf32>, vector<16x8xf32> -> vector<16x8xf32>
    %484 = vector.extract_strided_slice %433 {offsets = [0, 16], sizes = [16, 8], strides = [1, 1]} : vector<16x32xf32> to vector<16x8xf32>
    %485 = vector.extract_strided_slice %440 {offsets = [0, 16], sizes = [16, 8], strides = [1, 1]} : vector<16x32xf32> to vector<16x8xf32>
    %486 = vector.extract_strided_slice %447 {offsets = [0, 16], sizes = [16, 8], strides = [1, 1]} : vector<16x32xf32> to vector<16x8xf32>
    %cst_238 = arith.constant dense<0.000000e+00> : vector<16x16xf32>
    %487 = tpu.matmul %484, %485, %cst_238 {dimension_numbers = #tpu.dot_dimension_numbers<[1], [1], [0], [0], [0, 0, 1, 0], [], []>} : vector<16x8xf32>, vector<16x8xf32>, vector<16x16xf32> -> vector<16x16xf32>
    %cst_239 = arith.constant 0.353553385 : f32
    %488 = vector.broadcast %cst_239 : f32 to vector<16x16xf32>
    %489 = arith.mulf %487, %488 : vector<16x16xf32>
    %490 = arith.addf %489, %1 : vector<16x16xf32>
    %cst_240 = arith.constant dense<0xFF800000> : vector<16xf32>
    %491 = vector.multi_reduction <maximumf>, %490, %cst_240 [1] : vector<16x16xf32> to vector<16xf32>
    %492 = vector.shape_cast %491 : vector<16xf32> to vector<16x1xf32>
    %493 = vector.broadcast %492 : vector<16x1xf32> to vector<16x16xf32>
    %494 = arith.subf %490, %493 : vector<16x16xf32>
    %495 = math.exp %494 : vector<16x16xf32>
    %cst_241 = arith.constant dense<0.000000e+00> : vector<16xf32>
    %496 = vector.multi_reduction <add>, %495, %cst_241 [1] : vector<16x16xf32> to vector<16xf32>
    %497 = vector.shape_cast %496 : vector<16xf32> to vector<16x1xf32>
    %498 = tpu.reciprocal %497 {approx = true} : vector<16x1xf32> -> vector<16x1xf32>
    %499 = vector.broadcast %498 : vector<16x1xf32> to vector<16x16xf32>
    %500 = arith.mulf %495, %499 : vector<16x16xf32>
    %cst_242 = arith.constant dense<0.000000e+00> : vector<16x8xf32>
    %501 = tpu.matmul %500, %486, %cst_242 {dimension_numbers = #tpu.dot_dimension_numbers<[1], [0], [0], [1], [0, 0, 1, 1], [], []>} : vector<16x16xf32>, vector<16x8xf32>, vector<16x8xf32> -> vector<16x8xf32>
    %502 = vector.extract_strided_slice %433 {offsets = [0, 24], sizes = [16, 8], strides = [1, 1]} : vector<16x32xf32> to vector<16x8xf32>
    %503 = vector.extract_strided_slice %440 {offsets = [0, 24], sizes = [16, 8], strides = [1, 1]} : vector<16x32xf32> to vector<16x8xf32>
    %504 = vector.extract_strided_slice %447 {offsets = [0, 24], sizes = [16, 8], strides = [1, 1]} : vector<16x32xf32> to vector<16x8xf32>
    %cst_243 = arith.constant dense<0.000000e+00> : vector<16x16xf32>
    %505 = tpu.matmul %502, %503, %cst_243 {dimension_numbers = #tpu.dot_dimension_numbers<[1], [1], [0], [0], [0, 0, 1, 0], [], []>} : vector<16x8xf32>, vector<16x8xf32>, vector<16x16xf32> -> vector<16x16xf32>
    %cst_244 = arith.constant 0.353553385 : f32
    %506 = vector.broadcast %cst_244 : f32 to vector<16x16xf32>
    %507 = arith.mulf %505, %506 : vector<16x16xf32>
    %508 = arith.addf %507, %1 : vector<16x16xf32>
    %cst_245 = arith.constant dense<0xFF800000> : vector<16xf32>
    %509 = vector.multi_reduction <maximumf>, %508, %cst_245 [1] : vector<16x16xf32> to vector<16xf32>
    %510 = vector.shape_cast %509 : vector<16xf32> to vector<16x1xf32>
    %511 = vector.broadcast %510 : vector<16x1xf32> to vector<16x16xf32>
    %512 = arith.subf %508, %511 : vector<16x16xf32>
    %513 = math.exp %512 : vector<16x16xf32>
    %cst_246 = arith.constant dense<0.000000e+00> : vector<16xf32>
    %514 = vector.multi_reduction <add>, %513, %cst_246 [1] : vector<16x16xf32> to vector<16xf32>
    %515 = vector.shape_cast %514 : vector<16xf32> to vector<16x1xf32>
    %516 = tpu.reciprocal %515 {approx = true} : vector<16x1xf32> -> vector<16x1xf32>
    %517 = vector.broadcast %516 : vector<16x1xf32> to vector<16x16xf32>
    %518 = arith.mulf %513, %517 : vector<16x16xf32>
    %cst_247 = arith.constant dense<0.000000e+00> : vector<16x8xf32>
    %519 = tpu.matmul %518, %504, %cst_247 {dimension_numbers = #tpu.dot_dimension_numbers<[1], [0], [0], [1], [0, 0, 1, 1], [], []>} : vector<16x16xf32>, vector<16x8xf32>, vector<16x8xf32> -> vector<16x8xf32>
    %520 = tpu.concatenate %465, %483, %501, %519 in 1 : vector<16x8xf32>, vector<16x8xf32>, vector<16x8xf32>, vector<16x8xf32> -> vector<16x32xf32>
    %c2_248 = arith.constant 2 : index
    %c0_249 = arith.constant 0 : index
    %c0_250 = arith.constant 0 : index
    %521 = vector.load %arg17[%c2_248, %c0_249, %c0_250] : memref<6x32x32xf32, #tpu.memory_space<vmem>>, vector<1x32x32xf32>
    %522 = vector.shape_cast %521 : vector<1x32x32xf32> to vector<32x32xf32>
    %cst_251 = arith.constant dense<0.000000e+00> : vector<16x32xf32>
    %523 = tpu.matmul %520, %522, %cst_251 {dimension_numbers = #tpu.dot_dimension_numbers<[1], [0], [0], [1], [0, 0, 1, 1], [], []>} : vector<16x32xf32>, vector<32x32xf32>, vector<16x32xf32> -> vector<16x32xf32>
    %c2_252 = arith.constant 2 : index
    %c0_253 = arith.constant 0 : index
    %c0_254 = arith.constant 0 : index
    %524 = vector.load %arg18[%c2_252, %c0_253, %c0_254] : memref<6x1x32xf32, #tpu.memory_space<vmem>>, vector<1x1x32xf32>
    %525 = vector.shape_cast %524 : vector<1x1x32xf32> to vector<1x32xf32>
    %526 = vector.broadcast %525 : vector<1x32xf32> to vector<16x32xf32>
    %527 = arith.addf %523, %526 : vector<16x32xf32>
    %528 = arith.addf %399, %527 : vector<16x32xf32>
    %cst_255 = arith.constant dense<0.000000e+00> : vector<16xf32>
    %529 = vector.multi_reduction <add>, %528, %cst_255 [1] : vector<16x32xf32> to vector<16xf32>
    %530 = vector.shape_cast %529 : vector<16xf32> to vector<16x1xf32>
    %cst_256 = arith.constant 3.200000e+01 : f32
    %531 = vector.broadcast %cst_256 : f32 to vector<16x1xf32>
    %532 = arith.divf %530, %531 : vector<16x1xf32>
    %533 = vector.broadcast %532 : vector<16x1xf32> to vector<16x32xf32>
    %534 = arith.subf %528, %533 : vector<16x32xf32>
    %535 = arith.mulf %534, %534 : vector<16x32xf32>
    %cst_257 = arith.constant dense<0.000000e+00> : vector<16xf32>
    %536 = vector.multi_reduction <add>, %535, %cst_257 [1] : vector<16x32xf32> to vector<16xf32>
    %537 = vector.shape_cast %536 : vector<16xf32> to vector<16x1xf32>
    %cst_258 = arith.constant 0.0322580636 : f32
    %538 = vector.broadcast %cst_258 : f32 to vector<16x1xf32>
    %539 = arith.mulf %537, %538 : vector<16x1xf32>
    %540 = math.sqrt %539 : vector<16x1xf32>
    %cst_259 = arith.constant 9.99999997E-7 : f32
    %541 = vector.broadcast %cst_259 : f32 to vector<16x1xf32>
    %542 = arith.addf %540, %541 : vector<16x1xf32>
    %543 = tpu.reciprocal %542 {approx = true} : vector<16x1xf32> -> vector<16x1xf32>
    %c6 = arith.constant 6 : index
    %c0_260 = arith.constant 0 : index
    %c0_261 = arith.constant 0 : index
    %544 = vector.load %arg9[%c6, %c0_260, %c0_261] : memref<12x1x32xf32, #tpu.memory_space<vmem>>, vector<1x1x32xf32>
    %545 = vector.shape_cast %544 : vector<1x1x32xf32> to vector<1x32xf32>
    %546 = vector.broadcast %532 : vector<16x1xf32> to vector<16x32xf32>
    %547 = arith.subf %528, %546 : vector<16x32xf32>
    %548 = vector.broadcast %545 : vector<1x32xf32> to vector<16x32xf32>
    %549 = arith.mulf %548, %547 : vector<16x32xf32>
    %550 = vector.broadcast %543 : vector<16x1xf32> to vector<16x32xf32>
    %551 = arith.mulf %549, %550 : vector<16x32xf32>
    %c6_262 = arith.constant 6 : index
    %c0_263 = arith.constant 0 : index
    %c0_264 = arith.constant 0 : index
    %552 = vector.load %arg10[%c6_262, %c0_263, %c0_264] : memref<12x1x32xf32, #tpu.memory_space<vmem>>, vector<1x1x32xf32>
    %553 = vector.shape_cast %552 : vector<1x1x32xf32> to vector<1x32xf32>
    %554 = vector.broadcast %553 : vector<1x32xf32> to vector<16x32xf32>
    %555 = arith.addf %551, %554 : vector<16x32xf32>
    %c3_265 = arith.constant 3 : index
    %c0_266 = arith.constant 0 : index
    %c0_267 = arith.constant 0 : index
    %556 = vector.load %arg11[%c3_265, %c0_266, %c0_267] : memref<6x32x32xf32, #tpu.memory_space<vmem>>, vector<1x32x32xf32>
    %557 = vector.shape_cast %556 : vector<1x32x32xf32> to vector<32x32xf32>
    %cst_268 = arith.constant dense<0.000000e+00> : vector<16x32xf32>
    %558 = tpu.matmul %555, %557, %cst_268 {dimension_numbers = #tpu.dot_dimension_numbers<[1], [0], [0], [1], [0, 0, 1, 1], [], []>} : vector<16x32xf32>, vector<32x32xf32>, vector<16x32xf32> -> vector<16x32xf32>
    %c3_269 = arith.constant 3 : index
    %c0_270 = arith.constant 0 : index
    %c0_271 = arith.constant 0 : index
    %559 = vector.load %arg12[%c3_269, %c0_270, %c0_271] : memref<6x1x32xf32, #tpu.memory_space<vmem>>, vector<1x1x32xf32>
    %560 = vector.shape_cast %559 : vector<1x1x32xf32> to vector<1x32xf32>
    %561 = vector.broadcast %560 : vector<1x32xf32> to vector<16x32xf32>
    %562 = arith.addf %558, %561 : vector<16x32xf32>
    %c3_272 = arith.constant 3 : index
    %c0_273 = arith.constant 0 : index
    %c0_274 = arith.constant 0 : index
    %563 = vector.load %arg13[%c3_272, %c0_273, %c0_274] : memref<6x32x32xf32, #tpu.memory_space<vmem>>, vector<1x32x32xf32>
    %564 = vector.shape_cast %563 : vector<1x32x32xf32> to vector<32x32xf32>
    %cst_275 = arith.constant dense<0.000000e+00> : vector<16x32xf32>
    %565 = tpu.matmul %387, %564, %cst_275 {dimension_numbers = #tpu.dot_dimension_numbers<[1], [0], [0], [1], [0, 0, 1, 1], [], []>} : vector<16x32xf32>, vector<32x32xf32>, vector<16x32xf32> -> vector<16x32xf32>
    %c3_276 = arith.constant 3 : index
    %c0_277 = arith.constant 0 : index
    %c0_278 = arith.constant 0 : index
    %566 = vector.load %arg14[%c3_276, %c0_277, %c0_278] : memref<6x1x32xf32, #tpu.memory_space<vmem>>, vector<1x1x32xf32>
    %567 = vector.shape_cast %566 : vector<1x1x32xf32> to vector<1x32xf32>
    %568 = vector.broadcast %567 : vector<1x32xf32> to vector<16x32xf32>
    %569 = arith.addf %565, %568 : vector<16x32xf32>
    %c3_279 = arith.constant 3 : index
    %c0_280 = arith.constant 0 : index
    %c0_281 = arith.constant 0 : index
    %570 = vector.load %arg15[%c3_279, %c0_280, %c0_281] : memref<6x32x32xf32, #tpu.memory_space<vmem>>, vector<1x32x32xf32>
    %571 = vector.shape_cast %570 : vector<1x32x32xf32> to vector<32x32xf32>
    %cst_282 = arith.constant dense<0.000000e+00> : vector<16x32xf32>
    %572 = tpu.matmul %387, %571, %cst_282 {dimension_numbers = #tpu.dot_dimension_numbers<[1], [0], [0], [1], [0, 0, 1, 1], [], []>} : vector<16x32xf32>, vector<32x32xf32>, vector<16x32xf32> -> vector<16x32xf32>
    %c3_283 = arith.constant 3 : index
    %c0_284 = arith.constant 0 : index
    %c0_285 = arith.constant 0 : index
    %573 = vector.load %arg16[%c3_283, %c0_284, %c0_285] : memref<6x1x32xf32, #tpu.memory_space<vmem>>, vector<1x1x32xf32>
    %574 = vector.shape_cast %573 : vector<1x1x32xf32> to vector<1x32xf32>
    %575 = vector.broadcast %574 : vector<1x32xf32> to vector<16x32xf32>
    %576 = arith.addf %572, %575 : vector<16x32xf32>
    %577 = vector.extract_strided_slice %562 {offsets = [0, 0], sizes = [16, 8], strides = [1, 1]} : vector<16x32xf32> to vector<16x8xf32>
    %578 = vector.extract_strided_slice %569 {offsets = [0, 0], sizes = [16, 8], strides = [1, 1]} : vector<16x32xf32> to vector<16x8xf32>
    %579 = vector.extract_strided_slice %576 {offsets = [0, 0], sizes = [16, 8], strides = [1, 1]} : vector<16x32xf32> to vector<16x8xf32>
    %cst_286 = arith.constant dense<0.000000e+00> : vector<16x16xf32>
    %580 = tpu.matmul %577, %578, %cst_286 {dimension_numbers = #tpu.dot_dimension_numbers<[1], [1], [0], [0], [0, 0, 1, 0], [], []>} : vector<16x8xf32>, vector<16x8xf32>, vector<16x16xf32> -> vector<16x16xf32>
    %cst_287 = arith.constant 0.353553385 : f32
    %581 = vector.broadcast %cst_287 : f32 to vector<16x16xf32>
    %582 = arith.mulf %580, %581 : vector<16x16xf32>
    %583 = arith.addf %582, %2 : vector<16x16xf32>
    %cst_288 = arith.constant dense<0xFF800000> : vector<16xf32>
    %584 = vector.multi_reduction <maximumf>, %583, %cst_288 [1] : vector<16x16xf32> to vector<16xf32>
    %585 = vector.shape_cast %584 : vector<16xf32> to vector<16x1xf32>
    %586 = vector.broadcast %585 : vector<16x1xf32> to vector<16x16xf32>
    %587 = arith.subf %583, %586 : vector<16x16xf32>
    %588 = math.exp %587 : vector<16x16xf32>
    %cst_289 = arith.constant dense<0.000000e+00> : vector<16xf32>
    %589 = vector.multi_reduction <add>, %588, %cst_289 [1] : vector<16x16xf32> to vector<16xf32>
    %590 = vector.shape_cast %589 : vector<16xf32> to vector<16x1xf32>
    %591 = tpu.reciprocal %590 {approx = true} : vector<16x1xf32> -> vector<16x1xf32>
    %592 = vector.broadcast %591 : vector<16x1xf32> to vector<16x16xf32>
    %593 = arith.mulf %588, %592 : vector<16x16xf32>
    %cst_290 = arith.constant dense<0.000000e+00> : vector<16x8xf32>
    %594 = tpu.matmul %593, %579, %cst_290 {dimension_numbers = #tpu.dot_dimension_numbers<[1], [0], [0], [1], [0, 0, 1, 1], [], []>} : vector<16x16xf32>, vector<16x8xf32>, vector<16x8xf32> -> vector<16x8xf32>
    %595 = vector.extract_strided_slice %562 {offsets = [0, 8], sizes = [16, 8], strides = [1, 1]} : vector<16x32xf32> to vector<16x8xf32>
    %596 = vector.extract_strided_slice %569 {offsets = [0, 8], sizes = [16, 8], strides = [1, 1]} : vector<16x32xf32> to vector<16x8xf32>
    %597 = vector.extract_strided_slice %576 {offsets = [0, 8], sizes = [16, 8], strides = [1, 1]} : vector<16x32xf32> to vector<16x8xf32>
    %cst_291 = arith.constant dense<0.000000e+00> : vector<16x16xf32>
    %598 = tpu.matmul %595, %596, %cst_291 {dimension_numbers = #tpu.dot_dimension_numbers<[1], [1], [0], [0], [0, 0, 1, 0], [], []>} : vector<16x8xf32>, vector<16x8xf32>, vector<16x16xf32> -> vector<16x16xf32>
    %cst_292 = arith.constant 0.353553385 : f32
    %599 = vector.broadcast %cst_292 : f32 to vector<16x16xf32>
    %600 = arith.mulf %598, %599 : vector<16x16xf32>
    %601 = arith.addf %600, %2 : vector<16x16xf32>
    %cst_293 = arith.constant dense<0xFF800000> : vector<16xf32>
    %602 = vector.multi_reduction <maximumf>, %601, %cst_293 [1] : vector<16x16xf32> to vector<16xf32>
    %603 = vector.shape_cast %602 : vector<16xf32> to vector<16x1xf32>
    %604 = vector.broadcast %603 : vector<16x1xf32> to vector<16x16xf32>
    %605 = arith.subf %601, %604 : vector<16x16xf32>
    %606 = math.exp %605 : vector<16x16xf32>
    %cst_294 = arith.constant dense<0.000000e+00> : vector<16xf32>
    %607 = vector.multi_reduction <add>, %606, %cst_294 [1] : vector<16x16xf32> to vector<16xf32>
    %608 = vector.shape_cast %607 : vector<16xf32> to vector<16x1xf32>
    %609 = tpu.reciprocal %608 {approx = true} : vector<16x1xf32> -> vector<16x1xf32>
    %610 = vector.broadcast %609 : vector<16x1xf32> to vector<16x16xf32>
    %611 = arith.mulf %606, %610 : vector<16x16xf32>
    %cst_295 = arith.constant dense<0.000000e+00> : vector<16x8xf32>
    %612 = tpu.matmul %611, %597, %cst_295 {dimension_numbers = #tpu.dot_dimension_numbers<[1], [0], [0], [1], [0, 0, 1, 1], [], []>} : vector<16x16xf32>, vector<16x8xf32>, vector<16x8xf32> -> vector<16x8xf32>
    %613 = vector.extract_strided_slice %562 {offsets = [0, 16], sizes = [16, 8], strides = [1, 1]} : vector<16x32xf32> to vector<16x8xf32>
    %614 = vector.extract_strided_slice %569 {offsets = [0, 16], sizes = [16, 8], strides = [1, 1]} : vector<16x32xf32> to vector<16x8xf32>
    %615 = vector.extract_strided_slice %576 {offsets = [0, 16], sizes = [16, 8], strides = [1, 1]} : vector<16x32xf32> to vector<16x8xf32>
    %cst_296 = arith.constant dense<0.000000e+00> : vector<16x16xf32>
    %616 = tpu.matmul %613, %614, %cst_296 {dimension_numbers = #tpu.dot_dimension_numbers<[1], [1], [0], [0], [0, 0, 1, 0], [], []>} : vector<16x8xf32>, vector<16x8xf32>, vector<16x16xf32> -> vector<16x16xf32>
    %cst_297 = arith.constant 0.353553385 : f32
    %617 = vector.broadcast %cst_297 : f32 to vector<16x16xf32>
    %618 = arith.mulf %616, %617 : vector<16x16xf32>
    %619 = arith.addf %618, %2 : vector<16x16xf32>
    %cst_298 = arith.constant dense<0xFF800000> : vector<16xf32>
    %620 = vector.multi_reduction <maximumf>, %619, %cst_298 [1] : vector<16x16xf32> to vector<16xf32>
    %621 = vector.shape_cast %620 : vector<16xf32> to vector<16x1xf32>
    %622 = vector.broadcast %621 : vector<16x1xf32> to vector<16x16xf32>
    %623 = arith.subf %619, %622 : vector<16x16xf32>
    %624 = math.exp %623 : vector<16x16xf32>
    %cst_299 = arith.constant dense<0.000000e+00> : vector<16xf32>
    %625 = vector.multi_reduction <add>, %624, %cst_299 [1] : vector<16x16xf32> to vector<16xf32>
    %626 = vector.shape_cast %625 : vector<16xf32> to vector<16x1xf32>
    %627 = tpu.reciprocal %626 {approx = true} : vector<16x1xf32> -> vector<16x1xf32>
    %628 = vector.broadcast %627 : vector<16x1xf32> to vector<16x16xf32>
    %629 = arith.mulf %624, %628 : vector<16x16xf32>
    %cst_300 = arith.constant dense<0.000000e+00> : vector<16x8xf32>
    %630 = tpu.matmul %629, %615, %cst_300 {dimension_numbers = #tpu.dot_dimension_numbers<[1], [0], [0], [1], [0, 0, 1, 1], [], []>} : vector<16x16xf32>, vector<16x8xf32>, vector<16x8xf32> -> vector<16x8xf32>
    %631 = vector.extract_strided_slice %562 {offsets = [0, 24], sizes = [16, 8], strides = [1, 1]} : vector<16x32xf32> to vector<16x8xf32>
    %632 = vector.extract_strided_slice %569 {offsets = [0, 24], sizes = [16, 8], strides = [1, 1]} : vector<16x32xf32> to vector<16x8xf32>
    %633 = vector.extract_strided_slice %576 {offsets = [0, 24], sizes = [16, 8], strides = [1, 1]} : vector<16x32xf32> to vector<16x8xf32>
    %cst_301 = arith.constant dense<0.000000e+00> : vector<16x16xf32>
    %634 = tpu.matmul %631, %632, %cst_301 {dimension_numbers = #tpu.dot_dimension_numbers<[1], [1], [0], [0], [0, 0, 1, 0], [], []>} : vector<16x8xf32>, vector<16x8xf32>, vector<16x16xf32> -> vector<16x16xf32>
    %cst_302 = arith.constant 0.353553385 : f32
    %635 = vector.broadcast %cst_302 : f32 to vector<16x16xf32>
    %636 = arith.mulf %634, %635 : vector<16x16xf32>
    %637 = arith.addf %636, %2 : vector<16x16xf32>
    %cst_303 = arith.constant dense<0xFF800000> : vector<16xf32>
    %638 = vector.multi_reduction <maximumf>, %637, %cst_303 [1] : vector<16x16xf32> to vector<16xf32>
    %639 = vector.shape_cast %638 : vector<16xf32> to vector<16x1xf32>
    %640 = vector.broadcast %639 : vector<16x1xf32> to vector<16x16xf32>
    %641 = arith.subf %637, %640 : vector<16x16xf32>
    %642 = math.exp %641 : vector<16x16xf32>
    %cst_304 = arith.constant dense<0.000000e+00> : vector<16xf32>
    %643 = vector.multi_reduction <add>, %642, %cst_304 [1] : vector<16x16xf32> to vector<16xf32>
    %644 = vector.shape_cast %643 : vector<16xf32> to vector<16x1xf32>
    %645 = tpu.reciprocal %644 {approx = true} : vector<16x1xf32> -> vector<16x1xf32>
    %646 = vector.broadcast %645 : vector<16x1xf32> to vector<16x16xf32>
    %647 = arith.mulf %642, %646 : vector<16x16xf32>
    %cst_305 = arith.constant dense<0.000000e+00> : vector<16x8xf32>
    %648 = tpu.matmul %647, %633, %cst_305 {dimension_numbers = #tpu.dot_dimension_numbers<[1], [0], [0], [1], [0, 0, 1, 1], [], []>} : vector<16x16xf32>, vector<16x8xf32>, vector<16x8xf32> -> vector<16x8xf32>
    %649 = tpu.concatenate %594, %612, %630, %648 in 1 : vector<16x8xf32>, vector<16x8xf32>, vector<16x8xf32>, vector<16x8xf32> -> vector<16x32xf32>
    %c3_306 = arith.constant 3 : index
    %c0_307 = arith.constant 0 : index
    %c0_308 = arith.constant 0 : index
    %650 = vector.load %arg17[%c3_306, %c0_307, %c0_308] : memref<6x32x32xf32, #tpu.memory_space<vmem>>, vector<1x32x32xf32>
    %651 = vector.shape_cast %650 : vector<1x32x32xf32> to vector<32x32xf32>
    %cst_309 = arith.constant dense<0.000000e+00> : vector<16x32xf32>
    %652 = tpu.matmul %649, %651, %cst_309 {dimension_numbers = #tpu.dot_dimension_numbers<[1], [0], [0], [1], [0, 0, 1, 1], [], []>} : vector<16x32xf32>, vector<32x32xf32>, vector<16x32xf32> -> vector<16x32xf32>
    %c3_310 = arith.constant 3 : index
    %c0_311 = arith.constant 0 : index
    %c0_312 = arith.constant 0 : index
    %653 = vector.load %arg18[%c3_310, %c0_311, %c0_312] : memref<6x1x32xf32, #tpu.memory_space<vmem>>, vector<1x1x32xf32>
    %654 = vector.shape_cast %653 : vector<1x1x32xf32> to vector<1x32xf32>
    %655 = vector.broadcast %654 : vector<1x32xf32> to vector<16x32xf32>
    %656 = arith.addf %652, %655 : vector<16x32xf32>
    %657 = arith.addf %528, %656 : vector<16x32xf32>
    %cst_313 = arith.constant dense<0.000000e+00> : vector<16xf32>
    %658 = vector.multi_reduction <add>, %657, %cst_313 [1] : vector<16x32xf32> to vector<16xf32>
    %659 = vector.shape_cast %658 : vector<16xf32> to vector<16x1xf32>
    %cst_314 = arith.constant 3.200000e+01 : f32
    %660 = vector.broadcast %cst_314 : f32 to vector<16x1xf32>
    %661 = arith.divf %659, %660 : vector<16x1xf32>
    %662 = vector.broadcast %661 : vector<16x1xf32> to vector<16x32xf32>
    %663 = arith.subf %657, %662 : vector<16x32xf32>
    %664 = arith.mulf %663, %663 : vector<16x32xf32>
    %cst_315 = arith.constant dense<0.000000e+00> : vector<16xf32>
    %665 = vector.multi_reduction <add>, %664, %cst_315 [1] : vector<16x32xf32> to vector<16xf32>
    %666 = vector.shape_cast %665 : vector<16xf32> to vector<16x1xf32>
    %cst_316 = arith.constant 0.0322580636 : f32
    %667 = vector.broadcast %cst_316 : f32 to vector<16x1xf32>
    %668 = arith.mulf %666, %667 : vector<16x1xf32>
    %669 = math.sqrt %668 : vector<16x1xf32>
    %cst_317 = arith.constant 9.99999997E-7 : f32
    %670 = vector.broadcast %cst_317 : f32 to vector<16x1xf32>
    %671 = arith.addf %669, %670 : vector<16x1xf32>
    %672 = tpu.reciprocal %671 {approx = true} : vector<16x1xf32> -> vector<16x1xf32>
    %c7 = arith.constant 7 : index
    %c0_318 = arith.constant 0 : index
    %c0_319 = arith.constant 0 : index
    %673 = vector.load %arg9[%c7, %c0_318, %c0_319] : memref<12x1x32xf32, #tpu.memory_space<vmem>>, vector<1x1x32xf32>
    %674 = vector.shape_cast %673 : vector<1x1x32xf32> to vector<1x32xf32>
    %675 = vector.broadcast %661 : vector<16x1xf32> to vector<16x32xf32>
    %676 = arith.subf %657, %675 : vector<16x32xf32>
    %677 = vector.broadcast %674 : vector<1x32xf32> to vector<16x32xf32>
    %678 = arith.mulf %677, %676 : vector<16x32xf32>
    %679 = vector.broadcast %672 : vector<16x1xf32> to vector<16x32xf32>
    %680 = arith.mulf %678, %679 : vector<16x32xf32>
    %c7_320 = arith.constant 7 : index
    %c0_321 = arith.constant 0 : index
    %c0_322 = arith.constant 0 : index
    %681 = vector.load %arg10[%c7_320, %c0_321, %c0_322] : memref<12x1x32xf32, #tpu.memory_space<vmem>>, vector<1x1x32xf32>
    %682 = vector.shape_cast %681 : vector<1x1x32xf32> to vector<1x32xf32>
    %683 = vector.broadcast %682 : vector<1x32xf32> to vector<16x32xf32>
    %684 = arith.addf %680, %683 : vector<16x32xf32>
    %c2_323 = arith.constant 2 : index
    %c0_324 = arith.constant 0 : index
    %c0_325 = arith.constant 0 : index
    %685 = vector.load %arg19[%c2_323, %c0_324, %c0_325] : memref<4x32x64xf32, #tpu.memory_space<vmem>>, vector<1x32x64xf32>
    %686 = vector.shape_cast %685 : vector<1x32x64xf32> to vector<32x64xf32>
    %cst_326 = arith.constant dense<0.000000e+00> : vector<16x64xf32>
    %687 = tpu.matmul %684, %686, %cst_326 {dimension_numbers = #tpu.dot_dimension_numbers<[1], [0], [0], [1], [0, 0, 1, 1], [], []>} : vector<16x32xf32>, vector<32x64xf32>, vector<16x64xf32> -> vector<16x64xf32>
    %c2_327 = arith.constant 2 : index
    %c0_328 = arith.constant 0 : index
    %c0_329 = arith.constant 0 : index
    %688 = vector.load %arg20[%c2_327, %c0_328, %c0_329] : memref<4x1x64xf32, #tpu.memory_space<vmem>>, vector<1x1x64xf32>
    %689 = vector.shape_cast %688 : vector<1x1x64xf32> to vector<1x64xf32>
    %690 = vector.broadcast %689 : vector<1x64xf32> to vector<16x64xf32>
    %691 = arith.addf %687, %690 : vector<16x64xf32>
    %cst_330 = arith.constant 0.000000e+00 : f32
    %692 = vector.broadcast %cst_330 : f32 to vector<16x64xf32>
    %693 = arith.maximumf %691, %692 : vector<16x64xf32>
    %c2_331 = arith.constant 2 : index
    %c0_332 = arith.constant 0 : index
    %c0_333 = arith.constant 0 : index
    %694 = vector.load %arg21[%c2_331, %c0_332, %c0_333] : memref<4x64x32xf32, #tpu.memory_space<vmem>>, vector<1x64x32xf32>
    %695 = vector.shape_cast %694 : vector<1x64x32xf32> to vector<64x32xf32>
    %cst_334 = arith.constant dense<0.000000e+00> : vector<16x32xf32>
    %696 = tpu.matmul %693, %695, %cst_334 {dimension_numbers = #tpu.dot_dimension_numbers<[1], [0], [0], [1], [0, 0, 1, 1], [], []>} : vector<16x64xf32>, vector<64x32xf32>, vector<16x32xf32> -> vector<16x32xf32>
    %c2_335 = arith.constant 2 : index
    %c0_336 = arith.constant 0 : index
    %c0_337 = arith.constant 0 : index
    %697 = vector.load %arg22[%c2_335, %c0_336, %c0_337] : memref<4x1x32xf32, #tpu.memory_space<vmem>>, vector<1x1x32xf32>
    %698 = vector.shape_cast %697 : vector<1x1x32xf32> to vector<1x32xf32>
    %699 = vector.broadcast %698 : vector<1x32xf32> to vector<16x32xf32>
    %700 = arith.addf %696, %699 : vector<16x32xf32>
    %701 = arith.addf %657, %700 : vector<16x32xf32>
    %cst_338 = arith.constant dense<0.000000e+00> : vector<16xf32>
    %702 = vector.multi_reduction <add>, %701, %cst_338 [1] : vector<16x32xf32> to vector<16xf32>
    %703 = vector.shape_cast %702 : vector<16xf32> to vector<16x1xf32>
    %cst_339 = arith.constant 3.200000e+01 : f32
    %704 = vector.broadcast %cst_339 : f32 to vector<16x1xf32>
    %705 = arith.divf %703, %704 : vector<16x1xf32>
    %706 = vector.broadcast %705 : vector<16x1xf32> to vector<16x32xf32>
    %707 = arith.subf %701, %706 : vector<16x32xf32>
    %708 = arith.mulf %707, %707 : vector<16x32xf32>
    %cst_340 = arith.constant dense<0.000000e+00> : vector<16xf32>
    %709 = vector.multi_reduction <add>, %708, %cst_340 [1] : vector<16x32xf32> to vector<16xf32>
    %710 = vector.shape_cast %709 : vector<16xf32> to vector<16x1xf32>
    %cst_341 = arith.constant 0.0322580636 : f32
    %711 = vector.broadcast %cst_341 : f32 to vector<16x1xf32>
    %712 = arith.mulf %710, %711 : vector<16x1xf32>
    %713 = math.sqrt %712 : vector<16x1xf32>
    %cst_342 = arith.constant 9.99999997E-7 : f32
    %714 = vector.broadcast %cst_342 : f32 to vector<16x1xf32>
    %715 = arith.addf %713, %714 : vector<16x1xf32>
    %716 = tpu.reciprocal %715 {approx = true} : vector<16x1xf32> -> vector<16x1xf32>
    %c8 = arith.constant 8 : index
    %c0_343 = arith.constant 0 : index
    %c0_344 = arith.constant 0 : index
    %717 = vector.load %arg9[%c8, %c0_343, %c0_344] : memref<12x1x32xf32, #tpu.memory_space<vmem>>, vector<1x1x32xf32>
    %718 = vector.shape_cast %717 : vector<1x1x32xf32> to vector<1x32xf32>
    %719 = vector.broadcast %705 : vector<16x1xf32> to vector<16x32xf32>
    %720 = arith.subf %701, %719 : vector<16x32xf32>
    %721 = vector.broadcast %718 : vector<1x32xf32> to vector<16x32xf32>
    %722 = arith.mulf %721, %720 : vector<16x32xf32>
    %723 = vector.broadcast %716 : vector<16x1xf32> to vector<16x32xf32>
    %724 = arith.mulf %722, %723 : vector<16x32xf32>
    %c8_345 = arith.constant 8 : index
    %c0_346 = arith.constant 0 : index
    %c0_347 = arith.constant 0 : index
    %725 = vector.load %arg10[%c8_345, %c0_346, %c0_347] : memref<12x1x32xf32, #tpu.memory_space<vmem>>, vector<1x1x32xf32>
    %726 = vector.shape_cast %725 : vector<1x1x32xf32> to vector<1x32xf32>
    %727 = vector.broadcast %726 : vector<1x32xf32> to vector<16x32xf32>
    %728 = arith.addf %724, %727 : vector<16x32xf32>
    %c4_348 = arith.constant 4 : index
    %c0_349 = arith.constant 0 : index
    %c0_350 = arith.constant 0 : index
    %729 = vector.load %arg11[%c4_348, %c0_349, %c0_350] : memref<6x32x32xf32, #tpu.memory_space<vmem>>, vector<1x32x32xf32>
    %730 = vector.shape_cast %729 : vector<1x32x32xf32> to vector<32x32xf32>
    %cst_351 = arith.constant dense<0.000000e+00> : vector<16x32xf32>
    %731 = tpu.matmul %728, %730, %cst_351 {dimension_numbers = #tpu.dot_dimension_numbers<[1], [0], [0], [1], [0, 0, 1, 1], [], []>} : vector<16x32xf32>, vector<32x32xf32>, vector<16x32xf32> -> vector<16x32xf32>
    %c4_352 = arith.constant 4 : index
    %c0_353 = arith.constant 0 : index
    %c0_354 = arith.constant 0 : index
    %732 = vector.load %arg12[%c4_352, %c0_353, %c0_354] : memref<6x1x32xf32, #tpu.memory_space<vmem>>, vector<1x1x32xf32>
    %733 = vector.shape_cast %732 : vector<1x1x32xf32> to vector<1x32xf32>
    %734 = vector.broadcast %733 : vector<1x32xf32> to vector<16x32xf32>
    %735 = arith.addf %731, %734 : vector<16x32xf32>
    %c4_355 = arith.constant 4 : index
    %c0_356 = arith.constant 0 : index
    %c0_357 = arith.constant 0 : index
    %736 = vector.load %arg13[%c4_355, %c0_356, %c0_357] : memref<6x32x32xf32, #tpu.memory_space<vmem>>, vector<1x32x32xf32>
    %737 = vector.shape_cast %736 : vector<1x32x32xf32> to vector<32x32xf32>
    %cst_358 = arith.constant dense<0.000000e+00> : vector<16x32xf32>
    %738 = tpu.matmul %728, %737, %cst_358 {dimension_numbers = #tpu.dot_dimension_numbers<[1], [0], [0], [1], [0, 0, 1, 1], [], []>} : vector<16x32xf32>, vector<32x32xf32>, vector<16x32xf32> -> vector<16x32xf32>
    %c4_359 = arith.constant 4 : index
    %c0_360 = arith.constant 0 : index
    %c0_361 = arith.constant 0 : index
    %739 = vector.load %arg14[%c4_359, %c0_360, %c0_361] : memref<6x1x32xf32, #tpu.memory_space<vmem>>, vector<1x1x32xf32>
    %740 = vector.shape_cast %739 : vector<1x1x32xf32> to vector<1x32xf32>
    %741 = vector.broadcast %740 : vector<1x32xf32> to vector<16x32xf32>
    %742 = arith.addf %738, %741 : vector<16x32xf32>
    %c4_362 = arith.constant 4 : index
    %c0_363 = arith.constant 0 : index
    %c0_364 = arith.constant 0 : index
    %743 = vector.load %arg15[%c4_362, %c0_363, %c0_364] : memref<6x32x32xf32, #tpu.memory_space<vmem>>, vector<1x32x32xf32>
    %744 = vector.shape_cast %743 : vector<1x32x32xf32> to vector<32x32xf32>
    %cst_365 = arith.constant dense<0.000000e+00> : vector<16x32xf32>
    %745 = tpu.matmul %728, %744, %cst_365 {dimension_numbers = #tpu.dot_dimension_numbers<[1], [0], [0], [1], [0, 0, 1, 1], [], []>} : vector<16x32xf32>, vector<32x32xf32>, vector<16x32xf32> -> vector<16x32xf32>
    %c4_366 = arith.constant 4 : index
    %c0_367 = arith.constant 0 : index
    %c0_368 = arith.constant 0 : index
    %746 = vector.load %arg16[%c4_366, %c0_367, %c0_368] : memref<6x1x32xf32, #tpu.memory_space<vmem>>, vector<1x1x32xf32>
    %747 = vector.shape_cast %746 : vector<1x1x32xf32> to vector<1x32xf32>
    %748 = vector.broadcast %747 : vector<1x32xf32> to vector<16x32xf32>
    %749 = arith.addf %745, %748 : vector<16x32xf32>
    %750 = vector.extract_strided_slice %735 {offsets = [0, 0], sizes = [16, 8], strides = [1, 1]} : vector<16x32xf32> to vector<16x8xf32>
    %751 = vector.extract_strided_slice %742 {offsets = [0, 0], sizes = [16, 8], strides = [1, 1]} : vector<16x32xf32> to vector<16x8xf32>
    %752 = vector.extract_strided_slice %749 {offsets = [0, 0], sizes = [16, 8], strides = [1, 1]} : vector<16x32xf32> to vector<16x8xf32>
    %cst_369 = arith.constant dense<0.000000e+00> : vector<16x16xf32>
    %753 = tpu.matmul %750, %751, %cst_369 {dimension_numbers = #tpu.dot_dimension_numbers<[1], [1], [0], [0], [0, 0, 1, 0], [], []>} : vector<16x8xf32>, vector<16x8xf32>, vector<16x16xf32> -> vector<16x16xf32>
    %cst_370 = arith.constant 0.353553385 : f32
    %754 = vector.broadcast %cst_370 : f32 to vector<16x16xf32>
    %755 = arith.mulf %753, %754 : vector<16x16xf32>
    %756 = arith.addf %755, %1 : vector<16x16xf32>
    %cst_371 = arith.constant dense<0xFF800000> : vector<16xf32>
    %757 = vector.multi_reduction <maximumf>, %756, %cst_371 [1] : vector<16x16xf32> to vector<16xf32>
    %758 = vector.shape_cast %757 : vector<16xf32> to vector<16x1xf32>
    %759 = vector.broadcast %758 : vector<16x1xf32> to vector<16x16xf32>
    %760 = arith.subf %756, %759 : vector<16x16xf32>
    %761 = math.exp %760 : vector<16x16xf32>
    %cst_372 = arith.constant dense<0.000000e+00> : vector<16xf32>
    %762 = vector.multi_reduction <add>, %761, %cst_372 [1] : vector<16x16xf32> to vector<16xf32>
    %763 = vector.shape_cast %762 : vector<16xf32> to vector<16x1xf32>
    %764 = tpu.reciprocal %763 {approx = true} : vector<16x1xf32> -> vector<16x1xf32>
    %765 = vector.broadcast %764 : vector<16x1xf32> to vector<16x16xf32>
    %766 = arith.mulf %761, %765 : vector<16x16xf32>
    %cst_373 = arith.constant dense<0.000000e+00> : vector<16x8xf32>
    %767 = tpu.matmul %766, %752, %cst_373 {dimension_numbers = #tpu.dot_dimension_numbers<[1], [0], [0], [1], [0, 0, 1, 1], [], []>} : vector<16x16xf32>, vector<16x8xf32>, vector<16x8xf32> -> vector<16x8xf32>
    %768 = vector.extract_strided_slice %735 {offsets = [0, 8], sizes = [16, 8], strides = [1, 1]} : vector<16x32xf32> to vector<16x8xf32>
    %769 = vector.extract_strided_slice %742 {offsets = [0, 8], sizes = [16, 8], strides = [1, 1]} : vector<16x32xf32> to vector<16x8xf32>
    %770 = vector.extract_strided_slice %749 {offsets = [0, 8], sizes = [16, 8], strides = [1, 1]} : vector<16x32xf32> to vector<16x8xf32>
    %cst_374 = arith.constant dense<0.000000e+00> : vector<16x16xf32>
    %771 = tpu.matmul %768, %769, %cst_374 {dimension_numbers = #tpu.dot_dimension_numbers<[1], [1], [0], [0], [0, 0, 1, 0], [], []>} : vector<16x8xf32>, vector<16x8xf32>, vector<16x16xf32> -> vector<16x16xf32>
    %cst_375 = arith.constant 0.353553385 : f32
    %772 = vector.broadcast %cst_375 : f32 to vector<16x16xf32>
    %773 = arith.mulf %771, %772 : vector<16x16xf32>
    %774 = arith.addf %773, %1 : vector<16x16xf32>
    %cst_376 = arith.constant dense<0xFF800000> : vector<16xf32>
    %775 = vector.multi_reduction <maximumf>, %774, %cst_376 [1] : vector<16x16xf32> to vector<16xf32>
    %776 = vector.shape_cast %775 : vector<16xf32> to vector<16x1xf32>
    %777 = vector.broadcast %776 : vector<16x1xf32> to vector<16x16xf32>
    %778 = arith.subf %774, %777 : vector<16x16xf32>
    %779 = math.exp %778 : vector<16x16xf32>
    %cst_377 = arith.constant dense<0.000000e+00> : vector<16xf32>
    %780 = vector.multi_reduction <add>, %779, %cst_377 [1] : vector<16x16xf32> to vector<16xf32>
    %781 = vector.shape_cast %780 : vector<16xf32> to vector<16x1xf32>
    %782 = tpu.reciprocal %781 {approx = true} : vector<16x1xf32> -> vector<16x1xf32>
    %783 = vector.broadcast %782 : vector<16x1xf32> to vector<16x16xf32>
    %784 = arith.mulf %779, %783 : vector<16x16xf32>
    %cst_378 = arith.constant dense<0.000000e+00> : vector<16x8xf32>
    %785 = tpu.matmul %784, %770, %cst_378 {dimension_numbers = #tpu.dot_dimension_numbers<[1], [0], [0], [1], [0, 0, 1, 1], [], []>} : vector<16x16xf32>, vector<16x8xf32>, vector<16x8xf32> -> vector<16x8xf32>
    %786 = vector.extract_strided_slice %735 {offsets = [0, 16], sizes = [16, 8], strides = [1, 1]} : vector<16x32xf32> to vector<16x8xf32>
    %787 = vector.extract_strided_slice %742 {offsets = [0, 16], sizes = [16, 8], strides = [1, 1]} : vector<16x32xf32> to vector<16x8xf32>
    %788 = vector.extract_strided_slice %749 {offsets = [0, 16], sizes = [16, 8], strides = [1, 1]} : vector<16x32xf32> to vector<16x8xf32>
    %cst_379 = arith.constant dense<0.000000e+00> : vector<16x16xf32>
    %789 = tpu.matmul %786, %787, %cst_379 {dimension_numbers = #tpu.dot_dimension_numbers<[1], [1], [0], [0], [0, 0, 1, 0], [], []>} : vector<16x8xf32>, vector<16x8xf32>, vector<16x16xf32> -> vector<16x16xf32>
    %cst_380 = arith.constant 0.353553385 : f32
    %790 = vector.broadcast %cst_380 : f32 to vector<16x16xf32>
    %791 = arith.mulf %789, %790 : vector<16x16xf32>
    %792 = arith.addf %791, %1 : vector<16x16xf32>
    %cst_381 = arith.constant dense<0xFF800000> : vector<16xf32>
    %793 = vector.multi_reduction <maximumf>, %792, %cst_381 [1] : vector<16x16xf32> to vector<16xf32>
    %794 = vector.shape_cast %793 : vector<16xf32> to vector<16x1xf32>
    %795 = vector.broadcast %794 : vector<16x1xf32> to vector<16x16xf32>
    %796 = arith.subf %792, %795 : vector<16x16xf32>
    %797 = math.exp %796 : vector<16x16xf32>
    %cst_382 = arith.constant dense<0.000000e+00> : vector<16xf32>
    %798 = vector.multi_reduction <add>, %797, %cst_382 [1] : vector<16x16xf32> to vector<16xf32>
    %799 = vector.shape_cast %798 : vector<16xf32> to vector<16x1xf32>
    %800 = tpu.reciprocal %799 {approx = true} : vector<16x1xf32> -> vector<16x1xf32>
    %801 = vector.broadcast %800 : vector<16x1xf32> to vector<16x16xf32>
    %802 = arith.mulf %797, %801 : vector<16x16xf32>
    %cst_383 = arith.constant dense<0.000000e+00> : vector<16x8xf32>
    %803 = tpu.matmul %802, %788, %cst_383 {dimension_numbers = #tpu.dot_dimension_numbers<[1], [0], [0], [1], [0, 0, 1, 1], [], []>} : vector<16x16xf32>, vector<16x8xf32>, vector<16x8xf32> -> vector<16x8xf32>
    %804 = vector.extract_strided_slice %735 {offsets = [0, 24], sizes = [16, 8], strides = [1, 1]} : vector<16x32xf32> to vector<16x8xf32>
    %805 = vector.extract_strided_slice %742 {offsets = [0, 24], sizes = [16, 8], strides = [1, 1]} : vector<16x32xf32> to vector<16x8xf32>
    %806 = vector.extract_strided_slice %749 {offsets = [0, 24], sizes = [16, 8], strides = [1, 1]} : vector<16x32xf32> to vector<16x8xf32>
    %cst_384 = arith.constant dense<0.000000e+00> : vector<16x16xf32>
    %807 = tpu.matmul %804, %805, %cst_384 {dimension_numbers = #tpu.dot_dimension_numbers<[1], [1], [0], [0], [0, 0, 1, 0], [], []>} : vector<16x8xf32>, vector<16x8xf32>, vector<16x16xf32> -> vector<16x16xf32>
    %cst_385 = arith.constant 0.353553385 : f32
    %808 = vector.broadcast %cst_385 : f32 to vector<16x16xf32>
    %809 = arith.mulf %807, %808 : vector<16x16xf32>
    %810 = arith.addf %809, %1 : vector<16x16xf32>
    %cst_386 = arith.constant dense<0xFF800000> : vector<16xf32>
    %811 = vector.multi_reduction <maximumf>, %810, %cst_386 [1] : vector<16x16xf32> to vector<16xf32>
    %812 = vector.shape_cast %811 : vector<16xf32> to vector<16x1xf32>
    %813 = vector.broadcast %812 : vector<16x1xf32> to vector<16x16xf32>
    %814 = arith.subf %810, %813 : vector<16x16xf32>
    %815 = math.exp %814 : vector<16x16xf32>
    %cst_387 = arith.constant dense<0.000000e+00> : vector<16xf32>
    %816 = vector.multi_reduction <add>, %815, %cst_387 [1] : vector<16x16xf32> to vector<16xf32>
    %817 = vector.shape_cast %816 : vector<16xf32> to vector<16x1xf32>
    %818 = tpu.reciprocal %817 {approx = true} : vector<16x1xf32> -> vector<16x1xf32>
    %819 = vector.broadcast %818 : vector<16x1xf32> to vector<16x16xf32>
    %820 = arith.mulf %815, %819 : vector<16x16xf32>
    %cst_388 = arith.constant dense<0.000000e+00> : vector<16x8xf32>
    %821 = tpu.matmul %820, %806, %cst_388 {dimension_numbers = #tpu.dot_dimension_numbers<[1], [0], [0], [1], [0, 0, 1, 1], [], []>} : vector<16x16xf32>, vector<16x8xf32>, vector<16x8xf32> -> vector<16x8xf32>
    %822 = tpu.concatenate %767, %785, %803, %821 in 1 : vector<16x8xf32>, vector<16x8xf32>, vector<16x8xf32>, vector<16x8xf32> -> vector<16x32xf32>
    %c4_389 = arith.constant 4 : index
    %c0_390 = arith.constant 0 : index
    %c0_391 = arith.constant 0 : index
    %823 = vector.load %arg17[%c4_389, %c0_390, %c0_391] : memref<6x32x32xf32, #tpu.memory_space<vmem>>, vector<1x32x32xf32>
    %824 = vector.shape_cast %823 : vector<1x32x32xf32> to vector<32x32xf32>
    %cst_392 = arith.constant dense<0.000000e+00> : vector<16x32xf32>
    %825 = tpu.matmul %822, %824, %cst_392 {dimension_numbers = #tpu.dot_dimension_numbers<[1], [0], [0], [1], [0, 0, 1, 1], [], []>} : vector<16x32xf32>, vector<32x32xf32>, vector<16x32xf32> -> vector<16x32xf32>
    %c4_393 = arith.constant 4 : index
    %c0_394 = arith.constant 0 : index
    %c0_395 = arith.constant 0 : index
    %826 = vector.load %arg18[%c4_393, %c0_394, %c0_395] : memref<6x1x32xf32, #tpu.memory_space<vmem>>, vector<1x1x32xf32>
    %827 = vector.shape_cast %826 : vector<1x1x32xf32> to vector<1x32xf32>
    %828 = vector.broadcast %827 : vector<1x32xf32> to vector<16x32xf32>
    %829 = arith.addf %825, %828 : vector<16x32xf32>
    %830 = arith.addf %701, %829 : vector<16x32xf32>
    %cst_396 = arith.constant dense<0.000000e+00> : vector<16xf32>
    %831 = vector.multi_reduction <add>, %830, %cst_396 [1] : vector<16x32xf32> to vector<16xf32>
    %832 = vector.shape_cast %831 : vector<16xf32> to vector<16x1xf32>
    %cst_397 = arith.constant 3.200000e+01 : f32
    %833 = vector.broadcast %cst_397 : f32 to vector<16x1xf32>
    %834 = arith.divf %832, %833 : vector<16x1xf32>
    %835 = vector.broadcast %834 : vector<16x1xf32> to vector<16x32xf32>
    %836 = arith.subf %830, %835 : vector<16x32xf32>
    %837 = arith.mulf %836, %836 : vector<16x32xf32>
    %cst_398 = arith.constant dense<0.000000e+00> : vector<16xf32>
    %838 = vector.multi_reduction <add>, %837, %cst_398 [1] : vector<16x32xf32> to vector<16xf32>
    %839 = vector.shape_cast %838 : vector<16xf32> to vector<16x1xf32>
    %cst_399 = arith.constant 0.0322580636 : f32
    %840 = vector.broadcast %cst_399 : f32 to vector<16x1xf32>
    %841 = arith.mulf %839, %840 : vector<16x1xf32>
    %842 = math.sqrt %841 : vector<16x1xf32>
    %cst_400 = arith.constant 9.99999997E-7 : f32
    %843 = vector.broadcast %cst_400 : f32 to vector<16x1xf32>
    %844 = arith.addf %842, %843 : vector<16x1xf32>
    %845 = tpu.reciprocal %844 {approx = true} : vector<16x1xf32> -> vector<16x1xf32>
    %c9 = arith.constant 9 : index
    %c0_401 = arith.constant 0 : index
    %c0_402 = arith.constant 0 : index
    %846 = vector.load %arg9[%c9, %c0_401, %c0_402] : memref<12x1x32xf32, #tpu.memory_space<vmem>>, vector<1x1x32xf32>
    %847 = vector.shape_cast %846 : vector<1x1x32xf32> to vector<1x32xf32>
    %848 = vector.broadcast %834 : vector<16x1xf32> to vector<16x32xf32>
    %849 = arith.subf %830, %848 : vector<16x32xf32>
    %850 = vector.broadcast %847 : vector<1x32xf32> to vector<16x32xf32>
    %851 = arith.mulf %850, %849 : vector<16x32xf32>
    %852 = vector.broadcast %845 : vector<16x1xf32> to vector<16x32xf32>
    %853 = arith.mulf %851, %852 : vector<16x32xf32>
    %c9_403 = arith.constant 9 : index
    %c0_404 = arith.constant 0 : index
    %c0_405 = arith.constant 0 : index
    %854 = vector.load %arg10[%c9_403, %c0_404, %c0_405] : memref<12x1x32xf32, #tpu.memory_space<vmem>>, vector<1x1x32xf32>
    %855 = vector.shape_cast %854 : vector<1x1x32xf32> to vector<1x32xf32>
    %856 = vector.broadcast %855 : vector<1x32xf32> to vector<16x32xf32>
    %857 = arith.addf %853, %856 : vector<16x32xf32>
    %c5_406 = arith.constant 5 : index
    %c0_407 = arith.constant 0 : index
    %c0_408 = arith.constant 0 : index
    %858 = vector.load %arg11[%c5_406, %c0_407, %c0_408] : memref<6x32x32xf32, #tpu.memory_space<vmem>>, vector<1x32x32xf32>
    %859 = vector.shape_cast %858 : vector<1x32x32xf32> to vector<32x32xf32>
    %cst_409 = arith.constant dense<0.000000e+00> : vector<16x32xf32>
    %860 = tpu.matmul %857, %859, %cst_409 {dimension_numbers = #tpu.dot_dimension_numbers<[1], [0], [0], [1], [0, 0, 1, 1], [], []>} : vector<16x32xf32>, vector<32x32xf32>, vector<16x32xf32> -> vector<16x32xf32>
    %c5_410 = arith.constant 5 : index
    %c0_411 = arith.constant 0 : index
    %c0_412 = arith.constant 0 : index
    %861 = vector.load %arg12[%c5_410, %c0_411, %c0_412] : memref<6x1x32xf32, #tpu.memory_space<vmem>>, vector<1x1x32xf32>
    %862 = vector.shape_cast %861 : vector<1x1x32xf32> to vector<1x32xf32>
    %863 = vector.broadcast %862 : vector<1x32xf32> to vector<16x32xf32>
    %864 = arith.addf %860, %863 : vector<16x32xf32>
    %c5_413 = arith.constant 5 : index
    %c0_414 = arith.constant 0 : index
    %c0_415 = arith.constant 0 : index
    %865 = vector.load %arg13[%c5_413, %c0_414, %c0_415] : memref<6x32x32xf32, #tpu.memory_space<vmem>>, vector<1x32x32xf32>
    %866 = vector.shape_cast %865 : vector<1x32x32xf32> to vector<32x32xf32>
    %cst_416 = arith.constant dense<0.000000e+00> : vector<16x32xf32>
    %867 = tpu.matmul %387, %866, %cst_416 {dimension_numbers = #tpu.dot_dimension_numbers<[1], [0], [0], [1], [0, 0, 1, 1], [], []>} : vector<16x32xf32>, vector<32x32xf32>, vector<16x32xf32> -> vector<16x32xf32>
    %c5_417 = arith.constant 5 : index
    %c0_418 = arith.constant 0 : index
    %c0_419 = arith.constant 0 : index
    %868 = vector.load %arg14[%c5_417, %c0_418, %c0_419] : memref<6x1x32xf32, #tpu.memory_space<vmem>>, vector<1x1x32xf32>
    %869 = vector.shape_cast %868 : vector<1x1x32xf32> to vector<1x32xf32>
    %870 = vector.broadcast %869 : vector<1x32xf32> to vector<16x32xf32>
    %871 = arith.addf %867, %870 : vector<16x32xf32>
    %c5_420 = arith.constant 5 : index
    %c0_421 = arith.constant 0 : index
    %c0_422 = arith.constant 0 : index
    %872 = vector.load %arg15[%c5_420, %c0_421, %c0_422] : memref<6x32x32xf32, #tpu.memory_space<vmem>>, vector<1x32x32xf32>
    %873 = vector.shape_cast %872 : vector<1x32x32xf32> to vector<32x32xf32>
    %cst_423 = arith.constant dense<0.000000e+00> : vector<16x32xf32>
    %874 = tpu.matmul %387, %873, %cst_423 {dimension_numbers = #tpu.dot_dimension_numbers<[1], [0], [0], [1], [0, 0, 1, 1], [], []>} : vector<16x32xf32>, vector<32x32xf32>, vector<16x32xf32> -> vector<16x32xf32>
    %c5_424 = arith.constant 5 : index
    %c0_425 = arith.constant 0 : index
    %c0_426 = arith.constant 0 : index
    %875 = vector.load %arg16[%c5_424, %c0_425, %c0_426] : memref<6x1x32xf32, #tpu.memory_space<vmem>>, vector<1x1x32xf32>
    %876 = vector.shape_cast %875 : vector<1x1x32xf32> to vector<1x32xf32>
    %877 = vector.broadcast %876 : vector<1x32xf32> to vector<16x32xf32>
    %878 = arith.addf %874, %877 : vector<16x32xf32>
    %879 = vector.extract_strided_slice %864 {offsets = [0, 0], sizes = [16, 8], strides = [1, 1]} : vector<16x32xf32> to vector<16x8xf32>
    %880 = vector.extract_strided_slice %871 {offsets = [0, 0], sizes = [16, 8], strides = [1, 1]} : vector<16x32xf32> to vector<16x8xf32>
    %881 = vector.extract_strided_slice %878 {offsets = [0, 0], sizes = [16, 8], strides = [1, 1]} : vector<16x32xf32> to vector<16x8xf32>
    %cst_427 = arith.constant dense<0.000000e+00> : vector<16x16xf32>
    %882 = tpu.matmul %879, %880, %cst_427 {dimension_numbers = #tpu.dot_dimension_numbers<[1], [1], [0], [0], [0, 0, 1, 0], [], []>} : vector<16x8xf32>, vector<16x8xf32>, vector<16x16xf32> -> vector<16x16xf32>
    %cst_428 = arith.constant 0.353553385 : f32
    %883 = vector.broadcast %cst_428 : f32 to vector<16x16xf32>
    %884 = arith.mulf %882, %883 : vector<16x16xf32>
    %885 = arith.addf %884, %2 : vector<16x16xf32>
    %cst_429 = arith.constant dense<0xFF800000> : vector<16xf32>
    %886 = vector.multi_reduction <maximumf>, %885, %cst_429 [1] : vector<16x16xf32> to vector<16xf32>
    %887 = vector.shape_cast %886 : vector<16xf32> to vector<16x1xf32>
    %888 = vector.broadcast %887 : vector<16x1xf32> to vector<16x16xf32>
    %889 = arith.subf %885, %888 : vector<16x16xf32>
    %890 = math.exp %889 : vector<16x16xf32>
    %cst_430 = arith.constant dense<0.000000e+00> : vector<16xf32>
    %891 = vector.multi_reduction <add>, %890, %cst_430 [1] : vector<16x16xf32> to vector<16xf32>
    %892 = vector.shape_cast %891 : vector<16xf32> to vector<16x1xf32>
    %893 = tpu.reciprocal %892 {approx = true} : vector<16x1xf32> -> vector<16x1xf32>
    %894 = vector.broadcast %893 : vector<16x1xf32> to vector<16x16xf32>
    %895 = arith.mulf %890, %894 : vector<16x16xf32>
    %cst_431 = arith.constant dense<0.000000e+00> : vector<16x8xf32>
    %896 = tpu.matmul %895, %881, %cst_431 {dimension_numbers = #tpu.dot_dimension_numbers<[1], [0], [0], [1], [0, 0, 1, 1], [], []>} : vector<16x16xf32>, vector<16x8xf32>, vector<16x8xf32> -> vector<16x8xf32>
    %897 = vector.extract_strided_slice %864 {offsets = [0, 8], sizes = [16, 8], strides = [1, 1]} : vector<16x32xf32> to vector<16x8xf32>
    %898 = vector.extract_strided_slice %871 {offsets = [0, 8], sizes = [16, 8], strides = [1, 1]} : vector<16x32xf32> to vector<16x8xf32>
    %899 = vector.extract_strided_slice %878 {offsets = [0, 8], sizes = [16, 8], strides = [1, 1]} : vector<16x32xf32> to vector<16x8xf32>
    %cst_432 = arith.constant dense<0.000000e+00> : vector<16x16xf32>
    %900 = tpu.matmul %897, %898, %cst_432 {dimension_numbers = #tpu.dot_dimension_numbers<[1], [1], [0], [0], [0, 0, 1, 0], [], []>} : vector<16x8xf32>, vector<16x8xf32>, vector<16x16xf32> -> vector<16x16xf32>
    %cst_433 = arith.constant 0.353553385 : f32
    %901 = vector.broadcast %cst_433 : f32 to vector<16x16xf32>
    %902 = arith.mulf %900, %901 : vector<16x16xf32>
    %903 = arith.addf %902, %2 : vector<16x16xf32>
    %cst_434 = arith.constant dense<0xFF800000> : vector<16xf32>
    %904 = vector.multi_reduction <maximumf>, %903, %cst_434 [1] : vector<16x16xf32> to vector<16xf32>
    %905 = vector.shape_cast %904 : vector<16xf32> to vector<16x1xf32>
    %906 = vector.broadcast %905 : vector<16x1xf32> to vector<16x16xf32>
    %907 = arith.subf %903, %906 : vector<16x16xf32>
    %908 = math.exp %907 : vector<16x16xf32>
    %cst_435 = arith.constant dense<0.000000e+00> : vector<16xf32>
    %909 = vector.multi_reduction <add>, %908, %cst_435 [1] : vector<16x16xf32> to vector<16xf32>
    %910 = vector.shape_cast %909 : vector<16xf32> to vector<16x1xf32>
    %911 = tpu.reciprocal %910 {approx = true} : vector<16x1xf32> -> vector<16x1xf32>
    %912 = vector.broadcast %911 : vector<16x1xf32> to vector<16x16xf32>
    %913 = arith.mulf %908, %912 : vector<16x16xf32>
    %cst_436 = arith.constant dense<0.000000e+00> : vector<16x8xf32>
    %914 = tpu.matmul %913, %899, %cst_436 {dimension_numbers = #tpu.dot_dimension_numbers<[1], [0], [0], [1], [0, 0, 1, 1], [], []>} : vector<16x16xf32>, vector<16x8xf32>, vector<16x8xf32> -> vector<16x8xf32>
    %915 = vector.extract_strided_slice %864 {offsets = [0, 16], sizes = [16, 8], strides = [1, 1]} : vector<16x32xf32> to vector<16x8xf32>
    %916 = vector.extract_strided_slice %871 {offsets = [0, 16], sizes = [16, 8], strides = [1, 1]} : vector<16x32xf32> to vector<16x8xf32>
    %917 = vector.extract_strided_slice %878 {offsets = [0, 16], sizes = [16, 8], strides = [1, 1]} : vector<16x32xf32> to vector<16x8xf32>
    %cst_437 = arith.constant dense<0.000000e+00> : vector<16x16xf32>
    %918 = tpu.matmul %915, %916, %cst_437 {dimension_numbers = #tpu.dot_dimension_numbers<[1], [1], [0], [0], [0, 0, 1, 0], [], []>} : vector<16x8xf32>, vector<16x8xf32>, vector<16x16xf32> -> vector<16x16xf32>
    %cst_438 = arith.constant 0.353553385 : f32
    %919 = vector.broadcast %cst_438 : f32 to vector<16x16xf32>
    %920 = arith.mulf %918, %919 : vector<16x16xf32>
    %921 = arith.addf %920, %2 : vector<16x16xf32>
    %cst_439 = arith.constant dense<0xFF800000> : vector<16xf32>
    %922 = vector.multi_reduction <maximumf>, %921, %cst_439 [1] : vector<16x16xf32> to vector<16xf32>
    %923 = vector.shape_cast %922 : vector<16xf32> to vector<16x1xf32>
    %924 = vector.broadcast %923 : vector<16x1xf32> to vector<16x16xf32>
    %925 = arith.subf %921, %924 : vector<16x16xf32>
    %926 = math.exp %925 : vector<16x16xf32>
    %cst_440 = arith.constant dense<0.000000e+00> : vector<16xf32>
    %927 = vector.multi_reduction <add>, %926, %cst_440 [1] : vector<16x16xf32> to vector<16xf32>
    %928 = vector.shape_cast %927 : vector<16xf32> to vector<16x1xf32>
    %929 = tpu.reciprocal %928 {approx = true} : vector<16x1xf32> -> vector<16x1xf32>
    %930 = vector.broadcast %929 : vector<16x1xf32> to vector<16x16xf32>
    %931 = arith.mulf %926, %930 : vector<16x16xf32>
    %cst_441 = arith.constant dense<0.000000e+00> : vector<16x8xf32>
    %932 = tpu.matmul %931, %917, %cst_441 {dimension_numbers = #tpu.dot_dimension_numbers<[1], [0], [0], [1], [0, 0, 1, 1], [], []>} : vector<16x16xf32>, vector<16x8xf32>, vector<16x8xf32> -> vector<16x8xf32>
    %933 = vector.extract_strided_slice %864 {offsets = [0, 24], sizes = [16, 8], strides = [1, 1]} : vector<16x32xf32> to vector<16x8xf32>
    %934 = vector.extract_strided_slice %871 {offsets = [0, 24], sizes = [16, 8], strides = [1, 1]} : vector<16x32xf32> to vector<16x8xf32>
    %935 = vector.extract_strided_slice %878 {offsets = [0, 24], sizes = [16, 8], strides = [1, 1]} : vector<16x32xf32> to vector<16x8xf32>
    %cst_442 = arith.constant dense<0.000000e+00> : vector<16x16xf32>
    %936 = tpu.matmul %933, %934, %cst_442 {dimension_numbers = #tpu.dot_dimension_numbers<[1], [1], [0], [0], [0, 0, 1, 0], [], []>} : vector<16x8xf32>, vector<16x8xf32>, vector<16x16xf32> -> vector<16x16xf32>
    %cst_443 = arith.constant 0.353553385 : f32
    %937 = vector.broadcast %cst_443 : f32 to vector<16x16xf32>
    %938 = arith.mulf %936, %937 : vector<16x16xf32>
    %939 = arith.addf %938, %2 : vector<16x16xf32>
    %cst_444 = arith.constant dense<0xFF800000> : vector<16xf32>
    %940 = vector.multi_reduction <maximumf>, %939, %cst_444 [1] : vector<16x16xf32> to vector<16xf32>
    %941 = vector.shape_cast %940 : vector<16xf32> to vector<16x1xf32>
    %942 = vector.broadcast %941 : vector<16x1xf32> to vector<16x16xf32>
    %943 = arith.subf %939, %942 : vector<16x16xf32>
    %944 = math.exp %943 : vector<16x16xf32>
    %cst_445 = arith.constant dense<0.000000e+00> : vector<16xf32>
    %945 = vector.multi_reduction <add>, %944, %cst_445 [1] : vector<16x16xf32> to vector<16xf32>
    %946 = vector.shape_cast %945 : vector<16xf32> to vector<16x1xf32>
    %947 = tpu.reciprocal %946 {approx = true} : vector<16x1xf32> -> vector<16x1xf32>
    %948 = vector.broadcast %947 : vector<16x1xf32> to vector<16x16xf32>
    %949 = arith.mulf %944, %948 : vector<16x16xf32>
    %cst_446 = arith.constant dense<0.000000e+00> : vector<16x8xf32>
    %950 = tpu.matmul %949, %935, %cst_446 {dimension_numbers = #tpu.dot_dimension_numbers<[1], [0], [0], [1], [0, 0, 1, 1], [], []>} : vector<16x16xf32>, vector<16x8xf32>, vector<16x8xf32> -> vector<16x8xf32>
    %951 = tpu.concatenate %896, %914, %932, %950 in 1 : vector<16x8xf32>, vector<16x8xf32>, vector<16x8xf32>, vector<16x8xf32> -> vector<16x32xf32>
    %c5_447 = arith.constant 5 : index
    %c0_448 = arith.constant 0 : index
    %c0_449 = arith.constant 0 : index
    %952 = vector.load %arg17[%c5_447, %c0_448, %c0_449] : memref<6x32x32xf32, #tpu.memory_space<vmem>>, vector<1x32x32xf32>
    %953 = vector.shape_cast %952 : vector<1x32x32xf32> to vector<32x32xf32>
    %cst_450 = arith.constant dense<0.000000e+00> : vector<16x32xf32>
    %954 = tpu.matmul %951, %953, %cst_450 {dimension_numbers = #tpu.dot_dimension_numbers<[1], [0], [0], [1], [0, 0, 1, 1], [], []>} : vector<16x32xf32>, vector<32x32xf32>, vector<16x32xf32> -> vector<16x32xf32>
    %c5_451 = arith.constant 5 : index
    %c0_452 = arith.constant 0 : index
    %c0_453 = arith.constant 0 : index
    %955 = vector.load %arg18[%c5_451, %c0_452, %c0_453] : memref<6x1x32xf32, #tpu.memory_space<vmem>>, vector<1x1x32xf32>
    %956 = vector.shape_cast %955 : vector<1x1x32xf32> to vector<1x32xf32>
    %957 = vector.broadcast %956 : vector<1x32xf32> to vector<16x32xf32>
    %958 = arith.addf %954, %957 : vector<16x32xf32>
    %959 = arith.addf %830, %958 : vector<16x32xf32>
    %cst_454 = arith.constant dense<0.000000e+00> : vector<16xf32>
    %960 = vector.multi_reduction <add>, %959, %cst_454 [1] : vector<16x32xf32> to vector<16xf32>
    %961 = vector.shape_cast %960 : vector<16xf32> to vector<16x1xf32>
    %cst_455 = arith.constant 3.200000e+01 : f32
    %962 = vector.broadcast %cst_455 : f32 to vector<16x1xf32>
    %963 = arith.divf %961, %962 : vector<16x1xf32>
    %964 = vector.broadcast %963 : vector<16x1xf32> to vector<16x32xf32>
    %965 = arith.subf %959, %964 : vector<16x32xf32>
    %966 = arith.mulf %965, %965 : vector<16x32xf32>
    %cst_456 = arith.constant dense<0.000000e+00> : vector<16xf32>
    %967 = vector.multi_reduction <add>, %966, %cst_456 [1] : vector<16x32xf32> to vector<16xf32>
    %968 = vector.shape_cast %967 : vector<16xf32> to vector<16x1xf32>
    %cst_457 = arith.constant 0.0322580636 : f32
    %969 = vector.broadcast %cst_457 : f32 to vector<16x1xf32>
    %970 = arith.mulf %968, %969 : vector<16x1xf32>
    %971 = math.sqrt %970 : vector<16x1xf32>
    %cst_458 = arith.constant 9.99999997E-7 : f32
    %972 = vector.broadcast %cst_458 : f32 to vector<16x1xf32>
    %973 = arith.addf %971, %972 : vector<16x1xf32>
    %974 = tpu.reciprocal %973 {approx = true} : vector<16x1xf32> -> vector<16x1xf32>
    %c10 = arith.constant 10 : index
    %c0_459 = arith.constant 0 : index
    %c0_460 = arith.constant 0 : index
    %975 = vector.load %arg9[%c10, %c0_459, %c0_460] : memref<12x1x32xf32, #tpu.memory_space<vmem>>, vector<1x1x32xf32>
    %976 = vector.shape_cast %975 : vector<1x1x32xf32> to vector<1x32xf32>
    %977 = vector.broadcast %963 : vector<16x1xf32> to vector<16x32xf32>
    %978 = arith.subf %959, %977 : vector<16x32xf32>
    %979 = vector.broadcast %976 : vector<1x32xf32> to vector<16x32xf32>
    %980 = arith.mulf %979, %978 : vector<16x32xf32>
    %981 = vector.broadcast %974 : vector<16x1xf32> to vector<16x32xf32>
    %982 = arith.mulf %980, %981 : vector<16x32xf32>
    %c10_461 = arith.constant 10 : index
    %c0_462 = arith.constant 0 : index
    %c0_463 = arith.constant 0 : index
    %983 = vector.load %arg10[%c10_461, %c0_462, %c0_463] : memref<12x1x32xf32, #tpu.memory_space<vmem>>, vector<1x1x32xf32>
    %984 = vector.shape_cast %983 : vector<1x1x32xf32> to vector<1x32xf32>
    %985 = vector.broadcast %984 : vector<1x32xf32> to vector<16x32xf32>
    %986 = arith.addf %982, %985 : vector<16x32xf32>
    %c3_464 = arith.constant 3 : index
    %c0_465 = arith.constant 0 : index
    %c0_466 = arith.constant 0 : index
    %987 = vector.load %arg19[%c3_464, %c0_465, %c0_466] : memref<4x32x64xf32, #tpu.memory_space<vmem>>, vector<1x32x64xf32>
    %988 = vector.shape_cast %987 : vector<1x32x64xf32> to vector<32x64xf32>
    %cst_467 = arith.constant dense<0.000000e+00> : vector<16x64xf32>
    %989 = tpu.matmul %986, %988, %cst_467 {dimension_numbers = #tpu.dot_dimension_numbers<[1], [0], [0], [1], [0, 0, 1, 1], [], []>} : vector<16x32xf32>, vector<32x64xf32>, vector<16x64xf32> -> vector<16x64xf32>
    %c3_468 = arith.constant 3 : index
    %c0_469 = arith.constant 0 : index
    %c0_470 = arith.constant 0 : index
    %990 = vector.load %arg20[%c3_468, %c0_469, %c0_470] : memref<4x1x64xf32, #tpu.memory_space<vmem>>, vector<1x1x64xf32>
    %991 = vector.shape_cast %990 : vector<1x1x64xf32> to vector<1x64xf32>
    %992 = vector.broadcast %991 : vector<1x64xf32> to vector<16x64xf32>
    %993 = arith.addf %989, %992 : vector<16x64xf32>
    %cst_471 = arith.constant 0.000000e+00 : f32
    %994 = vector.broadcast %cst_471 : f32 to vector<16x64xf32>
    %995 = arith.maximumf %993, %994 : vector<16x64xf32>
    %c3_472 = arith.constant 3 : index
    %c0_473 = arith.constant 0 : index
    %c0_474 = arith.constant 0 : index
    %996 = vector.load %arg21[%c3_472, %c0_473, %c0_474] : memref<4x64x32xf32, #tpu.memory_space<vmem>>, vector<1x64x32xf32>
    %997 = vector.shape_cast %996 : vector<1x64x32xf32> to vector<64x32xf32>
    %cst_475 = arith.constant dense<0.000000e+00> : vector<16x32xf32>
    %998 = tpu.matmul %995, %997, %cst_475 {dimension_numbers = #tpu.dot_dimension_numbers<[1], [0], [0], [1], [0, 0, 1, 1], [], []>} : vector<16x64xf32>, vector<64x32xf32>, vector<16x32xf32> -> vector<16x32xf32>
    %c3_476 = arith.constant 3 : index
    %c0_477 = arith.constant 0 : index
    %c0_478 = arith.constant 0 : index
    %999 = vector.load %arg22[%c3_476, %c0_477, %c0_478] : memref<4x1x32xf32, #tpu.memory_space<vmem>>, vector<1x1x32xf32>
    %1000 = vector.shape_cast %999 : vector<1x1x32xf32> to vector<1x32xf32>
    %1001 = vector.broadcast %1000 : vector<1x32xf32> to vector<16x32xf32>
    %1002 = arith.addf %998, %1001 : vector<16x32xf32>
    %1003 = arith.addf %959, %1002 : vector<16x32xf32>
    %cst_479 = arith.constant dense<0.000000e+00> : vector<16xf32>
    %1004 = vector.multi_reduction <add>, %1003, %cst_479 [1] : vector<16x32xf32> to vector<16xf32>
    %1005 = vector.shape_cast %1004 : vector<16xf32> to vector<16x1xf32>
    %cst_480 = arith.constant 3.200000e+01 : f32
    %1006 = vector.broadcast %cst_480 : f32 to vector<16x1xf32>
    %1007 = arith.divf %1005, %1006 : vector<16x1xf32>
    %1008 = vector.broadcast %1007 : vector<16x1xf32> to vector<16x32xf32>
    %1009 = arith.subf %1003, %1008 : vector<16x32xf32>
    %1010 = arith.mulf %1009, %1009 : vector<16x32xf32>
    %cst_481 = arith.constant dense<0.000000e+00> : vector<16xf32>
    %1011 = vector.multi_reduction <add>, %1010, %cst_481 [1] : vector<16x32xf32> to vector<16xf32>
    %1012 = vector.shape_cast %1011 : vector<16xf32> to vector<16x1xf32>
    %cst_482 = arith.constant 0.0322580636 : f32
    %1013 = vector.broadcast %cst_482 : f32 to vector<16x1xf32>
    %1014 = arith.mulf %1012, %1013 : vector<16x1xf32>
    %1015 = math.sqrt %1014 : vector<16x1xf32>
    %cst_483 = arith.constant 9.99999997E-7 : f32
    %1016 = vector.broadcast %cst_483 : f32 to vector<16x1xf32>
    %1017 = arith.addf %1015, %1016 : vector<16x1xf32>
    %1018 = tpu.reciprocal %1017 {approx = true} : vector<16x1xf32> -> vector<16x1xf32>
    %c11 = arith.constant 11 : index
    %c0_484 = arith.constant 0 : index
    %c0_485 = arith.constant 0 : index
    %1019 = vector.load %arg9[%c11, %c0_484, %c0_485] : memref<12x1x32xf32, #tpu.memory_space<vmem>>, vector<1x1x32xf32>
    %1020 = vector.shape_cast %1019 : vector<1x1x32xf32> to vector<1x32xf32>
    %1021 = vector.broadcast %1007 : vector<16x1xf32> to vector<16x32xf32>
    %1022 = arith.subf %1003, %1021 : vector<16x32xf32>
    %1023 = vector.broadcast %1020 : vector<1x32xf32> to vector<16x32xf32>
    %1024 = arith.mulf %1023, %1022 : vector<16x32xf32>
    %1025 = vector.broadcast %1018 : vector<16x1xf32> to vector<16x32xf32>
    %1026 = arith.mulf %1024, %1025 : vector<16x32xf32>
    %c11_486 = arith.constant 11 : index
    %c0_487 = arith.constant 0 : index
    %c0_488 = arith.constant 0 : index
    %1027 = vector.load %arg10[%c11_486, %c0_487, %c0_488] : memref<12x1x32xf32, #tpu.memory_space<vmem>>, vector<1x1x32xf32>
    %1028 = vector.shape_cast %1027 : vector<1x1x32xf32> to vector<1x32xf32>
    %1029 = vector.broadcast %1028 : vector<1x32xf32> to vector<16x32xf32>
    %1030 = arith.addf %1026, %1029 : vector<16x32xf32>
    %c0_489 = arith.constant 0 : index
    %c0_490 = arith.constant 0 : index
    %1031 = vector.load %arg23[%c0_489, %c0_490] : memref<16x32xf32, #tpu.memory_space<vmem>>, vector<16x32xf32>
    tpu.vector_store %arg23[%c0_489, %c0_490], %1030 {strides = array<i32>} : memref<16x32xf32, #tpu.memory_space<vmem>>, vector<16x32xf32>,
    return
  }
}

</mosaic_0001>

<bundles_post_ra>
// kernel: encoder_decoder_forward.1
= control target key start
LH: loop header
LB: loop body
LE: loop exit
PB: predicated region body
PF: predicated region fallthrough
CT: control target
= control target key end

     0   :  { %s7398_s0 = inlined_call_operand.vmem [shape: s32[16,1], index: 0, kind: input, shape index: {}]   ;;  %s7399_s1 = inlined_call_operand.vmem [shape: s32[16,1], index: 1, kind: input, shape index: {}]   ;;  %s7400_s2 = inlined_call_operand.vmem [shape: f32[16,16], index: 2, kind: input, shape index: {}, may-alias: {2,4}]   ;;  %s7401_s3 = inlined_call_operand.vmem [shape: f32[16,16], index: 3, kind: input, shape index: {}]   ;;  %s7402_s4 = inlined_call_operand.vmem [shape: f32[16,16], index: 4, kind: input, shape index: {}, may-alias: {2,4}]   ;;  %s7403_s5 = inlined_call_operand.vmem [shape: f32[16,32], index: 5, kind: input, shape index: {}, may-alias: {5,6}]   ;;  %s7404_s6 = inlined_call_operand.vmem [shape: f32[16,32], index: 6, kind: input, shape index: {}, may-alias: {5,6}]   ;;  %s7405_s7 = inlined_call_operand.vmem [shape: f32[16,32], index: 7, kind: input, shape index: {}]   ;;  %s7406_s8 = inlined_call_operand.hbm [shape: f32[16,32], index: 8, kind: input, shape index: {}]   ;;  %s7407_s9 = inlined_call_operand.hbm [shape: f32[12,1,32], index: 9, kind: input, shape index: {}]   ;;  %s7408_s10 = inlined_call_operand.hbm [shape: f32[12,1,32], index: 10, kind: input, shape index: {}]   ;;  %s7409_s11 = inlined_call_operand.vmem [shape: f32[6,32,32], index: 11, kind: input, shape index: {}]   ;;  %s7410_s12 = inlined_call_operand.hbm [shape: f32[6,1,32], index: 12, kind: input, shape index: {}]   ;;  %s7411_s13 = inlined_call_operand.vmem [shape: f32[6,32,32], index: 13, kind: input, shape index: {}]   ;;  %s7412_s14 = inlined_call_operand.hbm [shape: f32[6,1,32], index: 14, kind: input, shape index: {}]   ;;  %s7413_s15 = inlined_call_operand.hbm [shape: f32[6,32,32], index: 15, kind: input, shape index: {}]   ;;  %s7414_s16 = inlined_call_operand.hbm [shape: f32[6,1,32], index: 16, kind: input, shape index: {}]   ;;  %s7415_s17 = inlined_call_operand.hbm [shape: f32[6,32,32], index: 17, kind: input, shape index: {}]   ;;  %s7416_s18 = inlined_call_operand.hbm [shape: f32[6,1,32], index: 18, kind: input, shape index: {}]   ;;  %s7417_s19 = inlined_call_operand.vmem [shape: f32[4,32,64], index: 19, kind: input, shape index: {}]   ;;  %s7418_s20 = inlined_call_operand.hbm [shape: f32[4,1,64], index: 20, kind: input, shape index: {}]   ;;  %s7419_s21 = inlined_call_operand.vmem [shape: f32[4,64,32], index: 21, kind: input, shape index: {}]   ;;  %s7420_s22 = inlined_call_operand.hbm [shape: f32[4,1,32], index: 22, kind: input, shape index: {}]   ;;  %s7421_s23 = inlined_call_operand.hbm [shape: f32[16,32], index: 23, kind: output, shape index: {}]  }
   0x1   :  { %7430 = sst [smem:[#allocation28_spill]] %s7398_s0 }
   0x2   :  { %7431 = sst [smem:[#allocation29_spill]] %s7399_s1 }
   0x3   :  { %7432 = sst [smem:[#allocation30_spill]] %s7400_s2 }
   0x4   :  { %7433 = sst [smem:[#allocation31_spill]] %s7401_s3 }
   0x5   :  { %7434 = sst [smem:[#allocation32_spill]] %s7402_s4 }
   0x6   :  { %7435 = sst [smem:[#allocation33_spill]] %s7403_s5 }
   0x7   :  { %7436 = sst [smem:[#allocation34_spill]] %s7404_s6 }
   0x8   :  { %7437 = sst [smem:[#allocation35_spill]] %s7405_s7 }
   0x9   :  { %28 = vsyncpa [#allocation3], 0 }
   0xa   :  { %29 = vsyncpa [#allocation6], 0 }
   0xb   :  { %30 = vsyncpa [#allocation9], 0 }
   0xc   :  { %31 = vsyncpa [#allocation12], 0 }
   0xd   :  { %32 = vsyncpa [#allocation15], 0 }
   0xe   :  { %33 = vsyncpa [#allocation18], 0  ;;  %s68_s24 = sshll.u32 %s7407_s9, 4  ;;  %s69_s24 = int_to_ptr.hbm [resolvable:$true] %s68_s24 }
   0xf   :  { %34 = vsyncpa [#allocation4], 0  ;;  %s5971_s25 = smov [#allocation5]   ;;  %s96_s2 = sshll.u32 %s7410_s12, 4  ;;  %s97_s2 = int_to_ptr.hbm [resolvable:$true] %s96_s2 }
  0x10   :  { %s70_s5 = sshll.u32 %s5971_s25, 4  ;;  %s5972_s6 = smov 16   ;;  %s71_s5 = int_to_ptr.vmem [resolvable:$true] %s70_s5 }
  0x11   :  { %s5973_s27 = smov 1   ;;  %s5974_s7 = smov [#allocation8]  }
  0x12   :  { %76 = dma.hbm_to_vmem [thread:$0]  %s69_s24, 192, %s71_s5, [#allocation6], %s5972_s6, %s5972_s6, %s5973_s27  }
  0x13   :  { %s98_s28 = sshll.u32 %s5974_s7, 4  ;;  %s124_s3 = sshll.u32 %s7413_s15, 4  ;;  %s99_s28 = int_to_ptr.vmem [resolvable:$true] %s98_s28  ;;  %s125_s3 = int_to_ptr.hbm [resolvable:$true] %s124_s3 }
  0x14   :  { %104 = dma.hbm_to_vmem [thread:$0]  %s97_s2, 96, %s99_s28, [#allocation9], %s5972_s6, %s5972_s6, %s5973_s27  }
  0x15   :  { %s5975_s12 = smov [#allocation11]   ;;  %s150_s24 = sshll.u32 %s7415_s17, 4  ;;  %s151_s24 = int_to_ptr.hbm [resolvable:$true] %s150_s24 }
  0x16   :  { %s126_s0 = sshll.u32 %s5975_s12, 4  ;;  %s5976_s25 = smov 128   ;;  %s127_s0 = int_to_ptr.vmem [resolvable:$true] %s126_s0 }
  0x17   :  { %s5977_s5 = smov 8   ;;  %s5978_s1 = smov [#allocation14]  }
  0x18   :  { %132 = dma.hbm_to_vmem [thread:$0]  %s125_s3, 3072, %s127_s0, [#allocation12], %s5976_s25, %s5976_s25, %s5977_s5  }
  0x19   :  { %s152_s26 = sshll.u32 %s5978_s1, 4  ;;  %s178_s15 = sshll.u32 %s7418_s20, 4  ;;  %s153_s26 = int_to_ptr.vmem [resolvable:$true] %s152_s26  ;;  %s179_s15 = int_to_ptr.hbm [resolvable:$true] %s178_s15 }
  0x1a   :  { %158 = dma.hbm_to_vmem [thread:$0]  %s151_s24, 3072, %s153_s26, [#allocation15], %s5976_s25, %s5976_s25, %s5977_s5  }
  0x1b   :  { %s55_s9 = sshll.u32 %s7406_s8, 4  ;;  %s5979_s29 = smov [#allocation17]   ;;  %s56_s9 = int_to_ptr.hbm [resolvable:$true] %s55_s9 }
  0x1c   :  { %s180_s12 = sshll.u32 %s5979_s29, 4  ;;  %s5980_s3 = smov [#allocation2]   ;;  %s181_s12 = int_to_ptr.vmem [resolvable:$true] %s180_s12 }
  0x1d   :  { %186 = dma.hbm_to_vmem [thread:$0]  %s179_s15, 64, %s181_s12, [#allocation18], %s5972_s6, %s5972_s6, %s5973_s27  }
  0x1e   :  { %s57_s20 = sshll.u32 %s5980_s3, 4  ;;  %s81_s30 = sshll.u32 %s7408_s10, 4  ;;  %s58_s20 = int_to_ptr.vmem [resolvable:$true] %s57_s20  ;;  %s82_s30 = int_to_ptr.hbm [resolvable:$true] %s81_s30 }
  0x1f   :  { %63 = dma.hbm_to_vmem [thread:$0]  %s56_s9, 256, %s58_s20, [#allocation3], %s5976_s25, %s5976_s25, %s5977_s5  }
  0x20   :  { %s111_s1 = sshll.u32 %s7412_s14, 4  ;;  %s5981_s26 = smov [#allocation7]   ;;  %s112_s1 = int_to_ptr.hbm [resolvable:$true] %s111_s1 }
  0x21   :  { %s83_s2 = sshll.u32 %s5981_s26, 4  ;;  %s5982_s7 = smov [#allocation10]   ;;  %s84_s2 = int_to_ptr.vmem [resolvable:$true] %s83_s2 }
  0x22   :  { %89 = dma.hbm_to_vmem [thread:$0]  %s82_s30, 192, %s84_s2, [#allocation6], %s5972_s6, %s5972_s6, %s5973_s27  }
  0x23   :  { %s113_s10 = sshll.u32 %s5982_s7, 4  ;;  %s137_s28 = sshll.u32 %s7414_s16, 4  ;;  %s114_s10 = int_to_ptr.vmem [resolvable:$true] %s113_s10  ;;  %s138_s28 = int_to_ptr.hbm [resolvable:$true] %s137_s28 }
  0x24   :  { %119 = dma.hbm_to_vmem [thread:$0]  %s112_s1, 96, %s114_s10, [#allocation9], %s5972_s6, %s5972_s6, %s5973_s27  }
  0x25   :  { %s163_s29 = sshll.u32 %s7416_s18, 4  ;;  %s5983_s12 = smov [#allocation13]   ;;  %s164_s29 = int_to_ptr.hbm [resolvable:$true] %s163_s29 }
  0x26   :  { %s139_s3 = sshll.u32 %s5983_s12, 4  ;;  %s5984_s20 = smov [#allocation16]   ;;  %s140_s3 = int_to_ptr.vmem [resolvable:$true] %s139_s3 }
  0x27   :  { %145 = dma.hbm_to_vmem [thread:$0]  %s138_s28, 96, %s140_s3, [#allocation12], %s5972_s6, %s5972_s6, %s5973_s27  }
  0x28   :  { %s165_s16 = sshll.u32 %s5984_s20, 4  ;;  %s193_s30 = sshll.u32 %s7420_s22, 4  ;;  %s166_s16 = int_to_ptr.vmem [resolvable:$true] %s165_s16  ;;  %s194_s30 = int_to_ptr.hbm [resolvable:$true] %s193_s30 }
  0x29   :  { %171 = dma.hbm_to_vmem [thread:$0]  %s164_s29, 96, %s166_s16, [#allocation15], %s5972_s6, %s5972_s6, %s5973_s27  }
  0x2a   :  { %s5985_s18 = smov [#allocation19]  }
  0x2b   :  { %s195_s8 = sshll.u32 %s5985_s18, 4  ;;  %s196_s8 = int_to_ptr.vmem [resolvable:$true] %s195_s8 }
  0x2c   :  { %201 = dma.hbm_to_vmem [thread:$0]  %s194_s30, 64, %s196_s8, [#allocation18], %s5972_s6, %s5972_s6, %s5973_s27  }
  0x2d   :  { %5957 = dma.done.wait [#allocation3], 256  }
  0x2e   :  { %5958 = vsyncadd [#allocation3], 4294967040 }
  0x2f   :  { %5959 = dma.done.wait [#allocation6], 384  }
  0x30   :  { %5960 = vsyncadd [#allocation6], 4294966912 }
  0x31   :  { %5961 = dma.done.wait [#allocation9], 192  }
  0x32   :  { %5962 = vsyncadd [#allocation9], 4294967104 }
  0x33   :  { %5963 = dma.done.wait [#allocation12], 3168  }
  0x34   :  { %5964 = vsyncadd [#allocation12], 4294964128 }
  0x35   :  { %5965 = dma.done.wait [#allocation15], 3168  }
  0x36   :  { %5966 = vsyncadd [#allocation15], 4294964128 }
  0x37   :  { %5967 = dma.done.wait [#allocation18], 128  }
  0x38   :  { %5968 = vsyncadd [#allocation18], 4294967168  ;;  %v5986_v0 = vmov 0   ;;  %s7438_s1 = sld [smem:[#allocation28_spill]]  ;;  %v254_v5 = vlaneseq  ;;  %vm270_vm0 = vcmask 130048   ;;  %v5987_v8 = vmov 0.0  }
  0x39   :  { %5227 = vset.pattern.permute.xlu0 %v5986_v0  ;;  %5258 = vset.pattern.permute.xlu2 %v5986_v0  ;;  %s7439_s2 = sld [smem:[#allocation35_spill]]  ;;  %vm306_vm3 = vcmask 261120   ;;  %v5988_v22 = vmov 32.0   ;;  %v379_v39 = vld [vmem:[%s7409_s11 + $0x18] sm:$0xff]  ;;  %v378_v40 = vld [vmem:[%s7409_s11 + $0x10] sm:$0xff]  ;;  %v377_v41 = vld [vmem:[%s7409_s11 + $0x8] sm:$0xff] }
  0x3a   :  { %v6192_v6 = vand.u32 127, %v254_v5  ;;  %s7440_s9 = sld [smem:[#allocation33_spill]]  ;;  %5375 = vrcp.f32 %v5988_v22  ;;  %5200 = vmatpush.msra.mxu2 %v379_v39  ;;  %402 = vmatpush.msra.mxu1 %v379_v39  ;;  %v376_v42 = vld [vmem:[%s7409_s11] sm:$0xff]  ;;  %v416_v45 = vld [vmem:[%s7411_s13 + $0x18] sm:$0xff]  ;;  %v447_v46 = vld [vmem:[#allocation11 + $0x18] sm:$0xff]  ;;  %s5989_s15 = smov 120  }
  0x3b   :  { %v415_v47 = vld [vmem:[%s7411_s13 + $0x10] sm:$0xff]  ;;  %v446_v48 = vld [vmem:[#allocation11 + $0x10] sm:$0xff]  ;;  %v445_v50 = vld [vmem:[#allocation11 + $0x8] sm:$0xff]  ;;  %s5990_s17 = smov 104   ;;  %vm475_vm9 = vcmask 64512   ;;  %s5991_s28 = smov 112  }
  0x3c   :  { %5201 = vmatpush.msra.mxu2 %v378_v40  ;;  %403 = vmatpush.msra.mxu1 %v378_v40  ;;  %v414_v49 = vld [vmem:[%s7411_s13 + $0x8] sm:$0xff]  ;;  %v413_v54 = vld [vmem:[%s7411_s13] sm:$0xff]  ;;  %v444_v55 = vld [vmem:[#allocation11] sm:$0xff]  ;;  %s7441_s29 = sld [smem:[#allocation30_spill]]  ;;  %s5992_s20 = smov 24   ;;  %vm896_vm10 = vcmask 195584  }
  0x3d   :  { %vm1053_vm15 = vcmask 523264   ;;  %s7442_s18 = sld [smem:[#allocation29_spill]] }
  0x3e   :  { %v253_v1 = vld [vmem:[%s7438_s1 + $0x8] sm:$0xff]  ;;  %v252_v3 = vld [vmem:[%s7438_s1] sm:$0xff]  ;;  %5202 = vmatpush.msra.mxu2 %v377_v41  ;;  %404 = vmatpush.msra.mxu1 %v377_v41  ;;  %s7443_s27 = sld [smem:[#allocation34_spill]] }
  0x3f   :  { %v269_v2 = vld [vmem:[%s7439_s2 + $0x8] sm:$0xff]  ;;  %260 = vperm.xlu0 %5227, %v253_v1   ;;  %v268_v4 = vld [vmem:[%s7439_s2] sm:$0xff]  ;;  %s7445_s16 = sld [smem:[#allocation32_spill]] }
  0x40   :  { %5198 = vmatpush.msra.mxu3 %v269_v2  ;;  %291 = vmatpush.msra.mxu0 %v269_v2  ;;  %v303_v13 = vld [vmem:[%s7440_s9 + $0x8] sm:$0xff]  ;;  %v302_v19 = vld [vmem:[%s7440_s9] sm:$0xff]  ;;  %v5376_v23 = vpop.eup %5375 }
  0x41   :  { %v314_v24 = vmul.f32 32.0, %v5376_v23  ;;  %vm318_vm4 = vweird.f32 %v5376_v23  ;;  %5203 = vmatpush.msra.mxu2 %v376_v42  ;;  %405 = vmatpush.msra.mxu1 %v376_v42 }
  0x42   :  { %5199 = vmatpush.msra.mxu3 %v268_v4  ;;  %292 = vmatpush.msra.mxu0 %v268_v4 }
  0x43   :  { %v315_v25 = vsub.f32 1.0, %v314_v24  ;;  %433 = vmatpush.msrb.mxu2 %v416_v45 }
  0x44   :  { %464 = vmatpush.msrb.mxu3 %v447_v46 }
  0x45   :  { %v316_v26 = vmul.f32 %v5376_v23, %v315_v25  ;;  %434 = vmatpush.msrb.mxu2 %v415_v47 }
  0x46   :  { %465 = vmatpush.msrb.mxu3 %v446_v48 }
  0x47   :  { %257 = vperm.xlu0 %5227, %v252_v3   ;;  %v317_v27 = vadd.f32 %v5376_v23, %v316_v26  ;;  %435 = vmatpush.msrb.mxu2 %v414_v49 }
  0x48   :  { %466 = vmatpush.msrb.mxu3 %v445_v50 }
  0x49   :  { %v6214_v28 = vsel %vm318_vm4, %v5376_v23, %v317_v27  ;;  %436 = vmatpush.msrb.mxu2 %v413_v54 }
  0x4a   :  { %467 = vmatpush.msrb.mxu3 %v444_v55 }
  0xb1   :  { %v261_v7 = vpop.permute.xlu0 %260 }
  0xb2   :  { %vm263_vm1 = vcmp.eq.s32.totalorder %v6192_v6, %v261_v7 }
  0xb3   :  { %v4907_v9 = vsel %vm263_vm1, 1.0, %v5987_v8 }
  0xb4   :  { %4909 = vmatmul.msk.f32.vlgmr.msra.gmra.mxu3 %vm270_vm0, %v4907_v9 }
  0xb9   :  { %v258_v10 = vpop.permute.xlu0 %257 }
  0xba   :  { %vm262_vm2 = vcmp.eq.s32.totalorder %v6192_v6, %v258_v10  ;;  %v5319_v10 = vld [vmem:[#allocation5] ss:$0 sm:$0xff] }
  0xbb   :  { %v4906_v11 = vsel %vm262_vm2, 1.0, %v5987_v8 }
  0xbc   :  { %4908 = vmatmul.msk.f32.vlgmr.msra.gmra.mxu0 %vm270_vm0, %v4906_v11 }
 0x137   :  { %v297_v12 = vpop.f32.mrf.mxu3 }
 0x138   :  { %v301_v14 = vmul.f32 5.656854, %v297_v12 }
 0x139   :  { %v294_v15 = vpop.f32.mrf.mxu0 }
 0x13a   :  { %v6203_v16 = vadd.f32 %v303_v13, %v301_v14  ;;  %v300_v17 = vmul.f32 5.656854, %v294_v15  ;;  %v5320_v15 = vld [vmem:[#allocation7] ss:$0 sm:$0xff] }
 0x13c   :  { %v310_v18 = vsel %vm306_vm3, %v6203_v16, 0.0  ;;  %v6210_v20 = vadd.f32 %v302_v19, %v300_v17 }
 0x13d   :  { %311 = vadd.xlane.f32.xlu1 %v310_v18 }
 0x13e   :  { %v307_v21 = vsel %vm306_vm3, %v6210_v20, 0.0 }
 0x145   :  { %308 = vadd.xlane.f32.xlu1 %v307_v21 }
 0x1b0   :  { %v312_v29 = vpop.xlane.xlu1 %311 }
 0x1b1   :  { %v321_v30 = vmul.f32 %v6214_v28, %v312_v29  ;;  %v5321_v29 = vld [vmem:[#allocation8] ss:$0 sm:$0xff] }
 0x1b3   :  { %v6218_v31 = vsub.f32 %v6203_v16, %v321_v30 }
 0x1b5   :  { %v325_v32 = vmul.f32 %v6218_v31, %v6218_v31  ;;  %v367_v14 = vmul.f32 %v5319_v10, %v6218_v31 }
 0x1b7   :  { %v329_v33 = vsel %vm306_vm3, %v325_v32, 0.0  ;;  %v5322_v32 = vld [vmem:[#allocation10] ss:$0 sm:$0xff] }
 0x1b8   :  { %330 = vadd.xlane.f32.xlu2 %v329_v33  ;;  %v309_v34 = vpop.xlane.xlu1 %308 }
 0x1b9   :  { %v320_v35 = vmul.f32 %v6214_v28, %v309_v34 }
 0x1bb   :  { %v6225_v36 = vsub.f32 %v6210_v20, %v320_v35 }
 0x1bd   :  { %v324_v37 = vmul.f32 %v6225_v36, %v6225_v36  ;;  %v366_v23 = vmul.f32 %v5319_v10, %v6225_v36  ;;  %v5323_v36 = vld [vmem:[#allocation13] ss:$0 sm:$0xff] }
 0x1bf   :  { %v326_v38 = vsel %vm306_vm3, %v324_v37, 0.0 }
 0x1c0   :  { %327 = vadd.xlane.f32.xlu2 %v326_v38 }
 0x22b   :  { %v331_v43 = vpop.xlane.xlu2 %330 }
 0x22c   :  { %v333_v44 = vmul.f32 0.032258064, %v331_v43 }
 0x22e   :  { %5377 = vrsqrt.f32 %v333_v44  ;;  %vm353_vm5 = vcmp.eq.f32.partialorder %v333_v44, inf  ;;  %v356_v1 = vand.u32 2147483648, %v333_v44  ;;  %vm355_vm6 = vcmp.eq.f32.partialorder %v333_v44, 0.0 }
 0x233   :  { %v328_v51 = vpop.xlane.xlu2 %327 }
 0x234   :  { %v5378_v52 = vpop.eup %5377  ;;  %v332_v53 = vmul.f32 0.032258064, %v328_v51  ;;  %v6289_v51 = vld [vmem:[%s7441_s29] sm:$0xff] }
 0x235   :  { %v347_v56 = vmul.f32 %v5378_v52, %v333_v44 }
 0x236   :  { %5379 = vrsqrt.f32 %v332_v53  ;;  %vm341_vm7 = vcmp.eq.f32.partialorder %v332_v53, inf  ;;  %v344_v12 = vand.u32 2147483648, %v332_v53  ;;  %vm343_vm8 = vcmp.eq.f32.partialorder %v332_v53, 0.0 }
 0x237   :  { %v348_v57 = vmul.f32 %v5378_v52, %v347_v56 }
 0x239   :  { %v349_v58 = vmul.f32 0.5, %v348_v57 }
 0x23b   :  { %v350_v59 = vsub.f32 1.5, %v349_v58 }
 0x23c   :  { %v5380_v60 = vpop.eup %5379 }
 0x23d   :  { %v335_v61 = vmul.f32 %v5380_v60, %v332_v53  ;;  %v351_v62 = vmul.f32 %v5378_v52, %v350_v59 }
 0x23f   :  { %v352_v63 = vmul.f32 %v351_v62, %v333_v44  ;;  %v336_v0 = vmul.f32 %v5380_v60, %v335_v61 }
 0x241   :  { %v354_v2 = vsel %vm353_vm5, %v333_v44, %v352_v63  ;;  %v337_v3 = vmul.f32 0.5, %v336_v0 }
 0x242   :  { %v357_v4 = vsel %vm355_vm6, %v356_v1, %v354_v2 }
 0x243   :  { %v359_v5 = vadd.f32 1e-06, %v357_v4  ;;  %v338_v7 = vsub.f32 1.5, %v337_v3  ;;  %v6304_v3 = vld [vmem:[%s7441_s29 + $0x8] sm:$0xff]  ;;  %s7444_s29 = sld [smem:[#allocation31_spill]] }
 0x245   :  { %5381 = vrcp.f32 %v359_v5  ;;  %v339_v9 = vmul.f32 %v5380_v60, %v338_v7 }
 0x247   :  { %v340_v11 = vmul.f32 %v339_v9, %v332_v53 }
 0x249   :  { %v342_v13 = vsel %vm341_vm7, %v332_v53, %v340_v11 }
 0x24a   :  { %v345_v17 = vsel %vm343_vm8, %v344_v12, %v342_v13 }
 0x24b   :  { %v5382_v18 = vpop.eup %5381  ;;  %v358_v19 = vadd.f32 1e-06, %v345_v17 }
 0x24c   :  { %v369_v21 = vmul.f32 %v5382_v18, %v367_v14 }
 0x24d   :  { %5383 = vrcp.f32 %v358_v19 }
 0x24e   :  { %v375_v22 = vadd.f32 %v5320_v15, %v369_v21 }
 0x250   :  { %4911 = vmatmul.msk.f32.vlgmr.msra.gmra.mxu2 %vm306_vm3, %v375_v22 }
 0x253   :  { %v5384_v24 = vpop.eup %5383 }
 0x254   :  { %v368_v25 = vmul.f32 %v5384_v24, %v366_v23 }
 0x256   :  { %v374_v26 = vadd.f32 %v5320_v15, %v368_v25 }
 0x258   :  { %4910 = vmatmul.msk.f32.vlgmr.msra.gmra.mxu1 %vm306_vm3, %v374_v26  ;;  %4912 = vmatmul.msk.f32.vlgmr.msrb.gmra.mxu2 %vm306_vm3, %v374_v26 }
 0x259   :  { %4914 = vmatmul.msk.f32.vlgmr.msrb.gmra.mxu3 %vm306_vm3, %v374_v26 }
 0x260   :  { %4913 = vmatmul.msk.f32.gmra.mxu2 %vm306_vm3, %v375_v22 }
 0x261   :  { %4915 = vmatmul.msk.f32.gmra.mxu3 %vm306_vm3, %v375_v22 }
 0x2d3   :  { %v410_v27 = vpop.f32.mrf.mxu2 }
 0x2d4   :  { %v411_v42 = vadd.f32 %v5321_v29, %v410_v27 }
 0x2d5   :  { %v407_v30 = vpop.f32.mrf.mxu1 }
 0x2d6   :  { %v408_v31 = vadd.f32 %v5321_v29, %v407_v30 }
 0x2d8   :  { %566 = vrot.lane.b32.xlu2 %v408_v31, %s5989_s15 }
 0x2db   :  { %v438_v33 = vpop.f32.mrf.mxu2 }
 0x2dc   :  { %v439_v34 = vadd.f32 %v5322_v32, %v438_v33  ;;  %v469_v35 = vpop.f32.mrf.mxu3 }
 0x2dd   :  { %v470_v40 = vadd.f32 %v5323_v36, %v469_v35 }
 0x2de   :  { %570 = vrot.lane.b32.xlu1 %v439_v34, %s5989_s15 }
 0x2e0   :  { %768 = vrot.lane.b32.xlu2 %v408_v31, %s5990_s17 }
 0x2e3   :  { %v441_v37 = vpop.f32.mrf.mxu2 }
 0x2e4   :  { %v442_v38 = vadd.f32 %v5322_v32, %v441_v37  ;;  %v472_v39 = vpop.f32.mrf.mxu3 }
 0x2e5   :  { %v473_v41 = vadd.f32 %v5323_v36, %v472_v39 }
 0x2e6   :  { %572 = vrot.lane.b32.xlu0 %v442_v38, %s5989_s15  ;;  %4916 = vmatpush.xpose.msk.msrb.mxu0 %vm475_vm9, %v442_v38 }
 0x2e7   :  { %557 = vmatpush.msrb.mxu1 %v473_v41  ;;  %674 = vrot.lane.b32.xlu1 %v442_v38, %s5991_s28  ;;  %v6268_v43 = vpack.i.bf16 %v470_v40, %v473_v41 }
 0x2e8   :  { %770 = vrot.lane.b32.xlu2 %v411_v42, %s5990_s17 }
 0x2e9   :  { %558 = vmatpush.msrb.mxu1 %v470_v40 }
 0x2ea   :  { %4917 = vmatpush.xpose.msk.msrb.mxu0 %vm475_vm9, %v439_v34 }
 0x2ed   :  { %4918 = vmatmul.msk.f32.vlgmr.msrb.gmra.mxu0 %vm475_vm9, %v408_v31 }
 0x2ee   :  { %568 = vrot.lane.b32.xlu0 %v411_v42, %s5989_s15 }
 0x2ef   :  { %668 = vrot.lane.b32.xlu1 %v408_v31, %s5991_s28 }
 0x2f5   :  { %4919 = vmatmul.msk.f32.gmra.mxu0 %vm475_vm9, %v411_v42 }
 0x2f6   :  { %774 = vrot.lane.b32.xlu0 %v442_v38, %s5990_s17 }
 0x2fe   :  { %772 = vrot.lane.b32.xlu0 %v439_v34, %s5990_s17 }
 0x306   :  { %672 = vrot.lane.b32.xlu0 %v439_v34, %s5991_s28 }
 0x30e   :  { %670 = vrot.lane.b32.xlu0 %v411_v42, %s5991_s28 }
 0x332   :  { %v567_v47 = vpop.permute.xlu2 %566 }
 0x33a   :  { %v769_v56 = vpop.permute.xlu2 %768 }
 0x342   :  { %v771_v58 = vpop.permute.xlu2 %770 }
 0x350   :  { %v571_v44 = vpop.permute.xlu1 %570 }
 0x358   :  { %v573_v45 = vpop.permute.xlu0 %572 }
 0x359   :  { %v675_v46 = vpop.permute.xlu1 %674  ;;  %4922 = vmatpush.xpose.msk.msra.mxu2 %vm475_vm9, %v573_v45 }
 0x35a   :  { %4928 = vmatpush.xpose.msk.msra.mxu0 %vm475_vm9, %v675_v46 }
 0x35d   :  { %4923 = vmatpush.xpose.msk.msra.mxu2 %vm475_vm9, %v571_v44 }
 0x360   :  { %v569_v48 = vpop.permute.xlu0 %568  ;;  %4924 = vmatmul.msk.f32.vlgmr.msra.gmra.mxu2 %vm475_vm9, %v567_v47 }
 0x361   :  { %v669_v59 = vpop.permute.xlu1 %668 }
 0x368   :  { %v775_v49 = vpop.permute.xlu0 %774  ;;  %4925 = vmatmul.msk.f32.gmra.mxu2 %vm475_vm9, %v569_v48 }
 0x369   :  { %4934 = vmatpush.xpose.msk.msrb.mxu2 %vm475_vm9, %v775_v49 }
 0x36a   :  { %v505_v50 = vpop.f32.mrf.mxu0 }
 0x36b   :  { %v511_v52 = vmul.f32 0.35355338, %v505_v50 }
 0x36d   :  { %v513_v53 = vadd.f32 %v511_v52, %v6289_v51 }
 0x36f   :  { %v515_v54 = vsel %vm270_vm0, %v513_v53, -inf }
 0x370   :  { %v773_v55 = vpop.permute.xlu0 %772  ;;  %516 = vmax.xlane.f32.xlu1 %v515_v54 }
 0x371   :  { %4935 = vmatpush.xpose.msk.msrb.mxu2 %vm475_vm9, %v773_v55 }
 0x372   :  { %v508_v63 = vpop.f32.mrf.mxu0 }
 0x373   :  { %v512_v1 = vmul.f32 0.35355338, %v508_v63 }
 0x374   :  { %4936 = vmatmul.msk.f32.vlgmr.msrb.gmra.mxu2 %vm475_vm9, %v769_v56 }
 0x375   :  { %v514_v7 = vadd.f32 %v512_v1, %v6304_v3 }
 0x377   :  { %v518_v11 = vsel %vm270_vm0, %v514_v7, -inf }
 0x378   :  { %v673_v57 = vpop.permute.xlu0 %672 }
 0x379   :  { %4929 = vmatpush.xpose.msk.msra.mxu0 %vm475_vm9, %v673_v57 }
 0x37c   :  { %4930 = vmatmul.msk.f32.vlgmr.msra.gmra.mxu0 %vm475_vm9, %v669_v59  ;;  %4937 = vmatmul.msk.f32.gmra.mxu2 %vm475_vm9, %v771_v58 }
 0x380   :  { %v671_v60 = vpop.permute.xlu0 %670 }
 0x384   :  { %4931 = vmatmul.msk.f32.gmra.mxu0 %vm475_vm9, %v671_v60 }
 0x3e3   :  { %v599_v61 = vpop.f32.mrf.mxu2  ;;  %v517_v13 = vpop.xlane.xlu1 %516 }
 0x3e4   :  { %v605_v62 = vmul.f32 0.35355338, %v599_v61  ;;  %v521_v19 = vsub.f32 %v513_v53, %v517_v13 }
 0x3e6   :  { %v607_v0 = vadd.f32 %v605_v62, %v6289_v51  ;;  %v523_v24 = vmul.f32 1.442695, %v521_v19 }
 0x3e8   :  { %v609_v2 = vsel %vm270_vm0, %v607_v0, -inf  ;;  %5385 = vpow2.f32 %v523_v24 }
 0x3e9   :  { %610 = vmax.xlane.f32.xlu2 %v609_v2 }
 0x3eb   :  { %v602_v4 = vpop.f32.mrf.mxu2 }
 0x3ec   :  { %v606_v5 = vmul.f32 0.35355338, %v602_v4 }
 0x3ee   :  { %v608_v9 = vadd.f32 %v606_v5, %v6304_v3  ;;  %v5386_v34 = vpop.eup %5385 }
 0x3ef   :  { %v527_v35 = vsel %vm270_vm0, %v5386_v34, 0.0 }
 0x3f0   :  { %v612_v10 = vsel %vm270_vm0, %v608_v9, -inf }
 0x3f1   :  { %613 = vmax.xlane.f32.xlu0 %v612_v10  ;;  %519 = vmax.xlane.f32.xlu2 %v518_v11 }
 0x3f7   :  { %v801_v12 = vpop.f32.mrf.mxu2 }
 0x3f8   :  { %v807_v14 = vmul.f32 0.35355338, %v801_v12 }
 0x3f9   :  { %v701_v15 = vpop.f32.mrf.mxu0 }
 0x3fa   :  { %v707_v17 = vmul.f32 0.35355338, %v701_v15  ;;  %v809_v18 = vadd.f32 %v807_v14, %v6289_v51 }
 0x3fc   :  { %v811_v21 = vsel %vm270_vm0, %v809_v18, -inf  ;;  %v709_v22 = vadd.f32 %v707_v17, %v6289_v51 }
 0x3fd   :  { %812 = vmax.xlane.f32.xlu1 %v811_v21 }
 0x3fe   :  { %v711_v23 = vsel %vm270_vm0, %v709_v22, -inf }
 0x3ff   :  { %v804_v25 = vpop.f32.mrf.mxu2  ;;  %712 = vmax.xlane.f32.xlu2 %v711_v23 }
 0x400   :  { %v808_v26 = vmul.f32 0.35355338, %v804_v25 }
 0x401   :  { %v704_v27 = vpop.f32.mrf.mxu0 }
 0x402   :  { %v708_v29 = vmul.f32 0.35355338, %v704_v27  ;;  %v810_v30 = vadd.f32 %v808_v26, %v6304_v3 }
 0x404   :  { %v814_v31 = vsel %vm270_vm0, %v810_v30, -inf  ;;  %v710_v32 = vadd.f32 %v708_v29, %v6304_v3 }
 0x405   :  { %815 = vmax.xlane.f32.xlu0 %v814_v31 }
 0x406   :  { %v714_v33 = vsel %vm270_vm0, %v710_v32, -inf }
 0x407   :  { %715 = vmax.xlane.f32.xlu1 %v714_v33 }
 0x40d   :  { %528 = vadd.xlane.f32.xlu0 %v527_v35 }
 0x420   :  { %5229 = vrot.lane.b32.xlu1 %v6268_v43, %s5989_s15 }
 0x428   :  { %5239 = vrot.lane.b32.xlu1 %v6268_v43, %s5991_s28 }
 0x45c   :  { %v611_v36 = vpop.xlane.xlu2 %610 }
 0x45d   :  { %v615_v37 = vsub.f32 %v607_v0, %v611_v36 }
 0x45f   :  { %v617_v38 = vmul.f32 1.442695, %v615_v37 }
 0x461   :  { %5387 = vpow2.f32 %v617_v38 }
 0x464   :  { %v614_v39 = vpop.xlane.xlu0 %613  ;;  %v520_v40 = vpop.xlane.xlu2 %519 }
 0x465   :  { %v616_v41 = vsub.f32 %v608_v9, %v614_v39  ;;  %v522_v42 = vsub.f32 %v514_v7, %v520_v40 }
 0x467   :  { %v5388_v44 = vpop.eup %5387  ;;  %v619_v45 = vmul.f32 1.442695, %v616_v41  ;;  %v525_v46 = vmul.f32 1.442695, %v522_v42 }
 0x468   :  { %v621_v47 = vsel %vm270_vm0, %v5388_v44, 0.0 }
 0x469   :  { %5389 = vpow2.f32 %v619_v45  ;;  %622 = vadd.xlane.f32.xlu2 %v621_v47 }
 0x46a   :  { %5391 = vpow2.f32 %v525_v46 }
 0x46f   :  { %v5390_v48 = vpop.eup %5389 }
 0x470   :  { %v5392_v49 = vpop.eup %5391  ;;  %v813_v50 = vpop.xlane.xlu1 %812  ;;  %v624_v52 = vsel %vm270_vm0, %v5390_v48, 0.0 }
 0x471   :  { %v817_v53 = vsub.f32 %v809_v18, %v813_v50  ;;  %625 = vadd.xlane.f32.xlu2 %v624_v52  ;;  %v530_v54 = vsel %vm270_vm0, %v5392_v49, 0.0 }
 0x472   :  { %531 = vadd.xlane.f32.xlu0 %v530_v54  ;;  %v713_v55 = vpop.xlane.xlu2 %712 }
 0x473   :  { %v819_v56 = vmul.f32 1.442695, %v817_v53  ;;  %v717_v57 = vsub.f32 %v709_v22, %v713_v55 }
 0x475   :  { %5393 = vpow2.f32 %v819_v56  ;;  %v719_v58 = vmul.f32 1.442695, %v717_v57  ;;  %v902_v57 = vld [vmem:[#allocation14 + $0x18] sm:$0xff] }
 0x476   :  { %925 = vmatpush.msrb.mxu0 %v902_v57 }
 0x477   :  { %5395 = vpow2.f32 %v719_v58  ;;  %v901_v58 = vld [vmem:[#allocation14 + $0x10] sm:$0xff] }
 0x478   :  { %v816_v59 = vpop.xlane.xlu0 %815  ;;  %926 = vmatpush.msrb.mxu0 %v901_v58 }
 0x479   :  { %v818_v60 = vsub.f32 %v810_v30, %v816_v59  ;;  %v900_v59 = vld [vmem:[#allocation14 + $0x8] sm:$0xff] }
 0x47a   :  { %v716_v61 = vpop.xlane.xlu1 %715  ;;  %927 = vmatpush.msrb.mxu0 %v900_v59 }
 0x47b   :  { %v5394_v62 = vpop.eup %5393  ;;  %v821_v63 = vmul.f32 1.442695, %v818_v60  ;;  %v718_v2 = vsub.f32 %v710_v32, %v716_v61  ;;  %v899_v60 = vld [vmem:[#allocation14] sm:$0xff] }
 0x47c   :  { %v823_v0 = vsel %vm270_vm0, %v5394_v62, 0.0  ;;  %928 = vmatpush.msrb.mxu0 %v899_v60 }
 0x47d   :  { %v5396_v1 = vpop.eup %5395  ;;  %5397 = vpow2.f32 %v821_v63  ;;  %824 = vadd.xlane.f32.xlu2 %v823_v0  ;;  %v721_v7 = vmul.f32 1.442695, %v718_v2 }
 0x47e   :  { %v723_v4 = vsel %vm270_vm0, %v5396_v1, 0.0 }
 0x47f   :  { %724 = vadd.xlane.f32.xlu0 %v723_v4 }
 0x480   :  { %v529_v5 = vpop.xlane.xlu0 %528 }
 0x481   :  { %5399 = vrcp.f32 %v529_v5 }
 0x482   :  { %5401 = vpow2.f32 %v721_v7 }
 0x483   :  { %v5398_v9 = vpop.eup %5397 }
 0x484   :  { %v826_v10 = vsel %vm270_vm0, %v5398_v9, 0.0 }
 0x487   :  { %v5400_v11 = vpop.eup %5399  ;;  %827 = vadd.xlane.f32.xlu0 %v826_v10 }
 0x488   :  { %v535_v12 = vmul.f32 %v5400_v11, %v5386_v34  ;;  %v5402_v13 = vpop.eup %5401 }
 0x489   :  { %v726_v14 = vsel %vm270_vm0, %v5402_v13, 0.0 }
 0x48a   :  { %4920 = vmatmul.msk.f32.vlgmr.msrb.gmra.mxu1 %vm270_vm0, %v535_v12  ;;  %v5324_v12 = vld [vmem:[#allocation16] ss:$0 sm:$0xff] }
 0x48f   :  { %727 = vadd.xlane.f32.xlu0 %v726_v14 }
 0x492   :  { %v5230_v15 = vpop.permute.xlu1 %5229 }
 0x493   :  { %v5231_v17 = vunpack.i.l.bf16 %v5230_v15  ;;  %v5232_v18 = vunpack.i.h.bf16 %v5230_v15 }
 0x495   :  { %5234 = vrot.lane.b32.xlu2 %v6268_v43, %s5990_s17  ;;  %659 = vmatpush.msra.mxu3 %v5231_v17 }
 0x497   :  { %660 = vmatpush.msra.mxu3 %v5232_v18 }
 0x49a   :  { %v5240_v19 = vpop.permute.xlu1 %5239 }
 0x49b   :  { %v5241_v21 = vunpack.i.l.bf16 %v5240_v19  ;;  %v5242_v22 = vunpack.i.h.bf16 %v5240_v19 }
 0x49d   :  { %759 = vmatpush.msra.mxu1 %v5241_v21 }
 0x49f   :  { %760 = vmatpush.msra.mxu1 %v5242_v22 }
 0x4dc   :  { %v623_v23 = vpop.xlane.xlu2 %622 }
 0x4dd   :  { %5403 = vrcp.f32 %v623_v23 }
 0x4e3   :  { %v5404_v24 = vpop.eup %5403 }
 0x4e4   :  { %v629_v25 = vmul.f32 %v5404_v24, %v5388_v44  ;;  %v626_v26 = vpop.xlane.xlu2 %625 }
 0x4e5   :  { %5405 = vrcp.f32 %v626_v26  ;;  %v532_v27 = vpop.xlane.xlu0 %531 }
 0x4e6   :  { %5407 = vrcp.f32 %v532_v27  ;;  %4926 = vmatmul.msk.f32.vlgmr.msra.gmra.mxu3 %vm270_vm0, %v629_v25 }
 0x4eb   :  { %v5406_v29 = vpop.eup %5405 }
 0x4ec   :  { %v5408_v30 = vpop.eup %5407  ;;  %v630_v43 = vmul.f32 %v5406_v29, %v5390_v48 }
 0x4ed   :  { %v536_v31 = vmul.f32 %v5408_v30, %v5392_v49 }
 0x4ee   :  { %4927 = vmatmul.msk.f32.gmra.mxu3 %vm270_vm0, %v630_v43 }
 0x4ef   :  { %4921 = vmatmul.msk.f32.gmra.mxu1 %vm270_vm0, %v536_v31  ;;  %v1005_v31 = vld [vmem:[%s7417_s19 + $0x18] sm:$0xff] }
 0x4f0   :  { %v825_v32 = vpop.xlane.xlu2 %824  ;;  %1028 = vmatpush.msrb.mxu1 %v1005_v31 }
 0x4f1   :  { %5409 = vrcp.f32 %v825_v32  ;;  %v1004_v32 = vld [vmem:[%s7417_s19 + $0x10] sm:$0xff] }
 0x4f2   :  { %v725_v33 = vpop.xlane.xlu0 %724  ;;  %1029 = vmatpush.msrb.mxu1 %v1004_v32 }
 0x4f3   :  { %5411 = vrcp.f32 %v725_v33  ;;  %v1003_v33 = vld [vmem:[%s7417_s19 + $0x8] sm:$0xff] }
 0x4f4   :  { %1030 = vmatpush.msrb.mxu1 %v1003_v33 }
 0x4f7   :  { %v5410_v34 = vpop.eup %5409 }
 0x4f8   :  { %v5235_v35 = vpop.permute.xlu2 %5234  ;;  %v831_v41 = vmul.f32 %v5410_v34, %v5394_v62  ;;  %v1002_v34 = vld [vmem:[%s7417_s19] sm:$0xff] }
 0x4f9   :  { %v5412_v36 = vpop.eup %5411  ;;  %v5236_v37 = vunpack.i.l.bf16 %v5235_v35  ;;  %v5237_v40 = vunpack.i.h.bf16 %v5235_v35  ;;  %1031 = vmatpush.msrb.mxu1 %v1002_v34 }
 0x4fa   :  { %v731_v38 = vmul.f32 %v5412_v36, %v5396_v1  ;;  %v828_v39 = vpop.xlane.xlu0 %827 }
 0x4fb   :  { %5413 = vrcp.f32 %v828_v39  ;;  %859 = vmatpush.msrb.mxu3 %v5236_v37 }
 0x4fc   :  { %4932 = vmatmul.msk.f32.vlgmr.msra.gmra.mxu1 %vm270_vm0, %v731_v38 }
 0x4fd   :  { %860 = vmatpush.msrb.mxu3 %v5237_v40 }
 0x4fe   :  { %4938 = vmatmul.msk.f32.vlgmr.msrb.gmra.mxu3 %vm270_vm0, %v831_v41 }
 0x501   :  { %v5414_v42 = vpop.eup %5413 }
 0x502   :  { %v728_v44 = vpop.xlane.xlu0 %727  ;;  %v832_v45 = vmul.f32 %v5414_v42, %v5398_v9 }
 0x503   :  { %5415 = vrcp.f32 %v728_v44  ;;  %v1048_v44 = vld [vmem:[%s7419_s21 + $0x38] sm:$0xff] }
 0x504   :  { %1068 = vmatpush.msra.mxu2 %v1048_v44 }
 0x506   :  { %4939 = vmatmul.msk.f32.gmra.mxu3 %vm270_vm0, %v832_v45  ;;  %v1047_v45 = vld [vmem:[%s7419_s21 + $0x30] sm:$0xff] }
 0x507   :  { %v560_v48 = vpop.f32.mrf.mxu1  ;;  %1069 = vmatpush.msra.mxu2 %v1047_v45 }
 0x509   :  { %v5416_v46 = vpop.eup %5415 }
 0x50a   :  { %v732_v47 = vmul.f32 %v5416_v46, %v5402_v13 }
 0x50c   :  { %4933 = vmatmul.msk.f32.gmra.mxu1 %vm270_vm0, %v732_v47  ;;  %v1046_v47 = vld [vmem:[%s7419_s21 + $0x28] sm:$0xff] }
 0x50d   :  { %1070 = vmatpush.msra.mxu2 %v1046_v47  ;;  %v4949_v47 = vld [vmem:[%s7409_s11 + $0x38] sm:$0xff] }
 0x50e   :  { %1177 = vmatpush.msra.mxu3 %v4949_v47 }
 0x569   :  { %v662_v49 = vpop.f32.mrf.mxu3 }
 0x56a   :  { %870 = vrot.lane.b32.xlu1 %v662_v49, %s5977_s5 }
 0x56c   :  { %v563_v50 = vpop.f32.mrf.mxu1 }
 0x571   :  { %v665_v52 = vpop.f32.mrf.mxu3 }
 0x572   :  { %872 = vrot.lane.b32.xlu2 %v665_v52, %s5977_s5 }
 0x579   :  { %v762_v53 = vpop.f32.mrf.mxu1 }
 0x57a   :  { %878 = vrot.lane.b32.xlu0 %v762_v53, %s5972_s6 }
 0x581   :  { %v862_v54 = vpop.f32.mrf.mxu3 }
 0x582   :  { %886 = vrot.lane.b32.xlu1 %v862_v54, %s5992_s20  ;;  %v1044_v54 = vld [vmem:[%s7419_s21 + $0x18] sm:$0xff] }
 0x589   :  { %v765_v55 = vpop.f32.mrf.mxu1  ;;  %v865_v56 = vpop.f32.mrf.mxu3 }
 0x58a   :  { %880 = vrot.lane.b32.xlu1 %v765_v55, %s5972_s6  ;;  %888 = vrot.lane.b32.xlu2 %v865_v56, %s5992_s20 }
 0x5cc   :  { %v873_v2 = vpop.permute.xlu2 %872 }
 0x5cd   :  { %v893_v5 = vsel %vm475_vm9, %v563_v50, %v873_v2  ;;  %v1045_v50 = vld [vmem:[%s7419_s21 + $0x20] sm:$0xff] }
 0x5ce   :  { %1071 = vmatpush.msra.mxu2 %v1045_v50  ;;  %v4948_v50 = vld [vmem:[%s7409_s11 + $0x30] sm:$0xff] }
 0x5cf   :  { %1178 = vmatpush.msra.mxu3 %v4948_v50  ;;  %v5333_v50 = vld [vmem:[#allocation8 + $0x1] ss:$0 sm:$0xff] }
 0x5d0   :  { %1072 = vmatpush.msra.mxu2 %v1044_v54  ;;  %v4947_v54 = vld [vmem:[%s7409_s11 + $0x28] sm:$0xff] }
 0x5d1   :  { %1179 = vmatpush.msra.mxu3 %v4947_v54 }
 0x5dc   :  { %v871_v61 = vpop.permute.xlu1 %870 }
 0x5dd   :  { %v892_v63 = vsel %vm475_vm9, %v560_v48, %v871_v61 }
 0x5e4   :  { %v889_v9 = vpop.permute.xlu2 %888 }
 0x5ec   :  { %v879_v62 = vpop.permute.xlu0 %878 }
 0x5ed   :  { %v894_v0 = vsel %vm270_vm0, %v892_v63, %v879_v62  ;;  %v5325_v62 = vld [vmem:[#allocation5 + $0x1] ss:$0 sm:$0xff] }
 0x5f4   :  { %v887_v1 = vpop.permute.xlu1 %886 }
 0x5f5   :  { %v897_v4 = vsel %vm896_vm10, %v894_v0, %v887_v1 }
 0x5f6   :  { %4940 = vmatmul.msk.f32.vlgmr.msrb.gmra.mxu0 %vm306_vm3, %v897_v4  ;;  %v5326_v4 = vld [vmem:[#allocation7 + $0x1] ss:$0 sm:$0xff] }
 0x5fc   :  { %v881_v7 = vpop.permute.xlu1 %880 }
 0x5fd   :  { %v895_v10 = vsel %vm270_vm0, %v893_v5, %v881_v7 }
 0x5fe   :  { %v898_v11 = vsel %vm896_vm10, %v895_v10, %v889_v9 }
 0x5ff   :  { %4941 = vmatmul.msk.f32.gmra.mxu0 %vm306_vm3, %v898_v11 }
 0x673   :  { %v930_v13 = vpop.f32.mrf.mxu0 }
 0x674   :  { %v931_v14 = vadd.f32 %v5324_v12, %v930_v13 }
 0x676   :  { %v6355_v15 = vadd.f32 %v931_v14, %v6210_v20 }
 0x678   :  { %v938_v17 = vsel %vm306_vm3, %v6355_v15, 0.0 }
 0x679   :  { %939 = vadd.xlane.f32.xlu1 %v938_v17 }
 0x67c   :  { %v933_v18 = vpop.f32.mrf.mxu0 }
 0x67d   :  { %v934_v19 = vadd.f32 %v5324_v12, %v933_v18 }
 0x67f   :  { %v6360_v21 = vadd.f32 %v934_v19, %v6203_v16  ;;  %v1043_v19 = vld [vmem:[%s7419_s21 + $0x10] sm:$0xff] }
 0x680   :  { %1073 = vmatpush.msra.mxu2 %v1043_v19 }
 0x681   :  { %v941_v22 = vsel %vm306_vm3, %v6360_v21, 0.0 }
 0x682   :  { %942 = vadd.xlane.f32.xlu0 %v941_v22  ;;  %v1042_v22 = vld [vmem:[%s7419_s21 + $0x8] sm:$0xff] }
 0x683   :  { %1074 = vmatpush.msra.mxu2 %v1042_v22 }
 0x6ec   :  { %v940_v23 = vpop.xlane.xlu1 %939 }
 0x6ed   :  { %v944_v24 = vmul.f32 %v940_v23, %v6214_v28  ;;  %v1041_v23 = vld [vmem:[%s7419_s21] sm:$0xff] }
 0x6ee   :  { %1075 = vmatpush.msra.mxu2 %v1041_v23  ;;  %v5329_v23 = vld [vmem:[#allocation5 + $0x2] ss:$0 sm:$0xff] }
 0x6ef   :  { %v946_v25 = vsub.f32 %v6355_v15, %v944_v24  ;;  %v5327_v24 = vld [vmem:[#allocation17] ss:$0 sm:$0xff] }
 0x6f1   :  { %v948_v20 = vmul.f32 %v946_v25, %v946_v25  ;;  %v991_v2 = vmul.f32 %v5325_v62, %v946_v25 }
 0x6f3   :  { %v950_v26 = vsel %vm306_vm3, %v948_v20, 0.0 }
 0x6f4   :  { %951 = vadd.xlane.f32.xlu2 %v950_v26 }
 0x6f5   :  { %v943_v27 = vpop.xlane.xlu0 %942 }
 0x6f6   :  { %v945_v29 = vmul.f32 %v943_v27, %v6214_v28 }
 0x6f8   :  { %v6369_v30 = vsub.f32 %v6360_v21, %v945_v29 }
 0x6fa   :  { %v949_v16 = vmul.f32 %v6369_v30, %v6369_v30  ;;  %v992_v13 = vmul.f32 %v5325_v62, %v6369_v30 }
 0x6fc   :  { %v953_v43 = vsel %vm306_vm3, %v949_v16, 0.0  ;;  %v5328_v16 = vld [vmem:[#allocation19] ss:$0 sm:$0xff] }
 0x6fd   :  { %954 = vadd.xlane.f32.xlu1 %v953_v43 }
 0x767   :  { %v952_v35 = vpop.xlane.xlu2 %951 }
 0x768   :  { %v956_v36 = vmul.f32 0.032258064, %v952_v35 }
 0x76a   :  { %5417 = vrsqrt.f32 %v956_v36  ;;  %vm965_vm11 = vcmp.eq.f32.partialorder %v956_v36, inf  ;;  %v968_v55 = vand.u32 2147483648, %v956_v36  ;;  %vm967_vm12 = vcmp.eq.f32.partialorder %v956_v36, 0.0 }
 0x770   :  { %v5418_v37 = vpop.eup %5417  ;;  %v955_v38 = vpop.xlane.xlu1 %954 }
 0x771   :  { %v959_v39 = vmul.f32 %v5418_v37, %v956_v36  ;;  %v957_v40 = vmul.f32 0.032258064, %v955_v38 }
 0x773   :  { %v960_v41 = vmul.f32 %v5418_v37, %v959_v39  ;;  %5419 = vrsqrt.f32 %v957_v40  ;;  %vm977_vm13 = vcmp.eq.f32.partialorder %v957_v40, inf  ;;  %v980_v1 = vand.u32 2147483648, %v957_v40 }
 0x774   :  { %vm979_vm14 = vcmp.eq.f32.partialorder %v957_v40, 0.0 }
 0x775   :  { %v961_v42 = vmul.f32 0.5, %v960_v41 }
 0x777   :  { %v962_v46 = vsub.f32 1.5, %v961_v42 }
 0x779   :  { %v5420_v48 = vpop.eup %5419  ;;  %v963_v49 = vmul.f32 %v5418_v37, %v962_v46 }
 0x77a   :  { %v971_v52 = vmul.f32 %v5420_v48, %v957_v40 }
 0x77b   :  { %v964_v53 = vmul.f32 %v963_v49, %v956_v36  ;;  %v1225_v49 = vld [vmem:[#allocation11 + $0x38] sm:$0xff] }
 0x77c   :  { %v972_v56 = vmul.f32 %v5420_v48, %v971_v52  ;;  %v4954_v52 = vld [vmem:[%s7411_s13 + $0x30] sm:$0xff]  ;;  %1243 = vmatpush.msra.mxu1 %v1225_v49 }
 0x77d   :  { %v966_v57 = vsel %vm965_vm11, %v956_v36, %v964_v53  ;;  %v1224_v53 = vld [vmem:[#allocation11 + $0x30] sm:$0xff] }
 0x77e   :  { %v969_v58 = vsel %vm967_vm12, %v968_v55, %v966_v57  ;;  %v973_v59 = vmul.f32 0.5, %v972_v56  ;;  %v4953_v55 = vld [vmem:[%s7411_s13 + $0x28] sm:$0xff]  ;;  %v1223_v56 = vld [vmem:[#allocation11 + $0x28] sm:$0xff]  ;;  %1244 = vmatpush.msra.mxu1 %v1224_v53 }
 0x77f   :  { %v982_v60 = vadd.f32 1e-06, %v969_v58  ;;  %v4946_v57 = vld [vmem:[%s7409_s11 + $0x20] sm:$0xff] }
 0x780   :  { %v974_v61 = vsub.f32 1.5, %v973_v59  ;;  %v4952_v58 = vld [vmem:[%s7411_s13 + $0x20] sm:$0xff]  ;;  %v1222_v59 = vld [vmem:[#allocation11 + $0x20] sm:$0xff]  ;;  %1245 = vmatpush.msra.mxu1 %v1223_v56  ;;  %1180 = vmatpush.msra.mxu3 %v4946_v57 }
 0x781   :  { %5421 = vrcp.f32 %v982_v60 }
 0x782   :  { %v975_v63 = vmul.f32 %v5420_v48, %v974_v61  ;;  %v4955_v48 = vld [vmem:[%s7411_s13 + $0x38] sm:$0xff]  ;;  %1246 = vmatpush.msra.mxu1 %v1222_v59 }
 0x783   :  { %1210 = vmatpush.msra.mxu0 %v4955_v48 }
 0x784   :  { %v976_v0 = vmul.f32 %v975_v63, %v957_v40 }
 0x785   :  { %1211 = vmatpush.msra.mxu0 %v4954_v52 }
 0x786   :  { %v978_v5 = vsel %vm977_vm13, %v957_v40, %v976_v0 }
 0x787   :  { %v5422_v7 = vpop.eup %5421  ;;  %v981_v9 = vsel %vm979_vm14, %v980_v1, %v978_v5  ;;  %1212 = vmatpush.msra.mxu0 %v4953_v55 }
 0x788   :  { %v993_v10 = vmul.f32 %v5422_v7, %v991_v2  ;;  %v983_v11 = vadd.f32 1e-06, %v981_v9 }
 0x789   :  { %1213 = vmatpush.msra.mxu0 %v4952_v58 }
 0x78a   :  { %v1000_v12 = vadd.f32 %v5326_v4, %v993_v10  ;;  %5423 = vrcp.f32 %v983_v11 }
 0x78c   :  { %4942 = vmatmul.msk.f32.vlgmr.msrb.gmra.mxu1 %vm306_vm3, %v1000_v12 }
 0x790   :  { %v5424_v14 = vpop.eup %5423 }
 0x791   :  { %v994_v17 = vmul.f32 %v5424_v14, %v992_v13 }
 0x793   :  { %v1001_v18 = vadd.f32 %v5326_v4, %v994_v17 }
 0x795   :  { %4943 = vmatmul.msk.f32.gmra.mxu1 %vm306_vm3, %v1001_v18 }
 0x809   :  { %v1033_v25 = vpop.f32.mrf.mxu1 }
 0x80a   :  { %v1034_v20 = vadd.f32 %v5327_v24, %v1033_v25 }
 0x80c   :  { %v1039_v26 = vmax.f32 %v1034_v20, 0.0 }
 0x80e   :  { %4944 = vmatmul.msk.f32.vlgmr.msra.gmra.mxu2 %vm1053_vm15, %v1039_v26 }
 0x812   :  { %v1036_v27 = vpop.f32.mrf.mxu1 }
 0x813   :  { %v1037_v29 = vadd.f32 %v5327_v24, %v1036_v27  ;;  %v5330_v27 = vld [vmem:[#allocation7 + $0x2] ss:$0 sm:$0xff] }
 0x815   :  { %v1040_v30 = vmax.f32 %v1037_v29, 0.0 }
 0x817   :  { %4945 = vmatmul.msk.f32.gmra.mxu2 %vm1053_vm15, %v1040_v30 }
 0x891   :  { %v1077_v43 = vpop.f32.mrf.mxu2 }
 0x892   :  { %v1078_v31 = vadd.f32 %v5328_v16, %v1077_v43 }
 0x894   :  { %v6416_v32 = vadd.f32 %v1078_v31, %v6355_v15 }
 0x896   :  { %v1085_v33 = vsel %vm306_vm3, %v6416_v32, 0.0 }
 0x897   :  { %1086 = vadd.xlane.f32.xlu0 %v1085_v33 }
 0x89a   :  { %v1080_v34 = vpop.f32.mrf.mxu2 }
 0x89b   :  { %v1081_v35 = vadd.f32 %v5328_v16, %v1080_v34 }
 0x89d   :  { %v6421_v36 = vadd.f32 %v1081_v35, %v6360_v21 }
 0x89f   :  { %v1088_v37 = vsel %vm306_vm3, %v6421_v36, 0.0 }
 0x8a0   :  { %1089 = vadd.xlane.f32.xlu2 %v1088_v37 }
 0x90a   :  { %v1087_v38 = vpop.xlane.xlu0 %1086 }
 0x90b   :  { %v1091_v39 = vmul.f32 %v1087_v38, %v6214_v28 }
 0x90d   :  { %v6427_v40 = vsub.f32 %v6416_v32, %v1091_v39  ;;  %v5331_v39 = vld [vmem:[#allocation10 + $0x1] ss:$0 sm:$0xff] }
 0x90f   :  { %v1095_v15 = vmul.f32 %v6427_v40, %v6427_v40  ;;  %v1138_v26 = vmul.f32 %v5329_v23, %v6427_v40 }
 0x911   :  { %v1097_v41 = vsel %vm306_vm3, %v1095_v15, 0.0 }
 0x912   :  { %1098 = vadd.xlane.f32.xlu1 %v1097_v41 }
 0x913   :  { %v1090_v42 = vpop.xlane.xlu2 %1089 }
 0x914   :  { %v1092_v21 = vmul.f32 %v1090_v42, %v6214_v28  ;;  %v5332_v42 = vld [vmem:[#allocation13 + $0x1] ss:$0 sm:$0xff] }
 0x916   :  { %v6434_v44 = vsub.f32 %v6421_v36, %v1092_v21 }
 0x918   :  { %v1096_v45 = vmul.f32 %v6434_v44, %v6434_v44  ;;  %v1139_v34 = vmul.f32 %v5329_v23, %v6434_v44 }
 0x91a   :  { %v1100_v46 = vsel %vm306_vm3, %v1096_v45, 0.0 }
 0x91b   :  { %1101 = vadd.xlane.f32.xlu0 %v1100_v46 }
 0x985   :  { %v1099_v60 = vpop.xlane.xlu1 %1098 }
 0x986   :  { %v1103_v61 = vmul.f32 0.032258064, %v1099_v60 }
 0x988   :  { %5425 = vrsqrt.f32 %v1103_v61  ;;  %vm1112_vm1 = vcmp.eq.f32.partialorder %v1103_v61, inf  ;;  %v1115_v12 = vand.u32 2147483648, %v1103_v61  ;;  %vm1114_vm2 = vcmp.eq.f32.partialorder %v1103_v61, 0.0 }
 0x98e   :  { %v5426_v62 = vpop.eup %5425  ;;  %v1102_v63 = vpop.xlane.xlu0 %1101 }
 0x98f   :  { %v1106_v0 = vmul.f32 %v5426_v62, %v1103_v61  ;;  %v1104_v1 = vmul.f32 0.032258064, %v1102_v63 }
 0x991   :  { %v1107_v2 = vmul.f32 %v5426_v62, %v1106_v0  ;;  %5427 = vrsqrt.f32 %v1104_v1  ;;  %vm1124_vm4 = vcmp.eq.f32.partialorder %v1104_v1, inf  ;;  %v1127_v20 = vand.u32 2147483648, %v1104_v1 }
 0x992   :  { %vm1126_vm5 = vcmp.eq.f32.partialorder %v1104_v1, 0.0 }
 0x993   :  { %v1108_v4 = vmul.f32 0.5, %v1107_v2 }
 0x995   :  { %v1109_v5 = vsub.f32 1.5, %v1108_v4 }
 0x997   :  { %v5428_v7 = vpop.eup %5427  ;;  %v1110_v9 = vmul.f32 %v5426_v62, %v1109_v5 }
 0x998   :  { %v1118_v10 = vmul.f32 %v5428_v7, %v1104_v1 }
 0x999   :  { %v1111_v11 = vmul.f32 %v1110_v9, %v1103_v61 }
 0x99a   :  { %v1119_v13 = vmul.f32 %v5428_v7, %v1118_v10 }
 0x99b   :  { %v1113_v14 = vsel %vm1112_vm1, %v1103_v61, %v1111_v11 }
 0x99c   :  { %v1116_v17 = vsel %vm1114_vm2, %v1115_v12, %v1113_v14  ;;  %v1120_v18 = vmul.f32 0.5, %v1119_v13 }
 0x99d   :  { %v1129_v19 = vadd.f32 1e-06, %v1116_v17 }
 0x99e   :  { %v1121_v22 = vsub.f32 1.5, %v1120_v18 }
 0x99f   :  { %5429 = vrcp.f32 %v1129_v19 }
 0x9a0   :  { %v1122_v24 = vmul.f32 %v5428_v7, %v1121_v22 }
 0x9a2   :  { %v1123_v25 = vmul.f32 %v1122_v24, %v1104_v1 }
 0x9a4   :  { %v1125_v29 = vsel %vm1124_vm4, %v1104_v1, %v1123_v25 }
 0x9a5   :  { %v5430_v30 = vpop.eup %5429  ;;  %v1128_v16 = vsel %vm1126_vm5, %v1127_v20, %v1125_v29 }
 0x9a6   :  { %v1140_v43 = vmul.f32 %v5430_v30, %v1138_v26  ;;  %v1130_v31 = vadd.f32 1e-06, %v1128_v16 }
 0x9a8   :  { %v1147_v33 = vadd.f32 %v5330_v27, %v1140_v43  ;;  %5431 = vrcp.f32 %v1130_v31 }
 0x9aa   :  { %4950 = vmatmul.msk.f32.vlgmr.msra.gmra.mxu3 %vm306_vm3, %v1147_v33  ;;  %4956 = vmatmul.msk.f32.vlgmr.msra.gmra.mxu0 %vm306_vm3, %v1147_v33 }
 0x9ab   :  { %4958 = vmatmul.msk.f32.vlgmr.msra.gmra.mxu1 %vm306_vm3, %v1147_v33 }
 0x9ae   :  { %v5432_v35 = vpop.eup %5431 }
 0x9af   :  { %v1141_v37 = vmul.f32 %v5432_v35, %v1139_v34 }
 0x9b1   :  { %v1148_v38 = vadd.f32 %v5330_v27, %v1141_v37 }
 0x9b3   :  { %4951 = vmatmul.msk.f32.gmra.mxu3 %vm306_vm3, %v1148_v38  ;;  %4957 = vmatmul.msk.f32.gmra.mxu0 %vm306_vm3, %v1148_v38 }
 0x9b4   :  { %4959 = vmatmul.msk.f32.gmra.mxu1 %vm306_vm3, %v1148_v38 }
 0xa27   :  { %v1215_v40 = vpop.f32.mrf.mxu0 }
 0xa28   :  { %v1216_v15 = vadd.f32 %v5331_v39, %v1215_v40  ;;  %v1248_v41 = vpop.f32.mrf.mxu1 }
 0xa29   :  { %v1249_v44 = vadd.f32 %v5332_v42, %v1248_v41 }
 0xa2a   :  { %1348 = vrot.lane.b32.xlu0 %v1216_v15, %s5989_s15 }
 0xa2d   :  { %v1182_v48 = vpop.f32.mrf.mxu3 }
 0xa2e   :  { %v1183_v52 = vadd.f32 %v5333_v50, %v1182_v48 }
 0xa30   :  { %v1218_v21 = vpop.f32.mrf.mxu0 }
 0xa31   :  { %v1219_v45 = vadd.f32 %v5331_v39, %v1218_v21  ;;  %v1251_v46 = vpop.f32.mrf.mxu1 }
 0xa32   :  { %v1252_v47 = vadd.f32 %v5332_v42, %v1251_v46  ;;  %1450 = vrot.lane.b32.xlu0 %v1216_v15, %s5991_s28 }
 0xa33   :  { %1452 = vrot.lane.b32.xlu1 %v1219_v45, %s5991_s28  ;;  %1350 = vrot.lane.b32.xlu2 %v1219_v45, %s5989_s15 }
 0xa34   :  { %1335 = vmatpush.msrb.mxu3 %v1252_v47  ;;  %4960 = vmatpush.xpose.msk.msrb.mxu2 %vm475_vm9, %v1219_v45  ;;  %v6476_v49 = vpack.i.bf16 %v1249_v44, %v1252_v47 }
 0xa36   :  { %1336 = vmatpush.msrb.mxu3 %v1249_v44  ;;  %v1185_v53 = vpop.f32.mrf.mxu3 }
 0xa37   :  { %v1186_v54 = vadd.f32 %v5333_v50, %v1185_v53 }
 0xa38   :  { %4961 = vmatpush.xpose.msk.msrb.mxu2 %vm475_vm9, %v1216_v15 }
 0xa3a   :  { %1552 = vrot.lane.b32.xlu0 %v1219_v45, %s5990_s17 }
 0xa3b   :  { %4962 = vmatmul.msk.f32.vlgmr.msrb.gmra.mxu2 %vm475_vm9, %v1183_v52  ;;  %1446 = vrot.lane.b32.xlu1 %v1183_v52, %s5991_s28 }
 0xa3c   :  { %1344 = vrot.lane.b32.xlu2 %v1183_v52, %s5989_s15 }
 0xa42   :  { %1546 = vrot.lane.b32.xlu0 %v1183_v52, %s5990_s17 }
 0xa43   :  { %4963 = vmatmul.msk.f32.gmra.mxu2 %vm475_vm9, %v1186_v54  ;;  %1448 = vrot.lane.b32.xlu1 %v1186_v54, %s5991_s28 }
 0xa44   :  { %1346 = vrot.lane.b32.xlu2 %v1186_v54, %s5989_s15 }
 0xa4b   :  { %1548 = vrot.lane.b32.xlu1 %v1186_v54, %s5990_s17 }
 0xa4c   :  { %1550 = vrot.lane.b32.xlu2 %v1216_v15, %s5990_s17 }
 0xa8d   :  { %v1351_v55 = vpop.permute.xlu2 %1350 }
 0xa8e   :  { %4966 = vmatpush.xpose.msk.msrb.mxu0 %vm475_vm9, %v1351_v55 }
 0xa96   :  { %v1345_v56 = vpop.permute.xlu2 %1344 }
 0xa9c   :  { %v1349_v57 = vpop.permute.xlu0 %1348 }
 0xa9d   :  { %4967 = vmatpush.xpose.msk.msrb.mxu0 %vm475_vm9, %v1349_v57 }
 0xa9e   :  { %v1347_v60 = vpop.permute.xlu2 %1346 }
 0xaa0   :  { %4968 = vmatmul.msk.f32.vlgmr.msrb.gmra.mxu0 %vm475_vm9, %v1345_v56 }
 0xaa4   :  { %v1451_v58 = vpop.permute.xlu0 %1450 }
 0xaa5   :  { %v1453_v59 = vpop.permute.xlu1 %1452 }
 0xaa6   :  { %4972 = vmatpush.xpose.msk.msra.mxu2 %vm475_vm9, %v1453_v59  ;;  %v1551_v63 = vpop.permute.xlu2 %1550 }
 0xaa8   :  { %4969 = vmatmul.msk.f32.gmra.mxu0 %vm475_vm9, %v1347_v60 }
 0xaaa   :  { %4973 = vmatpush.xpose.msk.msra.mxu2 %vm475_vm9, %v1451_v58 }
 0xaac   :  { %v1553_v61 = vpop.permute.xlu0 %1552 }
 0xaad   :  { %v1447_v62 = vpop.permute.xlu1 %1446  ;;  %4978 = vmatpush.xpose.msk.msra.mxu0 %vm475_vm9, %v1553_v61 }
 0xaae   :  { %4974 = vmatmul.msk.f32.vlgmr.msra.gmra.mxu2 %vm475_vm9, %v1447_v62 }
 0xab1   :  { %4979 = vmatpush.xpose.msk.msra.mxu0 %vm475_vm9, %v1551_v63 }
 0xab4   :  { %v1547_v0 = vpop.permute.xlu0 %1546 }
 0xab5   :  { %v1449_v1 = vpop.permute.xlu1 %1448  ;;  %4980 = vmatmul.msk.f32.vlgmr.msra.gmra.mxu0 %vm475_vm9, %v1547_v0 }
 0xab6   :  { %4975 = vmatmul.msk.f32.gmra.mxu2 %vm475_vm9, %v1449_v1 }
 0xabd   :  { %v1549_v2 = vpop.permute.xlu1 %1548 }
 0xabe   :  { %v1283_v4 = vpop.f32.mrf.mxu2  ;;  %4981 = vmatmul.msk.f32.gmra.mxu0 %vm475_vm9, %v1549_v2 }
 0xabf   :  { %v1289_v5 = vmul.f32 0.35355338, %v1283_v4 }
 0xac1   :  { %v1291_v7 = vadd.f32 %v1289_v5, %v6289_v51 }
 0xac3   :  { %v1293_v9 = vsel %vm270_vm0, %v1291_v7, -inf }
 0xac4   :  { %1294 = vmax.xlane.f32.xlu2 %v1293_v9 }
 0xac6   :  { %v1286_v10 = vpop.f32.mrf.mxu2 }
 0xac7   :  { %v1290_v11 = vmul.f32 0.35355338, %v1286_v10 }
 0xac9   :  { %v1292_v12 = vadd.f32 %v1290_v11, %v6304_v3 }
 0xacb   :  { %v1296_v13 = vsel %vm270_vm0, %v1292_v12, -inf }
 0xacc   :  { %1297 = vmax.xlane.f32.xlu1 %v1296_v13 }
 0xb1d   :  { %v1377_v14 = vpop.f32.mrf.mxu0 }
 0xb1e   :  { %v1383_v17 = vmul.f32 0.35355338, %v1377_v14 }
 0xb20   :  { %v1385_v18 = vadd.f32 %v1383_v17, %v6289_v51 }
 0xb22   :  { %v1387_v19 = vsel %vm270_vm0, %v1385_v18, -inf }
 0xb23   :  { %1388 = vmax.xlane.f32.xlu0 %v1387_v19 }
 0xb25   :  { %v1380_v22 = vpop.f32.mrf.mxu0 }
 0xb26   :  { %v1384_v23 = vmul.f32 0.35355338, %v1380_v22 }
 0xb28   :  { %v1386_v24 = vadd.f32 %v1384_v23, %v6304_v3 }
 0xb2a   :  { %v1390_v25 = vsel %vm270_vm0, %v1386_v24, -inf }
 0xb2b   :  { %1391 = vmax.xlane.f32.xlu2 %v1390_v25 }
 0xb31   :  { %v1479_v20 = vpop.f32.mrf.mxu2 }
 0xb32   :  { %v1485_v26 = vmul.f32 0.35355338, %v1479_v20  ;;  %v1579_v27 = vpop.f32.mrf.mxu0 }
 0xb33   :  { %v1585_v29 = vmul.f32 0.35355338, %v1579_v27 }
 0xb34   :  { %v1487_v30 = vadd.f32 %v1485_v26, %v6289_v51 }
 0xb35   :  { %v1587_v16 = vadd.f32 %v1585_v29, %v6289_v51 }
 0xb36   :  { %v1489_v43 = vsel %vm270_vm0, %v1487_v30, -inf }
 0xb37   :  { %v1295_v31 = vpop.xlane.xlu2 %1294  ;;  %1490 = vmax.xlane.f32.xlu0 %v1489_v43  ;;  %v1589_v33 = vsel %vm270_vm0, %v1587_v16, -inf }
 0xb38   :  { %v1299_v34 = vsub.f32 %v1291_v7, %v1295_v31  ;;  %1590 = vmax.xlane.f32.xlu1 %v1589_v33 }
 0xb39   :  { %v1482_v35 = vpop.f32.mrf.mxu2 }
 0xb3a   :  { %v1301_v37 = vmul.f32 1.442695, %v1299_v34  ;;  %v1486_v38 = vmul.f32 0.35355338, %v1482_v35 }
 0xb3b   :  { %v1582_v39 = vpop.f32.mrf.mxu0 }
 0xb3c   :  { %5433 = vpow2.f32 %v1301_v37  ;;  %v1586_v40 = vmul.f32 0.35355338, %v1582_v39  ;;  %v1488_v15 = vadd.f32 %v1486_v38, %v6304_v3 }
 0xb3e   :  { %v1492_v41 = vsel %vm270_vm0, %v1488_v15, -inf  ;;  %v1588_v51 = vadd.f32 %v1586_v40, %v6304_v3 }
 0xb3f   :  { %v1298_v42 = vpop.xlane.xlu1 %1297  ;;  %1493 = vmax.xlane.f32.xlu2 %v1492_v41 }
 0xb40   :  { %v1300_v21 = vsub.f32 %v1292_v12, %v1298_v42  ;;  %v1592_v45 = vsel %vm270_vm0, %v1588_v51, -inf }
 0xb41   :  { %1593 = vmax.xlane.f32.xlu0 %v1592_v45 }
 0xb42   :  { %v5434_v46 = vpop.eup %5433  ;;  %v1303_v44 = vmul.f32 1.442695, %v1300_v21 }
 0xb43   :  { %v1305_v47 = vsel %vm270_vm0, %v5434_v46, 0.0 }
 0xb44   :  { %5435 = vpow2.f32 %v1303_v44  ;;  %1306 = vadd.xlane.f32.xlu1 %v1305_v47 }
 0xb4a   :  { %v5436_v48 = vpop.eup %5435 }
 0xb4b   :  { %v1308_v50 = vsel %vm270_vm0, %v5436_v48, 0.0 }
 0xb4c   :  { %1309 = vadd.xlane.f32.xlu0 %v1308_v50 }
 0xb5d   :  { %5244 = vrot.lane.b32.xlu1 %v6476_v49, %s5989_s15 }
 0xb65   :  { %5254 = vrot.lane.b32.xlu1 %v6476_v49, %s5990_s17 }
 0xb96   :  { %v1389_v3 = vpop.xlane.xlu0 %1388 }
 0xb97   :  { %v1393_v52 = vsub.f32 %v1385_v18, %v1389_v3 }
 0xb99   :  { %v1395_v53 = vmul.f32 1.442695, %v1393_v52 }
 0xb9b   :  { %5437 = vpow2.f32 %v1395_v53 }
 0xb9e   :  { %v1392_v54 = vpop.xlane.xlu2 %1391 }
 0xb9f   :  { %v1394_v55 = vsub.f32 %v1386_v24, %v1392_v54 }
 0xba1   :  { %v5438_v56 = vpop.eup %5437  ;;  %v1397_v57 = vmul.f32 1.442695, %v1394_v55 }
 0xba2   :  { %v1399_v58 = vsel %vm270_vm0, %v5438_v56, 0.0 }
 0xba3   :  { %5439 = vpow2.f32 %v1397_v57  ;;  %1400 = vadd.xlane.f32.xlu2 %v1399_v58 }
 0xba9   :  { %v5440_v59 = vpop.eup %5439 }
 0xbaa   :  { %v1491_v60 = vpop.xlane.xlu0 %1490  ;;  %v1402_v61 = vsel %vm270_vm0, %v5440_v59, 0.0 }
 0xbab   :  { %v1495_v62 = vsub.f32 %v1487_v30, %v1491_v60  ;;  %1403 = vadd.xlane.f32.xlu2 %v1402_v61  ;;  %v1591_v0 = vpop.xlane.xlu1 %1590 }
 0xbac   :  { %v1595_v5 = vsub.f32 %v1587_v16, %v1591_v0 }
 0xbad   :  { %v1497_v63 = vmul.f32 1.442695, %v1495_v62  ;;  %v1931_v62 = vld [vmem:[%s7442_s18] sm:$0xff] }
 0xbae   :  { %v1597_v12 = vmul.f32 1.442695, %v1595_v5  ;;  %v1679_v5 = vld [vmem:[#allocation14 + $0x30] sm:$0xff] }
 0xbaf   :  { %5441 = vpow2.f32 %v1497_v63  ;;  %v1932_v63 = vld [vmem:[%s7442_s18 + $0x8] sm:$0xff] }
 0xbb2   :  { %v1494_v1 = vpop.xlane.xlu2 %1493 }
 0xbb3   :  { %v1496_v2 = vsub.f32 %v1488_v15, %v1494_v1  ;;  %v1946_v1 = vld [vmem:[#allocation2 + $0x8] sm:$0xff] }
 0xbb4   :  { %v1594_v10 = vpop.xlane.xlu0 %1593 }
 0xbb5   :  { %v5442_v4 = vpop.eup %5441  ;;  %v1499_v7 = vmul.f32 1.442695, %v1496_v2  ;;  %v1596_v14 = vsub.f32 %v1588_v51, %v1594_v10  ;;  %v1945_v2 = vld [vmem:[#allocation2] sm:$0xff] }
 0xbb6   :  { %v1501_v9 = vsel %vm270_vm0, %v5442_v4, 0.0  ;;  %v1677_v10 = vld [vmem:[#allocation14 + $0x20] sm:$0xff] }
 0xbb7   :  { %5443 = vpow2.f32 %v1499_v7  ;;  %v1307_v11 = vpop.xlane.xlu1 %1306  ;;  %1502 = vadd.xlane.f32.xlu0 %v1501_v9  ;;  %v1599_v23 = vmul.f32 1.442695, %v1596_v14  ;;  %v1678_v7 = vld [vmem:[#allocation14 + $0x28] sm:$0xff] }
 0xbb8   :  { %5445 = vrcp.f32 %v1307_v11 }
 0xbb9   :  { %5447 = vpow2.f32 %v1597_v12 }
 0xbbd   :  { %v5444_v13 = vpop.eup %5443 }
 0xbbe   :  { %v5446_v17 = vpop.eup %5445  ;;  %v1504_v18 = vsel %vm270_vm0, %v5444_v13, 0.0 }
 0xbbf   :  { %v1313_v19 = vmul.f32 %v5446_v17, %v5434_v46  ;;  %v1310_v22 = vpop.xlane.xlu0 %1309  ;;  %1505 = vadd.xlane.f32.xlu0 %v1504_v18  ;;  %v5448_v24 = vpop.eup %5447 }
 0xbc0   :  { %5449 = vrcp.f32 %v1310_v22  ;;  %v1601_v20 = vsel %vm270_vm0, %v5448_v24, 0.0 }
 0xbc1   :  { %4964 = vmatmul.msk.f32.vlgmr.msrb.gmra.mxu3 %vm270_vm0, %v1313_v19  ;;  %5451 = vpow2.f32 %v1599_v23 }
 0xbc3   :  { %5249 = vrot.lane.b32.xlu2 %v6476_v49, %s5991_s28 }
 0xbc6   :  { %v5450_v25 = vpop.eup %5449 }
 0xbc7   :  { %1602 = vadd.xlane.f32.xlu0 %v1601_v20  ;;  %v1314_v26 = vmul.f32 %v5450_v25, %v5436_v48  ;;  %v5452_v27 = vpop.eup %5451 }
 0xbc8   :  { %v1604_v29 = vsel %vm270_vm0, %v5452_v27, 0.0 }
 0xbc9   :  { %4965 = vmatmul.msk.f32.gmra.mxu3 %vm270_vm0, %v1314_v26 }
 0xbcf   :  { %v5245_v30 = vpop.permute.xlu1 %5244  ;;  %1605 = vadd.xlane.f32.xlu0 %v1604_v29 }
 0xbd0   :  { %v5246_v16 = vunpack.i.l.bf16 %v5245_v30  ;;  %v5247_v43 = vunpack.i.h.bf16 %v5245_v30 }
 0xbd2   :  { %1437 = vmatpush.msrb.mxu1 %v5246_v16  ;;  %v1978_v16 = vld [vmem:[%s7443_s27] sm:$0xff] }
 0xbd4   :  { %1438 = vmatpush.msrb.mxu1 %v5247_v43 }
 0xbd7   :  { %v5255_v31 = vpop.permute.xlu1 %5254 }
 0xbd8   :  { %v5256_v33 = vunpack.i.l.bf16 %v5255_v31  ;;  %v5257_v49 = vunpack.i.h.bf16 %v5255_v31 }
 0xbda   :  { %1637 = vmatpush.msra.mxu1 %v5256_v33 }
 0xbdc   :  { %1638 = vmatpush.msra.mxu1 %v5257_v49 }
 0xc16   :  { %v1401_v34 = vpop.xlane.xlu2 %1400 }
 0xc17   :  { %5453 = vrcp.f32 %v1401_v34 }
 0xc1d   :  { %v5454_v35 = vpop.eup %5453 }
 0xc1e   :  { %v1407_v37 = vmul.f32 %v5454_v35, %v5438_v56  ;;  %v1404_v38 = vpop.xlane.xlu2 %1403 }
 0xc1f   :  { %5455 = vrcp.f32 %v1404_v38 }
 0xc20   :  { %4970 = vmatmul.msk.f32.vlgmr.msrb.gmra.mxu1 %vm270_vm0, %v1407_v37 }
 0xc21   :  { %1967 = vmatpush.msrb.mxu1 %v1946_v1  ;;  %v5008_v1 = vld [vmem:[%s7409_s11 + $0x50] sm:$0xff] }
 0xc23   :  { %1968 = vmatpush.msrb.mxu1 %v1945_v2 }
 0xc25   :  { %v5456_v39 = vpop.eup %5455 }
 0xc26   :  { %v5250_v40 = vpop.permute.xlu2 %5249  ;;  %v1408_v15 = vmul.f32 %v5456_v39, %v5440_v59  ;;  %v1979_v39 = vld [vmem:[%s7443_s27 + $0x8] sm:$0xff] }
 0xc27   :  { %v5251_v41 = vunpack.i.l.bf16 %v5250_v40  ;;  %v5252_v51 = vunpack.i.h.bf16 %v5250_v40 }
 0xc28   :  { %4971 = vmatmul.msk.f32.gmra.mxu1 %vm270_vm0, %v1408_v15 }
 0xc29   :  { %1537 = vmatpush.msra.mxu3 %v5251_v41 }
 0xc2a   :  { %v1503_v42 = vpop.xlane.xlu0 %1502 }
 0xc2b   :  { %5457 = vrcp.f32 %v1503_v42  ;;  %1538 = vmatpush.msra.mxu3 %v5252_v51 }
 0xc31   :  { %v5458_v21 = vpop.eup %5457 }
 0xc32   :  { %v1509_v45 = vmul.f32 %v5458_v21, %v5442_v4  ;;  %v1506_v46 = vpop.xlane.xlu0 %1505  ;;  %v1680_v4 = vld [vmem:[#allocation14 + $0x38] sm:$0xff] }
 0xc33   :  { %5459 = vrcp.f32 %v1506_v46  ;;  %1704 = vmatpush.msrb.mxu2 %v1680_v4  ;;  %v5007_v4 = vld [vmem:[%s7409_s11 + $0x48] sm:$0xff] }
 0xc34   :  { %4976 = vmatmul.msk.f32.vlgmr.msra.gmra.mxu3 %vm270_vm0, %v1509_v45 }
 0xc35   :  { %1705 = vmatpush.msrb.mxu2 %v1679_v5  ;;  %v5006_v5 = vld [vmem:[%s7409_s11 + $0x40] sm:$0xff] }
 0xc37   :  { %1706 = vmatpush.msrb.mxu2 %v1678_v7 }
 0xc39   :  { %v5460_v44 = vpop.eup %5459  ;;  %1707 = vmatpush.msrb.mxu2 %v1677_v10  ;;  %v4989_v10 = vld [vmem:[%s7417_s19 + $0x38] sm:$0xff] }
 0xc3a   :  { %v1603_v47 = vpop.xlane.xlu0 %1602  ;;  %v1510_v48 = vmul.f32 %v5460_v44, %v5444_v13  ;;  %1809 = vmatpush.msrb.mxu3 %v4989_v10 }
 0xc3b   :  { %5461 = vrcp.f32 %v1603_v47 }
 0xc3c   :  { %4977 = vmatmul.msk.f32.gmra.mxu3 %vm270_vm0, %v1510_v48 }
 0xc41   :  { %v5462_v50 = vpop.eup %5461 }
 0xc42   :  { %v1609_v3 = vmul.f32 %v5462_v50, %v5448_v24  ;;  %v1606_v52 = vpop.xlane.xlu0 %1605 }
 0xc43   :  { %5463 = vrcp.f32 %v1606_v52 }
 0xc44   :  { %4982 = vmatmul.msk.f32.vlgmr.msra.gmra.mxu1 %vm270_vm0, %v1609_v3  ;;  %v1338_v56 = vpop.f32.mrf.mxu3 }
 0xc49   :  { %v5464_v53 = vpop.eup %5463 }
 0xc4a   :  { %v1610_v54 = vmul.f32 %v5464_v53, %v5452_v27 }
 0xc4c   :  { %4983 = vmatmul.msk.f32.gmra.mxu1 %vm270_vm0, %v1610_v54  ;;  %v1341_v58 = vpop.f32.mrf.mxu3 }
 0xc9d   :  { %v1440_v55 = vpop.f32.mrf.mxu1 }
 0xc9e   :  { %1648 = vrot.lane.b32.xlu1 %v1440_v55, %s5977_s5 }
 0xca5   :  { %v1443_v57 = vpop.f32.mrf.mxu1 }
 0xca6   :  { %1650 = vrot.lane.b32.xlu1 %v1443_v57, %s5977_s5 }
 0xcb7   :  { %v1540_v59 = vpop.f32.mrf.mxu3 }
 0xcb8   :  { %1656 = vrot.lane.b32.xlu2 %v1540_v59, %s5972_s6 }
 0xcbf   :  { %v1543_v60 = vpop.f32.mrf.mxu3 }
 0xcc0   :  { %1658 = vrot.lane.b32.xlu2 %v1543_v60, %s5972_s6 }
 0xcc1   :  { %v1640_v61 = vpop.f32.mrf.mxu1 }
 0xcc2   :  { %1664 = vrot.lane.b32.xlu0 %v1640_v61, %s5992_s20 }
 0xcc8   :  { %1934 = vperm.xlu2 %5258, %v1931_v62  }
 0xcc9   :  { %v1643_v0 = vpop.f32.mrf.mxu1 }
 0xcca   :  { %1937 = vperm.xlu0 %5227, %v1932_v63   ;;  %1666 = vrot.lane.b32.xlu1 %v1643_v0, %s5992_s20  ;;  %v5009_v63 = vld [vmem:[%s7409_s11 + $0x58] sm:$0xff] }
 0xccb   :  { %2074 = vmatpush.msra.mxu2 %v5009_v63 }
 0xccd   :  { %2075 = vmatpush.msra.mxu2 %v5008_v1 }
 0xccf   :  { %2076 = vmatpush.msra.mxu2 %v5007_v4 }
 0xcd1   :  { %2077 = vmatpush.msra.mxu2 %v5006_v5 }
 0xd10   :  { %v1649_v14 = vpop.permute.xlu1 %1648 }
 0xd11   :  { %v1670_v17 = vsel %vm475_vm9, %v1338_v56, %v1649_v14 }
 0xd12   :  { %v1657_v9 = vpop.permute.xlu2 %1656 }
 0xd13   :  { %v1672_v18 = vsel %vm270_vm0, %v1670_v17, %v1657_v9  ;;  %v4986_v17 = vld [vmem:[%s7417_s19 + $0x20] sm:$0xff] }
 0xd18   :  { %v1651_v19 = vpop.permute.xlu1 %1650 }
 0xd19   :  { %v1671_v24 = vsel %vm475_vm9, %v1341_v58, %v1651_v19 }
 0xd1a   :  { %v1659_v11 = vpop.permute.xlu2 %1658 }
 0xd1b   :  { %v1673_v25 = vsel %vm270_vm0, %v1671_v24, %v1659_v11  ;;  %v4988_v11 = vld [vmem:[%s7417_s19 + $0x30] sm:$0xff] }
 0xd1c   :  { %1810 = vmatpush.msrb.mxu3 %v4988_v11 }
 0xd22   :  { %v1935_v12 = vpop.permute.xlu2 %1934 }
 0xd23   :  { %vm1939_vm6 = vcmp.eq.s32.totalorder %v6192_v6, %v1935_v12 }
 0xd24   :  { %v5002_v13 = vsel %vm1939_vm6, 1.0, %v5987_v8 }
 0xd25   :  { %5004 = vmatmul.msk.f32.vlgmr.msrb.gmra.mxu1 %vm270_vm0, %v5002_v13  ;;  %v4987_v13 = vld [vmem:[%s7417_s19 + $0x28] sm:$0xff] }
 0xd26   :  { %1811 = vmatpush.msrb.mxu3 %v4987_v13  ;;  %v5338_v13 = vld [vmem:[#allocation7 + $0x3] ss:$0 sm:$0xff] }
 0xd28   :  { %1812 = vmatpush.msrb.mxu3 %v4986_v17 }
 0xd34   :  { %v1665_v22 = vpop.permute.xlu0 %1664 }
 0xd35   :  { %v1674_v23 = vsel %vm896_vm10, %v1672_v18, %v1665_v22 }
 0xd36   :  { %4984 = vmatmul.msk.f32.vlgmr.msrb.gmra.mxu2 %vm306_vm3, %v1674_v23 }
 0xd3c   :  { %v1667_v20 = vpop.permute.xlu1 %1666  ;;  %v1938_v26 = vpop.permute.xlu0 %1937 }
 0xd3d   :  { %vm1940_vm7 = vcmp.eq.s32.totalorder %v6192_v6, %v1938_v26  ;;  %v1675_v27 = vsel %vm896_vm10, %v1673_v25, %v1667_v20  ;;  %v5334_v6 = vld [vmem:[#allocation16 + $0x1] ss:$0 sm:$0xff] }
 0xd3e   :  { %4985 = vmatmul.msk.f32.gmra.mxu2 %vm306_vm3, %v1675_v27  ;;  %v5003_v29 = vsel %vm1940_vm7, 1.0, %v5987_v8 }
 0xd3f   :  { %5005 = vmatmul.msk.f32.gmra.mxu1 %vm270_vm0, %v5003_v29  ;;  %v6637_v29 = vld [vmem:[#allocation5 + $0x5] ss:$0 sm:$0xff] }
 0xda2   :  { %v1970_v30 = vpop.f32.mrf.mxu1 }
 0xda3   :  { %v1976_v43 = vmul.f32 5.656854, %v1970_v30 }
 0xda5   :  { %v6568_v31 = vadd.f32 %v1978_v16, %v1976_v43 }
 0xda7   :  { %v1982_v33 = vsel %vm306_vm3, %v6568_v31, 0.0 }
 0xda8   :  { %1983 = vadd.xlane.f32.xlu0 %v1982_v33 }
 0xdb9   :  { %v1709_v49 = vpop.f32.mrf.mxu2 }
 0xdba   :  { %v1710_v34 = vadd.f32 %v5334_v6, %v1709_v49 }
 0xdbc   :  { %v6573_v35 = vadd.f32 %v1710_v34, %v6416_v32  ;;  %v1973_v8 = vpop.f32.mrf.mxu1  ;;  %v6640_v34 = vld [vmem:[#allocation7 + $0x5] ss:$0 sm:$0xff] }
 0xdbd   :  { %v1977_v37 = vmul.f32 5.656854, %v1973_v8 }
 0xdbe   :  { %v1717_v38 = vsel %vm306_vm3, %v6573_v35, 0.0 }
 0xdbf   :  { %1718 = vadd.xlane.f32.xlu1 %v1717_v38  ;;  %v6580_v15 = vadd.f32 %v1979_v39, %v1977_v37 }
 0xdc1   :  { %v1712_v40 = vpop.f32.mrf.mxu2  ;;  %v1985_v42 = vsel %vm306_vm3, %v6580_v15, 0.0 }
 0xdc2   :  { %v1713_v41 = vadd.f32 %v5334_v6, %v1712_v40 }
 0xdc4   :  { %v6583_v51 = vadd.f32 %v1713_v41, %v6421_v36 }
 0xdc6   :  { %v1720_v32 = vsel %vm306_vm3, %v6583_v51, 0.0 }
 0xdc7   :  { %1721 = vadd.xlane.f32.xlu2 %v1720_v32  ;;  %1986 = vadd.xlane.f32.xlu1 %v1985_v42  ;;  %v5015_v32 = vld [vmem:[%s7411_s13 + $0x58] sm:$0xff]  ;;  %v5014_v42 = vld [vmem:[%s7411_s13 + $0x50] sm:$0xff] }
 0xdc8   :  { %2107 = vmatpush.msra.mxu3 %v5015_v32  ;;  %v2122_v32 = vld [vmem:[#allocation11 + $0x58] sm:$0xff] }
 0xdca   :  { %2108 = vmatpush.msra.mxu3 %v5014_v42  ;;  %v2121_v42 = vld [vmem:[#allocation11 + $0x50] sm:$0xff] }
 0xe1b   :  { %v1984_v21 = vpop.xlane.xlu0 %1983 }
 0xe1c   :  { %v1988_v45 = vmul.f32 %v1984_v21, %v6214_v28 }
 0xe1e   :  { %v1990_v46 = vsub.f32 %v6568_v31, %v1988_v45  ;;  %v5013_v45 = vld [vmem:[%s7411_s13 + $0x48] sm:$0xff] }
 0xe1f   :  { %2109 = vmatpush.msra.mxu3 %v5013_v45  ;;  %v2119_v45 = vld [vmem:[#allocation11 + $0x40] sm:$0xff] }
 0xe20   :  { %v1992_v44 = vmul.f32 %v1990_v46, %v1990_v46  ;;  %v2035_v33 = vmul.f32 %v6637_v29, %v1990_v46 }
 0xe22   :  { %v1994_v47 = vsel %vm306_vm3, %v1992_v44, 0.0 }
 0xe23   :  { %1995 = vadd.xlane.f32.xlu1 %v1994_v47 }
 0xe32   :  { %v1719_v48 = vpop.xlane.xlu1 %1718 }
 0xe33   :  { %v1723_v36 = vmul.f32 %v1719_v48, %v6214_v28 }
 0xe35   :  { %v6594_v50 = vsub.f32 %v6573_v35, %v1723_v36  ;;  %v5012_v36 = vld [vmem:[%s7411_s13 + $0x40] sm:$0xff] }
 0xe36   :  { %2110 = vmatpush.msra.mxu3 %v5012_v36 }
 0xe37   :  { %v1727_v3 = vmul.f32 %v6594_v50, %v6594_v50 }
 0xe39   :  { %v1729_v52 = vsel %vm306_vm3, %v1727_v3, 0.0 }
 0xe3a   :  { %v1722_v53 = vpop.xlane.xlu2 %1721  ;;  %1730 = vadd.xlane.f32.xlu2 %v1729_v52  ;;  %v1987_v54 = vpop.xlane.xlu1 %1986 }
 0xe3b   :  { %v1724_v55 = vmul.f32 %v1722_v53, %v6214_v28  ;;  %v1989_v56 = vmul.f32 %v1987_v54, %v6214_v28 }
 0xe3d   :  { %v6602_v57 = vsub.f32 %v6583_v51, %v1724_v55  ;;  %v6605_v58 = vsub.f32 %v6580_v15, %v1989_v56 }
 0xe3f   :  { %v1728_v59 = vmul.f32 %v6602_v57, %v6602_v57  ;;  %v1993_v60 = vmul.f32 %v6605_v58, %v6605_v58 }
 0xe41   :  { %v1732_v61 = vsel %vm306_vm3, %v1728_v59, 0.0  ;;  %v1997_v62 = vsel %vm306_vm3, %v1993_v60, 0.0 }
 0xe42   :  { %1733 = vadd.xlane.f32.xlu0 %v1732_v61  ;;  %1998 = vadd.xlane.f32.xlu2 %v1997_v62 }
 0xe96   :  { %v1996_v0 = vpop.xlane.xlu1 %1995 }
 0xe97   :  { %v2000_v2 = vmul.f32 0.032258064, %v1996_v0 }
 0xe99   :  { %5465 = vrsqrt.f32 %v2000_v2  ;;  %vm2009_vm8 = vcmp.eq.f32.partialorder %v2000_v2, inf  ;;  %v2012_v23 = vand.u32 2147483648, %v2000_v2  ;;  %vm2011_vm11 = vcmp.eq.f32.partialorder %v2000_v2, 0.0 }
 0xe9f   :  { %v5466_v7 = vpop.eup %5465 }
 0xea0   :  { %v2003_v9 = vmul.f32 %v5466_v7, %v2000_v2 }
 0xea2   :  { %v2004_v12 = vmul.f32 %v5466_v7, %v2003_v9 }
 0xea4   :  { %v2005_v14 = vmul.f32 0.5, %v2004_v12 }
 0xea6   :  { %v2006_v18 = vsub.f32 1.5, %v2005_v14 }
 0xea8   :  { %v2007_v19 = vmul.f32 %v5466_v7, %v2006_v18 }
 0xeaa   :  { %v2008_v22 = vmul.f32 %v2007_v19, %v2000_v2 }
 0xeac   :  { %v2010_v24 = vsel %vm2009_vm8, %v2000_v2, %v2008_v22  ;;  %v5336_v2 = vld [vmem:[#allocation5 + $0x3] ss:$0 sm:$0xff] }
 0xead   :  { %v1731_v25 = vpop.xlane.xlu2 %1730  ;;  %v2013_v20 = vsel %vm2011_vm11, %v2012_v23, %v2010_v24  ;;  %v1770_v12 = vmul.f32 %v5336_v2, %v6594_v50  ;;  %v1771_v50 = vmul.f32 %v5336_v2, %v6602_v57  ;;  %v4998_v57 = vld [vmem:[%s7419_s21 + $0x70] sm:$0xff] }
 0xeae   :  { %v1735_v26 = vmul.f32 0.032258064, %v1731_v25  ;;  %v2026_v27 = vadd.f32 1e-06, %v2013_v20  ;;  %v2036_v20 = vmul.f32 %v6637_v29, %v6605_v58  ;;  %v4999_v58 = vld [vmem:[%s7419_s21 + $0x78] sm:$0xff]  ;;  %v4997_v29 = vld [vmem:[%s7419_s21 + $0x68] sm:$0xff] }
 0xeaf   :  { %1850 = vmatpush.msrb.mxu0 %v4999_v58 }
 0xeb0   :  { %5467 = vrsqrt.f32 %v1735_v26  ;;  %vm1744_vm12 = vcmp.eq.f32.partialorder %v1735_v26, inf  ;;  %v1747_v54 = vand.u32 2147483648, %v1735_v26  ;;  %vm1746_vm13 = vcmp.eq.f32.partialorder %v1735_v26, 0.0 }
 0xeb1   :  { %5469 = vrcp.f32 %v2026_v27  ;;  %1851 = vmatpush.msrb.mxu0 %v4998_v57 }
 0xeb3   :  { %1852 = vmatpush.msrb.mxu0 %v4997_v29 }
 0xeb5   :  { %v1999_v30 = vpop.xlane.xlu2 %1998  ;;  %v1734_v16 = vpop.xlane.xlu0 %1733 }
 0xeb6   :  { %v5468_v43 = vpop.eup %5467  ;;  %v2001_v6 = vmul.f32 0.032258064, %v1999_v30  ;;  %v1736_v49 = vmul.f32 0.032258064, %v1734_v16 }
 0xeb7   :  { %v5470_v8 = vpop.eup %5469  ;;  %v1738_v37 = vmul.f32 %v5468_v43, %v1735_v26 }
 0xeb8   :  { %5471 = vrsqrt.f32 %v2001_v6  ;;  %v2037_v38 = vmul.f32 %v5470_v8, %v2035_v33  ;;  %vm2021_vm14 = vcmp.eq.f32.partialorder %v2001_v6, inf  ;;  %v2024_v9 = vand.u32 2147483648, %v2001_v6  ;;  %v4993_v8 = vld [vmem:[%s7419_s21 + $0x48] sm:$0xff] }
 0xeb9   :  { %v1739_v39 = vmul.f32 %v5468_v43, %v1738_v37  ;;  %5473 = vrsqrt.f32 %v1736_v49  ;;  %vm1756_vm1 = vcmp.eq.f32.partialorder %v1736_v49, inf  ;;  %v1759_v10 = vand.u32 2147483648, %v1736_v49  ;;  %v4992_v37 = vld [vmem:[%s7419_s21 + $0x40] sm:$0xff] }
 0xeba   :  { %v6643_v40 = vadd.f32 %v6640_v34, %v2037_v38  ;;  %vm2023_vm2 = vcmp.eq.f32.partialorder %v2001_v6, 0.0  ;;  %vm1758_vm4 = vcmp.eq.f32.partialorder %v1736_v49, 0.0  ;;  %v5339_v38 = vld [vmem:[#allocation8 + $0x2] ss:$0 sm:$0xff] }
 0xebb   :  { %v1740_v41 = vmul.f32 0.5, %v1739_v39 }
 0xebc   :  { %5010 = vmatmul.msk.f32.vlgmr.msra.gmra.mxu2 %vm306_vm3, %v6643_v40 }
 0xebd   :  { %v1741_v21 = vsub.f32 1.5, %v1740_v41 }
 0xebe   :  { %v5472_v46 = vpop.eup %5471 }
 0xebf   :  { %v5474_v44 = vpop.eup %5473  ;;  %v1742_v47 = vmul.f32 %v5468_v43, %v1741_v21  ;;  %v2015_v48 = vmul.f32 %v5472_v46, %v2001_v6  ;;  %v2120_v21 = vld [vmem:[#allocation11 + $0x48] sm:$0xff] }
 0xec0   :  { %v1750_v3 = vmul.f32 %v5474_v44, %v1736_v49 }
 0xec1   :  { %v1743_v52 = vmul.f32 %v1742_v47, %v1735_v26  ;;  %v2016_v53 = vmul.f32 %v5472_v46, %v2015_v48 }
 0xec2   :  { %v1751_v55 = vmul.f32 %v5474_v44, %v1750_v3 }
 0xec3   :  { %v1745_v56 = vsel %vm1744_vm12, %v1735_v26, %v1743_v52  ;;  %v2017_v59 = vmul.f32 0.5, %v2016_v53  ;;  %v5341_v53 = vld [vmem:[#allocation10 + $0x2] ss:$0 sm:$0xff] }
 0xec4   :  { %v1748_v60 = vsel %vm1746_vm13, %v1747_v54, %v1745_v56  ;;  %v1752_v61 = vmul.f32 0.5, %v1751_v55 }
 0xec5   :  { %v1761_v62 = vadd.f32 1e-06, %v1748_v60  ;;  %v2018_v63 = vsub.f32 1.5, %v2017_v59 }
 0xec6   :  { %v1753_v0 = vsub.f32 1.5, %v1752_v61 }
 0xec7   :  { %5475 = vrcp.f32 %v1761_v62  ;;  %v2019_v1 = vmul.f32 %v5472_v46, %v2018_v63  ;;  %v5340_v46 = vld [vmem:[#allocation17 + $0x1] ss:$0 sm:$0xff] }
 0xec8   :  { %v1754_v4 = vmul.f32 %v5474_v44, %v1753_v0 }
 0xec9   :  { %v2020_v5 = vmul.f32 %v2019_v1, %v2001_v6 }
 0xeca   :  { %v1755_v7 = vmul.f32 %v1754_v4, %v1736_v49 }
 0xecb   :  { %v2022_v11 = vsel %vm2021_vm14, %v2001_v6, %v2020_v5  ;;  %v4996_v6 = vld [vmem:[%s7419_s21 + $0x60] sm:$0xff] }
 0xecc   :  { %v1757_v14 = vsel %vm1756_vm1, %v1736_v49, %v1755_v7  ;;  %v2025_v17 = vsel %vm2023_vm2, %v2024_v9, %v2022_v11  ;;  %v4995_v49 = vld [vmem:[%s7419_s21 + $0x58] sm:$0xff]  ;;  %1853 = vmatpush.msrb.mxu0 %v4996_v6 }
 0xecd   :  { %v5476_v18 = vpop.eup %5475  ;;  %v1760_v19 = vsel %vm1758_vm4, %v1759_v10, %v1757_v14  ;;  %v2027_v22 = vadd.f32 1e-06, %v2025_v17  ;;  %v5343_v10 = vld [vmem:[#allocation13 + $0x2] ss:$0 sm:$0xff] }
 0xece   :  { %v1772_v23 = vmul.f32 %v5476_v18, %v1770_v12  ;;  %v1762_v24 = vadd.f32 1e-06, %v1760_v19  ;;  %1854 = vmatpush.msrb.mxu0 %v4995_v49 }
 0xecf   :  { %5477 = vrcp.f32 %v2027_v22  ;;  %v248_v22 = vld [vmem:[%s7444_s29] sm:$0xff] }
 0xed0   :  { %v1779_v25 = vadd.f32 %v5338_v13, %v1772_v23  ;;  %5479 = vrcp.f32 %v1762_v24 }
 0xed2   :  { %4990 = vmatmul.msk.f32.vlgmr.msrb.gmra.mxu3 %vm306_vm3, %v1779_v25 }
 0xed5   :  { %v5478_v26 = vpop.eup %5477 }
 0xed6   :  { %v5480_v27 = vpop.eup %5479  ;;  %v2038_v30 = vmul.f32 %v5478_v26, %v2036_v20 }
 0xed7   :  { %v1773_v16 = vmul.f32 %v5480_v27, %v1771_v50  ;;  %v249_v27 = vld [vmem:[%s7444_s29 + $0x8] sm:$0xff] }
 0xed8   :  { %v2045_v43 = vadd.f32 %v6640_v34, %v2038_v30  ;;  %v4994_v34 = vld [vmem:[%s7419_s21 + $0x50] sm:$0xff] }
 0xed9   :  { %v1780_v33 = vadd.f32 %v5338_v13, %v1773_v16  ;;  %1855 = vmatpush.msrb.mxu0 %v4994_v34 }
 0xeda   :  { %5011 = vmatmul.msk.f32.gmra.mxu2 %vm306_vm3, %v2045_v43 }
 0xedb   :  { %4991 = vmatmul.msk.f32.gmra.mxu3 %vm306_vm3, %v1780_v33  ;;  %1856 = vmatpush.msrb.mxu0 %v4993_v8 }
 0xedd   :  { %1857 = vmatpush.msrb.mxu0 %v4992_v37 }
 0xedf   :  { %2140 = vmatpush.msra.mxu0 %v2122_v32 }
 0xee1   :  { %2141 = vmatpush.msra.mxu0 %v2121_v42 }
 0xee3   :  { %5016 = vmatmul.msk.f32.vlgmr.msra.gmra.mxu3 %vm306_vm3, %v6643_v40  ;;  %2142 = vmatpush.msra.mxu0 %v2120_v21 }
 0xee5   :  { %2143 = vmatpush.msra.mxu0 %v2119_v45 }
 0xeeb   :  { %5017 = vmatmul.msk.f32.gmra.mxu3 %vm306_vm3, %v2045_v43 }
 0xf3f   :  { %v2079_v39 = vpop.f32.mrf.mxu2 }
 0xf40   :  { %v2080_v41 = vadd.f32 %v5339_v38, %v2079_v39 }
 0xf42   :  { %2241 = vrot.lane.b32.xlu2 %v2080_v41, %s5989_s15 }
 0xf55   :  { %v1814_v44 = vpop.f32.mrf.mxu3 }
 0xf56   :  { %v1815_v47 = vadd.f32 %v5340_v46, %v1814_v44 }
 0xf58   :  { %v1820_v48 = vmax.f32 %v1815_v47, 0.0 }
 0xf5a   :  { %5000 = vmatmul.msk.f32.vlgmr.msrb.gmra.mxu0 %vm1053_vm15, %v1820_v48 }
 0xf5d   :  { %v2082_v60 = vpop.f32.mrf.mxu2 }
 0xf5e   :  { %v1817_v36 = vpop.f32.mrf.mxu3  ;;  %v2083_v61 = vadd.f32 %v5339_v38, %v2082_v60 }
 0xf5f   :  { %v1818_v3 = vadd.f32 %v5340_v46, %v1817_v36 }
 0xf61   :  { %v1821_v52 = vmax.f32 %v1818_v3, 0.0 }
 0xf63   :  { %5001 = vmatmul.msk.f32.gmra.mxu0 %vm1053_vm15, %v1821_v52 }
 0xf66   :  { %v2112_v54 = vpop.f32.mrf.mxu3 }
 0xf67   :  { %v2113_v55 = vadd.f32 %v5341_v53, %v2112_v54 }
 0xf69   :  { %2245 = vrot.lane.b32.xlu1 %v2113_v55, %s5989_s15 }
 0xf6b   :  { %5018 = vmatmul.msk.f32.vlgmr.msra.gmra.mxu0 %vm306_vm3, %v6643_v40 }
 0xf6e   :  { %v2115_v56 = vpop.f32.mrf.mxu3 }
 0xf6f   :  { %v2116_v59 = vadd.f32 %v5341_v53, %v2115_v56 }
 0xf71   :  { %2349 = vrot.lane.b32.xlu2 %v2116_v59, %s5991_s28  ;;  %2247 = vrot.lane.b32.xlu0 %v2116_v59, %s5989_s15 }
 0xf72   :  { %5020 = vmatpush.xpose.msk.msra.mxu1 %vm475_vm9, %v2116_v59  ;;  %2449 = vrot.lane.b32.xlu1 %v2116_v59, %s5990_s17 }
 0xf73   :  { %5019 = vmatmul.msk.f32.gmra.mxu0 %vm306_vm3, %v2045_v43 }
 0xf76   :  { %5021 = vmatpush.xpose.msk.msra.mxu1 %vm475_vm9, %v2113_v55 }
 0xf79   :  { %5022 = vmatmul.msk.f32.vlgmr.msra.gmra.mxu1 %vm475_vm9, %v2080_v41  ;;  %2243 = vrot.lane.b32.xlu0 %v2083_v61, %s5989_s15 }
 0xf7a   :  { %2447 = vrot.lane.b32.xlu2 %v2113_v55, %s5990_s17  ;;  %2343 = vrot.lane.b32.xlu1 %v2080_v41, %s5991_s28 }
 0xf81   :  { %5023 = vmatmul.msk.f32.gmra.mxu1 %vm475_vm9, %v2083_v61  ;;  %2347 = vrot.lane.b32.xlu0 %v2113_v55, %s5991_s28 }
 0xf82   :  { %2345 = vrot.lane.b32.xlu2 %v2083_v61, %s5991_s28  ;;  %2445 = vrot.lane.b32.xlu1 %v2083_v61, %s5990_s17 }
 0xf89   :  { %2443 = vrot.lane.b32.xlu0 %v2080_v41, %s5990_s17 }
 0xf9c   :  { %v2242_v40 = vpop.permute.xlu2 %2241 }
 0xfcb   :  { %v2350_v62 = vpop.permute.xlu2 %2349 }
 0xfcc   :  { %5032 = vmatpush.xpose.msk.msrb.mxu1 %vm475_vm9, %v2350_v62 }
 0xfd4   :  { %v2448_v9 = vpop.permute.xlu2 %2447 }
 0xfd7   :  { %v6716_v63 = vpop.f32.mrf.mxu0 }
 0xfdb   :  { %v2246_v0 = vpop.permute.xlu1 %2245 }
 0xfdc   :  { %v2346_v26 = vpop.permute.xlu2 %2345 }
 0xfe0   :  { %v6718_v1 = vpop.f32.mrf.mxu0 }
 0xfe3   :  { %v2248_v2 = vpop.permute.xlu0 %2247 }
 0xfe4   :  { %5026 = vmatpush.xpose.msk.msrb.mxu3 %vm475_vm9, %v2248_v2  ;;  %v2450_v4 = vpop.permute.xlu1 %2449 }
 0xfe8   :  { %v2145_v5 = vpop.f32.mrf.mxu0  ;;  %5027 = vmatpush.xpose.msk.msrb.mxu3 %vm475_vm9, %v2246_v0 }
 0xfe9   :  { %v2146_v12 = vadd.f32 %v5343_v10, %v2145_v5 }
 0xfeb   :  { %v2244_v7 = vpop.permute.xlu0 %2243  ;;  %5028 = vmatmul.msk.f32.vlgmr.msrb.gmra.mxu3 %vm475_vm9, %v2242_v40 }
 0xfec   :  { %5038 = vmatpush.xpose.msk.msra.mxu3 %vm475_vm9, %v2450_v4  ;;  %v2344_v18 = vpop.permute.xlu1 %2343 }
 0xff0   :  { %5039 = vmatpush.xpose.msk.msra.mxu3 %vm475_vm9, %v2448_v9  ;;  %v2148_v11 = vpop.f32.mrf.mxu0 }
 0xff1   :  { %v2149_v13 = vadd.f32 %v5343_v10, %v2148_v11 }
 0xff3   :  { %v2348_v14 = vpop.permute.xlu0 %2347  ;;  %5029 = vmatmul.msk.f32.gmra.mxu3 %vm475_vm9, %v2244_v7  ;;  %2232 = vmatpush.msrb.mxu2 %v2149_v13  ;;  %v6726_v17 = vpack.i.bf16 %v2146_v12, %v2149_v13 }
 0xff4   :  { %5033 = vmatpush.xpose.msk.msrb.mxu1 %vm475_vm9, %v2348_v14  ;;  %v2446_v43 = vpop.permute.xlu1 %2445 }
 0xff5   :  { %2233 = vmatpush.msrb.mxu2 %v2146_v12 }
 0xff6   :  { %v2180_v19 = vpop.f32.mrf.mxu1 }
 0xff7   :  { %v2186_v23 = vmul.f32 0.35355338, %v2180_v19  ;;  %5034 = vmatmul.msk.f32.vlgmr.msrb.gmra.mxu1 %vm475_vm9, %v2344_v18 }
 0xff9   :  { %v2188_v24 = vadd.f32 %v2186_v23, %v248_v22 }
 0xffb   :  { %v2444_v25 = vpop.permute.xlu0 %2443  ;;  %v2190_v20 = vsel %vm270_vm0, %v2188_v24, -inf }
 0xffc   :  { %2191 = vmax.xlane.f32.xlu0 %v2190_v20  ;;  %5040 = vmatmul.msk.f32.vlgmr.msra.gmra.mxu3 %vm475_vm9, %v2444_v25 }
 0xffe   :  { %v2183_v50 = vpop.f32.mrf.mxu1 }
 0xfff   :  { %v2187_v30 = vmul.f32 0.35355338, %v2183_v50  ;;  %5035 = vmatmul.msk.f32.gmra.mxu1 %vm475_vm9, %v2346_v26 }
0x1001   :  { %v2189_v16 = vadd.f32 %v2187_v30, %v249_v27 }
0x1003   :  { %v2193_v33 = vsel %vm270_vm0, %v2189_v16, -inf }
0x1004   :  { %2194 = vmax.xlane.f32.xlu1 %v2193_v33  ;;  %5041 = vmatmul.msk.f32.gmra.mxu3 %vm475_vm9, %v2446_v43 }
0x106e   :  { %v2274_v58 = vpop.f32.mrf.mxu3 }
0x106f   :  { %v2280_v57 = vmul.f32 0.35355338, %v2274_v58  ;;  %v2192_v39 = vpop.xlane.xlu0 %2191 }
0x1070   :  { %v2196_v32 = vsub.f32 %v2188_v24, %v2192_v39 }
0x1071   :  { %v2282_v29 = vadd.f32 %v2280_v57, %v248_v22 }
0x1072   :  { %v2198_v44 = vmul.f32 1.442695, %v2196_v32 }
0x1073   :  { %v2284_v6 = vsel %vm270_vm0, %v2282_v29, -inf }
0x1074   :  { %2285 = vmax.xlane.f32.xlu2 %v2284_v6  ;;  %v2376_v49 = vpop.f32.mrf.mxu1  ;;  %5481 = vpow2.f32 %v2198_v44 }
0x1075   :  { %v2382_v34 = vmul.f32 0.35355338, %v2376_v49 }
0x1076   :  { %v2277_v8 = vpop.f32.mrf.mxu3 }
0x1077   :  { %v2281_v37 = vmul.f32 0.35355338, %v2277_v8  ;;  %v2384_v38 = vadd.f32 %v2382_v34, %v248_v22  ;;  %v2195_v36 = vpop.xlane.xlu1 %2194 }
0x1078   :  { %v2197_v53 = vsub.f32 %v2189_v16, %v2195_v36 }
0x1079   :  { %v2283_v41 = vadd.f32 %v2281_v37, %v249_v27  ;;  %v2386_v21 = vsel %vm270_vm0, %v2384_v38, -inf }
0x107a   :  { %v2200_v56 = vmul.f32 1.442695, %v2197_v53  ;;  %v5482_v61 = vpop.eup %5481 }
0x107b   :  { %v2287_v42 = vsel %vm270_vm0, %v2283_v41, -inf  ;;  %v2202_v0 = vsel %vm270_vm0, %v5482_v61, 0.0 }
0x107c   :  { %2288 = vmax.xlane.f32.xlu0 %v2287_v42  ;;  %2387 = vmax.xlane.f32.xlu2 %v2386_v21  ;;  %v2379_v45 = vpop.f32.mrf.mxu1  ;;  %5483 = vpow2.f32 %v2200_v56 }
0x107d   :  { %v2383_v46 = vmul.f32 0.35355338, %v2379_v45 }
0x107f   :  { %v2476_v47 = vpop.f32.mrf.mxu3  ;;  %v2385_v48 = vadd.f32 %v2383_v46, %v249_v27 }
0x1080   :  { %v2482_v3 = vmul.f32 0.35355338, %v2476_v47 }
0x1081   :  { %v2389_v54 = vsel %vm270_vm0, %v2385_v48, -inf }
0x1082   :  { %v2484_v52 = vadd.f32 %v2482_v3, %v248_v22  ;;  %v5484_v2 = vpop.eup %5483 }
0x1083   :  { %v2205_v4 = vsel %vm270_vm0, %v5484_v2, 0.0 }
0x1084   :  { %2390 = vmax.xlane.f32.xlu0 %v2389_v54  ;;  %v2486_v55 = vsel %vm270_vm0, %v2484_v52, -inf }
0x1085   :  { %2487 = vmax.xlane.f32.xlu1 %v2486_v55 }
0x1087   :  { %v2479_v59 = vpop.f32.mrf.mxu3 }
0x1088   :  { %v2483_v60 = vmul.f32 0.35355338, %v2479_v59 }
0x108a   :  { %v2485_v40 = vadd.f32 %v2483_v60, %v249_v27 }
0x108c   :  { %v2489_v62 = vsel %vm270_vm0, %v2485_v40, -inf }
0x108d   :  { %2490 = vmax.xlane.f32.xlu2 %v2489_v62  ;;  %2203 = vadd.xlane.f32.xlu1 %v2202_v0 }
0x1095   :  { %2206 = vadd.xlane.f32.xlu2 %v2205_v4 }
0x10a6   :  { %5260 = vrot.lane.b32.xlu1 %v6726_v17, %s5989_s15 }
0x10ae   :  { %5270 = vrot.lane.b32.xlu1 %v6726_v17, %s5990_s17 }
0x10e7   :  { %v2286_v5 = vpop.xlane.xlu2 %2285 }
0x10e8   :  { %v2290_v7 = vsub.f32 %v2282_v29, %v2286_v5 }
0x10ea   :  { %v2292_v9 = vmul.f32 1.442695, %v2290_v7 }
0x10ec   :  { %5485 = vpow2.f32 %v2292_v9 }
0x10ef   :  { %v2289_v10 = vpop.xlane.xlu0 %2288  ;;  %v2388_v11 = vpop.xlane.xlu2 %2387 }
0x10f0   :  { %v2291_v12 = vsub.f32 %v2283_v41, %v2289_v10  ;;  %v2392_v13 = vsub.f32 %v2384_v38, %v2388_v11 }
0x10f2   :  { %v5486_v14 = vpop.eup %5485  ;;  %v2294_v18 = vmul.f32 1.442695, %v2291_v12  ;;  %v2394_v19 = vmul.f32 1.442695, %v2392_v13 }
0x10f3   :  { %v2296_v22 = vsel %vm270_vm0, %v5486_v14, 0.0 }
0x10f4   :  { %5487 = vpow2.f32 %v2294_v18  ;;  %2297 = vadd.xlane.f32.xlu0 %v2296_v22 }
0x10f5   :  { %5489 = vpow2.f32 %v2394_v19 }
0x10f7   :  { %v2391_v23 = vpop.xlane.xlu0 %2390 }
0x10f8   :  { %v2393_v24 = vsub.f32 %v2385_v48, %v2391_v23  ;;  %v2488_v25 = vpop.xlane.xlu1 %2487 }
0x10f9   :  { %v2492_v27 = vsub.f32 %v2484_v52, %v2488_v25 }
0x10fa   :  { %v5488_v20 = vpop.eup %5487  ;;  %v2396_v26 = vmul.f32 1.442695, %v2393_v24 }
0x10fb   :  { %v6754_v50 = vpop.eup %5489  ;;  %v2299_v30 = vsel %vm270_vm0, %v5488_v20, 0.0  ;;  %v2494_v43 = vmul.f32 1.442695, %v2492_v27 }
0x10fc   :  { %5491 = vpow2.f32 %v2396_v26  ;;  %2300 = vadd.xlane.f32.xlu0 %v2299_v30  ;;  %v2398_v16 = vsel %vm270_vm0, %v6754_v50, 0.0 }
0x10fd   :  { %2399 = vadd.xlane.f32.xlu2 %v2398_v16 }
0x1100   :  { %v2491_v33 = vpop.xlane.xlu2 %2490  ;;  %v2204_v58 = vpop.xlane.xlu1 %2203 }
0x1101   :  { %5493 = vrcp.f32 %v2204_v58  ;;  %v2493_v29 = vsub.f32 %v2485_v40, %v2491_v33  ;;  %v2577_v33 = vld [vmem:[#allocation14 + $0x58] sm:$0xff]  ;;  %v2576_v58 = vld [vmem:[#allocation14 + $0x50] sm:$0xff] }
0x1102   :  { %v5492_v57 = vpop.eup %5491  ;;  %5495 = vpow2.f32 %v2494_v43  ;;  %2601 = vmatpush.msra.mxu1 %v2577_v33 }
0x1103   :  { %v2401_v6 = vsel %vm270_vm0, %v5492_v57, 0.0  ;;  %v2496_v34 = vmul.f32 1.442695, %v2493_v29  ;;  %v2574_v29 = vld [vmem:[#allocation14 + $0x40] sm:$0xff] }
0x1104   :  { %2602 = vmatpush.msra.mxu1 %v2576_v58 }
0x1105   :  { %2402 = vadd.xlane.f32.xlu2 %v2401_v6 }
0x1107   :  { %v5494_v49 = vpop.eup %5493 }
0x1108   :  { %v2210_v8 = vmul.f32 %v5494_v49, %v5482_v61  ;;  %v2207_v37 = vpop.xlane.xlu2 %2206  ;;  %v5496_v38 = vpop.eup %5495 }
0x1109   :  { %5497 = vrcp.f32 %v2207_v37  ;;  %v2498_v39 = vsel %vm270_vm0, %v5496_v38, 0.0 }
0x110a   :  { %5024 = vmatmul.msk.f32.vlgmr.msrb.gmra.mxu2 %vm270_vm0, %v2210_v8  ;;  %5499 = vpow2.f32 %v2496_v34 }
0x110d   :  { %2499 = vadd.xlane.f32.xlu2 %v2498_v39 }
0x110f   :  { %v5498_v41 = vpop.eup %5497 }
0x1110   :  { %5265 = vrot.lane.b32.xlu0 %v6726_v17, %s5991_s28  ;;  %v2211_v32 = vmul.f32 %v5498_v41, %v5484_v2  ;;  %v5500_v42 = vpop.eup %5499 }
0x1111   :  { %v2501_v21 = vsel %vm270_vm0, %v5500_v42, 0.0 }
0x1112   :  { %5025 = vmatmul.msk.f32.gmra.mxu2 %vm270_vm0, %v2211_v32 }
0x1115   :  { %2502 = vadd.xlane.f32.xlu2 %v2501_v21 }
0x1118   :  { %v5261_v45 = vpop.permute.xlu1 %5260 }
0x1119   :  { %v5262_v46 = vunpack.i.l.bf16 %v5261_v45  ;;  %v5263_v44 = vunpack.i.h.bf16 %v5261_v45 }
0x111b   :  { %2334 = vmatpush.msrb.mxu0 %v5262_v46 }
0x111d   :  { %2335 = vmatpush.msrb.mxu0 %v5263_v44 }
0x1120   :  { %v5271_v47 = vpop.permute.xlu1 %5270 }
0x1121   :  { %v5272_v48 = vunpack.i.l.bf16 %v5271_v47  ;;  %v5273_v36 = vunpack.i.h.bf16 %v5271_v47 }
0x1123   :  { %2534 = vmatpush.msra.mxu0 %v5272_v48 }
0x1125   :  { %2535 = vmatpush.msra.mxu0 %v5273_v36 }
0x1167   :  { %v2298_v3 = vpop.xlane.xlu0 %2297 }
0x1168   :  { %5501 = vrcp.f32 %v2298_v3 }
0x116e   :  { %v5502_v17 = vpop.eup %5501 }
0x116f   :  { %v2304_v52 = vmul.f32 %v5502_v17, %v5486_v14  ;;  %v2301_v53 = vpop.xlane.xlu0 %2300  ;;  %v5345_v17 = vld [vmem:[#allocation16 + $0x2] ss:$0 sm:$0xff] }
0x1170   :  { %5503 = vrcp.f32 %v2301_v53  ;;  %v2400_v54 = vpop.xlane.xlu2 %2399 }
0x1171   :  { %5030 = vmatmul.msk.f32.vlgmr.msrb.gmra.mxu0 %vm270_vm0, %v2304_v52  ;;  %5505 = vrcp.f32 %v2400_v54 }
0x1176   :  { %v5504_v55 = vpop.eup %5503 }
0x1177   :  { %v2305_v56 = vmul.f32 %v5504_v55, %v5488_v20  ;;  %v5506_v40 = vpop.eup %5505  ;;  %v5342_v20 = vld [vmem:[#allocation19 + $0x1] ss:$0 sm:$0xff] }
0x1178   :  { %v2403_v59 = vpop.xlane.xlu2 %2402  ;;  %v2406_v2 = vmul.f32 %v5506_v40, %v6754_v50  ;;  %v1863_v26 = vadd.f32 %v5342_v20, %v6718_v1  ;;  %v1860_v50 = vadd.f32 %v5342_v20, %v6716_v63 }
0x1179   :  { %5031 = vmatmul.msk.f32.gmra.mxu0 %vm270_vm0, %v2305_v56 }
0x117a   :  { %v1866_v27 = vadd.f32 %v1863_v26, %v6583_v51  ;;  %v1865_v16 = vadd.f32 %v1860_v50, %v6573_v35 }
0x117c   :  { %v1870_v30 = vsel %vm306_vm3, %v1866_v27, 0.0  ;;  %v1867_v43 = vsel %vm306_vm3, %v1865_v16, 0.0 }
0x1180   :  { %v2500_v60 = vpop.xlane.xlu2 %2499 }
0x1181   :  { %5507 = vrcp.f32 %v2500_v60 }
0x1182   :  { %v5266_v61 = vpop.permute.xlu0 %5265  ;;  %5509 = vrcp.f32 %v2403_v59 }
0x1183   :  { %v5267_v62 = vunpack.i.l.bf16 %v5266_v61  ;;  %v5268_v0 = vunpack.i.h.bf16 %v5266_v61 }
0x1185   :  { %2434 = vmatpush.msra.mxu2 %v5267_v62 }
0x1187   :  { %v5508_v4 = vpop.eup %5507  ;;  %2435 = vmatpush.msra.mxu2 %v5268_v0  ;;  %v2760_v0 = vld [vmem:[#allocation11 + $0x78] sm:$0xff] }
0x1188   :  { %v2506_v5 = vmul.f32 %v5508_v4, %v5496_v38  ;;  %v2503_v7 = vpop.xlane.xlu2 %2502  ;;  %5036 = vmatmul.msk.f32.vlgmr.msra.gmra.mxu2 %vm270_vm0, %v2406_v2  ;;  %v5510_v9 = vpop.eup %5509  ;;  %v5054_v2 = vld [vmem:[%s7411_s13 + $0x70] sm:$0xff]  ;;  %2778 = vmatpush.msrb.mxu0 %v2760_v0  ;;  %v5053_v4 = vld [vmem:[%s7411_s13 + $0x68] sm:$0xff] }
0x1189   :  { %5511 = vrcp.f32 %v2503_v7  ;;  %v2407_v10 = vmul.f32 %v5510_v9, %v5492_v57  ;;  %v2575_v57 = vld [vmem:[#allocation14 + $0x48] sm:$0xff]  ;;  %v2757_v9 = vld [vmem:[#allocation11 + $0x60] sm:$0xff] }
0x118a   :  { %5042 = vmatmul.msk.f32.vlgmr.msra.gmra.mxu0 %vm270_vm0, %v2506_v5  ;;  %2603 = vmatpush.msra.mxu1 %v2575_v57  ;;  %v2758_v5 = vld [vmem:[#allocation11 + $0x68] sm:$0xff] }
0x118b   :  { %v5052_v7 = vld [vmem:[%s7411_s13 + $0x60] sm:$0xff] }
0x118c   :  { %2604 = vmatpush.msra.mxu1 %v2574_v29 }
0x118d   :  { %v2235_v18 = vpop.f32.mrf.mxu2 }
0x118f   :  { %v5512_v11 = vpop.eup %5511 }
0x1190   :  { %5037 = vmatmul.msk.f32.gmra.mxu2 %vm270_vm0, %v2407_v10  ;;  %v2507_v12 = vmul.f32 %v5512_v11, %v5500_v42  ;;  %v5344_v42 = vld [vmem:[#allocation5 + $0x4] ss:$0 sm:$0xff] }
0x1192   :  { %5043 = vmatmul.msk.f32.gmra.mxu0 %vm270_vm0, %v2507_v12 }
0x1195   :  { %v2238_v19 = vpop.f32.mrf.mxu2 }
0x11ee   :  { %v2337_v13 = vpop.f32.mrf.mxu0 }
0x11ef   :  { %2545 = vrot.lane.b32.xlu0 %v2337_v13, %s5977_s5 }
0x11f6   :  { %v2340_v14 = vpop.f32.mrf.mxu0 }
0x11f7   :  { %2547 = vrot.lane.b32.xlu0 %v2340_v14, %s5977_s5 }
0x1207   :  { %v2537_v22 = vpop.f32.mrf.mxu0 }
0x1208   :  { %2561 = vrot.lane.b32.xlu2 %v2537_v22, %s5992_s20 }
0x120b   :  { %v2437_v23 = vpop.f32.mrf.mxu2 }
0x120c   :  { %2553 = vrot.lane.b32.xlu1 %v2437_v23, %s5972_s6 }
0x120f   :  { %v2540_v24 = vpop.f32.mrf.mxu0 }
0x1210   :  { %2563 = vrot.lane.b32.xlu0 %v2540_v24, %s5992_s20 }
0x1213   :  { %v2440_v25 = vpop.f32.mrf.mxu2 }
0x1214   :  { %2555 = vrot.lane.b32.xlu1 %v2440_v25, %s5972_s6 }
0x123a   :  { %1871 = vadd.xlane.f32.xlu0 %v1870_v30 }
0x123e   :  { %1868 = vadd.xlane.f32.xlu1 %v1867_v43 }
0x1261   :  { %v2546_v1 = vpop.permute.xlu0 %2545 }
0x1262   :  { %v2567_v63 = vsel %vm475_vm9, %v2235_v18, %v2546_v1  ;;  %v2562_v6 = vpop.permute.xlu2 %2561 }
0x1269   :  { %v2548_v49 = vpop.permute.xlu0 %2547 }
0x126a   :  { %v2568_v8 = vsel %vm475_vm9, %v2238_v19, %v2548_v49 }
0x127e   :  { %v2554_v51 = vpop.permute.xlu1 %2553 }
0x127f   :  { %v2569_v35 = vsel %vm270_vm0, %v2567_v63, %v2554_v51 }
0x1280   :  { %v2571_v34 = vsel %vm896_vm10, %v2569_v35, %v2562_v6 }
0x1281   :  { %5044 = vmatmul.msk.f32.vlgmr.msra.gmra.mxu1 %vm306_vm3, %v2571_v34 }
0x1282   :  { %v2564_v38 = vpop.permute.xlu0 %2563 }
0x1286   :  { %v2556_v37 = vpop.permute.xlu1 %2555 }
0x1287   :  { %v2570_v39 = vsel %vm270_vm0, %v2568_v8, %v2556_v37 }
0x1288   :  { %v2572_v41 = vsel %vm896_vm10, %v2570_v39, %v2564_v38 }
0x1289   :  { %5045 = vmatmul.msk.f32.gmra.mxu1 %vm306_vm3, %v2572_v41 }
0x12ad   :  { %v1872_v32 = vpop.xlane.xlu0 %1871 }
0x12ae   :  { %v1874_v21 = vmul.f32 %v1872_v32, %v6214_v28 }
0x12b0   :  { %v1876_v45 = vsub.f32 %v1866_v27, %v1874_v21  ;;  %v5346_v27 = vld [vmem:[#allocation7 + $0x4] ss:$0 sm:$0xff] }
0x12b1   :  { %v1869_v46 = vpop.xlane.xlu1 %1868 }
0x12b2   :  { %v6794_v44 = vmul.f32 %v5344_v42, %v1876_v45  ;;  %v1873_v47 = vmul.f32 %v1869_v46, %v6214_v28  ;;  %v1878_v40 = vmul.f32 %v1876_v45, %v1876_v45 }
0x12b4   :  { %v1875_v48 = vsub.f32 %v1865_v16, %v1873_v47  ;;  %v1882_v62 = vsel %vm306_vm3, %v1878_v40, 0.0 }
0x12b6   :  { %v1877_v36 = vmul.f32 %v1875_v48, %v1875_v48  ;;  %v1920_v50 = vmul.f32 %v5344_v42, %v1875_v48 }
0x12b8   :  { %v1879_v3 = vsel %vm306_vm3, %v1877_v36, 0.0 }
0x12b9   :  { %1880 = vadd.xlane.f32.xlu0 %v1879_v3 }
0x12fe   :  { %v2606_v52 = vpop.f32.mrf.mxu1 }
0x12ff   :  { %v2607_v53 = vadd.f32 %v5345_v17, %v2606_v52  ;;  %v6848_v52 = vld [vmem:[#allocation10 + $0x3] ss:$0 sm:$0xff] }
0x1301   :  { %v6799_v54 = vadd.f32 %v2607_v53, %v6568_v31  ;;  %v5055_v31 = vld [vmem:[%s7411_s13 + $0x78] sm:$0xff] }
0x1302   :  { %2745 = vmatpush.msrb.mxu3 %v5055_v31 }
0x1303   :  { %v2614_v55 = vsel %vm306_vm3, %v6799_v54, 0.0 }
0x1304   :  { %2615 = vadd.xlane.f32.xlu2 %v2614_v55  ;;  %2746 = vmatpush.msrb.mxu3 %v5054_v2 }
0x1306   :  { %v2609_v56 = vpop.f32.mrf.mxu1  ;;  %2747 = vmatpush.msrb.mxu3 %v5053_v4 }
0x1307   :  { %v2610_v59 = vadd.f32 %v5345_v17, %v2609_v56  ;;  %v5048_v56 = vld [vmem:[%s7409_s11 + $0x70] sm:$0xff] }
0x1308   :  { %2748 = vmatpush.msrb.mxu3 %v5052_v7 }
0x1309   :  { %v6804_v60 = vadd.f32 %v2610_v59, %v6580_v15  ;;  %v2759_v15 = vld [vmem:[#allocation11 + $0x70] sm:$0xff] }
0x130a   :  { %2779 = vmatpush.msrb.mxu0 %v2759_v15  ;;  %v5047_v59 = vld [vmem:[%s7409_s11 + $0x68] sm:$0xff] }
0x130b   :  { %v2617_v61 = vsel %vm306_vm3, %v6804_v60, 0.0 }
0x130c   :  { %2618 = vadd.xlane.f32.xlu1 %v2617_v61  ;;  %2780 = vmatpush.msrb.mxu0 %v2758_v5  ;;  %v5046_v61 = vld [vmem:[%s7409_s11 + $0x60] sm:$0xff] }
0x130e   :  { %2781 = vmatpush.msrb.mxu0 %v2757_v9 }
0x1314   :  { %1883 = vadd.xlane.f32.xlu1 %v1882_v62 }
0x132c   :  { %v1881_v10 = vpop.xlane.xlu0 %1880 }
0x132d   :  { %v1885_v11 = vmul.f32 0.032258064, %v1881_v10 }
0x132f   :  { %5513 = vrsqrt.f32 %v1885_v11  ;;  %vm1894_vm5 = vcmp.eq.f32.partialorder %v1885_v11, inf  ;;  %v1897_v24 = vand.u32 2147483648, %v1885_v11  ;;  %vm1896_vm6 = vcmp.eq.f32.partialorder %v1885_v11, 0.0 }
0x1335   :  { %v5514_v12 = vpop.eup %5513 }
0x1336   :  { %v1888_v13 = vmul.f32 %v5514_v12, %v1885_v11 }
0x1338   :  { %v1889_v14 = vmul.f32 %v5514_v12, %v1888_v13 }
0x133a   :  { %v1890_v18 = vmul.f32 0.5, %v1889_v14 }
0x133c   :  { %v1891_v19 = vsub.f32 1.5, %v1890_v18 }
0x133e   :  { %v1892_v22 = vmul.f32 %v5514_v12, %v1891_v19 }
0x1340   :  { %v1893_v23 = vmul.f32 %v1892_v22, %v1885_v11 }
0x1342   :  { %v1895_v25 = vsel %vm1894_vm5, %v1885_v11, %v1893_v23 }
0x1343   :  { %v1898_v20 = vsel %vm1896_vm6, %v1897_v24, %v1895_v25 }
0x1344   :  { %v1911_v26 = vadd.f32 1e-06, %v1898_v20  ;;  %v5347_v20 = vld [vmem:[#allocation5 + $0x6] ss:$0 sm:$0xff] }
0x1346   :  { %5515 = vrcp.f32 %v1911_v26 }
0x134c   :  { %v5516_v30 = vpop.eup %5515 }
0x134d   :  { %v1922_v16 = vmul.f32 %v5516_v30, %v1920_v50 }
0x134f   :  { %v6821_v43 = vadd.f32 %v5346_v27, %v1922_v16  ;;  %v5350_v16 = vld [vmem:[#allocation7 + $0x6] ss:$0 sm:$0xff] }
0x1351   :  { %5056 = vmatmul.msk.f32.vlgmr.msrb.gmra.mxu3 %vm306_vm3, %v6821_v43  ;;  %5058 = vmatmul.msk.f32.vlgmr.msrb.gmra.mxu0 %vm306_vm3, %v6821_v43 }
0x1377   :  { %v2616_v33 = vpop.xlane.xlu2 %2615 }
0x1378   :  { %v2620_v58 = vmul.f32 %v2616_v33, %v6214_v28 }
0x137a   :  { %v6829_v57 = vsub.f32 %v6799_v54, %v2620_v58 }
0x137c   :  { %v2624_v29 = vmul.f32 %v6829_v57, %v6829_v57  ;;  %v2667_v30 = vmul.f32 %v5347_v20, %v6829_v57 }
0x137e   :  { %v2626_v1 = vsel %vm306_vm3, %v2624_v29, 0.0 }
0x137f   :  { %2627 = vadd.xlane.f32.xlu2 %v2626_v1  ;;  %v2619_v63 = vpop.xlane.xlu1 %2618 }
0x1380   :  { %v2621_v51 = vmul.f32 %v2619_v63, %v6214_v28 }
0x1382   :  { %v6836_v6 = vsub.f32 %v6804_v60, %v2621_v51 }
0x1384   :  { %v2625_v49 = vmul.f32 %v6836_v6, %v6836_v6  ;;  %v2668_v51 = vmul.f32 %v5347_v20, %v6836_v6  ;;  %v5351_v6 = vld [vmem:[#allocation8 + $0x3] ss:$0 sm:$0xff] }
0x1386   :  { %v2629_v35 = vsel %vm306_vm3, %v2625_v49, 0.0 }
0x1387   :  { %2630 = vadd.xlane.f32.xlu0 %v2629_v35  ;;  %v1884_v34 = vpop.xlane.xlu1 %1883 }
0x1388   :  { %v1886_v8 = vmul.f32 0.032258064, %v1884_v34 }
0x138a   :  { %5517 = vrsqrt.f32 %v1886_v8  ;;  %vm1906_vm7 = vcmp.eq.f32.partialorder %v1886_v8, inf  ;;  %v1909_v45 = vand.u32 2147483648, %v1886_v8  ;;  %vm1908_vm8 = vcmp.eq.f32.partialorder %v1886_v8, 0.0 }
0x1390   :  { %v5518_v37 = vpop.eup %5517 }
0x1391   :  { %v1900_v38 = vmul.f32 %v5518_v37, %v1886_v8 }
0x1393   :  { %v1901_v39 = vmul.f32 %v5518_v37, %v1900_v38 }
0x1395   :  { %v1902_v41 = vmul.f32 0.5, %v1901_v39 }
0x1397   :  { %v1903_v32 = vsub.f32 1.5, %v1902_v41 }
0x1399   :  { %v1904_v42 = vmul.f32 %v5518_v37, %v1903_v32  ;;  %v5348_v37 = vld [vmem:[#allocation13 + $0x3] ss:$0 sm:$0xff] }
0x139b   :  { %v1905_v21 = vmul.f32 %v1904_v42, %v1886_v8 }
0x139d   :  { %v1907_v46 = vsel %vm1906_vm7, %v1886_v8, %v1905_v21 }
0x139e   :  { %v1910_v47 = vsel %vm1908_vm8, %v1909_v45, %v1907_v46 }
0x139f   :  { %v1912_v48 = vadd.f32 1e-06, %v1910_v47 }
0x13a1   :  { %5519 = vrcp.f32 %v1912_v48 }
0x13a7   :  { %v5520_v36 = vpop.eup %5519 }
0x13a8   :  { %v1923_v3 = vmul.f32 %v5520_v36, %v6794_v44  ;;  %v5049_v44 = vld [vmem:[%s7409_s11 + $0x78] sm:$0xff] }
0x13a9   :  { %2706 = vmatpush.msrb.mxu2 %v5049_v44 }
0x13aa   :  { %v6842_v17 = vadd.f32 %v5346_v27, %v1923_v3 }
0x13ab   :  { %2707 = vmatpush.msrb.mxu2 %v5048_v56 }
0x13ac   :  { %5057 = vmatmul.msk.f32.gmra.mxu3 %vm306_vm3, %v6842_v17  ;;  %5059 = vmatmul.msk.f32.gmra.mxu0 %vm306_vm3, %v6842_v17 }
0x13ad   :  { %2708 = vmatpush.msrb.mxu2 %v5047_v59  ;;  %v250_v59 = vld [vmem:[%s7445_s16] sm:$0xff] }
0x13af   :  { %2709 = vmatpush.msrb.mxu2 %v5046_v61 }
0x13ce   :  { %v2783_v8 = vpop.f32.mrf.mxu0 }
0x13cf   :  { %v2784_v57 = vadd.f32 %v5348_v37, %v2783_v8 }
0x13d4   :  { %v2750_v53 = vpop.f32.mrf.mxu3 }
0x13d5   :  { %v6851_v55 = vadd.f32 %v6848_v52, %v2750_v53 }
0x13d7   :  { %2883 = vrot.lane.b32.xlu2 %v6851_v55, %s5989_s15 }
0x13f2   :  { %v2628_v40 = vpop.xlane.xlu2 %2627 }
0x13f3   :  { %v2632_v62 = vmul.f32 0.032258064, %v2628_v40 }
0x13f5   :  { %5521 = vrsqrt.f32 %v2632_v62  ;;  %vm2641_vm11 = vcmp.eq.f32.partialorder %v2632_v62, inf  ;;  %v2644_v14 = vand.u32 2147483648, %v2632_v62  ;;  %vm2643_vm12 = vcmp.eq.f32.partialorder %v2632_v62, 0.0 }
0x13fa   :  { %v2631_v31 = vpop.xlane.xlu0 %2630 }
0x13fb   :  { %v5522_v0 = vpop.eup %5521  ;;  %v2633_v2 = vmul.f32 0.032258064, %v2631_v31 }
0x13fc   :  { %v2635_v15 = vmul.f32 %v5522_v0, %v2632_v62 }
0x13fd   :  { %5523 = vrsqrt.f32 %v2633_v2  ;;  %vm2653_vm13 = vcmp.eq.f32.partialorder %v2633_v2, inf  ;;  %v2656_v50 = vand.u32 2147483648, %v2633_v2  ;;  %vm2655_vm14 = vcmp.eq.f32.partialorder %v2633_v2, 0.0 }
0x13fe   :  { %v2636_v4 = vmul.f32 %v5522_v0, %v2635_v15  ;;  %v251_v15 = vld [vmem:[%s7445_s16 + $0x8] sm:$0xff] }
0x1400   :  { %v2637_v5 = vmul.f32 0.5, %v2636_v4 }
0x1402   :  { %v2638_v7 = vsub.f32 1.5, %v2637_v5 }
0x1403   :  { %v5524_v9 = vpop.eup %5523 }
0x1404   :  { %v2639_v10 = vmul.f32 %v5522_v0, %v2638_v7  ;;  %v2647_v11 = vmul.f32 %v5524_v9, %v2633_v2 }
0x1406   :  { %v2640_v12 = vmul.f32 %v2639_v10, %v2632_v62  ;;  %v2648_v13 = vmul.f32 %v5524_v9, %v2647_v11 }
0x1408   :  { %v2642_v18 = vsel %vm2641_vm11, %v2632_v62, %v2640_v12  ;;  %v2649_v19 = vmul.f32 0.5, %v2648_v13 }
0x1409   :  { %v2645_v22 = vsel %vm2643_vm12, %v2644_v14, %v2642_v18 }
0x140a   :  { %v2658_v23 = vadd.f32 1e-06, %v2645_v22  ;;  %v2650_v24 = vsub.f32 1.5, %v2649_v19 }
0x140c   :  { %5525 = vrcp.f32 %v2658_v23  ;;  %v2651_v25 = vmul.f32 %v5524_v9, %v2650_v24 }
0x140e   :  { %v2652_v26 = vmul.f32 %v2651_v25, %v2633_v2 }
0x1410   :  { %v2654_v27 = vsel %vm2653_vm13, %v2633_v2, %v2652_v26 }
0x1411   :  { %v2657_v33 = vsel %vm2655_vm14, %v2656_v50, %v2654_v27 }
0x1412   :  { %v5526_v58 = vpop.eup %5525  ;;  %v2659_v29 = vadd.f32 1e-06, %v2657_v33 }
0x1413   :  { %v2669_v1 = vmul.f32 %v5526_v58, %v2667_v30 }
0x1414   :  { %5527 = vrcp.f32 %v2659_v29 }
0x1415   :  { %v2676_v63 = vadd.f32 %v5350_v16, %v2669_v1 }
0x1417   :  { %5050 = vmatmul.msk.f32.vlgmr.msrb.gmra.mxu2 %vm306_vm3, %v2676_v63 }
0x141a   :  { %v5528_v49 = vpop.eup %5527 }
0x141b   :  { %v2670_v35 = vmul.f32 %v5528_v49, %v2668_v51 }
0x141d   :  { %v2677_v34 = vadd.f32 %v5350_v16, %v2670_v35 }
0x141f   :  { %5051 = vmatmul.msk.f32.gmra.mxu2 %vm306_vm3, %v2677_v34 }
0x1429   :  { %v2786_v38 = vpop.f32.mrf.mxu0 }
0x142a   :  { %v2787_v39 = vadd.f32 %v5348_v37, %v2786_v38 }
0x142c   :  { %2870 = vmatpush.msra.mxu2 %v2787_v39  ;;  %v6871_v41 = vpack.i.bf16 %v2784_v57, %v2787_v39 }
0x142e   :  { %2871 = vmatpush.msra.mxu2 %v2784_v57 }
0x142f   :  { %v2753_v32 = vpop.f32.mrf.mxu3 }
0x1430   :  { %v2754_v42 = vadd.f32 %v6848_v52, %v2753_v32 }
0x1431   :  { %v2884_v46 = vpop.permute.xlu2 %2883 }
0x1432   :  { %2885 = vrot.lane.b32.xlu1 %v2754_v42, %s5989_s15  ;;  %5060 = vmatpush.xpose.msk.msrb.mxu1 %vm475_vm9, %v2754_v42 }
0x1433   :  { %3087 = vrot.lane.b32.xlu2 %v2754_v42, %s5990_s17 }
0x1436   :  { %5061 = vmatpush.xpose.msk.msrb.mxu1 %vm475_vm9, %v6851_v55 }
0x143a   :  { %2985 = vrot.lane.b32.xlu1 %v6851_v55, %s5991_s28 }
0x148d   :  { %v3088_v3 = vpop.permute.xlu2 %3087 }
0x149a   :  { %v2711_v21 = vpop.f32.mrf.mxu2 }
0x149b   :  { %v2712_v45 = vadd.f32 %v5351_v6, %v2711_v21 }
0x149d   :  { %2879 = vrot.lane.b32.xlu0 %v2712_v45, %s5989_s15  ;;  %2981 = vrot.lane.b32.xlu2 %v2712_v45, %s5991_s28 }
0x149e   :  { %5062 = vmatmul.msk.f32.vlgmr.msrb.gmra.mxu1 %vm475_vm9, %v2712_v45 }
0x14a2   :  { %v2714_v47 = vpop.f32.mrf.mxu2 }
0x14a3   :  { %v2715_v48 = vadd.f32 %v5351_v6, %v2714_v47 }
0x14a4   :  { %v2886_v36 = vpop.permute.xlu1 %2885 }
0x14a5   :  { %2987 = vrot.lane.b32.xlu0 %v2754_v42, %s5991_s28  ;;  %5066 = vmatpush.xpose.msk.msra.mxu3 %vm475_vm9, %v2886_v36 }
0x14a6   :  { %3083 = vrot.lane.b32.xlu2 %v2715_v48, %s5990_s17  ;;  %2881 = vrot.lane.b32.xlu1 %v2715_v48, %s5989_s15 }
0x14a7   :  { %5063 = vmatmul.msk.f32.gmra.mxu1 %vm475_vm9, %v2715_v48 }
0x14a9   :  { %5067 = vmatpush.xpose.msk.msra.mxu3 %vm475_vm9, %v2884_v46 }
0x14ac   :  { %v2986_v53 = vpop.permute.xlu1 %2985 }
0x14ad   :  { %5078 = vmatpush.xpose.msk.msrb.mxu3 %vm475_vm9, %v3088_v3  ;;  %3085 = vrot.lane.b32.xlu0 %v6851_v55, %s5990_s17 }
0x14ae   :  { %3081 = vrot.lane.b32.xlu1 %v2712_v45, %s5990_s17 }
0x14b5   :  { %2983 = vrot.lane.b32.xlu0 %v2715_v48, %s5991_s28 }
0x14f7   :  { %v2982_v40 = vpop.permute.xlu2 %2981 }
0x1500   :  { %v3084_v11 = vpop.permute.xlu2 %3083 }
0x150f   :  { %v2880_v52 = vpop.permute.xlu0 %2879 }
0x1510   :  { %5068 = vmatmul.msk.f32.vlgmr.msra.gmra.mxu3 %vm475_vm9, %v2880_v52 }
0x1517   :  { %v2988_v44 = vpop.permute.xlu0 %2987 }
0x1518   :  { %v2882_v56 = vpop.permute.xlu1 %2881  ;;  %5072 = vmatpush.xpose.msk.msra.mxu1 %vm475_vm9, %v2988_v44 }
0x1519   :  { %5069 = vmatmul.msk.f32.gmra.mxu3 %vm475_vm9, %v2882_v56 }
0x151b   :  { %v2818_v61 = vpop.f32.mrf.mxu1 }
0x151c   :  { %v2824_v55 = vmul.f32 0.35355338, %v2818_v61  ;;  %5073 = vmatpush.xpose.msk.msra.mxu1 %vm475_vm9, %v2986_v53 }
0x151e   :  { %v2826_v62 = vadd.f32 %v2824_v55, %v250_v59 }
0x151f   :  { %5074 = vmatmul.msk.f32.vlgmr.msra.gmra.mxu1 %vm475_vm9, %v2982_v40  ;;  %v3086_v31 = vpop.permute.xlu0 %3085 }
0x1520   :  { %v2828_v0 = vsel %vm270_vm0, %v2826_v62, -inf  ;;  %5079 = vmatpush.xpose.msk.msrb.mxu3 %vm475_vm9, %v3086_v31  ;;  %v3082_v2 = vpop.permute.xlu1 %3081 }
0x1521   :  { %2829 = vmax.xlane.f32.xlu1 %v2828_v0 }
0x1523   :  { %5080 = vmatmul.msk.f32.vlgmr.msrb.gmra.mxu3 %vm475_vm9, %v3082_v2 }
0x1524   :  { %v2821_v4 = vpop.f32.mrf.mxu1 }
0x1525   :  { %v2825_v5 = vmul.f32 0.35355338, %v2821_v4 }
0x1527   :  { %v2827_v7 = vadd.f32 %v2825_v5, %v251_v15  ;;  %v2984_v9 = vpop.permute.xlu0 %2983 }
0x1528   :  { %5075 = vmatmul.msk.f32.gmra.mxu1 %vm475_vm9, %v2984_v9 }
0x1529   :  { %v2831_v10 = vsel %vm270_vm0, %v2827_v7, -inf }
0x152a   :  { %2832 = vmax.xlane.f32.xlu2 %v2831_v10 }
0x152b   :  { %5081 = vmatmul.msk.f32.gmra.mxu3 %vm475_vm9, %v3084_v11 }
0x1593   :  { %v2912_v12 = vpop.f32.mrf.mxu3 }
0x1594   :  { %v2918_v13 = vmul.f32 0.35355338, %v2912_v12  ;;  %v2830_v25 = vpop.xlane.xlu1 %2829 }
0x1595   :  { %v2834_v30 = vsub.f32 %v2826_v62, %v2830_v25 }
0x1596   :  { %v2920_v14 = vadd.f32 %v2918_v13, %v250_v59 }
0x1597   :  { %v2836_v33 = vmul.f32 1.442695, %v2834_v30 }
0x1598   :  { %v2922_v18 = vsel %vm270_vm0, %v2920_v14, -inf }
0x1599   :  { %2923 = vmax.xlane.f32.xlu0 %v2922_v18  ;;  %5529 = vpow2.f32 %v2836_v33 }
0x159c   :  { %v2915_v19 = vpop.f32.mrf.mxu3  ;;  %v3014_v22 = vpop.f32.mrf.mxu1 }
0x159d   :  { %v2919_v23 = vmul.f32 0.35355338, %v2915_v19  ;;  %v3020_v24 = vmul.f32 0.35355338, %v3014_v22  ;;  %v2833_v1 = vpop.xlane.xlu2 %2832 }
0x159e   :  { %v2835_v35 = vsub.f32 %v2827_v7, %v2833_v1 }
0x159f   :  { %v2921_v20 = vadd.f32 %v2919_v23, %v251_v15  ;;  %v3022_v26 = vadd.f32 %v3020_v24, %v250_v59  ;;  %v5530_v39 = vpop.eup %5529 }
0x15a0   :  { %v2838_v37 = vmul.f32 1.442695, %v2835_v35  ;;  %v2840_v42 = vsel %vm270_vm0, %v5530_v39, 0.0 }
0x15a1   :  { %v2925_v50 = vsel %vm270_vm0, %v2921_v20, -inf  ;;  %v3024_v27 = vsel %vm270_vm0, %v3022_v26, -inf }
0x15a2   :  { %2926 = vmax.xlane.f32.xlu1 %v2925_v50  ;;  %3025 = vmax.xlane.f32.xlu0 %v3024_v27  ;;  %5531 = vpow2.f32 %v2838_v37 }
0x15a5   :  { %v3017_v16 = vpop.f32.mrf.mxu1 }
0x15a6   :  { %v3021_v58 = vmul.f32 0.35355338, %v3017_v16  ;;  %v3114_v29 = vpop.f32.mrf.mxu3 }
0x15a7   :  { %v3120_v63 = vmul.f32 0.35355338, %v3114_v29 }
0x15a8   :  { %v3023_v51 = vadd.f32 %v3021_v58, %v251_v15  ;;  %v5532_v21 = vpop.eup %5531 }
0x15a9   :  { %v3122_v49 = vadd.f32 %v3120_v63, %v250_v59  ;;  %v2843_v45 = vsel %vm270_vm0, %v5532_v21, 0.0 }
0x15aa   :  { %v3027_v34 = vsel %vm270_vm0, %v3023_v51, -inf }
0x15ab   :  { %3028 = vmax.xlane.f32.xlu1 %v3027_v34  ;;  %v3124_v8 = vsel %vm270_vm0, %v3122_v49, -inf }
0x15ac   :  { %3125 = vmax.xlane.f32.xlu2 %v3124_v8 }
0x15ae   :  { %v3117_v38 = vpop.f32.mrf.mxu3 }
0x15af   :  { %v3121_v57 = vmul.f32 0.35355338, %v3117_v38 }
0x15b1   :  { %v3123_v32 = vadd.f32 %v3121_v57, %v251_v15 }
0x15b3   :  { %v3127_v6 = vsel %vm270_vm0, %v3123_v32, -inf }
0x15b4   :  { %2841 = vadd.xlane.f32.xlu2 %v2840_v42  ;;  %3128 = vmax.xlane.f32.xlu0 %v3127_v6 }
0x15bc   :  { %2844 = vadd.xlane.f32.xlu0 %v2843_v45 }
0x15cc   :  { %5275 = vrot.lane.b32.xlu2 %v6871_v41, %s5989_s15 }
0x15d4   :  { %5285 = vrot.lane.b32.xlu2 %v6871_v41, %s5990_s17 }
0x160c   :  { %v2924_v46 = vpop.xlane.xlu0 %2923 }
0x160d   :  { %v2928_v47 = vsub.f32 %v2920_v14, %v2924_v46 }
0x160f   :  { %v2930_v48 = vmul.f32 1.442695, %v2928_v47 }
0x1611   :  { %5533 = vpow2.f32 %v2930_v48 }
0x1615   :  { %v2927_v36 = vpop.xlane.xlu1 %2926  ;;  %v3026_v3 = vpop.xlane.xlu0 %3025 }
0x1616   :  { %v2929_v52 = vsub.f32 %v2921_v20, %v2927_v36  ;;  %v3030_v53 = vsub.f32 %v3022_v26, %v3026_v3 }
0x1617   :  { %v5534_v44 = vpop.eup %5533 }
0x1618   :  { %v2932_v56 = vmul.f32 1.442695, %v2929_v52  ;;  %v3032_v59 = vmul.f32 1.442695, %v3030_v53  ;;  %v2934_v61 = vsel %vm270_vm0, %v5534_v44, 0.0 }
0x1619   :  { %2935 = vadd.xlane.f32.xlu1 %v2934_v61 }
0x161a   :  { %5535 = vpow2.f32 %v2932_v56 }
0x161b   :  { %5537 = vpow2.f32 %v3032_v59 }
0x161e   :  { %v3029_v55 = vpop.xlane.xlu1 %3028 }
0x161f   :  { %v3031_v40 = vsub.f32 %v3023_v51, %v3029_v55  ;;  %v3126_v62 = vpop.xlane.xlu2 %3125 }
0x1620   :  { %v5536_v31 = vpop.eup %5535  ;;  %v3130_v15 = vsub.f32 %v3122_v49, %v3126_v62  ;;  %v3214_v62 = vld [vmem:[#allocation14 + $0x70] sm:$0xff] }
0x1621   :  { %v6925_v0 = vpop.eup %5537  ;;  %v3034_v2 = vmul.f32 1.442695, %v3031_v40  ;;  %v2937_v4 = vsel %vm270_vm0, %v5536_v31, 0.0  ;;  %v3215_v40 = vld [vmem:[#allocation14 + $0x78] sm:$0xff] }
0x1622   :  { %2938 = vadd.xlane.f32.xlu1 %v2937_v4  ;;  %v3036_v5 = vsel %vm270_vm0, %v6925_v0, 0.0  ;;  %v3132_v7 = vmul.f32 1.442695, %v3130_v15  ;;  %3239 = vmatpush.msrb.mxu1 %v3215_v40 }
0x1623   :  { %5539 = vpow2.f32 %v3034_v2  ;;  %3037 = vadd.xlane.f32.xlu0 %v3036_v5 }
0x1624   :  { %3240 = vmatpush.msrb.mxu1 %v3214_v62 }
0x1627   :  { %v2842_v9 = vpop.xlane.xlu2 %2841  ;;  %v3129_v10 = vpop.xlane.xlu0 %3128 }
0x1628   :  { %5541 = vrcp.f32 %v2842_v9  ;;  %v3131_v12 = vsub.f32 %v3123_v32, %v3129_v10 }
0x1629   :  { %v6930_v11 = vpop.eup %5539  ;;  %5543 = vpow2.f32 %v3132_v7 }
0x162a   :  { %v3039_v13 = vsel %vm270_vm0, %v6930_v11, 0.0  ;;  %v3134_v14 = vmul.f32 1.442695, %v3131_v12 }
0x162b   :  { %3040 = vadd.xlane.f32.xlu0 %v3039_v13 }
0x162e   :  { %v5542_v18 = vpop.eup %5541 }
0x162f   :  { %v5544_v19 = vpop.eup %5543  ;;  %v2848_v22 = vmul.f32 %v5542_v18, %v5530_v39  ;;  %v5276_v23 = vpop.permute.xlu2 %5275 }
0x1630   :  { %v2845_v24 = vpop.xlane.xlu0 %2844  ;;  %v5277_v25 = vunpack.i.l.bf16 %v5276_v23  ;;  %v5278_v20 = vunpack.i.h.bf16 %v5276_v23  ;;  %v3136_v26 = vsel %vm270_vm0, %v5544_v19, 0.0 }
0x1631   :  { %5545 = vrcp.f32 %v2845_v24  ;;  %5064 = vmatmul.msk.f32.vlgmr.msra.gmra.mxu2 %vm270_vm0, %v2848_v22 }
0x1632   :  { %5547 = vpow2.f32 %v3134_v14  ;;  %2972 = vmatpush.msra.mxu0 %v5277_v25 }
0x1633   :  { %3137 = vadd.xlane.f32.xlu0 %v3136_v26 }
0x1634   :  { %2973 = vmatpush.msra.mxu0 %v5278_v20 }
0x1637   :  { %v5546_v50 = vpop.eup %5545  ;;  %v5286_v30 = vpop.permute.xlu2 %5285 }
0x1638   :  { %v5548_v27 = vpop.eup %5547  ;;  %v2849_v16 = vmul.f32 %v5546_v50, %v5532_v21  ;;  %v5287_v33 = vunpack.i.l.bf16 %v5286_v30  ;;  %v5288_v58 = vunpack.i.h.bf16 %v5286_v30 }
0x1639   :  { %v3139_v29 = vsel %vm270_vm0, %v5548_v27, 0.0 }
0x163a   :  { %5065 = vmatmul.msk.f32.gmra.mxu2 %vm270_vm0, %v2849_v16  ;;  %3172 = vmatpush.msrb.mxu0 %v5287_v33 }
0x163b   :  { %5280 = vrot.lane.b32.xlu1 %v6871_v41, %s5991_s28  ;;  %3140 = vadd.xlane.f32.xlu0 %v3139_v29 }
0x163c   :  { %3173 = vmatpush.msrb.mxu0 %v5288_v58 }
0x168c   :  { %v2936_v1 = vpop.xlane.xlu1 %2935 }
0x168d   :  { %5549 = vrcp.f32 %v2936_v1 }
0x1693   :  { %v5550_v63 = vpop.eup %5549 }
0x1694   :  { %v2942_v51 = vmul.f32 %v5550_v63, %v5534_v44 }
0x1695   :  { %v2939_v49 = vpop.xlane.xlu1 %2938 }
0x1696   :  { %5551 = vrcp.f32 %v2939_v49  ;;  %v3038_v35 = vpop.xlane.xlu0 %3037  ;;  %5070 = vmatmul.msk.f32.vlgmr.msra.gmra.mxu0 %vm270_vm0, %v2942_v51  ;;  %v5089_v49 = vld [vmem:[%s7417_s19 + $0x58] sm:$0xff] }
0x169c   :  { %v5552_v34 = vpop.eup %5551 }
0x169d   :  { %v2943_v8 = vmul.f32 %v5552_v34, %v5536_v31  ;;  %v3213_v31 = vld [vmem:[#allocation14 + $0x68] sm:$0xff] }
0x169e   :  { %v3041_v37 = vpop.xlane.xlu0 %3040  ;;  %3241 = vmatpush.msrb.mxu1 %v3213_v31  ;;  %v5087_v34 = vld [vmem:[%s7417_s19 + $0x48] sm:$0xff] }
0x169f   :  { %5071 = vmatmul.msk.f32.gmra.mxu0 %vm270_vm0, %v2943_v8  ;;  %v5086_v8 = vld [vmem:[%s7417_s19 + $0x40] sm:$0xff] }
0x16a6   :  { %v3138_v38 = vpop.xlane.xlu0 %3137 }
0x16a7   :  { %5553 = vrcp.f32 %v3138_v38 }
0x16a8   :  { %5555 = vrcp.f32 %v3038_v35  ;;  %v5088_v35 = vld [vmem:[%s7417_s19 + $0x50] sm:$0xff] }
0x16ad   :  { %v5554_v41 = vpop.eup %5553  ;;  %v5281_v57 = vpop.permute.xlu1 %5280 }
0x16ae   :  { %v5556_v39 = vpop.eup %5555  ;;  %v3144_v32 = vmul.f32 %v5554_v41, %v5544_v19  ;;  %v5282_v42 = vunpack.i.l.bf16 %v5281_v57  ;;  %v3141_v6 = vpop.xlane.xlu0 %3140  ;;  %v5283_v21 = vunpack.i.h.bf16 %v5281_v57  ;;  %v5352_v19 = vld [vmem:[#allocation16 + $0x3] ss:$0 sm:$0xff] }
0x16af   :  { %5557 = vrcp.f32 %v3141_v6  ;;  %v3044_v45 = vmul.f32 %v5556_v39, %v6925_v0  ;;  %v3212_v0 = vld [vmem:[#allocation14 + $0x60] sm:$0xff] }
0x16b0   :  { %5559 = vrcp.f32 %v3041_v37  ;;  %3072 = vmatpush.msrb.mxu2 %v5282_v42  ;;  %5082 = vmatmul.msk.f32.vlgmr.msrb.gmra.mxu0 %vm270_vm0, %v3144_v32  ;;  %v5099_v6 = vld [vmem:[%s7419_s21 + $0xb8] sm:$0xff] }
0x16b1   :  { %3242 = vmatpush.msrb.mxu1 %v3212_v0  ;;  %3385 = vmatpush.msra.mxu3 %v5099_v6 }
0x16b2   :  { %3073 = vmatpush.msrb.mxu2 %v5283_v21  ;;  %v5098_v21 = vld [vmem:[%s7419_s21 + $0xb0] sm:$0xff] }
0x16b3   :  { %5076 = vmatmul.msk.f32.vlgmr.msrb.gmra.mxu2 %vm270_vm0, %v3044_v45  ;;  %3386 = vmatpush.msra.mxu3 %v5098_v21 }
0x16b4   :  { %v2873_v53 = vpop.f32.mrf.mxu2  ;;  %3344 = vmatpush.msra.mxu2 %v5089_v49 }
0x16b5   :  { %v5558_v46 = vpop.eup %5557 }
0x16b6   :  { %v5560_v47 = vpop.eup %5559  ;;  %v3145_v48 = vmul.f32 %v5558_v46, %v5548_v27  ;;  %3345 = vmatpush.msra.mxu2 %v5088_v35  ;;  %v5097_v46 = vld [vmem:[%s7419_s21 + $0xa8] sm:$0xff] }
0x16b7   :  { %v3045_v36 = vmul.f32 %v5560_v47, %v6930_v11  ;;  %3387 = vmatpush.msra.mxu3 %v5097_v46  ;;  %v5111_v46 = vld [vmem:[%s7411_s13 + $0x98] sm:$0xff] }
0x16b8   :  { %5083 = vmatmul.msk.f32.gmra.mxu0 %vm270_vm0, %v3145_v48  ;;  %3346 = vmatpush.msra.mxu2 %v5087_v34 }
0x16b9   :  { %3527 = vmatpush.msra.mxu1 %v5111_v46 }
0x16ba   :  { %3347 = vmatpush.msra.mxu2 %v5086_v8 }
0x16bb   :  { %5077 = vmatmul.msk.f32.gmra.mxu2 %vm270_vm0, %v3045_v36  ;;  %v5096_v36 = vld [vmem:[%s7419_s21 + $0xa0] sm:$0xff] }
0x16bc   :  { %3388 = vmatpush.msra.mxu3 %v5096_v36  ;;  %v5110_v36 = vld [vmem:[%s7411_s13 + $0x90] sm:$0xff] }
0x16bd   :  { %v2876_v56 = vpop.f32.mrf.mxu2  ;;  %3528 = vmatpush.msra.mxu1 %v5110_v36 }
0x1713   :  { %v2975_v3 = vpop.f32.mrf.mxu0 }
0x1714   :  { %3183 = vrot.lane.b32.xlu2 %v2975_v3, %s5977_s5 }
0x171c   :  { %v2978_v52 = vpop.f32.mrf.mxu0 }
0x171d   :  { %3185 = vrot.lane.b32.xlu2 %v2978_v52, %s5977_s5 }
0x172d   :  { %v3175_v44 = vpop.f32.mrf.mxu0 }
0x172e   :  { %3199 = vrot.lane.b32.xlu1 %v3175_v44, %s5992_s20 }
0x1735   :  { %v3178_v59 = vpop.f32.mrf.mxu0 }
0x1736   :  { %v3075_v61 = vpop.f32.mrf.mxu2  ;;  %3201 = vrot.lane.b32.xlu2 %v3178_v59, %s5992_s20 }
0x1737   :  { %3191 = vrot.lane.b32.xlu0 %v3075_v61, %s5972_s6 }
0x173e   :  { %v3078_v55 = vpop.f32.mrf.mxu2 }
0x173f   :  { %3193 = vrot.lane.b32.xlu1 %v3078_v55, %s5972_s6 }
0x176e   :  { %v3184_v2 = vpop.permute.xlu2 %3183 }
0x176f   :  { %v3205_v15 = vsel %vm475_vm9, %v2873_v53, %v3184_v2  ;;  %v5095_v53 = vld [vmem:[%s7419_s21 + $0x98] sm:$0xff]  ;;  %v5353_v2 = vld [vmem:[#allocation5 + $0x7] ss:$0 sm:$0xff] }
0x1770   :  { %3389 = vmatpush.msra.mxu3 %v5095_v53  ;;  %v5109_v53 = vld [vmem:[%s7411_s13 + $0x88] sm:$0xff] }
0x1771   :  { %3529 = vmatpush.msra.mxu1 %v5109_v53 }
0x1777   :  { %v3186_v7 = vpop.permute.xlu2 %3185 }
0x1778   :  { %v3206_v11 = vsel %vm475_vm9, %v2876_v56, %v3186_v7 }
0x1790   :  { %v3202_v13 = vpop.permute.xlu2 %3201 }
0x17a0   :  { %v3200_v4 = vpop.permute.xlu1 %3199 }
0x17a9   :  { %v3192_v5 = vpop.permute.xlu0 %3191 }
0x17aa   :  { %v3207_v9 = vsel %vm270_vm0, %v3205_v15, %v3192_v5 }
0x17ab   :  { %v3209_v10 = vsel %vm896_vm10, %v3207_v9, %v3200_v4  ;;  %v5354_v9 = vld [vmem:[#allocation7 + $0x7] ss:$0 sm:$0xff] }
0x17ac   :  { %5084 = vmatmul.msk.f32.vlgmr.msrb.gmra.mxu1 %vm306_vm3, %v3209_v10 }
0x17b1   :  { %v3194_v12 = vpop.permute.xlu1 %3193 }
0x17b2   :  { %v3208_v14 = vsel %vm270_vm0, %v3206_v11, %v3194_v12 }
0x17b3   :  { %v3210_v18 = vsel %vm896_vm10, %v3208_v14, %v3202_v13 }
0x17b4   :  { %5085 = vmatmul.msk.f32.gmra.mxu1 %vm306_vm3, %v3210_v18 }
0x1829   :  { %v3244_v22 = vpop.f32.mrf.mxu1 }
0x182a   :  { %v3245_v23 = vadd.f32 %v5352_v19, %v3244_v22 }
0x182c   :  { %v6963_v24 = vadd.f32 %v3245_v23, %v6799_v54 }
0x182e   :  { %v3252_v25 = vsel %vm306_vm3, %v6963_v24, 0.0 }
0x182f   :  { %3253 = vadd.xlane.f32.xlu1 %v3252_v25  ;;  %v5094_v25 = vld [vmem:[%s7419_s21 + $0x90] sm:$0xff] }
0x1830   :  { %3390 = vmatpush.msra.mxu3 %v5094_v25 }
0x1831   :  { %v3247_v20 = vpop.f32.mrf.mxu1 }
0x1832   :  { %v3248_v26 = vadd.f32 %v5352_v19, %v3247_v20  ;;  %v5093_v20 = vld [vmem:[%s7419_s21 + $0x88] sm:$0xff] }
0x1833   :  { %3391 = vmatpush.msra.mxu3 %v5093_v20  ;;  %v5357_v20 = vld [vmem:[#allocation5 + $0x8] ss:$0 sm:$0xff] }
0x1834   :  { %v6968_v50 = vadd.f32 %v3248_v26, %v6804_v60  ;;  %v5092_v26 = vld [vmem:[%s7419_s21 + $0x80] sm:$0xff] }
0x1835   :  { %3392 = vmatpush.msra.mxu3 %v5092_v26 }
0x1836   :  { %v3255_v27 = vsel %vm306_vm3, %v6968_v50, 0.0 }
0x1837   :  { %3256 = vadd.xlane.f32.xlu2 %v3255_v27  ;;  %v5355_v27 = vld [vmem:[#allocation17 + $0x2] ss:$0 sm:$0xff] }
0x18a2   :  { %v3254_v30 = vpop.xlane.xlu1 %3253 }
0x18a3   :  { %v3258_v16 = vmul.f32 %v3254_v30, %v6214_v28 }
0x18a5   :  { %v3260_v33 = vsub.f32 %v6963_v24, %v3258_v16 }
0x18a7   :  { %v3262_v54 = vmul.f32 %v3260_v33, %v3260_v33  ;;  %v3305_v7 = vmul.f32 %v5353_v2, %v3260_v33 }
0x18a9   :  { %v3264_v58 = vsel %vm306_vm3, %v3262_v54, 0.0 }
0x18aa   :  { %v3257_v29 = vpop.xlane.xlu2 %3256  ;;  %3265 = vadd.xlane.f32.xlu0 %v3264_v58 }
0x18ab   :  { %v3259_v1 = vmul.f32 %v3257_v29, %v6214_v28 }
0x18ad   :  { %v6977_v63 = vsub.f32 %v6968_v50, %v3259_v1  ;;  %v5356_v1 = vld [vmem:[#allocation19 + $0x2] ss:$0 sm:$0xff] }
0x18af   :  { %v3263_v60 = vmul.f32 %v6977_v63, %v6977_v63  ;;  %v3306_v18 = vmul.f32 %v5353_v2, %v6977_v63 }
0x18b1   :  { %v3267_v51 = vsel %vm306_vm3, %v3263_v60, 0.0 }
0x18b2   :  { %3268 = vadd.xlane.f32.xlu1 %v3267_v51 }
0x191d   :  { %v3266_v37 = vpop.xlane.xlu0 %3265 }
0x191e   :  { %v3270_v38 = vmul.f32 0.032258064, %v3266_v37 }
0x1920   :  { %5561 = vrsqrt.f32 %v3270_v38  ;;  %vm3279_vm1 = vcmp.eq.f32.partialorder %v3270_v38, inf  ;;  %v3282_v59 = vand.u32 2147483648, %v3270_v38  ;;  %vm3281_vm2 = vcmp.eq.f32.partialorder %v3270_v38, 0.0 }
0x1925   :  { %v3269_v41 = vpop.xlane.xlu1 %3268 }
0x1926   :  { %v5562_v57 = vpop.eup %5561  ;;  %v3271_v39 = vmul.f32 0.032258064, %v3269_v41 }
0x1927   :  { %v3273_v32 = vmul.f32 %v5562_v57, %v3270_v38 }
0x1928   :  { %5563 = vrsqrt.f32 %v3271_v39  ;;  %vm3291_vm4 = vcmp.eq.f32.partialorder %v3271_v39, inf  ;;  %v3294_v4 = vand.u32 2147483648, %v3271_v39  ;;  %vm3293_vm5 = vcmp.eq.f32.partialorder %v3271_v39, 0.0 }
0x1929   :  { %v3274_v42 = vmul.f32 %v5562_v57, %v3273_v32 }
0x192b   :  { %v3275_v45 = vmul.f32 0.5, %v3274_v42 }
0x192d   :  { %v3276_v47 = vsub.f32 1.5, %v3275_v45  ;;  %v5105_v45 = vld [vmem:[%s7409_s11 + $0x98] sm:$0xff] }
0x192e   :  { %v5564_v48 = vpop.eup %5563  ;;  %3494 = vmatpush.msra.mxu0 %v5105_v45 }
0x192f   :  { %v3277_v3 = vmul.f32 %v5562_v57, %v3276_v47  ;;  %v3285_v52 = vmul.f32 %v5564_v48, %v3271_v39  ;;  %v3542_v47 = vld [vmem:[#allocation11 + $0x98] sm:$0xff] }
0x1930   :  { %3560 = vmatpush.msrb.mxu2 %v3542_v47 }
0x1931   :  { %v3278_v44 = vmul.f32 %v3277_v3, %v3270_v38  ;;  %v3286_v56 = vmul.f32 %v5564_v48, %v3285_v52  ;;  %v3541_v3 = vld [vmem:[#allocation11 + $0x90] sm:$0xff] }
0x1932   :  { %v5103_v52 = vld [vmem:[%s7409_s11 + $0x88] sm:$0xff]  ;;  %3561 = vmatpush.msrb.mxu2 %v3541_v3 }
0x1933   :  { %v3280_v61 = vsel %vm3279_vm1, %v3270_v38, %v3278_v44  ;;  %v3287_v55 = vmul.f32 0.5, %v3286_v56  ;;  %v3540_v44 = vld [vmem:[#allocation11 + $0x88] sm:$0xff] }
0x1934   :  { %v3283_v40 = vsel %vm3281_vm2, %v3282_v59, %v3280_v61  ;;  %v5102_v56 = vld [vmem:[%s7409_s11 + $0x80] sm:$0xff]  ;;  %v3539_v61 = vld [vmem:[#allocation11 + $0x80] sm:$0xff]  ;;  %3562 = vmatpush.msrb.mxu2 %v3540_v44 }
0x1935   :  { %v3296_v62 = vadd.f32 1e-06, %v3283_v40  ;;  %v3288_v31 = vsub.f32 1.5, %v3287_v55  ;;  %v5108_v59 = vld [vmem:[%s7411_s13 + $0x80] sm:$0xff] }
0x1936   :  { %3530 = vmatpush.msra.mxu1 %v5108_v59  ;;  %3563 = vmatpush.msrb.mxu2 %v3539_v61 }
0x1937   :  { %5565 = vrcp.f32 %v3296_v62  ;;  %v3289_v0 = vmul.f32 %v5564_v48, %v3288_v31  ;;  %v5104_v48 = vld [vmem:[%s7409_s11 + $0x90] sm:$0xff] }
0x1938   :  { %3495 = vmatpush.msra.mxu0 %v5104_v48 }
0x1939   :  { %v3290_v15 = vmul.f32 %v3289_v0, %v3271_v39 }
0x193a   :  { %3496 = vmatpush.msra.mxu0 %v5103_v52 }
0x193b   :  { %v3292_v5 = vsel %vm3291_vm4, %v3271_v39, %v3290_v15 }
0x193c   :  { %v3295_v10 = vsel %vm3293_vm5, %v3294_v4, %v3292_v5  ;;  %3497 = vmatpush.msra.mxu0 %v5102_v56 }
0x193d   :  { %v5566_v11 = vpop.eup %5565  ;;  %v3297_v12 = vadd.f32 1e-06, %v3295_v10 }
0x193e   :  { %v3307_v13 = vmul.f32 %v5566_v11, %v3305_v7 }
0x193f   :  { %5567 = vrcp.f32 %v3297_v12 }
0x1940   :  { %v3314_v14 = vadd.f32 %v5354_v9, %v3307_v13 }
0x1942   :  { %5090 = vmatmul.msk.f32.vlgmr.msra.gmra.mxu2 %vm306_vm3, %v3314_v14 }
0x1945   :  { %v5568_v19 = vpop.eup %5567 }
0x1946   :  { %v3308_v22 = vmul.f32 %v5568_v19, %v3306_v18 }
0x1948   :  { %v3315_v23 = vadd.f32 %v5354_v9, %v3308_v22 }
0x194a   :  { %5091 = vmatmul.msk.f32.gmra.mxu2 %vm306_vm3, %v3315_v23 }
0x19c5   :  { %v3349_v30 = vpop.f32.mrf.mxu2 }
0x19c6   :  { %v3350_v16 = vadd.f32 %v5355_v27, %v3349_v30 }
0x19c8   :  { %v3355_v33 = vmax.f32 %v3350_v16, 0.0 }
0x19ca   :  { %5100 = vmatmul.msk.f32.vlgmr.msra.gmra.mxu3 %vm1053_vm15, %v3355_v33  ;;  %v5358_v33 = vld [vmem:[#allocation7 + $0x8] ss:$0 sm:$0xff] }
0x19cd   :  { %v3352_v54 = vpop.f32.mrf.mxu2 }
0x19ce   :  { %v3353_v58 = vadd.f32 %v5355_v27, %v3352_v54 }
0x19d0   :  { %v3356_v29 = vmax.f32 %v3353_v58, 0.0 }
0x19d2   :  { %5101 = vmatmul.msk.f32.gmra.mxu3 %vm1053_vm15, %v3356_v29 }
0x1a4d   :  { %v3394_v63 = vpop.f32.mrf.mxu3 }
0x1a4e   :  { %v3395_v60 = vadd.f32 %v5356_v1, %v3394_v63 }
0x1a50   :  { %v7024_v51 = vadd.f32 %v3395_v60, %v6963_v24 }
0x1a52   :  { %v3402_v49 = vsel %vm306_vm3, %v7024_v51, 0.0 }
0x1a53   :  { %3403 = vadd.xlane.f32.xlu2 %v3402_v49 }
0x1a55   :  { %v3397_v35 = vpop.f32.mrf.mxu3 }
0x1a56   :  { %v3398_v34 = vadd.f32 %v5356_v1, %v3397_v35 }
0x1a58   :  { %v7029_v8 = vadd.f32 %v3398_v34, %v6968_v50 }
0x1a5a   :  { %v3405_v37 = vsel %vm306_vm3, %v7029_v8, 0.0 }
0x1a5b   :  { %3406 = vadd.xlane.f32.xlu0 %v3405_v37  ;;  %v5359_v37 = vld [vmem:[#allocation8 + $0x4] ss:$0 sm:$0xff] }
0x1ac6   :  { %v3404_v38 = vpop.xlane.xlu2 %3403 }
0x1ac7   :  { %v3408_v41 = vmul.f32 %v3404_v38, %v6214_v28  ;;  %v5360_v38 = vld [vmem:[#allocation10 + $0x4] ss:$0 sm:$0xff] }
0x1ac9   :  { %v7035_v57 = vsub.f32 %v7024_v51, %v3408_v41 }
0x1acb   :  { %v3412_v24 = vmul.f32 %v7035_v57, %v7035_v57  ;;  %v3455_v16 = vmul.f32 %v5357_v20, %v7035_v57 }
0x1acd   :  { %v3414_v39 = vsel %vm306_vm3, %v3412_v24, 0.0 }
0x1ace   :  { %3415 = vadd.xlane.f32.xlu1 %v3414_v39  ;;  %v3407_v32 = vpop.xlane.xlu0 %3406 }
0x1acf   :  { %v3409_v50 = vmul.f32 %v3407_v32, %v6214_v28 }
0x1ad1   :  { %v7042_v42 = vsub.f32 %v7029_v8, %v3409_v50 }
0x1ad3   :  { %v3413_v6 = vmul.f32 %v7042_v42, %v7042_v42  ;;  %v3456_v60 = vmul.f32 %v5357_v20, %v7042_v42  ;;  %v3996_v20 = vld [vmem:[#allocation14 + $0x90] sm:$0xff] }
0x1ad5   :  { %v3417_v21 = vsel %vm306_vm3, %v3413_v6, 0.0  ;;  %v5361_v6 = vld [vmem:[#allocation13 + $0x4] ss:$0 sm:$0xff] }
0x1ad6   :  { %3418 = vadd.xlane.f32.xlu2 %v3417_v21 }
0x1b41   :  { %v3416_v55 = vpop.xlane.xlu1 %3415 }
0x1b42   :  { %v3420_v40 = vmul.f32 0.032258064, %v3416_v55 }
0x1b44   :  { %5569 = vrsqrt.f32 %v3420_v40  ;;  %vm3429_vm6 = vcmp.eq.f32.partialorder %v3420_v40, inf  ;;  %v3432_v13 = vand.u32 2147483648, %v3420_v40  ;;  %vm3431_vm7 = vcmp.eq.f32.partialorder %v3420_v40, 0.0 }
0x1b49   :  { %v3419_v62 = vpop.xlane.xlu2 %3418 }
0x1b4a   :  { %v5570_v31 = vpop.eup %5569  ;;  %v3421_v0 = vmul.f32 0.032258064, %v3419_v62 }
0x1b4b   :  { %v3423_v2 = vmul.f32 %v5570_v31, %v3420_v40 }
0x1b4c   :  { %5571 = vrsqrt.f32 %v3421_v0  ;;  %vm3441_vm8 = vcmp.eq.f32.partialorder %v3421_v0, inf  ;;  %v3444_v27 = vand.u32 2147483648, %v3421_v0  ;;  %vm3443_vm11 = vcmp.eq.f32.partialorder %v3421_v0, 0.0 }
0x1b4d   :  { %v3424_v15 = vmul.f32 %v5570_v31, %v3423_v2  ;;  %v5150_v2 = vld [vmem:[%s7411_s13 + $0xb0] sm:$0xff] }
0x1b4f   :  { %v3425_v4 = vmul.f32 0.5, %v3424_v15 }
0x1b51   :  { %v3426_v5 = vsub.f32 1.5, %v3425_v4  ;;  %v5665_v4 = vld [vmem:[%s7444_s29] sm:$0xff] }
0x1b52   :  { %v5572_v7 = vpop.eup %5571 }
0x1b53   :  { %v3427_v9 = vmul.f32 %v5570_v31, %v3426_v5  ;;  %v3435_v10 = vmul.f32 %v5572_v7, %v3421_v0 }
0x1b55   :  { %v3428_v11 = vmul.f32 %v3427_v9, %v3420_v40  ;;  %v3436_v12 = vmul.f32 %v5572_v7, %v3435_v10  ;;  %v5148_v10 = vld [vmem:[%s7411_s13 + $0xa0] sm:$0xff] }
0x1b57   :  { %v3430_v14 = vsel %vm3429_vm6, %v3420_v40, %v3428_v11  ;;  %v3437_v18 = vmul.f32 0.5, %v3436_v12  ;;  %v5151_v40 = vld [vmem:[%s7411_s13 + $0xb8] sm:$0xff] }
0x1b58   :  { %v3433_v19 = vsel %vm3431_vm7, %v3432_v13, %v3430_v14 }
0x1b59   :  { %v3446_v22 = vadd.f32 1e-06, %v3433_v19  ;;  %v3438_v23 = vsub.f32 1.5, %v3437_v18 }
0x1b5b   :  { %5573 = vrcp.f32 %v3446_v22  ;;  %v3439_v25 = vmul.f32 %v5572_v7, %v3438_v23  ;;  %v5149_v7 = vld [vmem:[%s7411_s13 + $0xa8] sm:$0xff] }
0x1b5d   :  { %v3440_v26 = vmul.f32 %v3439_v25, %v3421_v0  ;;  %v3997_v25 = vld [vmem:[#allocation14 + $0x98] sm:$0xff] }
0x1b5f   :  { %v3442_v30 = vsel %vm3441_vm8, %v3421_v0, %v3440_v26 }
0x1b60   :  { %v3445_v54 = vsel %vm3443_vm11, %v3444_v27, %v3442_v30  ;;  %v5666_v27 = vld [vmem:[%s7444_s29 + $0x8] sm:$0xff] }
0x1b61   :  { %v5574_v58 = vpop.eup %5573  ;;  %v3447_v29 = vadd.f32 1e-06, %v3445_v54 }
0x1b62   :  { %v3457_v1 = vmul.f32 %v5574_v58, %v3455_v16 }
0x1b63   :  { %5575 = vrcp.f32 %v3447_v29 }
0x1b64   :  { %v3464_v63 = vadd.f32 %v5358_v33, %v3457_v1  ;;  %v3994_v1 = vld [vmem:[#allocation14 + $0x80] sm:$0xff] }
0x1b66   :  { %5106 = vmatmul.msk.f32.vlgmr.msra.gmra.mxu0 %vm306_vm3, %v3464_v63  ;;  %5112 = vmatmul.msk.f32.vlgmr.msra.gmra.mxu1 %vm306_vm3, %v3464_v63 }
0x1b67   :  { %5114 = vmatmul.msk.f32.vlgmr.msrb.gmra.mxu2 %vm306_vm3, %v3464_v63 }
0x1b69   :  { %v5576_v49 = vpop.eup %5575 }
0x1b6a   :  { %v3458_v35 = vmul.f32 %v5576_v49, %v3456_v60 }
0x1b6c   :  { %v3465_v34 = vadd.f32 %v5358_v33, %v3458_v35  ;;  %v3995_v33 = vld [vmem:[#allocation14 + $0x88] sm:$0xff] }
0x1b6e   :  { %5107 = vmatmul.msk.f32.gmra.mxu0 %vm306_vm3, %v3465_v34  ;;  %5113 = vmatmul.msk.f32.gmra.mxu1 %vm306_vm3, %v3465_v34 }
0x1b6f   :  { %5115 = vmatmul.msk.f32.gmra.mxu2 %vm306_vm3, %v3465_v34 }
0x1be3   :  { %v3499_v41 = vpop.f32.mrf.mxu0  ;;  %v3532_v57 = vpop.f32.mrf.mxu1 }
0x1be4   :  { %v3500_v24 = vadd.f32 %v5359_v37, %v3499_v41  ;;  %v3533_v39 = vadd.f32 %v5360_v38, %v3532_v57 }
0x1be6   :  { %3665 = vrot.lane.b32.xlu1 %v3533_v39, %s5989_s15  ;;  %3661 = vrot.lane.b32.xlu2 %v3500_v24, %s5989_s15 }
0x1bea   :  { %v3565_v32 = vpop.f32.mrf.mxu2 }
0x1beb   :  { %v3535_v50 = vpop.f32.mrf.mxu1  ;;  %v3502_v21 = vpop.f32.mrf.mxu0  ;;  %v3566_v46 = vadd.f32 %v5361_v6, %v3565_v32 }
0x1bec   :  { %v3536_v42 = vadd.f32 %v5360_v38, %v3535_v50  ;;  %v3503_v48 = vadd.f32 %v5359_v37, %v3502_v21 }
0x1bee   :  { %3667 = vrot.lane.b32.xlu0 %v3536_v42, %s5989_s15  ;;  %5116 = vmatpush.xpose.msk.msrb.mxu3 %vm475_vm9, %v3536_v42 }
0x1bef   :  { %3767 = vrot.lane.b32.xlu1 %v3533_v39, %s5991_s28  ;;  %3869 = vrot.lane.b32.xlu2 %v3536_v42, %s5990_s17 }
0x1bf2   :  { %v3568_v45 = vpop.f32.mrf.mxu2  ;;  %5117 = vmatpush.xpose.msk.msrb.mxu3 %vm475_vm9, %v3533_v39 }
0x1bf3   :  { %v3569_v47 = vadd.f32 %v5361_v6, %v3568_v45 }
0x1bf5   :  { %3652 = vmatpush.msrb.mxu0 %v3569_v47  ;;  %5118 = vmatmul.msk.f32.vlgmr.msrb.gmra.mxu3 %vm475_vm9, %v3500_v24  ;;  %v7087_v36 = vpack.i.bf16 %v3566_v46, %v3569_v47 }
0x1bf6   :  { %3663 = vrot.lane.b32.xlu0 %v3503_v48, %s5989_s15 }
0x1bf7   :  { %3653 = vmatpush.msrb.mxu0 %v3566_v46  ;;  %3863 = vrot.lane.b32.xlu1 %v3500_v24, %s5990_s17 }
0x1bf8   :  { %3763 = vrot.lane.b32.xlu2 %v3500_v24, %s5991_s28 }
0x1bfd   :  { %5119 = vmatmul.msk.f32.gmra.mxu3 %vm475_vm9, %v3503_v48 }
0x1bfe   :  { %3769 = vrot.lane.b32.xlu0 %v3536_v42, %s5991_s28 }
0x1c00   :  { %3865 = vrot.lane.b32.xlu2 %v3503_v48, %s5990_s17 }
0x1c06   :  { %3867 = vrot.lane.b32.xlu0 %v3533_v39, %s5990_s17 }
0x1c0e   :  { %3765 = vrot.lane.b32.xlu0 %v3503_v48, %s5991_s28 }
0x1c40   :  { %v3662_v3 = vpop.permute.xlu2 %3661 }
0x1c49   :  { %v3870_v44 = vpop.permute.xlu2 %3869 }
0x1c52   :  { %v3764_v55 = vpop.permute.xlu2 %3763 }
0x1c58   :  { %v3666_v53 = vpop.permute.xlu1 %3665 }
0x1c5a   :  { %v3866_v12 = vpop.permute.xlu2 %3865 }
0x1c60   :  { %v3668_v52 = vpop.permute.xlu0 %3667 }
0x1c61   :  { %5122 = vmatpush.xpose.msk.msrb.mxu1 %vm475_vm9, %v3668_v52  ;;  %v3768_v61 = vpop.permute.xlu1 %3767 }
0x1c65   :  { %5123 = vmatpush.xpose.msk.msrb.mxu1 %vm475_vm9, %v3666_v53  ;;  %v5362_v53 = vld [vmem:[#allocation10 + $0x5] ss:$0 sm:$0xff] }
0x1c68   :  { %v3664_v56 = vpop.permute.xlu0 %3663  ;;  %5124 = vmatmul.msk.f32.vlgmr.msrb.gmra.mxu1 %vm475_vm9, %v3662_v3 }
0x1c69   :  { %5134 = vmatpush.xpose.msk.msra.mxu1 %vm475_vm9, %v3870_v44  ;;  %v3864_v15 = vpop.permute.xlu1 %3863 }
0x1c70   :  { %v3770_v59 = vpop.permute.xlu0 %3769  ;;  %5125 = vmatmul.msk.f32.gmra.mxu1 %vm475_vm9, %v3664_v56 }
0x1c71   :  { %5128 = vmatpush.xpose.msk.msra.mxu3 %vm475_vm9, %v3770_v59 }
0x1c75   :  { %5129 = vmatpush.xpose.msk.msra.mxu3 %vm475_vm9, %v3768_v61 }
0x1c78   :  { %v3868_v62 = vpop.permute.xlu0 %3867  ;;  %v3600_v31 = vpop.f32.mrf.mxu3  ;;  %5130 = vmatmul.msk.f32.vlgmr.msra.gmra.mxu3 %vm475_vm9, %v3764_v55 }
0x1c79   :  { %v3606_v0 = vmul.f32 0.35355338, %v3600_v31  ;;  %5135 = vmatpush.xpose.msk.msra.mxu1 %vm475_vm9, %v3868_v62  ;;  %4021 = vmatpush.msrb.mxu3 %v3997_v25 }
0x1c7b   :  { %v3608_v5 = vadd.f32 %v5665_v4, %v3606_v0  ;;  %4022 = vmatpush.msrb.mxu3 %v3996_v20 }
0x1c7c   :  { %5136 = vmatmul.msk.f32.vlgmr.msra.gmra.mxu1 %vm475_vm9, %v3864_v15 }
0x1c7d   :  { %4159 = vmatpush.msrb.mxu1 %v5151_v40  ;;  %v3610_v9 = vsel %vm270_vm0, %v3608_v5, -inf  ;;  %4023 = vmatpush.msrb.mxu3 %v3995_v33 }
0x1c7e   :  { %3611 = vmax.xlane.f32.xlu0 %v3610_v9 }
0x1c7f   :  { %4160 = vmatpush.msrb.mxu1 %v5150_v2  ;;  %4024 = vmatpush.msrb.mxu3 %v3994_v1 }
0x1c80   :  { %v3766_v11 = vpop.permute.xlu0 %3765  ;;  %v3603_v18 = vpop.f32.mrf.mxu3 }
0x1c81   :  { %4161 = vmatpush.msrb.mxu1 %v5149_v7  ;;  %5131 = vmatmul.msk.f32.gmra.mxu3 %vm475_vm9, %v3766_v11  ;;  %v3607_v22 = vmul.f32 0.35355338, %v3603_v18 }
0x1c83   :  { %4162 = vmatpush.msrb.mxu1 %v5148_v10  ;;  %v3609_v30 = vadd.f32 %v5666_v27, %v3607_v22 }
0x1c84   :  { %5137 = vmatmul.msk.f32.gmra.mxu1 %vm475_vm9, %v3866_v12 }
0x1c85   :  { %v3613_v29 = vsel %vm270_vm0, %v3609_v30, -inf }
0x1c8c   :  { %5152 = vmatmul.msk.f32.vlgmr.msrb.gmra.mxu1 %vm306_vm3, %v6821_v43 }
0x1c94   :  { %5153 = vmatmul.msk.f32.gmra.mxu1 %vm306_vm3, %v6842_v17 }
0x1ce5   :  { %v3694_v13 = vpop.f32.mrf.mxu1 }
0x1ce6   :  { %v3700_v14 = vmul.f32 0.35355338, %v3694_v13 }
0x1ce8   :  { %v3702_v19 = vadd.f32 %v5665_v4, %v3700_v14 }
0x1cea   :  { %v3704_v23 = vsel %vm270_vm0, %v3702_v19, -inf }
0x1ceb   :  { %3705 = vmax.xlane.f32.xlu1 %v3704_v23 }
0x1ced   :  { %v3697_v26 = vpop.f32.mrf.mxu1 }
0x1cee   :  { %v3701_v16 = vmul.f32 0.35355338, %v3697_v26 }
0x1cf0   :  { %v3703_v54 = vadd.f32 %v5666_v27, %v3701_v16 }
0x1cf1   :  { %v3612_v60 = vpop.xlane.xlu0 %3611 }
0x1cf2   :  { %v3707_v58 = vsel %vm270_vm0, %v3703_v54, -inf  ;;  %v3616_v38 = vsub.f32 %v3608_v5, %v3612_v60 }
0x1cf3   :  { %3708 = vmax.xlane.f32.xlu2 %v3707_v58  ;;  %3614 = vmax.xlane.f32.xlu1 %v3613_v29 }
0x1cf4   :  { %v3618_v39 = vmul.f32 1.442695, %v3616_v38 }
0x1cf6   :  { %5577 = vpow2.f32 %v3618_v39 }
0x1cf9   :  { %v3896_v63 = vpop.f32.mrf.mxu1 }
0x1cfa   :  { %v3902_v49 = vmul.f32 0.35355338, %v3896_v63 }
0x1cfb   :  { %v3796_v35 = vpop.f32.mrf.mxu3 }
0x1cfc   :  { %v3904_v34 = vadd.f32 %v5665_v4, %v3902_v49  ;;  %v3802_v37 = vmul.f32 0.35355338, %v3796_v35  ;;  %v7139_v3 = vpop.eup %5577 }
0x1cfd   :  { %v3622_v52 = vsel %vm270_vm0, %v7139_v3, 0.0 }
0x1cfe   :  { %v3804_v41 = vadd.f32 %v5665_v4, %v3802_v37  ;;  %v3906_v57 = vsel %vm270_vm0, %v3904_v34, -inf }
0x1cff   :  { %3907 = vmax.xlane.f32.xlu2 %v3906_v57 }
0x1d00   :  { %v3806_v24 = vsel %vm270_vm0, %v3804_v41, -inf }
0x1d01   :  { %v3899_v32 = vpop.f32.mrf.mxu1  ;;  %3807 = vmax.xlane.f32.xlu0 %v3806_v24 }
0x1d02   :  { %v3903_v50 = vmul.f32 0.35355338, %v3899_v32 }
0x1d04   :  { %v3905_v42 = vadd.f32 %v5666_v27, %v3903_v50  ;;  %v3799_v6 = vpop.f32.mrf.mxu3 }
0x1d05   :  { %v3803_v21 = vmul.f32 0.35355338, %v3799_v6 }
0x1d06   :  { %v3909_v45 = vsel %vm270_vm0, %v3905_v42, -inf }
0x1d07   :  { %v3805_v46 = vadd.f32 %v5666_v27, %v3803_v21  ;;  %3910 = vmax.xlane.f32.xlu1 %v3909_v45 }
0x1d09   :  { %v4164_v47 = vpop.f32.mrf.mxu1  ;;  %v3809_v48 = vsel %vm270_vm0, %v3805_v46, -inf }
0x1d0a   :  { %3810 = vmax.xlane.f32.xlu2 %v3809_v48  ;;  %v7147_v59 = vadd.f32 %v5362_v53, %v4164_v47 }
0x1d0f   :  { %3623 = vadd.xlane.f32.xlu1 %v3622_v52 }
0x1d11   :  { %v4167_v44 = vpop.f32.mrf.mxu1 }
0x1d12   :  { %v7143_v56 = vadd.f32 %v5362_v53, %v4167_v44 }
0x1d14   :  { %5156 = vmatpush.xpose.msk.msra.mxu3 %vm475_vm9, %v7143_v56 }
0x1d18   :  { %5157 = vmatpush.xpose.msk.msra.mxu3 %vm475_vm9, %v7147_v59 }
0x1d22   :  { %5290 = vrot.lane.b32.xlu2 %v7087_v36, %s5989_s15 }
0x1d2a   :  { %5300 = vrot.lane.b32.xlu2 %v7087_v36, %s5991_s28 }
0x1d5e   :  { %v3706_v61 = vpop.xlane.xlu1 %3705 }
0x1d5f   :  { %v3710_v55 = vsub.f32 %v3702_v19, %v3706_v61 }
0x1d61   :  { %v3712_v40 = vmul.f32 1.442695, %v3710_v55 }
0x1d63   :  { %5579 = vpow2.f32 %v3712_v40 }
0x1d66   :  { %v3709_v62 = vpop.xlane.xlu2 %3708  ;;  %v3615_v31 = vpop.xlane.xlu1 %3614 }
0x1d67   :  { %v3711_v0 = vsub.f32 %v3703_v54, %v3709_v62  ;;  %v3617_v2 = vsub.f32 %v3609_v30, %v3615_v31 }
0x1d69   :  { %v5580_v15 = vpop.eup %5579  ;;  %v3714_v4 = vmul.f32 1.442695, %v3711_v0  ;;  %v3620_v5 = vmul.f32 1.442695, %v3617_v2 }
0x1d6a   :  { %v3716_v7 = vsel %vm270_vm0, %v5580_v15, 0.0 }
0x1d6b   :  { %5581 = vpow2.f32 %v3714_v4  ;;  %3717 = vadd.xlane.f32.xlu0 %v3716_v7 }
0x1d6c   :  { %5583 = vpow2.f32 %v3620_v5  ;;  %v4173_v5 = vld [vmem:[#allocation11 + $0xb0] sm:$0xff] }
0x1d71   :  { %v5582_v9 = vpop.eup %5581 }
0x1d72   :  { %v5584_v10 = vpop.eup %5583  ;;  %v3908_v11 = vpop.xlane.xlu2 %3907  ;;  %v3719_v12 = vsel %vm270_vm0, %v5582_v9, 0.0 }
0x1d73   :  { %v3912_v13 = vsub.f32 %v3904_v34, %v3908_v11  ;;  %3720 = vadd.xlane.f32.xlu0 %v3719_v12  ;;  %v3625_v14 = vsel %vm270_vm0, %v5584_v10, 0.0  ;;  %v4171_v11 = vld [vmem:[#allocation11 + $0xa0] sm:$0xff] }
0x1d74   :  { %3626 = vadd.xlane.f32.xlu1 %v3625_v14  ;;  %v3808_v18 = vpop.xlane.xlu0 %3807 }
0x1d75   :  { %v3914_v19 = vmul.f32 1.442695, %v3912_v13  ;;  %v3812_v22 = vsub.f32 %v3804_v41, %v3808_v18 }
0x1d77   :  { %5585 = vpow2.f32 %v3914_v19  ;;  %v3814_v23 = vmul.f32 1.442695, %v3812_v22 }
0x1d79   :  { %5587 = vpow2.f32 %v3814_v23  ;;  %v5145_v23 = vld [vmem:[%s7409_s11 + $0xb8] sm:$0xff] }
0x1d7a   :  { %v3911_v25 = vpop.xlane.xlu1 %3910 }
0x1d7b   :  { %v3913_v20 = vsub.f32 %v3905_v42, %v3911_v25  ;;  %v5142_v25 = vld [vmem:[%s7409_s11 + $0xa0] sm:$0xff] }
0x1d7d   :  { %v7158_v26 = vpop.eup %5585  ;;  %v3916_v27 = vmul.f32 1.442695, %v3913_v20  ;;  %v3811_v30 = vpop.xlane.xlu2 %3810 }
0x1d7e   :  { %v3918_v16 = vsel %vm270_vm0, %v7158_v26, 0.0  ;;  %v3813_v54 = vsub.f32 %v3805_v46, %v3811_v30 }
0x1d7f   :  { %v5588_v33 = vpop.eup %5587  ;;  %5589 = vpow2.f32 %v3916_v27  ;;  %3919 = vadd.xlane.f32.xlu0 %v3918_v16  ;;  %v5363_v16 = vld [vmem:[#allocation13 + $0x5] ss:$0 sm:$0xff] }
0x1d80   :  { %v3818_v58 = vsel %vm270_vm0, %v5588_v33, 0.0  ;;  %v3816_v1 = vmul.f32 1.442695, %v3813_v54 }
0x1d81   :  { %3819 = vadd.xlane.f32.xlu1 %v3818_v58 }
0x1d82   :  { %v3624_v29 = vpop.xlane.xlu1 %3623 }
0x1d83   :  { %5591 = vrcp.f32 %v3624_v29 }
0x1d84   :  { %5593 = vpow2.f32 %v3816_v1 }
0x1d85   :  { %v7163_v63 = vpop.eup %5589  ;;  %v5291_v60 = vpop.permute.xlu2 %5290 }
0x1d86   :  { %v5292_v49 = vunpack.i.l.bf16 %v5291_v60  ;;  %v5293_v35 = vunpack.i.h.bf16 %v5291_v60  ;;  %v3921_v34 = vsel %vm270_vm0, %v7163_v63, 0.0 }
0x1d88   :  { %3754 = vmatpush.msra.mxu2 %v5292_v49 }
0x1d89   :  { %v5592_v37 = vpop.eup %5591  ;;  %3922 = vadd.xlane.f32.xlu1 %v3921_v34 }
0x1d8a   :  { %v3630_v38 = vmul.f32 %v5592_v37, %v7139_v3  ;;  %3755 = vmatpush.msra.mxu2 %v5293_v35  ;;  %v5594_v41 = vpop.eup %5593 }
0x1d8b   :  { %v3821_v32 = vsel %vm270_vm0, %v5594_v41, 0.0 }
0x1d8c   :  { %5120 = vmatmul.msk.f32.vlgmr.msrb.gmra.mxu0 %vm270_vm0, %v3630_v38 }
0x1d8d   :  { %v5301_v57 = vpop.permute.xlu2 %5300 }
0x1d8e   :  { %v5302_v24 = vunpack.i.l.bf16 %v5301_v57  ;;  %v5303_v39 = vunpack.i.h.bf16 %v5301_v57 }
0x1d90   :  { %3854 = vmatpush.msra.mxu0 %v5302_v24 }
0x1d91   :  { %3822 = vadd.xlane.f32.xlu1 %v3821_v32  ;;  %v5364_v32 = vld [vmem:[#allocation16 + $0x4] ss:$0 sm:$0xff] }
0x1d92   :  { %3855 = vmatpush.msra.mxu0 %v5303_v39 }
0x1d93   :  { %5295 = vrot.lane.b32.xlu0 %v7087_v36, %s5990_s17 }
0x1d94   :  { %4126 = vmatpush.msrb.mxu0 %v5145_v23 }
0x1dde   :  { %v3718_v50 = vpop.xlane.xlu0 %3717 }
0x1ddf   :  { %5595 = vrcp.f32 %v3718_v50 }
0x1de5   :  { %v5596_v42 = vpop.eup %5595 }
0x1de6   :  { %v3724_v6 = vmul.f32 %v5596_v42, %v5580_v15  ;;  %v3721_v21 = vpop.xlane.xlu0 %3720  ;;  %v4174_v15 = vld [vmem:[#allocation11 + $0xb8] sm:$0xff] }
0x1de7   :  { %5597 = vrcp.f32 %v3721_v21  ;;  %v3627_v45 = vpop.xlane.xlu1 %3626 }
0x1de8   :  { %5599 = vrcp.f32 %v3627_v45  ;;  %5126 = vmatmul.msk.f32.vlgmr.msra.gmra.mxu2 %vm270_vm0, %v3724_v6 }
0x1ded   :  { %v5598_v46 = vpop.eup %5597 }
0x1dee   :  { %v5600_v47 = vpop.eup %5599  ;;  %v3725_v48 = vmul.f32 %v5598_v46, %v5582_v9  ;;  %v4172_v9 = vld [vmem:[#allocation11 + $0xa8] sm:$0xff] }
0x1def   :  { %v3631_v3 = vmul.f32 %v5600_v47, %v5584_v10 }
0x1df0   :  { %5127 = vmatmul.msk.f32.gmra.mxu2 %vm270_vm0, %v3725_v48 }
0x1df1   :  { %5121 = vmatmul.msk.f32.gmra.mxu0 %vm270_vm0, %v3631_v3 }
0x1df2   :  { %v3920_v61 = vpop.xlane.xlu0 %3919 }
0x1df4   :  { %v3820_v52 = vpop.xlane.xlu1 %3819 }
0x1df5   :  { %5601 = vrcp.f32 %v3820_v52 }
0x1df6   :  { %5603 = vrcp.f32 %v3920_v61 }
0x1dfb   :  { %v5602_v36 = vpop.eup %5601 }
0x1dfc   :  { %v3826_v53 = vmul.f32 %v5602_v36, %v5588_v33  ;;  %v3923_v44 = vpop.xlane.xlu1 %3922  ;;  %v5604_v62 = vpop.eup %5603 }
0x1dfd   :  { %v3926_v2 = vmul.f32 %v5604_v62, %v7158_v26 }
0x1dfe   :  { %5132 = vmatmul.msk.f32.vlgmr.msra.gmra.mxu0 %vm270_vm0, %v3826_v53 }
0x1e04   :  { %v3823_v55 = vpop.xlane.xlu1 %3822 }
0x1e05   :  { %5605 = vrcp.f32 %v3823_v55  ;;  %v5296_v40 = vpop.permute.xlu0 %5295 }
0x1e06   :  { %v5297_v31 = vunpack.i.l.bf16 %v5296_v40  ;;  %5607 = vrcp.f32 %v3923_v44  ;;  %v5298_v0 = vunpack.i.h.bf16 %v5296_v40 }
0x1e08   :  { %3954 = vmatpush.msrb.mxu2 %v5297_v31 }
0x1e09   :  { %v3655_v13 = vpop.f32.mrf.mxu0 }
0x1e0a   :  { %3955 = vmatpush.msrb.mxu2 %v5298_v0 }
0x1e0b   :  { %v5606_v4 = vpop.eup %5605  ;;  %5138 = vmatmul.msk.f32.vlgmr.msrb.gmra.mxu2 %vm270_vm0, %v3926_v2 }
0x1e0c   :  { %v3827_v7 = vmul.f32 %v5606_v4, %v5594_v41  ;;  %4192 = vmatpush.msra.mxu2 %v4174_v15  ;;  %v5608_v10 = vpop.eup %5607 }
0x1e0d   :  { %v3927_v12 = vmul.f32 %v5608_v10, %v7163_v63 }
0x1e0e   :  { %5133 = vmatmul.msk.f32.gmra.mxu0 %vm270_vm0, %v3827_v7  ;;  %4193 = vmatpush.msra.mxu2 %v4173_v5 }
0x1e10   :  { %4194 = vmatpush.msra.mxu2 %v4172_v9 }
0x1e12   :  { %4195 = vmatpush.msra.mxu2 %v4171_v11 }
0x1e13   :  { %5139 = vmatmul.msk.f32.gmra.mxu2 %vm270_vm0, %v3927_v12 }
0x1e1b   :  { %5154 = vmatmul.msk.f32.vlgmr.msra.gmra.mxu2 %vm306_vm3, %v6821_v43  ;;  %v5144_v43 = vld [vmem:[%s7409_s11 + $0xb0] sm:$0xff] }
0x1e1c   :  { %4127 = vmatpush.msrb.mxu0 %v5144_v43 }
0x1e23   :  { %5155 = vmatmul.msk.f32.gmra.mxu2 %vm306_vm3, %v6842_v17  ;;  %v5143_v17 = vld [vmem:[%s7409_s11 + $0xa8] sm:$0xff] }
0x1e24   :  { %4128 = vmatpush.msrb.mxu0 %v5143_v17 }
0x1e26   :  { %4129 = vmatpush.msrb.mxu0 %v5142_v25 }
0x1e6b   :  { %v3757_v14 = vpop.f32.mrf.mxu2 }
0x1e6c   :  { %3965 = vrot.lane.b32.xlu2 %v3757_v14, %s5977_s5 }
0x1e6e   :  { %v3658_v18 = vpop.f32.mrf.mxu0 }
0x1e73   :  { %v3760_v19 = vpop.f32.mrf.mxu2 }
0x1e74   :  { %3967 = vrot.lane.b32.xlu2 %v3760_v19, %s5977_s5 }
0x1e7b   :  { %v3857_v22 = vpop.f32.mrf.mxu0 }
0x1e7c   :  { %3973 = vrot.lane.b32.xlu1 %v3857_v22, %s5972_s6 }
0x1e8b   :  { %v3860_v26 = vpop.f32.mrf.mxu0 }
0x1e8e   :  { %v3957_v20 = vpop.f32.mrf.mxu2 }
0x1e8f   :  { %3981 = vrot.lane.b32.xlu0 %v3957_v20, %s5992_s20 }
0x1e96   :  { %v3960_v27 = vpop.f32.mrf.mxu2 }
0x1e97   :  { %3983 = vrot.lane.b32.xlu2 %v3960_v27, %s5992_s20  ;;  %3975 = vrot.lane.b32.xlu0 %v3860_v26, %s5972_s6  ;;  %v5365_v26 = vld [vmem:[#allocation5 + $0x9] ss:$0 sm:$0xff] }
0x1e9e   :  { %v4197_v30 = vpop.f32.mrf.mxu2 }
0x1e9f   :  { %v4198_v54 = vadd.f32 %v5363_v16, %v4197_v30 }
0x1ea6   :  { %v4200_v33 = vpop.f32.mrf.mxu2 }
0x1ea7   :  { %v4201_v58 = vadd.f32 %v5363_v16, %v4200_v33 }
0x1ea9   :  { %4284 = vmatpush.msra.mxu0 %v4201_v58  ;;  %v7203_v29 = vpack.i.bf16 %v4198_v54, %v4201_v58 }
0x1eab   :  { %4285 = vmatpush.msra.mxu0 %v4198_v54  ;;  %v5366_v54 = vld [vmem:[#allocation7 + $0x9] ss:$0 sm:$0xff] }
0x1ec6   :  { %v3966_v1 = vpop.permute.xlu2 %3965 }
0x1ec7   :  { %v3987_v60 = vsel %vm475_vm9, %v3655_v13, %v3966_v1 }
0x1ece   :  { %v3968_v34 = vpop.permute.xlu2 %3967 }
0x1ecf   :  { %v3988_v38 = vsel %vm475_vm9, %v3658_v18, %v3968_v34 }
0x1eee   :  { %v3974_v63 = vpop.permute.xlu1 %3973 }
0x1eef   :  { %v3989_v49 = vsel %vm270_vm0, %v3987_v60, %v3974_v63 }
0x1ef1   :  { %v3984_v57 = vpop.permute.xlu2 %3983 }
0x1f01   :  { %v3982_v35 = vpop.permute.xlu0 %3981 }
0x1f02   :  { %v3991_v37 = vsel %vm896_vm10, %v3989_v49, %v3982_v35 }
0x1f03   :  { %5140 = vmatmul.msk.f32.vlgmr.msrb.gmra.mxu3 %vm306_vm3, %v3991_v37 }
0x1f09   :  { %v3976_v41 = vpop.permute.xlu0 %3975 }
0x1f0a   :  { %v3990_v24 = vsel %vm270_vm0, %v3988_v38, %v3976_v41 }
0x1f0b   :  { %v3992_v39 = vsel %vm896_vm10, %v3990_v24, %v3984_v57  ;;  %v5367_v24 = vld [vmem:[#allocation8 + $0x5] ss:$0 sm:$0xff] }
0x1f0c   :  { %5141 = vmatmul.msk.f32.gmra.mxu3 %vm306_vm3, %v3992_v39 }
0x1f86   :  { %v4026_v50 = vpop.f32.mrf.mxu3 }
0x1f87   :  { %v4027_v42 = vadd.f32 %v5364_v32, %v4026_v50 }
0x1f89   :  { %v7214_v6 = vadd.f32 %v4027_v42, %v7024_v51 }
0x1f8b   :  { %v4034_v21 = vsel %vm306_vm3, %v7214_v6, 0.0 }
0x1f8c   :  { %4035 = vadd.xlane.f32.xlu0 %v4034_v21 }
0x1f8f   :  { %v4029_v45 = vpop.f32.mrf.mxu3 }
0x1f90   :  { %v4030_v46 = vadd.f32 %v5364_v32, %v4029_v45 }
0x1f92   :  { %v7219_v47 = vadd.f32 %v4030_v46, %v7029_v8 }
0x1f94   :  { %v4037_v48 = vsel %vm306_vm3, %v7219_v47, 0.0 }
0x1f95   :  { %4038 = vadd.xlane.f32.xlu2 %v4037_v48 }
0x1fad   :  { %4299 = vrot.lane.b32.xlu2 %v7143_v56, %s5989_s15 }
0x1fb5   :  { %4399 = vrot.lane.b32.xlu2 %v7147_v59, %s5991_s28 }
0x1fff   :  { %v4036_v51 = vpop.xlane.xlu0 %4035 }
0x2000   :  { %v4040_v3 = vmul.f32 %v4036_v51, %v6214_v28 }
0x2002   :  { %v4042_v52 = vsub.f32 %v7214_v6, %v4040_v3 }
0x2004   :  { %v4044_v36 = vmul.f32 %v4042_v52, %v4042_v52  ;;  %v4087_v33 = vmul.f32 %v5365_v26, %v4042_v52 }
0x2006   :  { %v4046_v53 = vsel %vm306_vm3, %v4044_v36, 0.0  ;;  %v5667_v36 = vld [vmem:[%s7445_s16] sm:$0xff] }
0x2007   :  { %4047 = vadd.xlane.f32.xlu1 %v4046_v53 }
0x2008   :  { %v4039_v8 = vpop.xlane.xlu2 %4038 }
0x2009   :  { %v4041_v44 = vmul.f32 %v4039_v8, %v6214_v28 }
0x200b   :  { %v4043_v61 = vsub.f32 %v7219_v47, %v4041_v44 }
0x200d   :  { %v4045_v55 = vmul.f32 %v4043_v61, %v4043_v61  ;;  %v4088_v37 = vmul.f32 %v5365_v26, %v4043_v61 }
0x200f   :  { %v4049_v40 = vsel %vm306_vm3, %v4045_v55, 0.0 }
0x2010   :  { %v4300_v62 = vpop.permute.xlu2 %4299  ;;  %4050 = vadd.xlane.f32.xlu0 %v4049_v40 }
0x2011   :  { %5162 = vmatpush.xpose.msk.msra.mxu1 %vm475_vm9, %v4300_v62 }
0x2018   :  { %v4400_v21 = vpop.permute.xlu2 %4399 }
0x2020   :  { %4297 = vrot.lane.b32.xlu1 %v7147_v59, %s5989_s15 }
0x2028   :  { %4501 = vrot.lane.b32.xlu1 %v7143_v56, %s5990_s17 }
0x207a   :  { %v4048_v31 = vpop.xlane.xlu1 %4047 }
0x207b   :  { %v4052_v0 = vmul.f32 0.032258064, %v4048_v31 }
0x207d   :  { %5609 = vrsqrt.f32 %v4052_v0  ;;  %vm4061_vm12 = vcmp.eq.f32.partialorder %v4052_v0, inf  ;;  %v4064_v18 = vand.u32 2147483648, %v4052_v0  ;;  %vm4063_vm13 = vcmp.eq.f32.partialorder %v4052_v0, 0.0 }
0x2083   :  { %v5610_v2 = vpop.eup %5609  ;;  %v4051_v15 = vpop.xlane.xlu0 %4050 }
0x2084   :  { %v4055_v4 = vmul.f32 %v5610_v2, %v4052_v0  ;;  %v4053_v5 = vmul.f32 0.032258064, %v4051_v15  ;;  %v5668_v15 = vld [vmem:[%s7445_s16 + $0x8] sm:$0xff] }
0x2086   :  { %v4056_v7 = vmul.f32 %v5610_v2, %v4055_v4  ;;  %5611 = vrsqrt.f32 %v4053_v5  ;;  %vm4073_vm14 = vcmp.eq.f32.partialorder %v4053_v5, inf  ;;  %v4076_v16 = vand.u32 2147483648, %v4053_v5 }
0x2087   :  { %vm4075_vm1 = vcmp.eq.f32.partialorder %v4053_v5, 0.0 }
0x2088   :  { %v4057_v9 = vmul.f32 0.5, %v4056_v7 }
0x208a   :  { %v4058_v10 = vsub.f32 1.5, %v4057_v9 }
0x208c   :  { %v5612_v11 = vpop.eup %5611  ;;  %v4059_v12 = vmul.f32 %v5610_v2, %v4058_v10 }
0x208d   :  { %v4067_v13 = vmul.f32 %v5612_v11, %v4053_v5 }
0x208e   :  { %v4060_v14 = vmul.f32 %v4059_v12, %v4052_v0 }
0x208f   :  { %v4068_v19 = vmul.f32 %v5612_v11, %v4067_v13 }
0x2090   :  { %v4062_v22 = vsel %vm4061_vm12, %v4052_v0, %v4060_v14 }
0x2091   :  { %v4069_v23 = vmul.f32 0.5, %v4068_v19  ;;  %v4065_v43 = vsel %vm4063_vm13, %v4064_v18, %v4062_v22 }
0x2092   :  { %v4298_v17 = vpop.permute.xlu1 %4297  ;;  %v4078_v25 = vadd.f32 1e-06, %v4065_v43 }
0x2093   :  { %5163 = vmatpush.xpose.msk.msra.mxu1 %vm475_vm9, %v4298_v17  ;;  %v4070_v20 = vsub.f32 1.5, %v4069_v23 }
0x2094   :  { %5613 = vrcp.f32 %v4078_v25 }
0x2095   :  { %v4071_v27 = vmul.f32 %v5612_v11, %v4070_v20 }
0x2097   :  { %v4072_v30 = vmul.f32 %v4071_v27, %v4053_v5 }
0x2099   :  { %v4074_v58 = vsel %vm4073_vm14, %v4053_v5, %v4072_v30 }
0x209a   :  { %v5614_v1 = vpop.eup %5613  ;;  %v4502_v63 = vpop.permute.xlu1 %4501  ;;  %v4077_v60 = vsel %vm4075_vm1, %v4076_v16, %v4074_v58 }
0x209b   :  { %5174 = vmatpush.xpose.msk.msrb.mxu1 %vm475_vm9, %v4502_v63  ;;  %v4089_v49 = vmul.f32 %v5614_v1, %v4087_v33  ;;  %v4079_v35 = vadd.f32 1e-06, %v4077_v60 }
0x209d   :  { %v4096_v34 = vadd.f32 %v5366_v54, %v4089_v49  ;;  %5615 = vrcp.f32 %v4079_v35 }
0x209f   :  { %5146 = vmatmul.msk.f32.vlgmr.msrb.gmra.mxu0 %vm306_vm3, %v4096_v34 }
0x20a3   :  { %v5616_v38 = vpop.eup %5615 }
0x20a4   :  { %v4090_v41 = vmul.f32 %v5616_v38, %v4088_v37 }
0x20a6   :  { %v4097_v57 = vadd.f32 %v5366_v54, %v4090_v41 }
0x20a8   :  { %5147 = vmatmul.msk.f32.gmra.mxu0 %vm306_vm3, %v4097_v57 }
0x211c   :  { %v4131_v39 = vpop.f32.mrf.mxu0 }
0x211d   :  { %v4132_v32 = vadd.f32 %v5367_v24, %v4131_v39 }
0x211f   :  { %4395 = vrot.lane.b32.xlu1 %v4132_v32, %s5991_s28  ;;  %4293 = vrot.lane.b32.xlu0 %v4132_v32, %s5989_s15 }
0x2120   :  { %5158 = vmatmul.msk.f32.vlgmr.msra.gmra.mxu3 %vm475_vm9, %v4132_v32 }
0x2125   :  { %v4134_v50 = vpop.f32.mrf.mxu0 }
0x2126   :  { %v4135_v42 = vadd.f32 %v5367_v24, %v4134_v50 }
0x2127   :  { %4401 = vrot.lane.b32.xlu0 %v7143_v56, %s5991_s28 }
0x2128   :  { %4497 = vrot.lane.b32.xlu1 %v4135_v42, %s5990_s17  ;;  %4295 = vrot.lane.b32.xlu2 %v4135_v42, %s5989_s15 }
0x2129   :  { %5159 = vmatmul.msk.f32.gmra.mxu3 %vm475_vm9, %v4135_v42 }
0x212f   :  { %4499 = vrot.lane.b32.xlu0 %v7147_v59, %s5990_s17 }
0x2130   :  { %4495 = vrot.lane.b32.xlu2 %v4132_v32, %s5990_s17 }
0x2137   :  { %4397 = vrot.lane.b32.xlu0 %v4135_v42, %s5991_s28 }
0x2182   :  { %v4296_v46 = vpop.permute.xlu2 %4295 }
0x218a   :  { %v4496_v3 = vpop.permute.xlu2 %4495 }
0x2191   :  { %v4294_v45 = vpop.permute.xlu0 %4293  ;;  %v4396_v56 = vpop.permute.xlu1 %4395 }
0x2192   :  { %5164 = vmatmul.msk.f32.vlgmr.msra.gmra.mxu1 %vm475_vm9, %v4294_v45 }
0x2199   :  { %v4402_v48 = vpop.permute.xlu0 %4401 }
0x219a   :  { %5165 = vmatmul.msk.f32.gmra.mxu1 %vm475_vm9, %v4296_v46  ;;  %5168 = vmatpush.xpose.msk.msrb.mxu3 %vm475_vm9, %v4402_v48  ;;  %v4498_v61 = vpop.permute.xlu1 %4497 }
0x219e   :  { %5169 = vmatpush.xpose.msk.msrb.mxu3 %vm475_vm9, %v4400_v21 }
0x21a1   :  { %5170 = vmatmul.msk.f32.vlgmr.msrb.gmra.mxu3 %vm475_vm9, %v4396_v56  ;;  %v4500_v59 = vpop.permute.xlu0 %4499 }
0x21a2   :  { %5175 = vmatpush.xpose.msk.msrb.mxu1 %vm475_vm9, %v4500_v59 }
0x21a3   :  { %v4232_v51 = vpop.f32.mrf.mxu3 }
0x21a4   :  { %v4238_v52 = vmul.f32 0.35355338, %v4232_v51 }
0x21a5   :  { %5176 = vmatmul.msk.f32.vlgmr.msrb.gmra.mxu1 %vm475_vm9, %v4496_v3 }
0x21a6   :  { %v4240_v53 = vadd.f32 %v5667_v36, %v4238_v52 }
0x21a8   :  { %v4242_v8 = vsel %vm270_vm0, %v4240_v53, -inf }
0x21a9   :  { %4243 = vmax.xlane.f32.xlu0 %v4242_v8  ;;  %v4398_v44 = vpop.permute.xlu0 %4397 }
0x21aa   :  { %5171 = vmatmul.msk.f32.gmra.mxu3 %vm475_vm9, %v4398_v44 }
0x21ac   :  { %v4235_v62 = vpop.f32.mrf.mxu3 }
0x21ad   :  { %5177 = vmatmul.msk.f32.gmra.mxu1 %vm475_vm9, %v4498_v61  ;;  %v4239_v0 = vmul.f32 0.35355338, %v4235_v62 }
0x21af   :  { %v4241_v4 = vadd.f32 %v5668_v15, %v4239_v0 }
0x21b1   :  { %v4245_v9 = vsel %vm270_vm0, %v4241_v4, -inf }
0x220f   :  { %v4326_v55 = vpop.f32.mrf.mxu1 }
0x2210   :  { %v4332_v40 = vmul.f32 0.35355338, %v4326_v55 }
0x2212   :  { %v4334_v31 = vadd.f32 %v5667_v36, %v4332_v40 }
0x2214   :  { %v4336_v2 = vsel %vm270_vm0, %v4334_v31, -inf }
0x2215   :  { %4337 = vmax.xlane.f32.xlu2 %v4336_v2 }
0x2217   :  { %v4329_v5 = vpop.f32.mrf.mxu1 }
0x2218   :  { %v4333_v23 = vmul.f32 0.35355338, %v4329_v5 }
0x221a   :  { %v4335_v20 = vadd.f32 %v5668_v15, %v4333_v23 }
0x221c   :  { %v4244_v7 = vpop.xlane.xlu0 %4243  ;;  %v4339_v54 = vsel %vm270_vm0, %v4335_v20, -inf }
0x221d   :  { %v4248_v10 = vsub.f32 %v4240_v53, %v4244_v7  ;;  %4246 = vmax.xlane.f32.xlu2 %v4245_v9 }
0x221f   :  { %v4250_v11 = vmul.f32 1.442695, %v4248_v10 }
0x2221   :  { %5617 = vpow2.f32 %v4250_v11 }
0x2222   :  { %v4528_v12 = vpop.f32.mrf.mxu1 }
0x2223   :  { %v4534_v58 = vmul.f32 0.35355338, %v4528_v12 }
0x2224   :  { %v4428_v13 = vpop.f32.mrf.mxu3 }
0x2225   :  { %v4434_v14 = vmul.f32 0.35355338, %v4428_v13  ;;  %v4536_v63 = vadd.f32 %v5667_v36, %v4534_v58 }
0x2227   :  { %v5618_v18 = vpop.eup %5617  ;;  %v4436_v19 = vadd.f32 %v5667_v36, %v4434_v14  ;;  %v4538_v60 = vsel %vm270_vm0, %v4536_v63, -inf }
0x2228   :  { %v4254_v22 = vsel %vm270_vm0, %v5618_v18, 0.0 }
0x2229   :  { %4255 = vadd.xlane.f32.xlu2 %v4254_v22  ;;  %v4438_v43 = vsel %vm270_vm0, %v4436_v19, -inf }
0x222a   :  { %4439 = vmax.xlane.f32.xlu1 %v4438_v43  ;;  %v4531_v17 = vpop.f32.mrf.mxu1 }
0x222b   :  { %v4535_v25 = vmul.f32 0.35355338, %v4531_v17 }
0x222d   :  { %v4537_v26 = vadd.f32 %v5668_v15, %v4535_v25  ;;  %v4431_v27 = vpop.f32.mrf.mxu3 }
0x222e   :  { %v4435_v30 = vmul.f32 0.35355338, %v4431_v27 }
0x222f   :  { %v4541_v16 = vsel %vm270_vm0, %v4537_v26, -inf }
0x2230   :  { %v7275_v33 = vadd.f32 %v5668_v15, %v4435_v30 }
0x2231   :  { %4542 = vmax.xlane.f32.xlu2 %v4541_v16 }
0x2232   :  { %4340 = vmax.xlane.f32.xlu1 %v4339_v54  ;;  %v4441_v1 = vsel %vm270_vm0, %v7275_v33, -inf }
0x2233   :  { %4442 = vmax.xlane.f32.xlu0 %v4441_v1 }
0x223b   :  { %4539 = vmax.xlane.f32.xlu0 %v4538_v60 }
0x224f   :  { %5305 = vrot.lane.b32.xlu0 %v7203_v29, %s5989_s15 }
0x2288   :  { %v4338_v49 = vpop.xlane.xlu2 %4337 }
0x2289   :  { %v4342_v35 = vsub.f32 %v4334_v31, %v4338_v49 }
0x228b   :  { %v4344_v34 = vmul.f32 1.442695, %v4342_v35 }
0x228d   :  { %5619 = vpow2.f32 %v4344_v34 }
0x2290   :  { %v4247_v37 = vpop.xlane.xlu2 %4246 }
0x2291   :  { %v4249_v38 = vsub.f32 %v4241_v4, %v4247_v37 }
0x2293   :  { %v5620_v41 = vpop.eup %5619  ;;  %v4252_v57 = vmul.f32 1.442695, %v4249_v38 }
0x2294   :  { %v4348_v24 = vsel %vm270_vm0, %v5620_v41, 0.0 }
0x2295   :  { %5621 = vpow2.f32 %v4252_v57  ;;  %4349 = vadd.xlane.f32.xlu1 %v4348_v24 }
0x229b   :  { %v5622_v39 = vpop.eup %5621 }
0x229c   :  { %v4256_v32 = vpop.xlane.xlu2 %4255  ;;  %v4257_v50 = vsel %vm270_vm0, %v5622_v39, 0.0 }
0x229d   :  { %5623 = vrcp.f32 %v4256_v32  ;;  %v4440_v42 = vpop.xlane.xlu1 %4439  ;;  %4258 = vadd.xlane.f32.xlu2 %v4257_v50 }
0x229e   :  { %v4444_v21 = vsub.f32 %v4436_v19, %v4440_v42 }
0x22a0   :  { %v4446_v45 = vmul.f32 1.442695, %v4444_v21 }
0x22a2   :  { %5625 = vpow2.f32 %v4446_v45 }
0x22a3   :  { %v5624_v46 = vpop.eup %5623 }
0x22a4   :  { %v4262_v48 = vmul.f32 %v5624_v46, %v5618_v18  ;;  %v4543_v56 = vpop.xlane.xlu2 %4542 }
0x22a5   :  { %v4545_v59 = vsub.f32 %v4537_v26, %v4543_v56  ;;  %v4341_v51 = vpop.xlane.xlu1 %4340  ;;  %v4628_v56 = vld [vmem:[#allocation14 + $0xb0] sm:$0xff] }
0x22a6   :  { %v4343_v3 = vsub.f32 %v4335_v20, %v4341_v51  ;;  %5160 = vmatmul.msk.f32.vlgmr.msra.gmra.mxu0 %vm270_vm0, %v4262_v48  ;;  %v4443_v52 = vpop.xlane.xlu0 %4442  ;;  %v4629_v48 = vld [vmem:[#allocation14 + $0xb8] sm:$0xff]  ;;  %v4626_v51 = vld [vmem:[#allocation14 + $0xa0] sm:$0xff] }
0x22a7   :  { %v4548_v36 = vmul.f32 1.442695, %v4545_v59  ;;  %v4445_v10 = vsub.f32 %v7275_v33, %v4443_v52  ;;  %4653 = vmatpush.msra.mxu3 %v4629_v48  ;;  %v4627_v59 = vld [vmem:[#allocation14 + $0xa8] sm:$0xff] }
0x22a8   :  { %v5626_v53 = vpop.eup %5625  ;;  %v4346_v8 = vmul.f32 1.442695, %v4343_v3 }
0x22a9   :  { %5627 = vpow2.f32 %v4548_v36  ;;  %v4450_v44 = vsel %vm270_vm0, %v5626_v53, 0.0  ;;  %v4448_v11 = vmul.f32 1.442695, %v4445_v10  ;;  %4654 = vmatpush.msra.mxu3 %v4628_v56 }
0x22aa   :  { %5629 = vpow2.f32 %v4346_v8  ;;  %4451 = vadd.xlane.f32.xlu2 %v4450_v44 }
0x22ab   :  { %4655 = vmatpush.msra.mxu3 %v4627_v59  ;;  %v5369_v59 = vld [vmem:[#allocation5 + $0xa] ss:$0 sm:$0xff] }
0x22ad   :  { %4656 = vmatpush.msra.mxu3 %v4626_v51 }
0x22ae   :  { %v4540_v61 = vpop.xlane.xlu0 %4539 }
0x22af   :  { %v7287_v55 = vpop.eup %5627  ;;  %v4544_v40 = vsub.f32 %v4536_v63, %v4540_v61 }
0x22b0   :  { %v5630_v62 = vpop.eup %5629  ;;  %v4553_v31 = vsel %vm270_vm0, %v7287_v55, 0.0 }
0x22b1   :  { %v4546_v0 = vmul.f32 1.442695, %v4544_v40  ;;  %4554 = vadd.xlane.f32.xlu0 %v4553_v31  ;;  %v4351_v2 = vsel %vm270_vm0, %v5630_v62, 0.0 }
0x22b2   :  { %4352 = vadd.xlane.f32.xlu1 %v4351_v2  ;;  %v5368_v2 = vld [vmem:[#allocation16 + $0x5] ss:$0 sm:$0xff] }
0x22b3   :  { %5631 = vpow2.f32 %v4546_v0 }
0x22b4   :  { %5633 = vpow2.f32 %v4448_v11 }
0x22b9   :  { %v5632_v15 = vpop.eup %5631 }
0x22ba   :  { %v4550_v4 = vsel %vm270_vm0, %v5632_v15, 0.0  ;;  %v5634_v12 = vpop.eup %5633 }
0x22bb   :  { %4551 = vadd.xlane.f32.xlu1 %v4550_v4  ;;  %v4453_v13 = vsel %vm270_vm0, %v5634_v12, 0.0 }
0x22c1   :  { %v5306_v5 = vpop.permute.xlu0 %5305 }
0x22c2   :  { %v5307_v7 = vunpack.i.l.bf16 %v5306_v5  ;;  %5315 = vrot.lane.b32.xlu2 %v7203_v29, %s5991_s28  ;;  %v5308_v9 = vunpack.i.h.bf16 %v5306_v5 }
0x22c4   :  { %4386 = vmatpush.msrb.mxu2 %v5307_v7 }
0x22c6   :  { %4387 = vmatpush.msrb.mxu2 %v5308_v9 }
0x22d4   :  { %5310 = vrot.lane.b32.xlu1 %v7203_v29, %s5990_s17 }
0x22fe   :  { %4454 = vadd.xlane.f32.xlu1 %v4453_v13 }
0x2308   :  { %v4350_v14 = vpop.xlane.xlu1 %4349 }
0x2309   :  { %5635 = vrcp.f32 %v4350_v14 }
0x230f   :  { %v5636_v18 = vpop.eup %5635 }
0x2310   :  { %v4356_v19 = vmul.f32 %v5636_v18, %v5620_v41  ;;  %v4259_v22 = vpop.xlane.xlu2 %4258 }
0x2311   :  { %5637 = vrcp.f32 %v4259_v22 }
0x2312   :  { %5166 = vmatmul.msk.f32.vlgmr.msrb.gmra.mxu2 %vm270_vm0, %v4356_v19 }
0x2317   :  { %v5638_v23 = vpop.eup %5637 }
0x2318   :  { %v4263_v43 = vmul.f32 %v5638_v23, %v5622_v39 }
0x231a   :  { %5161 = vmatmul.msk.f32.gmra.mxu0 %vm270_vm0, %v4263_v43 }
0x231d   :  { %v4452_v29 = vpop.xlane.xlu2 %4451 }
0x231e   :  { %5639 = vrcp.f32 %v4452_v29 }
0x2323   :  { %v4287_v39 = vpop.f32.mrf.mxu0 }
0x2324   :  { %v5640_v20 = vpop.eup %5639  ;;  %v4555_v58 = vpop.xlane.xlu0 %4554 }
0x2325   :  { %v4353_v17 = vpop.xlane.xlu1 %4352  ;;  %v5316_v25 = vpop.permute.xlu2 %5315  ;;  %v4458_v30 = vmul.f32 %v5640_v20, %v5626_v53  ;;  %v5183_v20 = vld [vmem:[%s7417_s19 + $0x68] sm:$0xff] }
0x2326   :  { %5641 = vrcp.f32 %v4353_v17  ;;  %v5317_v26 = vunpack.i.l.bf16 %v5316_v25  ;;  %v5318_v27 = vunpack.i.h.bf16 %v5316_v25  ;;  %v5185_v17 = vld [vmem:[%s7417_s19 + $0x78] sm:$0xff]  ;;  %v5184_v25 = vld [vmem:[%s7417_s19 + $0x70] sm:$0xff] }
0x2328   :  { %4486 = vmatpush.msrb.mxu0 %v5317_v26  ;;  %v5182_v26 = vld [vmem:[%s7417_s19 + $0x60] sm:$0xff] }
0x232a   :  { %4487 = vmatpush.msrb.mxu0 %v5318_v27 }
0x232b   :  { %5172 = vmatmul.msk.f32.vlgmr.msrb.gmra.mxu0 %vm270_vm0, %v4458_v30 }
0x232c   :  { %v5642_v16 = vpop.eup %5641  ;;  %4758 = vmatpush.msra.mxu0 %v5185_v17 }
0x232d   :  { %v4357_v33 = vmul.f32 %v5642_v16, %v5630_v62 }
0x232e   :  { %v4552_v54 = vpop.xlane.xlu1 %4551  ;;  %4759 = vmatpush.msra.mxu0 %v5184_v25 }
0x232f   :  { %5167 = vmatmul.msk.f32.gmra.mxu2 %vm270_vm0, %v4357_v33  ;;  %5643 = vrcp.f32 %v4552_v54 }
0x2330   :  { %5645 = vrcp.f32 %v4555_v58  ;;  %4760 = vmatpush.msra.mxu0 %v5183_v20 }
0x2332   :  { %4761 = vmatpush.msra.mxu0 %v5182_v26 }
0x2335   :  { %v5644_v63 = vpop.eup %5643 }
0x2336   :  { %v4558_v35 = vmul.f32 %v5644_v63, %v5632_v15  ;;  %v5646_v34 = vpop.eup %5645  ;;  %v5195_v63 = vld [vmem:[%s7419_s21 + $0xf8] sm:$0xff] }
0x2337   :  { %v4559_v37 = vmul.f32 %v5646_v34, %v7287_v55  ;;  %4799 = vmatpush.msra.mxu1 %v5195_v63 }
0x2346   :  { %v5311_v1 = vpop.permute.xlu1 %5310 }
0x2347   :  { %v5312_v60 = vunpack.i.l.bf16 %v5311_v1  ;;  %v5313_v49 = vunpack.i.h.bf16 %v5311_v1 }
0x2349   :  { %4586 = vmatpush.msra.mxu2 %v5312_v60  ;;  %v5194_v60 = vld [vmem:[%s7419_s21 + $0xf0] sm:$0xff] }
0x234a   :  { %4800 = vmatpush.msra.mxu1 %v5194_v60 }
0x234b   :  { %4587 = vmatpush.msra.mxu2 %v5313_v49 }
0x234c   :  { %5178 = vmatmul.msk.f32.vlgmr.msra.gmra.mxu2 %vm270_vm0, %v4558_v35  ;;  %v5193_v35 = vld [vmem:[%s7419_s21 + $0xe8] sm:$0xff] }
0x234d   :  { %4801 = vmatpush.msra.mxu1 %v5193_v35 }
0x2354   :  { %5179 = vmatmul.msk.f32.gmra.mxu2 %vm270_vm0, %v4559_v37 }
0x2371   :  { %v4455_v38 = vpop.xlane.xlu1 %4454 }
0x2372   :  { %5647 = vrcp.f32 %v4455_v38  ;;  %v5192_v38 = vld [vmem:[%s7419_s21 + $0xe0] sm:$0xff] }
0x2373   :  { %4802 = vmatpush.msra.mxu1 %v5192_v38 }
0x2378   :  { %v5648_v41 = vpop.eup %5647 }
0x2379   :  { %v4459_v57 = vmul.f32 %v5648_v41, %v5634_v12 }
0x237b   :  { %5173 = vmatmul.msk.f32.gmra.mxu0 %vm270_vm0, %v4459_v57 }
0x2395   :  { %v4389_v24 = vpop.f32.mrf.mxu2 }
0x2396   :  { %4597 = vrot.lane.b32.xlu2 %v4389_v24, %s5977_s5  ;;  %v5191_v24 = vld [vmem:[%s7419_s21 + $0xd8] sm:$0xff] }
0x2397   :  { %v4290_v32 = vpop.f32.mrf.mxu0  ;;  %4803 = vmatpush.msra.mxu1 %v5191_v24 }
0x23a8   :  { %v4489_v50 = vpop.f32.mrf.mxu0 }
0x23a9   :  { %4605 = vrot.lane.b32.xlu2 %v4489_v50, %s5972_s6 }
0x23b2   :  { %v4392_v42 = vpop.f32.mrf.mxu2 }
0x23b3   :  { %4599 = vrot.lane.b32.xlu0 %v4392_v42, %s5977_s5 }
0x23cf   :  { %v4589_v45 = vpop.f32.mrf.mxu2 }
0x23d7   :  { %v4592_v46 = vpop.f32.mrf.mxu2 }
0x23f0   :  { %v4598_v3 = vpop.permute.xlu2 %4597 }
0x23f1   :  { %v4619_v53 = vsel %vm475_vm9, %v4287_v39, %v4598_v3 }
0x23f8   :  { %v4492_v21 = vpop.f32.mrf.mxu0 }
0x23f9   :  { %4607 = vrot.lane.b32.xlu2 %v4492_v21, %s5972_s6  ;;  %s4888_s6 = sshll.u32 %s7421_s23, 4  ;;  %s4889_s6 = int_to_ptr.hbm [resolvable:$true] %s4888_s6 }
0x2401   :  { %4613 = vrot.lane.b32.xlu2 %v4589_v45, %s5992_s20 }
0x2403   :  { %v4606_v52 = vpop.permute.xlu2 %4605 }
0x2404   :  { %v4621_v8 = vsel %vm270_vm0, %v4619_v53, %v4606_v52  ;;  %v5370_v53 = vld [vmem:[#allocation7 + $0xa] ss:$0 sm:$0xff] }
0x2409   :  { %4615 = vrot.lane.b32.xlu2 %v4592_v46, %s5992_s20 }
0x2425   :  { %v4600_v55 = vpop.permute.xlu0 %4599 }
0x2426   :  { %v4620_v40 = vsel %vm475_vm9, %v4290_v32, %v4600_v55 }
0x2453   :  { %v4608_v36 = vpop.permute.xlu2 %4607 }
0x2454   :  { %v4622_v62 = vsel %vm270_vm0, %v4620_v40, %v4608_v36 }
0x245b   :  { %v4614_v44 = vpop.permute.xlu2 %4613 }
0x245c   :  { %v4623_v61 = vsel %vm896_vm10, %v4621_v8, %v4614_v44 }
0x245d   :  { %5180 = vmatmul.msk.f32.vlgmr.msra.gmra.mxu3 %vm306_vm3, %v4623_v61 }
0x2463   :  { %v4616_v31 = vpop.permute.xlu2 %4615 }
0x2464   :  { %v4624_v0 = vsel %vm896_vm10, %v4622_v62, %v4616_v31 }
0x2465   :  { %5181 = vmatmul.msk.f32.gmra.mxu3 %vm306_vm3, %v4624_v0 }
0x24e0   :  { %v4658_v15 = vpop.f32.mrf.mxu3 }
0x24e1   :  { %v4659_v4 = vadd.f32 %v5368_v2, %v4658_v15  ;;  %v5190_v15 = vld [vmem:[%s7419_s21 + $0xd0] sm:$0xff] }
0x24e2   :  { %4804 = vmatpush.msra.mxu1 %v5190_v15 }
0x24e3   :  { %v7322_v5 = vadd.f32 %v4659_v4, %v7214_v6  ;;  %v5189_v4 = vld [vmem:[%s7419_s21 + $0xc8] sm:$0xff] }
0x24e4   :  { %4805 = vmatpush.msra.mxu1 %v5189_v4 }
0x24e5   :  { %v4666_v7 = vsel %vm306_vm3, %v7322_v5, 0.0 }
0x24e6   :  { %4667 = vadd.xlane.f32.xlu0 %v4666_v7  ;;  %v5188_v7 = vld [vmem:[%s7419_s21 + $0xc0] sm:$0xff]  ;;  %s5993_s21 = smov [#allocation20]  }
0x24e7   :  { %4806 = vmatpush.msra.mxu1 %v5188_v7  ;;  %s4886_s26 = sshll.u32 %s5993_s21, 4  ;;  %s4887_s26 = int_to_ptr.vmem [resolvable:$true] %s4886_s26 }
0x24e8   :  { %v4661_v9 = vpop.f32.mrf.mxu3 }
0x24e9   :  { %v4662_v10 = vadd.f32 %v5368_v2, %v4661_v9  ;;  %v5371_v9 = vld [vmem:[#allocation17 + $0x3] ss:$0 sm:$0xff] }
0x24eb   :  { %v7327_v11 = vadd.f32 %v4662_v10, %v7219_v47 }
0x24ed   :  { %v4669_v12 = vsel %vm306_vm3, %v7327_v11, 0.0 }
0x24ee   :  { %4670 = vadd.xlane.f32.xlu2 %v4669_v12 }
0x2559   :  { %v4668_v13 = vpop.xlane.xlu0 %4667 }
0x255a   :  { %v4672_v14 = vmul.f32 %v4668_v13, %v6214_v28 }
0x255c   :  { %v4674_v18 = vsub.f32 %v7322_v5, %v4672_v14 }
0x255e   :  { %v4676_v6 = vmul.f32 %v4674_v18, %v4674_v18  ;;  %v4719_v36 = vmul.f32 %v5369_v59, %v4674_v18 }
0x2560   :  { %v4678_v19 = vsel %vm306_vm3, %v4676_v6, 0.0 }
0x2561   :  { %4679 = vadd.xlane.f32.xlu1 %v4678_v19  ;;  %v4671_v22 = vpop.xlane.xlu2 %4670  ;;  %v5372_v19 = vld [vmem:[#allocation19 + $0x3] ss:$0 sm:$0xff] }
0x2562   :  { %v4673_v23 = vmul.f32 %v4671_v22, %v6214_v28 }
0x2564   :  { %v7336_v43 = vsub.f32 %v7327_v11, %v4673_v23 }
0x2566   :  { %v4677_v47 = vmul.f32 %v7336_v43, %v7336_v43  ;;  %v4720_v62 = vmul.f32 %v5369_v59, %v7336_v43 }
0x2568   :  { %v4681_v29 = vsel %vm306_vm3, %v4677_v47, 0.0 }
0x2569   :  { %4682 = vadd.xlane.f32.xlu1 %v4681_v29 }
0x25d4   :  { %v4680_v27 = vpop.xlane.xlu1 %4679 }
0x25d5   :  { %v4684_v30 = vmul.f32 0.032258064, %v4680_v27 }
0x25d7   :  { %5649 = vrsqrt.f32 %v4684_v30  ;;  %vm4693_vm0 = vcmp.eq.f32.partialorder %v4684_v30, inf  ;;  %v4696_v50 = vand.u32 2147483648, %v4684_v30  ;;  %vm4695_vm9 = vcmp.eq.f32.partialorder %v4684_v30, 0.0 }
0x25dc   :  { %v4683_v16 = vpop.xlane.xlu1 %4682 }
0x25dd   :  { %v5650_v33 = vpop.eup %5649  ;;  %v4685_v54 = vmul.f32 0.032258064, %v4683_v16 }
0x25de   :  { %v4687_v58 = vmul.f32 %v5650_v33, %v4684_v30 }
0x25df   :  { %5651 = vrsqrt.f32 %v4685_v54  ;;  %vm4705_vm10 = vcmp.eq.f32.partialorder %v4685_v54, inf  ;;  %v4708_v3 = vand.u32 2147483648, %v4685_v54  ;;  %vm4707_vm2 = vcmp.eq.f32.partialorder %v4685_v54, 0.0 }
0x25e0   :  { %v4688_v1 = vmul.f32 %v5650_v33, %v4687_v58 }
0x25e2   :  { %v4689_v49 = vmul.f32 0.5, %v4688_v1 }
0x25e4   :  { %v4690_v34 = vsub.f32 1.5, %v4689_v49 }
0x25e5   :  { %v5652_v37 = vpop.eup %5651 }
0x25e6   :  { %v4691_v41 = vmul.f32 %v5650_v33, %v4690_v34  ;;  %v4699_v57 = vmul.f32 %v5652_v37, %v4685_v54 }
0x25e8   :  { %v4692_v39 = vmul.f32 %v4691_v41, %v4684_v30  ;;  %v4700_v32 = vmul.f32 %v5652_v37, %v4699_v57 }
0x25ea   :  { %v4694_v42 = vsel %vm4693_vm0, %v4684_v30, %v4692_v39  ;;  %v4701_v21 = vmul.f32 0.5, %v4700_v32 }
0x25eb   :  { %v4697_v45 = vsel %vm4695_vm9, %v4696_v50, %v4694_v42 }
0x25ec   :  { %v4710_v46 = vadd.f32 1e-06, %v4697_v45  ;;  %v4702_v48 = vsub.f32 1.5, %v4701_v21 }
0x25ee   :  { %5653 = vrcp.f32 %v4710_v46  ;;  %v4703_v56 = vmul.f32 %v5652_v37, %v4702_v48 }
0x25f0   :  { %v4704_v51 = vmul.f32 %v4703_v56, %v4685_v54 }
0x25f2   :  { %v4706_v52 = vsel %vm4705_vm10, %v4685_v54, %v4704_v51  ;;  %v5373_v51 = vld [vmem:[#allocation5 + $0xb] ss:$0 sm:$0xff] }
0x25f3   :  { %v4709_v8 = vsel %vm4707_vm2, %v4708_v3, %v4706_v52 }
0x25f4   :  { %v5654_v44 = vpop.eup %5653  ;;  %v4711_v61 = vadd.f32 1e-06, %v4709_v8 }
0x25f5   :  { %v4721_v55 = vmul.f32 %v5654_v44, %v4719_v36  ;;  %v5374_v44 = vld [vmem:[#allocation7 + $0xb] ss:$0 sm:$0xff] }
0x25f6   :  { %5655 = vrcp.f32 %v4711_v61 }
0x25f7   :  { %v4728_v40 = vadd.f32 %v5370_v53, %v4721_v55 }
0x25f9   :  { %5186 = vmatmul.msk.f32.vlgmr.msra.gmra.mxu0 %vm306_vm3, %v4728_v40 }
0x25fc   :  { %v5656_v31 = vpop.eup %5655 }
0x25fd   :  { %v4722_v0 = vmul.f32 %v5656_v31, %v4720_v62 }
0x25ff   :  { %v4729_v2 = vadd.f32 %v5370_v53, %v4722_v0 }
0x2601   :  { %5187 = vmatmul.msk.f32.gmra.mxu0 %vm306_vm3, %v4729_v2 }
0x2676   :  { %v4763_v10 = vpop.f32.mrf.mxu0 }
0x2677   :  { %v4764_v12 = vadd.f32 %v5371_v9, %v4763_v10 }
0x2679   :  { %v4769_v13 = vmax.f32 %v4764_v12, 0.0 }
0x267b   :  { %5196 = vmatmul.msk.f32.vlgmr.msra.gmra.mxu1 %vm1053_vm15, %v4769_v13 }
0x267e   :  { %v4766_v14 = vpop.f32.mrf.mxu0 }
0x267f   :  { %v4767_v18 = vadd.f32 %v5371_v9, %v4766_v14 }
0x2681   :  { %v4770_v6 = vmax.f32 %v4767_v18, 0.0 }
0x2683   :  { %5197 = vmatmul.msk.f32.gmra.mxu1 %vm1053_vm15, %v4770_v6 }
0x26f8   :  { %v4808_v22 = vpop.f32.mrf.mxu1 }
0x26f9   :  { %v4809_v23 = vadd.f32 %v5372_v19, %v4808_v22 }
0x26fb   :  { %v4814_v43 = vadd.f32 %v4809_v23, %v7322_v5 }
0x26fd   :  { %v4816_v47 = vsel %vm306_vm3, %v4814_v43, 0.0 }
0x26fe   :  { %4817 = vadd.xlane.f32.xlu1 %v4816_v47 }
0x2700   :  { %v4811_v29 = vpop.f32.mrf.mxu1 }
0x2701   :  { %v4812_v17 = vadd.f32 %v5372_v19, %v4811_v29 }
0x2703   :  { %v4815_v25 = vadd.f32 %v4812_v17, %v7327_v11 }
0x2705   :  { %v4819_v20 = vsel %vm306_vm3, %v4815_v25, 0.0 }
0x2706   :  { %4820 = vadd.xlane.f32.xlu1 %v4819_v20 }
0x2771   :  { %v4818_v26 = vpop.xlane.xlu1 %4817 }
0x2772   :  { %v4822_v27 = vmul.f32 %v4818_v26, %v6214_v28 }
0x2774   :  { %v4824_v30 = vsub.f32 %v4814_v43, %v4822_v27 }
0x2776   :  { %v4826_v16 = vmul.f32 %v4824_v30, %v4824_v30  ;;  %v4869_v53 = vmul.f32 %v5373_v51, %v4824_v30 }
0x2778   :  { %v4828_v33 = vsel %vm306_vm3, %v4826_v16, 0.0 }
0x2779   :  { %4829 = vadd.xlane.f32.xlu1 %v4828_v33  ;;  %v4821_v54 = vpop.xlane.xlu1 %4820 }
0x277a   :  { %v4823_v5 = vmul.f32 %v4821_v54, %v6214_v28 }
0x277c   :  { %v4825_v58 = vsub.f32 %v4815_v25, %v4823_v5 }
0x277e   :  { %v4827_v1 = vmul.f32 %v4825_v58, %v4825_v58  ;;  %v4870_v31 = vmul.f32 %v5373_v51, %v4825_v58 }
0x2780   :  { %v4831_v63 = vsel %vm306_vm3, %v4827_v1, 0.0 }
0x2781   :  { %4832 = vadd.xlane.f32.xlu0 %v4831_v63 }
0x27ec   :  { %v4830_v11 = vpop.xlane.xlu1 %4829 }
0x27ed   :  { %v4834_v60 = vmul.f32 0.032258064, %v4830_v11 }
0x27ef   :  { %5657 = vrsqrt.f32 %v4834_v60  ;;  %vm4843_vm15 = vcmp.eq.f32.partialorder %v4834_v60, inf  ;;  %v4846_v42 = vand.u32 2147483648, %v4834_v60  ;;  %vm4845_vm4 = vcmp.eq.f32.partialorder %v4834_v60, 0.0 }
0x27f4   :  { %v4833_v49 = vpop.xlane.xlu0 %4832 }
0x27f5   :  { %v5658_v35 = vpop.eup %5657  ;;  %v4835_v34 = vmul.f32 0.032258064, %v4833_v49 }
0x27f6   :  { %v4837_v37 = vmul.f32 %v5658_v35, %v4834_v60 }
0x27f7   :  { %5659 = vrsqrt.f32 %v4835_v34  ;;  %vm4855_vm5 = vcmp.eq.f32.partialorder %v4835_v34, inf  ;;  %v4858_v52 = vand.u32 2147483648, %v4835_v34  ;;  %vm4857_vm6 = vcmp.eq.f32.partialorder %v4835_v34, 0.0 }
0x27f8   :  { %v4838_v38 = vmul.f32 %v5658_v35, %v4837_v37 }
0x27fa   :  { %v4839_v41 = vmul.f32 0.5, %v4838_v38 }
0x27fc   :  { %v4840_v57 = vsub.f32 1.5, %v4839_v41 }
0x27fd   :  { %v5660_v24 = vpop.eup %5659 }
0x27fe   :  { %v4841_v39 = vmul.f32 %v5658_v35, %v4840_v57  ;;  %v4849_v32 = vmul.f32 %v5660_v24, %v4835_v34 }
0x2800   :  { %v4842_v28 = vmul.f32 %v4841_v39, %v4834_v60  ;;  %v4850_v50 = vmul.f32 %v5660_v24, %v4849_v32 }
0x2802   :  { %v4851_v21 = vmul.f32 0.5, %v4850_v50  ;;  %v4844_v45 = vsel %vm4843_vm15, %v4834_v60, %v4842_v28 }
0x2803   :  { %v4847_v46 = vsel %vm4845_vm4, %v4846_v42, %v4844_v45 }
0x2804   :  { %v4852_v48 = vsub.f32 1.5, %v4851_v21  ;;  %v4860_v56 = vadd.f32 1e-06, %v4847_v46 }
0x2806   :  { %v4853_v59 = vmul.f32 %v5660_v24, %v4852_v48  ;;  %5661 = vrcp.f32 %v4860_v56 }
0x2808   :  { %v4854_v3 = vmul.f32 %v4853_v59, %v4835_v34 }
0x280a   :  { %v4856_v36 = vsel %vm4855_vm5, %v4835_v34, %v4854_v3 }
0x280b   :  { %v4859_v8 = vsel %vm4857_vm6, %v4858_v52, %v4856_v36 }
0x280c   :  { %v5662_v61 = vpop.eup %5661  ;;  %v4861_v55 = vadd.f32 1e-06, %v4859_v8 }
0x280d   :  { %v4871_v40 = vmul.f32 %v5662_v61, %v4869_v53 }
0x280e   :  { %5663 = vrcp.f32 %v4861_v55 }
0x280f   :  { %v4878_v62 = vadd.f32 %v5374_v44, %v4871_v40 }
0x2811   :  { %4880 = vst.msk [vmem:[#allocation20] sm:$0xff] %vm306_vm3, %v4878_v62 }
0x2814   :  { %v5664_v0 = vpop.eup %5663 }
0x2815   :  { %v4872_v2 = vmul.f32 %v5664_v0, %v4870_v31 }
0x2817   :  { %v4879_v15 = vadd.f32 %v5374_v44, %v4872_v2 }
0x2819   :  { %4881 = vst.msk [vmem:[#allocation20 + $0x8] sm:$0xff] %vm306_vm3, %v4879_v15 }
0x281a   :  { %4894 = dma.vmem_to_hbm [thread:$0]  %s4887_s26, 256, %s4889_s6, [#allocation4], %s5976_s25, %s5976_s25, %s5977_s5  }
0x281b   :  { %5969 = dma.done.wait [#allocation4], 256  }
0x281c   :  { %5970 = vsyncadd [#allocation4], 4294967040 }
0x281d   :  { %4899 = vsyncpa [#allocation3], 1 }
0x281e   :  { %4900 = vsyncpa [#allocation6], 1 }
0x281f   :  { %4901 = vsyncpa [#allocation9], 1 }
0x2820   :  { %4902 = vsyncpa [#allocation12], 1 }
0x2821   :  { %4903 = vsyncpa [#allocation15], 1 }
0x2822   :  { %4904 = vsyncpa [#allocation18], 1 }
0x2823   :  { %4905 = vsyncpa [#allocation4], 1 }

</bundles_post_ra>
